<compile_context>
chip_gen: v7x
topology: tpu7x:2x2x1
jax: 0.10.0
libtpu: 0.0.40
codegen_flags: <defaults>
</compile_context>

<pallas_src>
import math

import jax
import jax.numpy as jnp
from jax.experimental import pallas as pl
from jax.experimental.pallas import tpu as pltpu


_BF16_MIN = float(jnp.finfo(jnp.bfloat16).min)   # bf16-safe max-pool pad sentinel
_OUT_CHANNELS = (16, 32, 64, 128)


# ----------------------------------------------------------------------------
# Small helpers
# ----------------------------------------------------------------------------
def _round_up(v, m):
    return ((v + m - 1) // m) * m


def _pad_axis(x, target, axis, value=0.0):
    amt = target - x.shape[axis]
    if amt <= 0:
        return x
    widths = [(0, 0)] * x.ndim
    widths[axis] = (0, amt)
    return jnp.pad(x, widths, constant_values=value)


def _vmem_limit(need_bytes):
    """Hardware-aware VMEM cap (v7x: 64 MiB physical; v5e/v6e: 128 MiB)."""
    try:
        cap = int(getattr(pltpu.get_tpu_info(), "vmem_capacity_bytes", 0)) or (64 << 20)
    except Exception:
        cap = 64 << 20
    return int(min(max(2 * need_bytes + (8 << 20), 16 << 20), int(0.4 * cap)))


def _prep_input(x, kh, kw, stride, pad, pad_value=0.0):
    """Cast to bf16, pad spatially, and (for stride 2) pack W column pairs into
    the channel axis so that in-kernel tap extraction only needs contiguous
    static slices (no strided loads).  Returns (x_prepped, h_out, w_out, c_stored).
    """
    n, h, w, c = x.shape
    ho = (h + 2 * pad - kh) // stride + 1
    wo = (w + 2 * pad - kw) // stride + 1
    wp = w + 2 * pad
    extra = (wp % 2) if stride == 2 else 0
    xb = x.astype(jnp.bfloat16)
    if pad or extra:
        xb = jnp.pad(xb, ((0, 0), (pad, pad), (pad, pad + extra), (0, 0)),
                     constant_values=pad_value)
    if stride == 2:
        xb = xb.reshape(n, h + 2 * pad, (wp + extra) // 2, 2 * c)
    return xb, ho, wo, c


# ----------------------------------------------------------------------------
# Pallas kernels
# ----------------------------------------------------------------------------
def _make_conv_kernel(branch_meta, wo, relu):
    """Streamed multi-branch conv: per output row, accumulate kh*kw tap dots
    (per branch) into an f32 accumulator, add the pre-summed BN shift, optional
    ReLU, store bf16.  branch_meta[b] = (kh, kw, stride, cin_real, c_stored)."""

    def kernel(*refs):
        o_ref = refs[-1]
        shift_ref = refs[-2]
        oy = pl.program_id(1)
        coutp = o_ref.shape[-1]
        acc = jnp.zeros((wo, coutp), jnp.float32)
        for b, (kh, kw, stride, cin, c_st) in enumerate(branch_meta):
            x_ref = refs[2 * b]
            w_ref = refs[2 * b + 1]
            row0 = oy * stride
            for dy in range(kh):
                row = x_ref[0, row0 + dy]                 # (Wq, Cpk) bf16, VMEM->vreg
                for dx in range(kw):
                    if stride == 2:
                        cs, ch0 = dx // 2, (dx % 2) * c_st
                    else:
                        cs, ch0 = dx, 0
                    a = row[cs:cs + wo, ch0:ch0 + cin]    # (wo, cin) contiguous slice
                    acc = acc + jnp.dot(a, w_ref[dy * kw + dx],
                                        preferred_element_type=jnp.float32)
        y = acc + shift_ref[...]
        if relu:
            y = jnp.maximum(y, 0.0)
        o_ref[0, 0] = y.astype(o_ref.dtype)

    return kernel


def _make_pool_kernel(kh, kw, stride, c_st, wo):
    """3x3/s2 max pool as chained elementwise maxima over shifted in-VMEM slices."""

    def kernel(x_ref, o_ref):
        oy = pl.program_id(1)
        row0 = oy * stride
        acc = None
        for dy in range(kh):
            row = x_ref[0, row0 + dy]
            for dx in range(kw):
                if stride == 2:
                    cs, ch0 = dx // 2, (dx % 2) * c_st
                else:
                    cs, ch0 = dx, 0
                v = row[cs:cs + wo, ch0:ch0 + c_st]
                acc = v if acc is None else jnp.maximum(acc, v)
        o_ref[0, 0] = acc.astype(o_ref.dtype)

    return kernel


# ----------------------------------------------------------------------------
# Fused streamed-conv wrapper
# ----------------------------------------------------------------------------
def fused_conv(branches, shift, cout, *, relu=True):
    """relu( sum_b conv(x_b, w_b * bn_scale_b) + shift ) with bf16 output.

    branches: list of (x_nhwc, w_hwio, bn_scale, stride, padding); all branches
    must map to the same output spatial grid and the same cout.  The output is
    channel-padded to a 128 multiple (padded channels are exact zeros).
    """
    coutp = _round_up(cout, 128)
    args, in_specs, meta = [], [], []
    need = 0
    n = ho = wo = None

    for (x, w, scale, stride, padding) in branches:
        kh, kw, cin, cout_b = w.shape
        assert cout_b == cout
        xp, ho_b, wo_b, c_st = _prep_input(x, kh, kw, stride, padding, 0.0)
        if ho is None:
            n, ho, wo = x.shape[0], ho_b, wo_b
        assert (x.shape[0], ho_b, wo_b) == (n, ho, wo)

        # Fold the BN scale into the weight (host-side, f32), flatten the taps,
        # pad Cout to the lane multiple, cast to bf16 for the MXU.
        wf = (w.astype(jnp.float32) * scale.reshape(1, 1, 1, -1)).reshape(kh * kw, cin, cout)
        wf = _pad_axis(wf, coutp, axis=2).astype(jnp.bfloat16)

        args += [xp, wf]
        in_specs += [
            # Whole image resident in VMEM; re-DMA'd only when the batch index changes.
            pl.BlockSpec((1,) + tuple(xp.shape[1:]), lambda i, j: (i, 0, 0, 0)),
            pl.BlockSpec(tuple(wf.shape), lambda i, j: (0, 0, 0)),
        ]
        meta.append((kh, kw, stride, cin, c_st))
        need += 2 * math.prod(xp.shape[1:]) * 2
        need += 2 * kh * kw * _round_up(cin, 8) * coutp * 2

    shift_p = _pad_axis(shift.reshape(1, -1).astype(jnp.float32), coutp, axis=1)
    args.append(shift_p)
    in_specs.append(pl.BlockSpec((1, coutp), lambda i, j: (0, 0)))
    need += 2 * coutp * 4 + 2 * wo * coutp * 2

    out = pl.pallas_call(
        _make_conv_kernel(tuple(meta), wo, relu),
        out_shape=jax.ShapeDtypeStruct((n, ho, wo, coutp), jnp.bfloat16),
        grid=(n, ho),
        in_specs=in_specs,
        out_specs=pl.BlockSpec((1, 1, wo, coutp), lambda i, j: (i, j, 0, 0)),
        compiler_params=pltpu.CompilerParams(
            dimension_semantics=("parallel", "arbitrary"),
            vmem_limit_bytes=_vmem_limit(need)),
    )(*args)
    return out


def max_pool_3x3_s2(x):
    """MaxPool2d(kernel_size=3, stride=2, padding=1) on bf16 NHWC, streamed."""
    n, h, w, c = x.shape
    xp, ho, wo, c_st = _prep_input(x, 3, 3, 2, 1, pad_value=_BF16_MIN)
    need = 2 * math.prod(xp.shape[1:]) * 2 + 2 * wo * c * 2
    return pl.pallas_call(
        _make_pool_kernel(3, 3, 2, c_st, wo),
        out_shape=jax.ShapeDtypeStruct((n, ho, wo, c), jnp.bfloat16),
        grid=(n, ho),
        in_specs=[pl.BlockSpec((1,) + tuple(xp.shape[1:]), lambda i, j: (i, 0, 0, 0))],
        out_specs=pl.BlockSpec((1, 1, wo, c), lambda i, j: (i, j, 0, 0)),
        compiler_params=pltpu.CompilerParams(
            dimension_semantics=("parallel", "arbitrary"),
            vmem_limit_bytes=_vmem_limit(need)),
    )(xp)


# ----------------------------------------------------------------------------
# ResNet (stem + 4 BasicBlock stages); activations stay bf16 / 128-lane padded.
# ----------------------------------------------------------------------------
def basic_block(x, p, stride, cin, cout):
    out1 = fused_conv([(x, p["w1"], p["s1"], stride, 1)], p["b1"], cout, relu=True)
    if "wd" in p:
        wd, sd, bd = p["wd"], p["sd"], p["bd"]
    else:
        # Identity shortcut expressed as a 1x1 identity-weight conv branch.
        wd = jnp.eye(cin, dtype=jnp.float32).reshape(1, 1, cin, cin)
        sd = jnp.ones((cin,), jnp.float32)
        bd = jnp.zeros((cin,), jnp.float32)
    # conv2 + BN2, downsample conv + BN, residual add and ReLU in ONE pallas_call;
    # BN shifts are pre-summed so the epilogue is a single add.
    return fused_conv([(out1, p["w2"], p["s2"], 1, 1),
                       (x, wd, sd, stride, 0)],
                      p["b2"] + bd, cout, relu=True)


def resnet_forward(x_nhwc, params):
    x = fused_conv([(x_nhwc, params["conv1_w"], params["bn1_s"], 2, 3)],
                   params["bn1_b"], 64, relu=True)
    x = max_pool_3x3_s2(x)
    feats = []
    cin = 64
    for i, cout in enumerate(_OUT_CHANNELS):
        stride = 1 if i == 0 else 2
        x = basic_block(x, params[f"layer{i + 1}"], stride, cin, cout)
        feats.append(x[..., :cout].astype(jnp.float32))   # slice padded channels once
        cin = cout
    return tuple(feats)


# ----------------------------------------------------------------------------
# Deterministic parameter initialization (eval-mode BN folded to scale/shift)
# ----------------------------------------------------------------------------
def init_params(key, out_channels=_OUT_CHANNELS):
    keys = iter(jax.random.split(key, 128))
    eps = 1e-5

    def conv_w(kh, kw, cin, cout):
        fan_in = kh * kw * cin
        return jax.random.normal(next(keys), (kh, kw, cin, cout),
                                 jnp.float32) * (1.0 / math.sqrt(fan_in))

    def bn(c):
        gamma = jax.random.uniform(next(keys), (c,), jnp.float32, 0.5, 1.5)
        beta = jax.random.normal(next(keys), (c,), jnp.float32) * 0.1
        mean = jax.random.normal(next(keys), (c,), jnp.float32) * 0.1
        var = jax.random.uniform(next(keys), (c,), jnp.float32, 0.5, 1.5)
        scale = gamma / jnp.sqrt(var + eps)
        shift = beta - mean * scale
        return scale, shift

    params = {"conv1_w": conv_w(7, 7, 3, 64)}
    params["bn1_s"], params["bn1_b"] = bn(64)

    cin = 64
    for i, cout in enumerate(out_channels):
        stride = 1 if i == 0 else 2
        blk = {}
        blk["w1"] = conv_w(3, 3, cin, cout)
        blk["s1"], blk["b1"] = bn(cout)
        blk["w2"] = conv_w(3, 3, cout, cout)
        blk["s2"], blk["b2"] = bn(cout)
        if stride != 1 or cin != cout:
            blk["wd"] = conv_w(1, 1, cin, cout)
            blk["sd"], blk["bd"] = bn(cout)
        params[f"layer{i + 1}"] = blk
        cin = cout
    return params


# ----------------------------------------------------------------------------
if __name__ == "__main__":
    key = jax.random.PRNGKey(0)
    pkey, xkey = jax.random.split(key)
    params = init_params(pkey)

    # PyTorch-style NCHW input: batch=2, channels=3 (conv1 requires 3), spatial=16
    x_nchw = jax.random.normal(xkey, (2, 3, 16, 16), jnp.float32)
    x_nhwc = jnp.transpose(x_nchw, (0, 2, 3, 1))

    fwd = jax.jit(resnet_forward)
    feats = jax.block_until_ready(fwd(x_nhwc, params))

    expected = [(2, 4, 4, 16), (2, 2, 2, 32), (2, 1, 1, 64), (2, 1, 1, 128)]
    for f, exp in zip(feats, expected):
        assert f.shape == exp, (f.shape, exp)
        assert bool(jnp.all(jnp.isfinite(f)))

    print("KERNEL_OK")
</pallas_src>

<mosaic_0001>
module attributes {stable_mosaic.version = 11 : i64} {
  func.func @kernel(%arg0: i32, %arg1: i32, %arg2: memref<1x22x11x6xbf16, #tpu.memory_space<vmem>>, %arg3: memref<49x3x128xbf16, #tpu.memory_space<vmem>>, %arg4: memref<1x128xf32, #tpu.memory_space<vmem>>, %arg5: memref<1x1x8x128xbf16, #tpu.memory_space<vmem>>) attributes {dimension_semantics = [#tpu.dimension_semantics<parallel>, #tpu.dimension_semantics<arbitrary>], iteration_bounds = array<i64: 2, 8>, scalar_prefetch = 0 : i64, scratch_operands = 0 : i64, tpu.core_type = #tpu.core_type<tc>, window_params = [{transform_indices = @transform_0, window_bounds = array<i64: 1, 22, 11, 6>}, {pipeline_mode = #tpu.pipeline_mode<synchronous>, transform_indices = @transform_1, window_bounds = array<i64: 49, 3, 128>}, {pipeline_mode = #tpu.pipeline_mode<synchronous>, transform_indices = @transform_2, window_bounds = array<i64: 1, 128>}, {transform_indices = @transform_3, window_bounds = array<i64: 1, 1, 8, 128>}]} {
    %cst = arith.constant 0.000000e+00 : f32
    %0 = vector.broadcast %cst : f32 to vector<8x128xf32>
    %c2_i32 = arith.constant 2 : i32
    %1 = arith.muli %arg1, %c2_i32 : i32
    %c0_i32 = arith.constant 0 : i32
    %2 = arith.addi %1, %c0_i32 : i32
    %c0 = arith.constant 0 : index
    %3 = arith.index_cast %2 : i32 to index
    %c0_0 = arith.constant 0 : index
    %c0_1 = arith.constant 0 : index
    %4 = vector.load %arg2[%c0, %3, %c0_0, %c0_1] : memref<1x22x11x6xbf16, #tpu.memory_space<vmem>>, vector<1x1x11x6xbf16>
    %5 = vector.shape_cast %4 : vector<1x1x11x6xbf16> to vector<11x6xbf16>
    %6 = vector.extract_strided_slice %5 {offsets = [0, 0], sizes = [8, 3], strides = [1, 1]} : vector<11x6xbf16> to vector<8x3xbf16>
    %c0_2 = arith.constant 0 : index
    %c0_3 = arith.constant 0 : index
    %c0_4 = arith.constant 0 : index
    %7 = vector.load %arg3[%c0_2, %c0_3, %c0_4] : memref<49x3x128xbf16, #tpu.memory_space<vmem>>, vector<1x3x128xbf16>
    %8 = vector.shape_cast %7 : vector<1x3x128xbf16> to vector<3x128xbf16>
    %cst_5 = arith.constant dense<0.000000e+00> : vector<8x128xf32>
    %9 = tpu.matmul %6, %8, %cst_5 {dimension_numbers = #tpu.dot_dimension_numbers<[1], [0], [0], [1], [0, 0, 1, 1], [], []>} : vector<8x3xbf16>, vector<3x128xbf16>, vector<8x128xf32> -> vector<8x128xf32>
    %10 = arith.addf %0, %9 : vector<8x128xf32>
    %11 = vector.extract_strided_slice %5 {offsets = [0, 3], sizes = [8, 3], strides = [1, 1]} : vector<11x6xbf16> to vector<8x3xbf16>
    %c1 = arith.constant 1 : index
    %c0_6 = arith.constant 0 : index
    %c0_7 = arith.constant 0 : index
    %12 = vector.load %arg3[%c1, %c0_6, %c0_7] : memref<49x3x128xbf16, #tpu.memory_space<vmem>>, vector<1x3x128xbf16>
    %13 = vector.shape_cast %12 : vector<1x3x128xbf16> to vector<3x128xbf16>
    %cst_8 = arith.constant dense<0.000000e+00> : vector<8x128xf32>
    %14 = tpu.matmul %11, %13, %cst_8 {dimension_numbers = #tpu.dot_dimension_numbers<[1], [0], [0], [1], [0, 0, 1, 1], [], []>} : vector<8x3xbf16>, vector<3x128xbf16>, vector<8x128xf32> -> vector<8x128xf32>
    %15 = arith.addf %10, %14 : vector<8x128xf32>
    %16 = vector.extract_strided_slice %5 {offsets = [1, 0], sizes = [8, 3], strides = [1, 1]} : vector<11x6xbf16> to vector<8x3xbf16>
    %c2 = arith.constant 2 : index
    %c0_9 = arith.constant 0 : index
    %c0_10 = arith.constant 0 : index
    %17 = vector.load %arg3[%c2, %c0_9, %c0_10] : memref<49x3x128xbf16, #tpu.memory_space<vmem>>, vector<1x3x128xbf16>
    %18 = vector.shape_cast %17 : vector<1x3x128xbf16> to vector<3x128xbf16>
    %cst_11 = arith.constant dense<0.000000e+00> : vector<8x128xf32>
    %19 = tpu.matmul %16, %18, %cst_11 {dimension_numbers = #tpu.dot_dimension_numbers<[1], [0], [0], [1], [0, 0, 1, 1], [], []>} : vector<8x3xbf16>, vector<3x128xbf16>, vector<8x128xf32> -> vector<8x128xf32>
    %20 = arith.addf %15, %19 : vector<8x128xf32>
    %21 = vector.extract_strided_slice %5 {offsets = [1, 3], sizes = [8, 3], strides = [1, 1]} : vector<11x6xbf16> to vector<8x3xbf16>
    %c3 = arith.constant 3 : index
    %c0_12 = arith.constant 0 : index
    %c0_13 = arith.constant 0 : index
    %22 = vector.load %arg3[%c3, %c0_12, %c0_13] : memref<49x3x128xbf16, #tpu.memory_space<vmem>>, vector<1x3x128xbf16>
    %23 = vector.shape_cast %22 : vector<1x3x128xbf16> to vector<3x128xbf16>
    %cst_14 = arith.constant dense<0.000000e+00> : vector<8x128xf32>
    %24 = tpu.matmul %21, %23, %cst_14 {dimension_numbers = #tpu.dot_dimension_numbers<[1], [0], [0], [1], [0, 0, 1, 1], [], []>} : vector<8x3xbf16>, vector<3x128xbf16>, vector<8x128xf32> -> vector<8x128xf32>
    %25 = arith.addf %20, %24 : vector<8x128xf32>
    %26 = vector.extract_strided_slice %5 {offsets = [2, 0], sizes = [8, 3], strides = [1, 1]} : vector<11x6xbf16> to vector<8x3xbf16>
    %c4 = arith.constant 4 : index
    %c0_15 = arith.constant 0 : index
    %c0_16 = arith.constant 0 : index
    %27 = vector.load %arg3[%c4, %c0_15, %c0_16] : memref<49x3x128xbf16, #tpu.memory_space<vmem>>, vector<1x3x128xbf16>
    %28 = vector.shape_cast %27 : vector<1x3x128xbf16> to vector<3x128xbf16>
    %cst_17 = arith.constant dense<0.000000e+00> : vector<8x128xf32>
    %29 = tpu.matmul %26, %28, %cst_17 {dimension_numbers = #tpu.dot_dimension_numbers<[1], [0], [0], [1], [0, 0, 1, 1], [], []>} : vector<8x3xbf16>, vector<3x128xbf16>, vector<8x128xf32> -> vector<8x128xf32>
    %30 = arith.addf %25, %29 : vector<8x128xf32>
    %31 = vector.extract_strided_slice %5 {offsets = [2, 3], sizes = [8, 3], strides = [1, 1]} : vector<11x6xbf16> to vector<8x3xbf16>
    %c5 = arith.constant 5 : index
    %c0_18 = arith.constant 0 : index
    %c0_19 = arith.constant 0 : index
    %32 = vector.load %arg3[%c5, %c0_18, %c0_19] : memref<49x3x128xbf16, #tpu.memory_space<vmem>>, vector<1x3x128xbf16>
    %33 = vector.shape_cast %32 : vector<1x3x128xbf16> to vector<3x128xbf16>
    %cst_20 = arith.constant dense<0.000000e+00> : vector<8x128xf32>
    %34 = tpu.matmul %31, %33, %cst_20 {dimension_numbers = #tpu.dot_dimension_numbers<[1], [0], [0], [1], [0, 0, 1, 1], [], []>} : vector<8x3xbf16>, vector<3x128xbf16>, vector<8x128xf32> -> vector<8x128xf32>
    %35 = arith.addf %30, %34 : vector<8x128xf32>
    %36 = vector.extract_strided_slice %5 {offsets = [3, 0], sizes = [8, 3], strides = [1, 1]} : vector<11x6xbf16> to vector<8x3xbf16>
    %c6 = arith.constant 6 : index
    %c0_21 = arith.constant 0 : index
    %c0_22 = arith.constant 0 : index
    %37 = vector.load %arg3[%c6, %c0_21, %c0_22] : memref<49x3x128xbf16, #tpu.memory_space<vmem>>, vector<1x3x128xbf16>
    %38 = vector.shape_cast %37 : vector<1x3x128xbf16> to vector<3x128xbf16>
    %cst_23 = arith.constant dense<0.000000e+00> : vector<8x128xf32>
    %39 = tpu.matmul %36, %38, %cst_23 {dimension_numbers = #tpu.dot_dimension_numbers<[1], [0], [0], [1], [0, 0, 1, 1], [], []>} : vector<8x3xbf16>, vector<3x128xbf16>, vector<8x128xf32> -> vector<8x128xf32>
    %40 = arith.addf %35, %39 : vector<8x128xf32>
    %c1_i32 = arith.constant 1 : i32
    %41 = arith.addi %1, %c1_i32 : i32
    %c0_24 = arith.constant 0 : index
    %42 = arith.index_cast %41 : i32 to index
    %c0_25 = arith.constant 0 : index
    %c0_26 = arith.constant 0 : index
    %43 = vector.load %arg2[%c0_24, %42, %c0_25, %c0_26] : memref<1x22x11x6xbf16, #tpu.memory_space<vmem>>, vector<1x1x11x6xbf16>
    %44 = vector.shape_cast %43 : vector<1x1x11x6xbf16> to vector<11x6xbf16>
    %45 = vector.extract_strided_slice %44 {offsets = [0, 0], sizes = [8, 3], strides = [1, 1]} : vector<11x6xbf16> to vector<8x3xbf16>
    %c7 = arith.constant 7 : index
    %c0_27 = arith.constant 0 : index
    %c0_28 = arith.constant 0 : index
    %46 = vector.load %arg3[%c7, %c0_27, %c0_28] : memref<49x3x128xbf16, #tpu.memory_space<vmem>>, vector<1x3x128xbf16>
    %47 = vector.shape_cast %46 : vector<1x3x128xbf16> to vector<3x128xbf16>
    %cst_29 = arith.constant dense<0.000000e+00> : vector<8x128xf32>
    %48 = tpu.matmul %45, %47, %cst_29 {dimension_numbers = #tpu.dot_dimension_numbers<[1], [0], [0], [1], [0, 0, 1, 1], [], []>} : vector<8x3xbf16>, vector<3x128xbf16>, vector<8x128xf32> -> vector<8x128xf32>
    %49 = arith.addf %40, %48 : vector<8x128xf32>
    %50 = vector.extract_strided_slice %44 {offsets = [0, 3], sizes = [8, 3], strides = [1, 1]} : vector<11x6xbf16> to vector<8x3xbf16>
    %c8 = arith.constant 8 : index
    %c0_30 = arith.constant 0 : index
    %c0_31 = arith.constant 0 : index
    %51 = vector.load %arg3[%c8, %c0_30, %c0_31] : memref<49x3x128xbf16, #tpu.memory_space<vmem>>, vector<1x3x128xbf16>
    %52 = vector.shape_cast %51 : vector<1x3x128xbf16> to vector<3x128xbf16>
    %cst_32 = arith.constant dense<0.000000e+00> : vector<8x128xf32>
    %53 = tpu.matmul %50, %52, %cst_32 {dimension_numbers = #tpu.dot_dimension_numbers<[1], [0], [0], [1], [0, 0, 1, 1], [], []>} : vector<8x3xbf16>, vector<3x128xbf16>, vector<8x128xf32> -> vector<8x128xf32>
    %54 = arith.addf %49, %53 : vector<8x128xf32>
    %55 = vector.extract_strided_slice %44 {offsets = [1, 0], sizes = [8, 3], strides = [1, 1]} : vector<11x6xbf16> to vector<8x3xbf16>
    %c9 = arith.constant 9 : index
    %c0_33 = arith.constant 0 : index
    %c0_34 = arith.constant 0 : index
    %56 = vector.load %arg3[%c9, %c0_33, %c0_34] : memref<49x3x128xbf16, #tpu.memory_space<vmem>>, vector<1x3x128xbf16>
    %57 = vector.shape_cast %56 : vector<1x3x128xbf16> to vector<3x128xbf16>
    %cst_35 = arith.constant dense<0.000000e+00> : vector<8x128xf32>
    %58 = tpu.matmul %55, %57, %cst_35 {dimension_numbers = #tpu.dot_dimension_numbers<[1], [0], [0], [1], [0, 0, 1, 1], [], []>} : vector<8x3xbf16>, vector<3x128xbf16>, vector<8x128xf32> -> vector<8x128xf32>
    %59 = arith.addf %54, %58 : vector<8x128xf32>
    %60 = vector.extract_strided_slice %44 {offsets = [1, 3], sizes = [8, 3], strides = [1, 1]} : vector<11x6xbf16> to vector<8x3xbf16>
    %c10 = arith.constant 10 : index
    %c0_36 = arith.constant 0 : index
    %c0_37 = arith.constant 0 : index
    %61 = vector.load %arg3[%c10, %c0_36, %c0_37] : memref<49x3x128xbf16, #tpu.memory_space<vmem>>, vector<1x3x128xbf16>
    %62 = vector.shape_cast %61 : vector<1x3x128xbf16> to vector<3x128xbf16>
    %cst_38 = arith.constant dense<0.000000e+00> : vector<8x128xf32>
    %63 = tpu.matmul %60, %62, %cst_38 {dimension_numbers = #tpu.dot_dimension_numbers<[1], [0], [0], [1], [0, 0, 1, 1], [], []>} : vector<8x3xbf16>, vector<3x128xbf16>, vector<8x128xf32> -> vector<8x128xf32>
    %64 = arith.addf %59, %63 : vector<8x128xf32>
    %65 = vector.extract_strided_slice %44 {offsets = [2, 0], sizes = [8, 3], strides = [1, 1]} : vector<11x6xbf16> to vector<8x3xbf16>
    %c11 = arith.constant 11 : index
    %c0_39 = arith.constant 0 : index
    %c0_40 = arith.constant 0 : index
    %66 = vector.load %arg3[%c11, %c0_39, %c0_40] : memref<49x3x128xbf16, #tpu.memory_space<vmem>>, vector<1x3x128xbf16>
    %67 = vector.shape_cast %66 : vector<1x3x128xbf16> to vector<3x128xbf16>
    %cst_41 = arith.constant dense<0.000000e+00> : vector<8x128xf32>
    %68 = tpu.matmul %65, %67, %cst_41 {dimension_numbers = #tpu.dot_dimension_numbers<[1], [0], [0], [1], [0, 0, 1, 1], [], []>} : vector<8x3xbf16>, vector<3x128xbf16>, vector<8x128xf32> -> vector<8x128xf32>
    %69 = arith.addf %64, %68 : vector<8x128xf32>
    %70 = vector.extract_strided_slice %44 {offsets = [2, 3], sizes = [8, 3], strides = [1, 1]} : vector<11x6xbf16> to vector<8x3xbf16>
    %c12 = arith.constant 12 : index
    %c0_42 = arith.constant 0 : index
    %c0_43 = arith.constant 0 : index
    %71 = vector.load %arg3[%c12, %c0_42, %c0_43] : memref<49x3x128xbf16, #tpu.memory_space<vmem>>, vector<1x3x128xbf16>
    %72 = vector.shape_cast %71 : vector<1x3x128xbf16> to vector<3x128xbf16>
    %cst_44 = arith.constant dense<0.000000e+00> : vector<8x128xf32>
    %73 = tpu.matmul %70, %72, %cst_44 {dimension_numbers = #tpu.dot_dimension_numbers<[1], [0], [0], [1], [0, 0, 1, 1], [], []>} : vector<8x3xbf16>, vector<3x128xbf16>, vector<8x128xf32> -> vector<8x128xf32>
    %74 = arith.addf %69, %73 : vector<8x128xf32>
    %75 = vector.extract_strided_slice %44 {offsets = [3, 0], sizes = [8, 3], strides = [1, 1]} : vector<11x6xbf16> to vector<8x3xbf16>
    %c13 = arith.constant 13 : index
    %c0_45 = arith.constant 0 : index
    %c0_46 = arith.constant 0 : index
    %76 = vector.load %arg3[%c13, %c0_45, %c0_46] : memref<49x3x128xbf16, #tpu.memory_space<vmem>>, vector<1x3x128xbf16>
    %77 = vector.shape_cast %76 : vector<1x3x128xbf16> to vector<3x128xbf16>
    %cst_47 = arith.constant dense<0.000000e+00> : vector<8x128xf32>
    %78 = tpu.matmul %75, %77, %cst_47 {dimension_numbers = #tpu.dot_dimension_numbers<[1], [0], [0], [1], [0, 0, 1, 1], [], []>} : vector<8x3xbf16>, vector<3x128xbf16>, vector<8x128xf32> -> vector<8x128xf32>
    %79 = arith.addf %74, %78 : vector<8x128xf32>
    %c2_i32_48 = arith.constant 2 : i32
    %80 = arith.addi %1, %c2_i32_48 : i32
    %c0_49 = arith.constant 0 : index
    %81 = arith.index_cast %80 : i32 to index
    %c0_50 = arith.constant 0 : index
    %c0_51 = arith.constant 0 : index
    %82 = vector.load %arg2[%c0_49, %81, %c0_50, %c0_51] : memref<1x22x11x6xbf16, #tpu.memory_space<vmem>>, vector<1x1x11x6xbf16>
    %83 = vector.shape_cast %82 : vector<1x1x11x6xbf16> to vector<11x6xbf16>
    %84 = vector.extract_strided_slice %83 {offsets = [0, 0], sizes = [8, 3], strides = [1, 1]} : vector<11x6xbf16> to vector<8x3xbf16>
    %c14 = arith.constant 14 : index
    %c0_52 = arith.constant 0 : index
    %c0_53 = arith.constant 0 : index
    %85 = vector.load %arg3[%c14, %c0_52, %c0_53] : memref<49x3x128xbf16, #tpu.memory_space<vmem>>, vector<1x3x128xbf16>
    %86 = vector.shape_cast %85 : vector<1x3x128xbf16> to vector<3x128xbf16>
    %cst_54 = arith.constant dense<0.000000e+00> : vector<8x128xf32>
    %87 = tpu.matmul %84, %86, %cst_54 {dimension_numbers = #tpu.dot_dimension_numbers<[1], [0], [0], [1], [0, 0, 1, 1], [], []>} : vector<8x3xbf16>, vector<3x128xbf16>, vector<8x128xf32> -> vector<8x128xf32>
    %88 = arith.addf %79, %87 : vector<8x128xf32>
    %89 = vector.extract_strided_slice %83 {offsets = [0, 3], sizes = [8, 3], strides = [1, 1]} : vector<11x6xbf16> to vector<8x3xbf16>
    %c15 = arith.constant 15 : index
    %c0_55 = arith.constant 0 : index
    %c0_56 = arith.constant 0 : index
    %90 = vector.load %arg3[%c15, %c0_55, %c0_56] : memref<49x3x128xbf16, #tpu.memory_space<vmem>>, vector<1x3x128xbf16>
    %91 = vector.shape_cast %90 : vector<1x3x128xbf16> to vector<3x128xbf16>
    %cst_57 = arith.constant dense<0.000000e+00> : vector<8x128xf32>
    %92 = tpu.matmul %89, %91, %cst_57 {dimension_numbers = #tpu.dot_dimension_numbers<[1], [0], [0], [1], [0, 0, 1, 1], [], []>} : vector<8x3xbf16>, vector<3x128xbf16>, vector<8x128xf32> -> vector<8x128xf32>
    %93 = arith.addf %88, %92 : vector<8x128xf32>
    %94 = vector.extract_strided_slice %83 {offsets = [1, 0], sizes = [8, 3], strides = [1, 1]} : vector<11x6xbf16> to vector<8x3xbf16>
    %c16 = arith.constant 16 : index
    %c0_58 = arith.constant 0 : index
    %c0_59 = arith.constant 0 : index
    %95 = vector.load %arg3[%c16, %c0_58, %c0_59] : memref<49x3x128xbf16, #tpu.memory_space<vmem>>, vector<1x3x128xbf16>
    %96 = vector.shape_cast %95 : vector<1x3x128xbf16> to vector<3x128xbf16>
    %cst_60 = arith.constant dense<0.000000e+00> : vector<8x128xf32>
    %97 = tpu.matmul %94, %96, %cst_60 {dimension_numbers = #tpu.dot_dimension_numbers<[1], [0], [0], [1], [0, 0, 1, 1], [], []>} : vector<8x3xbf16>, vector<3x128xbf16>, vector<8x128xf32> -> vector<8x128xf32>
    %98 = arith.addf %93, %97 : vector<8x128xf32>
    %99 = vector.extract_strided_slice %83 {offsets = [1, 3], sizes = [8, 3], strides = [1, 1]} : vector<11x6xbf16> to vector<8x3xbf16>
    %c17 = arith.constant 17 : index
    %c0_61 = arith.constant 0 : index
    %c0_62 = arith.constant 0 : index
    %100 = vector.load %arg3[%c17, %c0_61, %c0_62] : memref<49x3x128xbf16, #tpu.memory_space<vmem>>, vector<1x3x128xbf16>
    %101 = vector.shape_cast %100 : vector<1x3x128xbf16> to vector<3x128xbf16>
    %cst_63 = arith.constant dense<0.000000e+00> : vector<8x128xf32>
    %102 = tpu.matmul %99, %101, %cst_63 {dimension_numbers = #tpu.dot_dimension_numbers<[1], [0], [0], [1], [0, 0, 1, 1], [], []>} : vector<8x3xbf16>, vector<3x128xbf16>, vector<8x128xf32> -> vector<8x128xf32>
    %103 = arith.addf %98, %102 : vector<8x128xf32>
    %104 = vector.extract_strided_slice %83 {offsets = [2, 0], sizes = [8, 3], strides = [1, 1]} : vector<11x6xbf16> to vector<8x3xbf16>
    %c18 = arith.constant 18 : index
    %c0_64 = arith.constant 0 : index
    %c0_65 = arith.constant 0 : index
    %105 = vector.load %arg3[%c18, %c0_64, %c0_65] : memref<49x3x128xbf16, #tpu.memory_space<vmem>>, vector<1x3x128xbf16>
    %106 = vector.shape_cast %105 : vector<1x3x128xbf16> to vector<3x128xbf16>
    %cst_66 = arith.constant dense<0.000000e+00> : vector<8x128xf32>
    %107 = tpu.matmul %104, %106, %cst_66 {dimension_numbers = #tpu.dot_dimension_numbers<[1], [0], [0], [1], [0, 0, 1, 1], [], []>} : vector<8x3xbf16>, vector<3x128xbf16>, vector<8x128xf32> -> vector<8x128xf32>
    %108 = arith.addf %103, %107 : vector<8x128xf32>
    %109 = vector.extract_strided_slice %83 {offsets = [2, 3], sizes = [8, 3], strides = [1, 1]} : vector<11x6xbf16> to vector<8x3xbf16>
    %c19 = arith.constant 19 : index
    %c0_67 = arith.constant 0 : index
    %c0_68 = arith.constant 0 : index
    %110 = vector.load %arg3[%c19, %c0_67, %c0_68] : memref<49x3x128xbf16, #tpu.memory_space<vmem>>, vector<1x3x128xbf16>
    %111 = vector.shape_cast %110 : vector<1x3x128xbf16> to vector<3x128xbf16>
    %cst_69 = arith.constant dense<0.000000e+00> : vector<8x128xf32>
    %112 = tpu.matmul %109, %111, %cst_69 {dimension_numbers = #tpu.dot_dimension_numbers<[1], [0], [0], [1], [0, 0, 1, 1], [], []>} : vector<8x3xbf16>, vector<3x128xbf16>, vector<8x128xf32> -> vector<8x128xf32>
    %113 = arith.addf %108, %112 : vector<8x128xf32>
    %114 = vector.extract_strided_slice %83 {offsets = [3, 0], sizes = [8, 3], strides = [1, 1]} : vector<11x6xbf16> to vector<8x3xbf16>
    %c20 = arith.constant 20 : index
    %c0_70 = arith.constant 0 : index
    %c0_71 = arith.constant 0 : index
    %115 = vector.load %arg3[%c20, %c0_70, %c0_71] : memref<49x3x128xbf16, #tpu.memory_space<vmem>>, vector<1x3x128xbf16>
    %116 = vector.shape_cast %115 : vector<1x3x128xbf16> to vector<3x128xbf16>
    %cst_72 = arith.constant dense<0.000000e+00> : vector<8x128xf32>
    %117 = tpu.matmul %114, %116, %cst_72 {dimension_numbers = #tpu.dot_dimension_numbers<[1], [0], [0], [1], [0, 0, 1, 1], [], []>} : vector<8x3xbf16>, vector<3x128xbf16>, vector<8x128xf32> -> vector<8x128xf32>
    %118 = arith.addf %113, %117 : vector<8x128xf32>
    %c3_i32 = arith.constant 3 : i32
    %119 = arith.addi %1, %c3_i32 : i32
    %c0_73 = arith.constant 0 : index
    %120 = arith.index_cast %119 : i32 to index
    %c0_74 = arith.constant 0 : index
    %c0_75 = arith.constant 0 : index
    %121 = vector.load %arg2[%c0_73, %120, %c0_74, %c0_75] : memref<1x22x11x6xbf16, #tpu.memory_space<vmem>>, vector<1x1x11x6xbf16>
    %122 = vector.shape_cast %121 : vector<1x1x11x6xbf16> to vector<11x6xbf16>
    %123 = vector.extract_strided_slice %122 {offsets = [0, 0], sizes = [8, 3], strides = [1, 1]} : vector<11x6xbf16> to vector<8x3xbf16>
    %c21 = arith.constant 21 : index
    %c0_76 = arith.constant 0 : index
    %c0_77 = arith.constant 0 : index
    %124 = vector.load %arg3[%c21, %c0_76, %c0_77] : memref<49x3x128xbf16, #tpu.memory_space<vmem>>, vector<1x3x128xbf16>
    %125 = vector.shape_cast %124 : vector<1x3x128xbf16> to vector<3x128xbf16>
    %cst_78 = arith.constant dense<0.000000e+00> : vector<8x128xf32>
    %126 = tpu.matmul %123, %125, %cst_78 {dimension_numbers = #tpu.dot_dimension_numbers<[1], [0], [0], [1], [0, 0, 1, 1], [], []>} : vector<8x3xbf16>, vector<3x128xbf16>, vector<8x128xf32> -> vector<8x128xf32>
    %127 = arith.addf %118, %126 : vector<8x128xf32>
    %128 = vector.extract_strided_slice %122 {offsets = [0, 3], sizes = [8, 3], strides = [1, 1]} : vector<11x6xbf16> to vector<8x3xbf16>
    %c22 = arith.constant 22 : index
    %c0_79 = arith.constant 0 : index
    %c0_80 = arith.constant 0 : index
    %129 = vector.load %arg3[%c22, %c0_79, %c0_80] : memref<49x3x128xbf16, #tpu.memory_space<vmem>>, vector<1x3x128xbf16>
    %130 = vector.shape_cast %129 : vector<1x3x128xbf16> to vector<3x128xbf16>
    %cst_81 = arith.constant dense<0.000000e+00> : vector<8x128xf32>
    %131 = tpu.matmul %128, %130, %cst_81 {dimension_numbers = #tpu.dot_dimension_numbers<[1], [0], [0], [1], [0, 0, 1, 1], [], []>} : vector<8x3xbf16>, vector<3x128xbf16>, vector<8x128xf32> -> vector<8x128xf32>
    %132 = arith.addf %127, %131 : vector<8x128xf32>
    %133 = vector.extract_strided_slice %122 {offsets = [1, 0], sizes = [8, 3], strides = [1, 1]} : vector<11x6xbf16> to vector<8x3xbf16>
    %c23 = arith.constant 23 : index
    %c0_82 = arith.constant 0 : index
    %c0_83 = arith.constant 0 : index
    %134 = vector.load %arg3[%c23, %c0_82, %c0_83] : memref<49x3x128xbf16, #tpu.memory_space<vmem>>, vector<1x3x128xbf16>
    %135 = vector.shape_cast %134 : vector<1x3x128xbf16> to vector<3x128xbf16>
    %cst_84 = arith.constant dense<0.000000e+00> : vector<8x128xf32>
    %136 = tpu.matmul %133, %135, %cst_84 {dimension_numbers = #tpu.dot_dimension_numbers<[1], [0], [0], [1], [0, 0, 1, 1], [], []>} : vector<8x3xbf16>, vector<3x128xbf16>, vector<8x128xf32> -> vector<8x128xf32>
    %137 = arith.addf %132, %136 : vector<8x128xf32>
    %138 = vector.extract_strided_slice %122 {offsets = [1, 3], sizes = [8, 3], strides = [1, 1]} : vector<11x6xbf16> to vector<8x3xbf16>
    %c24 = arith.constant 24 : index
    %c0_85 = arith.constant 0 : index
    %c0_86 = arith.constant 0 : index
    %139 = vector.load %arg3[%c24, %c0_85, %c0_86] : memref<49x3x128xbf16, #tpu.memory_space<vmem>>, vector<1x3x128xbf16>
    %140 = vector.shape_cast %139 : vector<1x3x128xbf16> to vector<3x128xbf16>
    %cst_87 = arith.constant dense<0.000000e+00> : vector<8x128xf32>
    %141 = tpu.matmul %138, %140, %cst_87 {dimension_numbers = #tpu.dot_dimension_numbers<[1], [0], [0], [1], [0, 0, 1, 1], [], []>} : vector<8x3xbf16>, vector<3x128xbf16>, vector<8x128xf32> -> vector<8x128xf32>
    %142 = arith.addf %137, %141 : vector<8x128xf32>
    %143 = vector.extract_strided_slice %122 {offsets = [2, 0], sizes = [8, 3], strides = [1, 1]} : vector<11x6xbf16> to vector<8x3xbf16>
    %c25 = arith.constant 25 : index
    %c0_88 = arith.constant 0 : index
    %c0_89 = arith.constant 0 : index
    %144 = vector.load %arg3[%c25, %c0_88, %c0_89] : memref<49x3x128xbf16, #tpu.memory_space<vmem>>, vector<1x3x128xbf16>
    %145 = vector.shape_cast %144 : vector<1x3x128xbf16> to vector<3x128xbf16>
    %cst_90 = arith.constant dense<0.000000e+00> : vector<8x128xf32>
    %146 = tpu.matmul %143, %145, %cst_90 {dimension_numbers = #tpu.dot_dimension_numbers<[1], [0], [0], [1], [0, 0, 1, 1], [], []>} : vector<8x3xbf16>, vector<3x128xbf16>, vector<8x128xf32> -> vector<8x128xf32>
    %147 = arith.addf %142, %146 : vector<8x128xf32>
    %148 = vector.extract_strided_slice %122 {offsets = [2, 3], sizes = [8, 3], strides = [1, 1]} : vector<11x6xbf16> to vector<8x3xbf16>
    %c26 = arith.constant 26 : index
    %c0_91 = arith.constant 0 : index
    %c0_92 = arith.constant 0 : index
    %149 = vector.load %arg3[%c26, %c0_91, %c0_92] : memref<49x3x128xbf16, #tpu.memory_space<vmem>>, vector<1x3x128xbf16>
    %150 = vector.shape_cast %149 : vector<1x3x128xbf16> to vector<3x128xbf16>
    %cst_93 = arith.constant dense<0.000000e+00> : vector<8x128xf32>
    %151 = tpu.matmul %148, %150, %cst_93 {dimension_numbers = #tpu.dot_dimension_numbers<[1], [0], [0], [1], [0, 0, 1, 1], [], []>} : vector<8x3xbf16>, vector<3x128xbf16>, vector<8x128xf32> -> vector<8x128xf32>
    %152 = arith.addf %147, %151 : vector<8x128xf32>
    %153 = vector.extract_strided_slice %122 {offsets = [3, 0], sizes = [8, 3], strides = [1, 1]} : vector<11x6xbf16> to vector<8x3xbf16>
    %c27 = arith.constant 27 : index
    %c0_94 = arith.constant 0 : index
    %c0_95 = arith.constant 0 : index
    %154 = vector.load %arg3[%c27, %c0_94, %c0_95] : memref<49x3x128xbf16, #tpu.memory_space<vmem>>, vector<1x3x128xbf16>
    %155 = vector.shape_cast %154 : vector<1x3x128xbf16> to vector<3x128xbf16>
    %cst_96 = arith.constant dense<0.000000e+00> : vector<8x128xf32>
    %156 = tpu.matmul %153, %155, %cst_96 {dimension_numbers = #tpu.dot_dimension_numbers<[1], [0], [0], [1], [0, 0, 1, 1], [], []>} : vector<8x3xbf16>, vector<3x128xbf16>, vector<8x128xf32> -> vector<8x128xf32>
    %157 = arith.addf %152, %156 : vector<8x128xf32>
    %c4_i32 = arith.constant 4 : i32
    %158 = arith.addi %1, %c4_i32 : i32
    %c0_97 = arith.constant 0 : index
    %159 = arith.index_cast %158 : i32 to index
    %c0_98 = arith.constant 0 : index
    %c0_99 = arith.constant 0 : index
    %160 = vector.load %arg2[%c0_97, %159, %c0_98, %c0_99] : memref<1x22x11x6xbf16, #tpu.memory_space<vmem>>, vector<1x1x11x6xbf16>
    %161 = vector.shape_cast %160 : vector<1x1x11x6xbf16> to vector<11x6xbf16>
    %162 = vector.extract_strided_slice %161 {offsets = [0, 0], sizes = [8, 3], strides = [1, 1]} : vector<11x6xbf16> to vector<8x3xbf16>
    %c28 = arith.constant 28 : index
    %c0_100 = arith.constant 0 : index
    %c0_101 = arith.constant 0 : index
    %163 = vector.load %arg3[%c28, %c0_100, %c0_101] : memref<49x3x128xbf16, #tpu.memory_space<vmem>>, vector<1x3x128xbf16>
    %164 = vector.shape_cast %163 : vector<1x3x128xbf16> to vector<3x128xbf16>
    %cst_102 = arith.constant dense<0.000000e+00> : vector<8x128xf32>
    %165 = tpu.matmul %162, %164, %cst_102 {dimension_numbers = #tpu.dot_dimension_numbers<[1], [0], [0], [1], [0, 0, 1, 1], [], []>} : vector<8x3xbf16>, vector<3x128xbf16>, vector<8x128xf32> -> vector<8x128xf32>
    %166 = arith.addf %157, %165 : vector<8x128xf32>
    %167 = vector.extract_strided_slice %161 {offsets = [0, 3], sizes = [8, 3], strides = [1, 1]} : vector<11x6xbf16> to vector<8x3xbf16>
    %c29 = arith.constant 29 : index
    %c0_103 = arith.constant 0 : index
    %c0_104 = arith.constant 0 : index
    %168 = vector.load %arg3[%c29, %c0_103, %c0_104] : memref<49x3x128xbf16, #tpu.memory_space<vmem>>, vector<1x3x128xbf16>
    %169 = vector.shape_cast %168 : vector<1x3x128xbf16> to vector<3x128xbf16>
    %cst_105 = arith.constant dense<0.000000e+00> : vector<8x128xf32>
    %170 = tpu.matmul %167, %169, %cst_105 {dimension_numbers = #tpu.dot_dimension_numbers<[1], [0], [0], [1], [0, 0, 1, 1], [], []>} : vector<8x3xbf16>, vector<3x128xbf16>, vector<8x128xf32> -> vector<8x128xf32>
    %171 = arith.addf %166, %170 : vector<8x128xf32>
    %172 = vector.extract_strided_slice %161 {offsets = [1, 0], sizes = [8, 3], strides = [1, 1]} : vector<11x6xbf16> to vector<8x3xbf16>
    %c30 = arith.constant 30 : index
    %c0_106 = arith.constant 0 : index
    %c0_107 = arith.constant 0 : index
    %173 = vector.load %arg3[%c30, %c0_106, %c0_107] : memref<49x3x128xbf16, #tpu.memory_space<vmem>>, vector<1x3x128xbf16>
    %174 = vector.shape_cast %173 : vector<1x3x128xbf16> to vector<3x128xbf16>
    %cst_108 = arith.constant dense<0.000000e+00> : vector<8x128xf32>
    %175 = tpu.matmul %172, %174, %cst_108 {dimension_numbers = #tpu.dot_dimension_numbers<[1], [0], [0], [1], [0, 0, 1, 1], [], []>} : vector<8x3xbf16>, vector<3x128xbf16>, vector<8x128xf32> -> vector<8x128xf32>
    %176 = arith.addf %171, %175 : vector<8x128xf32>
    %177 = vector.extract_strided_slice %161 {offsets = [1, 3], sizes = [8, 3], strides = [1, 1]} : vector<11x6xbf16> to vector<8x3xbf16>
    %c31 = arith.constant 31 : index
    %c0_109 = arith.constant 0 : index
    %c0_110 = arith.constant 0 : index
    %178 = vector.load %arg3[%c31, %c0_109, %c0_110] : memref<49x3x128xbf16, #tpu.memory_space<vmem>>, vector<1x3x128xbf16>
    %179 = vector.shape_cast %178 : vector<1x3x128xbf16> to vector<3x128xbf16>
    %cst_111 = arith.constant dense<0.000000e+00> : vector<8x128xf32>
    %180 = tpu.matmul %177, %179, %cst_111 {dimension_numbers = #tpu.dot_dimension_numbers<[1], [0], [0], [1], [0, 0, 1, 1], [], []>} : vector<8x3xbf16>, vector<3x128xbf16>, vector<8x128xf32> -> vector<8x128xf32>
    %181 = arith.addf %176, %180 : vector<8x128xf32>
    %182 = vector.extract_strided_slice %161 {offsets = [2, 0], sizes = [8, 3], strides = [1, 1]} : vector<11x6xbf16> to vector<8x3xbf16>
    %c32 = arith.constant 32 : index
    %c0_112 = arith.constant 0 : index
    %c0_113 = arith.constant 0 : index
    %183 = vector.load %arg3[%c32, %c0_112, %c0_113] : memref<49x3x128xbf16, #tpu.memory_space<vmem>>, vector<1x3x128xbf16>
    %184 = vector.shape_cast %183 : vector<1x3x128xbf16> to vector<3x128xbf16>
    %cst_114 = arith.constant dense<0.000000e+00> : vector<8x128xf32>
    %185 = tpu.matmul %182, %184, %cst_114 {dimension_numbers = #tpu.dot_dimension_numbers<[1], [0], [0], [1], [0, 0, 1, 1], [], []>} : vector<8x3xbf16>, vector<3x128xbf16>, vector<8x128xf32> -> vector<8x128xf32>
    %186 = arith.addf %181, %185 : vector<8x128xf32>
    %187 = vector.extract_strided_slice %161 {offsets = [2, 3], sizes = [8, 3], strides = [1, 1]} : vector<11x6xbf16> to vector<8x3xbf16>
    %c33 = arith.constant 33 : index
    %c0_115 = arith.constant 0 : index
    %c0_116 = arith.constant 0 : index
    %188 = vector.load %arg3[%c33, %c0_115, %c0_116] : memref<49x3x128xbf16, #tpu.memory_space<vmem>>, vector<1x3x128xbf16>
    %189 = vector.shape_cast %188 : vector<1x3x128xbf16> to vector<3x128xbf16>
    %cst_117 = arith.constant dense<0.000000e+00> : vector<8x128xf32>
    %190 = tpu.matmul %187, %189, %cst_117 {dimension_numbers = #tpu.dot_dimension_numbers<[1], [0], [0], [1], [0, 0, 1, 1], [], []>} : vector<8x3xbf16>, vector<3x128xbf16>, vector<8x128xf32> -> vector<8x128xf32>
    %191 = arith.addf %186, %190 : vector<8x128xf32>
    %192 = vector.extract_strided_slice %161 {offsets = [3, 0], sizes = [8, 3], strides = [1, 1]} : vector<11x6xbf16> to vector<8x3xbf16>
    %c34 = arith.constant 34 : index
    %c0_118 = arith.constant 0 : index
    %c0_119 = arith.constant 0 : index
    %193 = vector.load %arg3[%c34, %c0_118, %c0_119] : memref<49x3x128xbf16, #tpu.memory_space<vmem>>, vector<1x3x128xbf16>
    %194 = vector.shape_cast %193 : vector<1x3x128xbf16> to vector<3x128xbf16>
    %cst_120 = arith.constant dense<0.000000e+00> : vector<8x128xf32>
    %195 = tpu.matmul %192, %194, %cst_120 {dimension_numbers = #tpu.dot_dimension_numbers<[1], [0], [0], [1], [0, 0, 1, 1], [], []>} : vector<8x3xbf16>, vector<3x128xbf16>, vector<8x128xf32> -> vector<8x128xf32>
    %196 = arith.addf %191, %195 : vector<8x128xf32>
    %c5_i32 = arith.constant 5 : i32
    %197 = arith.addi %1, %c5_i32 : i32
    %c0_121 = arith.constant 0 : index
    %198 = arith.index_cast %197 : i32 to index
    %c0_122 = arith.constant 0 : index
    %c0_123 = arith.constant 0 : index
    %199 = vector.load %arg2[%c0_121, %198, %c0_122, %c0_123] : memref<1x22x11x6xbf16, #tpu.memory_space<vmem>>, vector<1x1x11x6xbf16>
    %200 = vector.shape_cast %199 : vector<1x1x11x6xbf16> to vector<11x6xbf16>
    %201 = vector.extract_strided_slice %200 {offsets = [0, 0], sizes = [8, 3], strides = [1, 1]} : vector<11x6xbf16> to vector<8x3xbf16>
    %c35 = arith.constant 35 : index
    %c0_124 = arith.constant 0 : index
    %c0_125 = arith.constant 0 : index
    %202 = vector.load %arg3[%c35, %c0_124, %c0_125] : memref<49x3x128xbf16, #tpu.memory_space<vmem>>, vector<1x3x128xbf16>
    %203 = vector.shape_cast %202 : vector<1x3x128xbf16> to vector<3x128xbf16>
    %cst_126 = arith.constant dense<0.000000e+00> : vector<8x128xf32>
    %204 = tpu.matmul %201, %203, %cst_126 {dimension_numbers = #tpu.dot_dimension_numbers<[1], [0], [0], [1], [0, 0, 1, 1], [], []>} : vector<8x3xbf16>, vector<3x128xbf16>, vector<8x128xf32> -> vector<8x128xf32>
    %205 = arith.addf %196, %204 : vector<8x128xf32>
    %206 = vector.extract_strided_slice %200 {offsets = [0, 3], sizes = [8, 3], strides = [1, 1]} : vector<11x6xbf16> to vector<8x3xbf16>
    %c36 = arith.constant 36 : index
    %c0_127 = arith.constant 0 : index
    %c0_128 = arith.constant 0 : index
    %207 = vector.load %arg3[%c36, %c0_127, %c0_128] : memref<49x3x128xbf16, #tpu.memory_space<vmem>>, vector<1x3x128xbf16>
    %208 = vector.shape_cast %207 : vector<1x3x128xbf16> to vector<3x128xbf16>
    %cst_129 = arith.constant dense<0.000000e+00> : vector<8x128xf32>
    %209 = tpu.matmul %206, %208, %cst_129 {dimension_numbers = #tpu.dot_dimension_numbers<[1], [0], [0], [1], [0, 0, 1, 1], [], []>} : vector<8x3xbf16>, vector<3x128xbf16>, vector<8x128xf32> -> vector<8x128xf32>
    %210 = arith.addf %205, %209 : vector<8x128xf32>
    %211 = vector.extract_strided_slice %200 {offsets = [1, 0], sizes = [8, 3], strides = [1, 1]} : vector<11x6xbf16> to vector<8x3xbf16>
    %c37 = arith.constant 37 : index
    %c0_130 = arith.constant 0 : index
    %c0_131 = arith.constant 0 : index
    %212 = vector.load %arg3[%c37, %c0_130, %c0_131] : memref<49x3x128xbf16, #tpu.memory_space<vmem>>, vector<1x3x128xbf16>
    %213 = vector.shape_cast %212 : vector<1x3x128xbf16> to vector<3x128xbf16>
    %cst_132 = arith.constant dense<0.000000e+00> : vector<8x128xf32>
    %214 = tpu.matmul %211, %213, %cst_132 {dimension_numbers = #tpu.dot_dimension_numbers<[1], [0], [0], [1], [0, 0, 1, 1], [], []>} : vector<8x3xbf16>, vector<3x128xbf16>, vector<8x128xf32> -> vector<8x128xf32>
    %215 = arith.addf %210, %214 : vector<8x128xf32>
    %216 = vector.extract_strided_slice %200 {offsets = [1, 3], sizes = [8, 3], strides = [1, 1]} : vector<11x6xbf16> to vector<8x3xbf16>
    %c38 = arith.constant 38 : index
    %c0_133 = arith.constant 0 : index
    %c0_134 = arith.constant 0 : index
    %217 = vector.load %arg3[%c38, %c0_133, %c0_134] : memref<49x3x128xbf16, #tpu.memory_space<vmem>>, vector<1x3x128xbf16>
    %218 = vector.shape_cast %217 : vector<1x3x128xbf16> to vector<3x128xbf16>
    %cst_135 = arith.constant dense<0.000000e+00> : vector<8x128xf32>
    %219 = tpu.matmul %216, %218, %cst_135 {dimension_numbers = #tpu.dot_dimension_numbers<[1], [0], [0], [1], [0, 0, 1, 1], [], []>} : vector<8x3xbf16>, vector<3x128xbf16>, vector<8x128xf32> -> vector<8x128xf32>
    %220 = arith.addf %215, %219 : vector<8x128xf32>
    %221 = vector.extract_strided_slice %200 {offsets = [2, 0], sizes = [8, 3], strides = [1, 1]} : vector<11x6xbf16> to vector<8x3xbf16>
    %c39 = arith.constant 39 : index
    %c0_136 = arith.constant 0 : index
    %c0_137 = arith.constant 0 : index
    %222 = vector.load %arg3[%c39, %c0_136, %c0_137] : memref<49x3x128xbf16, #tpu.memory_space<vmem>>, vector<1x3x128xbf16>
    %223 = vector.shape_cast %222 : vector<1x3x128xbf16> to vector<3x128xbf16>
    %cst_138 = arith.constant dense<0.000000e+00> : vector<8x128xf32>
    %224 = tpu.matmul %221, %223, %cst_138 {dimension_numbers = #tpu.dot_dimension_numbers<[1], [0], [0], [1], [0, 0, 1, 1], [], []>} : vector<8x3xbf16>, vector<3x128xbf16>, vector<8x128xf32> -> vector<8x128xf32>
    %225 = arith.addf %220, %224 : vector<8x128xf32>
    %226 = vector.extract_strided_slice %200 {offsets = [2, 3], sizes = [8, 3], strides = [1, 1]} : vector<11x6xbf16> to vector<8x3xbf16>
    %c40 = arith.constant 40 : index
    %c0_139 = arith.constant 0 : index
    %c0_140 = arith.constant 0 : index
    %227 = vector.load %arg3[%c40, %c0_139, %c0_140] : memref<49x3x128xbf16, #tpu.memory_space<vmem>>, vector<1x3x128xbf16>
    %228 = vector.shape_cast %227 : vector<1x3x128xbf16> to vector<3x128xbf16>
    %cst_141 = arith.constant dense<0.000000e+00> : vector<8x128xf32>
    %229 = tpu.matmul %226, %228, %cst_141 {dimension_numbers = #tpu.dot_dimension_numbers<[1], [0], [0], [1], [0, 0, 1, 1], [], []>} : vector<8x3xbf16>, vector<3x128xbf16>, vector<8x128xf32> -> vector<8x128xf32>
    %230 = arith.addf %225, %229 : vector<8x128xf32>
    %231 = vector.extract_strided_slice %200 {offsets = [3, 0], sizes = [8, 3], strides = [1, 1]} : vector<11x6xbf16> to vector<8x3xbf16>
    %c41 = arith.constant 41 : index
    %c0_142 = arith.constant 0 : index
    %c0_143 = arith.constant 0 : index
    %232 = vector.load %arg3[%c41, %c0_142, %c0_143] : memref<49x3x128xbf16, #tpu.memory_space<vmem>>, vector<1x3x128xbf16>
    %233 = vector.shape_cast %232 : vector<1x3x128xbf16> to vector<3x128xbf16>
    %cst_144 = arith.constant dense<0.000000e+00> : vector<8x128xf32>
    %234 = tpu.matmul %231, %233, %cst_144 {dimension_numbers = #tpu.dot_dimension_numbers<[1], [0], [0], [1], [0, 0, 1, 1], [], []>} : vector<8x3xbf16>, vector<3x128xbf16>, vector<8x128xf32> -> vector<8x128xf32>
    %235 = arith.addf %230, %234 : vector<8x128xf32>
    %c6_i32 = arith.constant 6 : i32
    %236 = arith.addi %1, %c6_i32 : i32
    %c0_145 = arith.constant 0 : index
    %237 = arith.index_cast %236 : i32 to index
    %c0_146 = arith.constant 0 : index
    %c0_147 = arith.constant 0 : index
    %238 = vector.load %arg2[%c0_145, %237, %c0_146, %c0_147] : memref<1x22x11x6xbf16, #tpu.memory_space<vmem>>, vector<1x1x11x6xbf16>
    %239 = vector.shape_cast %238 : vector<1x1x11x6xbf16> to vector<11x6xbf16>
    %240 = vector.extract_strided_slice %239 {offsets = [0, 0], sizes = [8, 3], strides = [1, 1]} : vector<11x6xbf16> to vector<8x3xbf16>
    %c42 = arith.constant 42 : index
    %c0_148 = arith.constant 0 : index
    %c0_149 = arith.constant 0 : index
    %241 = vector.load %arg3[%c42, %c0_148, %c0_149] : memref<49x3x128xbf16, #tpu.memory_space<vmem>>, vector<1x3x128xbf16>
    %242 = vector.shape_cast %241 : vector<1x3x128xbf16> to vector<3x128xbf16>
    %cst_150 = arith.constant dense<0.000000e+00> : vector<8x128xf32>
    %243 = tpu.matmul %240, %242, %cst_150 {dimension_numbers = #tpu.dot_dimension_numbers<[1], [0], [0], [1], [0, 0, 1, 1], [], []>} : vector<8x3xbf16>, vector<3x128xbf16>, vector<8x128xf32> -> vector<8x128xf32>
    %244 = arith.addf %235, %243 : vector<8x128xf32>
    %245 = vector.extract_strided_slice %239 {offsets = [0, 3], sizes = [8, 3], strides = [1, 1]} : vector<11x6xbf16> to vector<8x3xbf16>
    %c43 = arith.constant 43 : index
    %c0_151 = arith.constant 0 : index
    %c0_152 = arith.constant 0 : index
    %246 = vector.load %arg3[%c43, %c0_151, %c0_152] : memref<49x3x128xbf16, #tpu.memory_space<vmem>>, vector<1x3x128xbf16>
    %247 = vector.shape_cast %246 : vector<1x3x128xbf16> to vector<3x128xbf16>
    %cst_153 = arith.constant dense<0.000000e+00> : vector<8x128xf32>
    %248 = tpu.matmul %245, %247, %cst_153 {dimension_numbers = #tpu.dot_dimension_numbers<[1], [0], [0], [1], [0, 0, 1, 1], [], []>} : vector<8x3xbf16>, vector<3x128xbf16>, vector<8x128xf32> -> vector<8x128xf32>
    %249 = arith.addf %244, %248 : vector<8x128xf32>
    %250 = vector.extract_strided_slice %239 {offsets = [1, 0], sizes = [8, 3], strides = [1, 1]} : vector<11x6xbf16> to vector<8x3xbf16>
    %c44 = arith.constant 44 : index
    %c0_154 = arith.constant 0 : index
    %c0_155 = arith.constant 0 : index
    %251 = vector.load %arg3[%c44, %c0_154, %c0_155] : memref<49x3x128xbf16, #tpu.memory_space<vmem>>, vector<1x3x128xbf16>
    %252 = vector.shape_cast %251 : vector<1x3x128xbf16> to vector<3x128xbf16>
    %cst_156 = arith.constant dense<0.000000e+00> : vector<8x128xf32>
    %253 = tpu.matmul %250, %252, %cst_156 {dimension_numbers = #tpu.dot_dimension_numbers<[1], [0], [0], [1], [0, 0, 1, 1], [], []>} : vector<8x3xbf16>, vector<3x128xbf16>, vector<8x128xf32> -> vector<8x128xf32>
    %254 = arith.addf %249, %253 : vector<8x128xf32>
    %255 = vector.extract_strided_slice %239 {offsets = [1, 3], sizes = [8, 3], strides = [1, 1]} : vector<11x6xbf16> to vector<8x3xbf16>
    %c45 = arith.constant 45 : index
    %c0_157 = arith.constant 0 : index
    %c0_158 = arith.constant 0 : index
    %256 = vector.load %arg3[%c45, %c0_157, %c0_158] : memref<49x3x128xbf16, #tpu.memory_space<vmem>>, vector<1x3x128xbf16>
    %257 = vector.shape_cast %256 : vector<1x3x128xbf16> to vector<3x128xbf16>
    %cst_159 = arith.constant dense<0.000000e+00> : vector<8x128xf32>
    %258 = tpu.matmul %255, %257, %cst_159 {dimension_numbers = #tpu.dot_dimension_numbers<[1], [0], [0], [1], [0, 0, 1, 1], [], []>} : vector<8x3xbf16>, vector<3x128xbf16>, vector<8x128xf32> -> vector<8x128xf32>
    %259 = arith.addf %254, %258 : vector<8x128xf32>
    %260 = vector.extract_strided_slice %239 {offsets = [2, 0], sizes = [8, 3], strides = [1, 1]} : vector<11x6xbf16> to vector<8x3xbf16>
    %c46 = arith.constant 46 : index
    %c0_160 = arith.constant 0 : index
    %c0_161 = arith.constant 0 : index
    %261 = vector.load %arg3[%c46, %c0_160, %c0_161] : memref<49x3x128xbf16, #tpu.memory_space<vmem>>, vector<1x3x128xbf16>
    %262 = vector.shape_cast %261 : vector<1x3x128xbf16> to vector<3x128xbf16>
    %cst_162 = arith.constant dense<0.000000e+00> : vector<8x128xf32>
    %263 = tpu.matmul %260, %262, %cst_162 {dimension_numbers = #tpu.dot_dimension_numbers<[1], [0], [0], [1], [0, 0, 1, 1], [], []>} : vector<8x3xbf16>, vector<3x128xbf16>, vector<8x128xf32> -> vector<8x128xf32>
    %264 = arith.addf %259, %263 : vector<8x128xf32>
    %265 = vector.extract_strided_slice %239 {offsets = [2, 3], sizes = [8, 3], strides = [1, 1]} : vector<11x6xbf16> to vector<8x3xbf16>
    %c47 = arith.constant 47 : index
    %c0_163 = arith.constant 0 : index
    %c0_164 = arith.constant 0 : index
    %266 = vector.load %arg3[%c47, %c0_163, %c0_164] : memref<49x3x128xbf16, #tpu.memory_space<vmem>>, vector<1x3x128xbf16>
    %267 = vector.shape_cast %266 : vector<1x3x128xbf16> to vector<3x128xbf16>
    %cst_165 = arith.constant dense<0.000000e+00> : vector<8x128xf32>
    %268 = tpu.matmul %265, %267, %cst_165 {dimension_numbers = #tpu.dot_dimension_numbers<[1], [0], [0], [1], [0, 0, 1, 1], [], []>} : vector<8x3xbf16>, vector<3x128xbf16>, vector<8x128xf32> -> vector<8x128xf32>
    %269 = arith.addf %264, %268 : vector<8x128xf32>
    %270 = vector.extract_strided_slice %239 {offsets = [3, 0], sizes = [8, 3], strides = [1, 1]} : vector<11x6xbf16> to vector<8x3xbf16>
    %c48 = arith.constant 48 : index
    %c0_166 = arith.constant 0 : index
    %c0_167 = arith.constant 0 : index
    %271 = vector.load %arg3[%c48, %c0_166, %c0_167] : memref<49x3x128xbf16, #tpu.memory_space<vmem>>, vector<1x3x128xbf16>
    %272 = vector.shape_cast %271 : vector<1x3x128xbf16> to vector<3x128xbf16>
    %cst_168 = arith.constant dense<0.000000e+00> : vector<8x128xf32>
    %273 = tpu.matmul %270, %272, %cst_168 {dimension_numbers = #tpu.dot_dimension_numbers<[1], [0], [0], [1], [0, 0, 1, 1], [], []>} : vector<8x3xbf16>, vector<3x128xbf16>, vector<8x128xf32> -> vector<8x128xf32>
    %274 = arith.addf %269, %273 : vector<8x128xf32>
    %c0_169 = arith.constant 0 : index
    %c0_170 = arith.constant 0 : index
    %275 = vector.load %arg4[%c0_169, %c0_170] : memref<1x128xf32, #tpu.memory_space<vmem>>, vector<1x128xf32>
    %276 = vector.broadcast %275 : vector<1x128xf32> to vector<8x128xf32>
    %277 = arith.addf %274, %276 : vector<8x128xf32>
    %cst_171 = arith.constant 0.000000e+00 : f32
    %278 = vector.broadcast %cst_171 : f32 to vector<8x128xf32>
    %279 = arith.maximumf %277, %278 : vector<8x128xf32>
    %280 = arith.truncf %279 : vector<8x128xf32> to vector<8x128xbf16>
    %c0_172 = arith.constant 0 : index
    %c0_173 = arith.constant 0 : index
    %c0_174 = arith.constant 0 : index
    %c0_175 = arith.constant 0 : index
    %281 = vector.load %arg5[%c0_172, %c0_173, %c0_174, %c0_175] : memref<1x1x8x128xbf16, #tpu.memory_space<vmem>>, vector<1x1x8x128xbf16>
    %282 = vector.shape_cast %281 : vector<1x1x8x128xbf16> to vector<8x128xbf16>
    %283 = vector.shape_cast %280 : vector<8x128xbf16> to vector<1x1x8x128xbf16>
    tpu.vector_store %arg5[%c0_172, %c0_173, %c0_174, %c0_175], %283 {strides = array<i32>} : memref<1x1x8x128xbf16, #tpu.memory_space<vmem>>, vector<1x1x8x128xbf16>,
    return
  }
  func.func @transform_0(%arg0: i32, %arg1: i32) -> (i32, i32, i32, i32) {
    %c0_i32 = arith.constant 0 : i32
    %c0_i32_0 = arith.constant 0 : i32
    %c0_i32_1 = arith.constant 0 : i32
    %c0_i32_2 = arith.constant 0 : i32
    return %arg0, %c0_i32, %c0_i32_0, %c0_i32_1 : i32, i32, i32, i32
  }
  func.func @transform_1(%arg0: i32, %arg1: i32) -> (i32, i32, i32) {
    %c0_i32 = arith.constant 0 : i32
    %c0_i32_0 = arith.constant 0 : i32
    %c0_i32_1 = arith.constant 0 : i32
    %c0_i32_2 = arith.constant 0 : i32
    return %c0_i32, %c0_i32_0, %c0_i32_1 : i32, i32, i32
  }
  func.func @transform_2(%arg0: i32, %arg1: i32) -> (i32, i32) {
    %c0_i32 = arith.constant 0 : i32
    %c0_i32_0 = arith.constant 0 : i32
    %c0_i32_1 = arith.constant 0 : i32
    return %c0_i32, %c0_i32_0 : i32, i32
  }
  func.func @transform_3(%arg0: i32, %arg1: i32) -> (i32, i32, i32, i32) {
    %c0_i32 = arith.constant 0 : i32
    %c0_i32_0 = arith.constant 0 : i32
    %c0_i32_1 = arith.constant 0 : i32
    return %arg0, %arg1, %c0_i32, %c0_i32_0 : i32, i32, i32, i32
  }
}

module attributes {stable_mosaic.version = 11 : i64} {
  func.func @kernel(%arg0: i32, %arg1: i32, %arg2: memref<1x10x5x256xbf16, #tpu.memory_space<vmem>>, %arg3: memref<1x1x4x128xbf16, #tpu.memory_space<vmem>>) attributes {dimension_semantics = [#tpu.dimension_semantics<parallel>, #tpu.dimension_semantics<arbitrary>], iteration_bounds = array<i64: 2, 4>, scalar_prefetch = 0 : i64, scratch_operands = 0 : i64, tpu.core_type = #tpu.core_type<tc>, window_params = [{transform_indices = @transform_0, window_bounds = array<i64: 1, 10, 5, 256>}, {transform_indices = @transform_1, window_bounds = array<i64: 1, 1, 4, 128>}]} {
    %c2_i32 = arith.constant 2 : i32
    %0 = arith.muli %arg1, %c2_i32 : i32
    %c0_i32 = arith.constant 0 : i32
    %1 = arith.addi %0, %c0_i32 : i32
    %c0 = arith.constant 0 : index
    %2 = arith.index_cast %1 : i32 to index
    %c0_0 = arith.constant 0 : index
    %c0_1 = arith.constant 0 : index
    %3 = vector.load %arg2[%c0, %2, %c0_0, %c0_1] : memref<1x10x5x256xbf16, #tpu.memory_space<vmem>>, vector<1x1x5x256xbf16>
    %4 = vector.shape_cast %3 : vector<1x1x5x256xbf16> to vector<5x256xbf16>
    %5 = vector.extract_strided_slice %4 {offsets = [0, 0], sizes = [4, 128], strides = [1, 1]} : vector<5x256xbf16> to vector<4x128xbf16>
    %6 = vector.extract_strided_slice %4 {offsets = [0, 128], sizes = [4, 128], strides = [1, 1]} : vector<5x256xbf16> to vector<4x128xbf16>
    %7 = arith.maximumf %5, %6 : vector<4x128xbf16>
    %8 = vector.extract_strided_slice %4 {offsets = [1, 0], sizes = [4, 128], strides = [1, 1]} : vector<5x256xbf16> to vector<4x128xbf16>
    %9 = arith.maximumf %7, %8 : vector<4x128xbf16>
    %c1_i32 = arith.constant 1 : i32
    %10 = arith.addi %0, %c1_i32 : i32
    %c0_2 = arith.constant 0 : index
    %11 = arith.index_cast %10 : i32 to index
    %c0_3 = arith.constant 0 : index
    %c0_4 = arith.constant 0 : index
    %12 = vector.load %arg2[%c0_2, %11, %c0_3, %c0_4] : memref<1x10x5x256xbf16, #tpu.memory_space<vmem>>, vector<1x1x5x256xbf16>
    %13 = vector.shape_cast %12 : vector<1x1x5x256xbf16> to vector<5x256xbf16>
    %14 = vector.extract_strided_slice %13 {offsets = [0, 0], sizes = [4, 128], strides = [1, 1]} : vector<5x256xbf16> to vector<4x128xbf16>
    %15 = arith.maximumf %9, %14 : vector<4x128xbf16>
    %16 = vector.extract_strided_slice %13 {offsets = [0, 128], sizes = [4, 128], strides = [1, 1]} : vector<5x256xbf16> to vector<4x128xbf16>
    %17 = arith.maximumf %15, %16 : vector<4x128xbf16>
    %18 = vector.extract_strided_slice %13 {offsets = [1, 0], sizes = [4, 128], strides = [1, 1]} : vector<5x256xbf16> to vector<4x128xbf16>
    %19 = arith.maximumf %17, %18 : vector<4x128xbf16>
    %c2_i32_5 = arith.constant 2 : i32
    %20 = arith.addi %0, %c2_i32_5 : i32
    %c0_6 = arith.constant 0 : index
    %21 = arith.index_cast %20 : i32 to index
    %c0_7 = arith.constant 0 : index
    %c0_8 = arith.constant 0 : index
    %22 = vector.load %arg2[%c0_6, %21, %c0_7, %c0_8] : memref<1x10x5x256xbf16, #tpu.memory_space<vmem>>, vector<1x1x5x256xbf16>
    %23 = vector.shape_cast %22 : vector<1x1x5x256xbf16> to vector<5x256xbf16>
    %24 = vector.extract_strided_slice %23 {offsets = [0, 0], sizes = [4, 128], strides = [1, 1]} : vector<5x256xbf16> to vector<4x128xbf16>
    %25 = arith.maximumf %19, %24 : vector<4x128xbf16>
    %26 = vector.extract_strided_slice %23 {offsets = [0, 128], sizes = [4, 128], strides = [1, 1]} : vector<5x256xbf16> to vector<4x128xbf16>
    %27 = arith.maximumf %25, %26 : vector<4x128xbf16>
    %28 = vector.extract_strided_slice %23 {offsets = [1, 0], sizes = [4, 128], strides = [1, 1]} : vector<5x256xbf16> to vector<4x128xbf16>
    %29 = arith.maximumf %27, %28 : vector<4x128xbf16>
    %c0_9 = arith.constant 0 : index
    %c0_10 = arith.constant 0 : index
    %c0_11 = arith.constant 0 : index
    %c0_12 = arith.constant 0 : index
    %30 = vector.load %arg3[%c0_9, %c0_10, %c0_11, %c0_12] : memref<1x1x4x128xbf16, #tpu.memory_space<vmem>>, vector<1x1x4x128xbf16>
    %31 = vector.shape_cast %30 : vector<1x1x4x128xbf16> to vector<4x128xbf16>
    %32 = vector.shape_cast %29 : vector<4x128xbf16> to vector<1x1x4x128xbf16>
    tpu.vector_store %arg3[%c0_9, %c0_10, %c0_11, %c0_12], %32 {strides = array<i32>} : memref<1x1x4x128xbf16, #tpu.memory_space<vmem>>, vector<1x1x4x128xbf16>,
    return
  }
  func.func @transform_0(%arg0: i32, %arg1: i32) -> (i32, i32, i32, i32) {
    %c0_i32 = arith.constant 0 : i32
    %c0_i32_0 = arith.constant 0 : i32
    %c0_i32_1 = arith.constant 0 : i32
    %c0_i32_2 = arith.constant 0 : i32
    return %arg0, %c0_i32, %c0_i32_0, %c0_i32_1 : i32, i32, i32, i32
  }
  func.func @transform_1(%arg0: i32, %arg1: i32) -> (i32, i32, i32, i32) {
    %c0_i32 = arith.constant 0 : i32
    %c0_i32_0 = arith.constant 0 : i32
    %c0_i32_1 = arith.constant 0 : i32
    return %arg0, %arg1, %c0_i32, %c0_i32_0 : i32, i32, i32, i32
  }
}

module attributes {stable_mosaic.version = 11 : i64} {
  func.func @kernel(%arg0: i32, %arg1: i32, %arg2: memref<1x6x6x128xbf16, #tpu.memory_space<vmem>>, %arg3: memref<9x64x128xbf16, #tpu.memory_space<vmem>>, %arg4: memref<1x128xf32, #tpu.memory_space<vmem>>, %arg5: memref<1x1x4x128xbf16, #tpu.memory_space<vmem>>) attributes {dimension_semantics = [#tpu.dimension_semantics<parallel>, #tpu.dimension_semantics<arbitrary>], iteration_bounds = array<i64: 2, 4>, scalar_prefetch = 0 : i64, scratch_operands = 0 : i64, tpu.core_type = #tpu.core_type<tc>, window_params = [{transform_indices = @transform_0, window_bounds = array<i64: 1, 6, 6, 128>}, {pipeline_mode = #tpu.pipeline_mode<synchronous>, transform_indices = @transform_1, window_bounds = array<i64: 9, 64, 128>}, {pipeline_mode = #tpu.pipeline_mode<synchronous>, transform_indices = @transform_2, window_bounds = array<i64: 1, 128>}, {transform_indices = @transform_3, window_bounds = array<i64: 1, 1, 4, 128>}]} {
    %cst = arith.constant 0.000000e+00 : f32
    %0 = vector.broadcast %cst : f32 to vector<4x128xf32>
    %c1_i32 = arith.constant 1 : i32
    %1 = arith.muli %arg1, %c1_i32 : i32
    %c0_i32 = arith.constant 0 : i32
    %2 = arith.addi %1, %c0_i32 : i32
    %c0 = arith.constant 0 : index
    %3 = arith.index_cast %2 : i32 to index
    %c0_0 = arith.constant 0 : index
    %c0_1 = arith.constant 0 : index
    %4 = vector.load %arg2[%c0, %3, %c0_0, %c0_1] : memref<1x6x6x128xbf16, #tpu.memory_space<vmem>>, vector<1x1x6x128xbf16>
    %5 = vector.shape_cast %4 : vector<1x1x6x128xbf16> to vector<6x128xbf16>
    %6 = vector.extract_strided_slice %5 {offsets = [0, 0], sizes = [4, 64], strides = [1, 1]} : vector<6x128xbf16> to vector<4x64xbf16>
    %c0_2 = arith.constant 0 : index
    %c0_3 = arith.constant 0 : index
    %c0_4 = arith.constant 0 : index
    %7 = vector.load %arg3[%c0_2, %c0_3, %c0_4] : memref<9x64x128xbf16, #tpu.memory_space<vmem>>, vector<1x64x128xbf16>
    %8 = vector.shape_cast %7 : vector<1x64x128xbf16> to vector<64x128xbf16>
    %cst_5 = arith.constant dense<0.000000e+00> : vector<4x128xf32>
    %9 = tpu.matmul %6, %8, %cst_5 {dimension_numbers = #tpu.dot_dimension_numbers<[1], [0], [0], [1], [0, 0, 1, 1], [], []>} : vector<4x64xbf16>, vector<64x128xbf16>, vector<4x128xf32> -> vector<4x128xf32>
    %10 = arith.addf %0, %9 : vector<4x128xf32>
    %11 = vector.extract_strided_slice %5 {offsets = [1, 0], sizes = [4, 64], strides = [1, 1]} : vector<6x128xbf16> to vector<4x64xbf16>
    %c1 = arith.constant 1 : index
    %c0_6 = arith.constant 0 : index
    %c0_7 = arith.constant 0 : index
    %12 = vector.load %arg3[%c1, %c0_6, %c0_7] : memref<9x64x128xbf16, #tpu.memory_space<vmem>>, vector<1x64x128xbf16>
    %13 = vector.shape_cast %12 : vector<1x64x128xbf16> to vector<64x128xbf16>
    %cst_8 = arith.constant dense<0.000000e+00> : vector<4x128xf32>
    %14 = tpu.matmul %11, %13, %cst_8 {dimension_numbers = #tpu.dot_dimension_numbers<[1], [0], [0], [1], [0, 0, 1, 1], [], []>} : vector<4x64xbf16>, vector<64x128xbf16>, vector<4x128xf32> -> vector<4x128xf32>
    %15 = arith.addf %10, %14 : vector<4x128xf32>
    %16 = vector.extract_strided_slice %5 {offsets = [2, 0], sizes = [4, 64], strides = [1, 1]} : vector<6x128xbf16> to vector<4x64xbf16>
    %c2 = arith.constant 2 : index
    %c0_9 = arith.constant 0 : index
    %c0_10 = arith.constant 0 : index
    %17 = vector.load %arg3[%c2, %c0_9, %c0_10] : memref<9x64x128xbf16, #tpu.memory_space<vmem>>, vector<1x64x128xbf16>
    %18 = vector.shape_cast %17 : vector<1x64x128xbf16> to vector<64x128xbf16>
    %cst_11 = arith.constant dense<0.000000e+00> : vector<4x128xf32>
    %19 = tpu.matmul %16, %18, %cst_11 {dimension_numbers = #tpu.dot_dimension_numbers<[1], [0], [0], [1], [0, 0, 1, 1], [], []>} : vector<4x64xbf16>, vector<64x128xbf16>, vector<4x128xf32> -> vector<4x128xf32>
    %20 = arith.addf %15, %19 : vector<4x128xf32>
    %c1_i32_12 = arith.constant 1 : i32
    %21 = arith.addi %1, %c1_i32_12 : i32
    %c0_13 = arith.constant 0 : index
    %22 = arith.index_cast %21 : i32 to index
    %c0_14 = arith.constant 0 : index
    %c0_15 = arith.constant 0 : index
    %23 = vector.load %arg2[%c0_13, %22, %c0_14, %c0_15] : memref<1x6x6x128xbf16, #tpu.memory_space<vmem>>, vector<1x1x6x128xbf16>
    %24 = vector.shape_cast %23 : vector<1x1x6x128xbf16> to vector<6x128xbf16>
    %25 = vector.extract_strided_slice %24 {offsets = [0, 0], sizes = [4, 64], strides = [1, 1]} : vector<6x128xbf16> to vector<4x64xbf16>
    %c3 = arith.constant 3 : index
    %c0_16 = arith.constant 0 : index
    %c0_17 = arith.constant 0 : index
    %26 = vector.load %arg3[%c3, %c0_16, %c0_17] : memref<9x64x128xbf16, #tpu.memory_space<vmem>>, vector<1x64x128xbf16>
    %27 = vector.shape_cast %26 : vector<1x64x128xbf16> to vector<64x128xbf16>
    %cst_18 = arith.constant dense<0.000000e+00> : vector<4x128xf32>
    %28 = tpu.matmul %25, %27, %cst_18 {dimension_numbers = #tpu.dot_dimension_numbers<[1], [0], [0], [1], [0, 0, 1, 1], [], []>} : vector<4x64xbf16>, vector<64x128xbf16>, vector<4x128xf32> -> vector<4x128xf32>
    %29 = arith.addf %20, %28 : vector<4x128xf32>
    %30 = vector.extract_strided_slice %24 {offsets = [1, 0], sizes = [4, 64], strides = [1, 1]} : vector<6x128xbf16> to vector<4x64xbf16>
    %c4 = arith.constant 4 : index
    %c0_19 = arith.constant 0 : index
    %c0_20 = arith.constant 0 : index
    %31 = vector.load %arg3[%c4, %c0_19, %c0_20] : memref<9x64x128xbf16, #tpu.memory_space<vmem>>, vector<1x64x128xbf16>
    %32 = vector.shape_cast %31 : vector<1x64x128xbf16> to vector<64x128xbf16>
    %cst_21 = arith.constant dense<0.000000e+00> : vector<4x128xf32>
    %33 = tpu.matmul %30, %32, %cst_21 {dimension_numbers = #tpu.dot_dimension_numbers<[1], [0], [0], [1], [0, 0, 1, 1], [], []>} : vector<4x64xbf16>, vector<64x128xbf16>, vector<4x128xf32> -> vector<4x128xf32>
    %34 = arith.addf %29, %33 : vector<4x128xf32>
    %35 = vector.extract_strided_slice %24 {offsets = [2, 0], sizes = [4, 64], strides = [1, 1]} : vector<6x128xbf16> to vector<4x64xbf16>
    %c5 = arith.constant 5 : index
    %c0_22 = arith.constant 0 : index
    %c0_23 = arith.constant 0 : index
    %36 = vector.load %arg3[%c5, %c0_22, %c0_23] : memref<9x64x128xbf16, #tpu.memory_space<vmem>>, vector<1x64x128xbf16>
    %37 = vector.shape_cast %36 : vector<1x64x128xbf16> to vector<64x128xbf16>
    %cst_24 = arith.constant dense<0.000000e+00> : vector<4x128xf32>
    %38 = tpu.matmul %35, %37, %cst_24 {dimension_numbers = #tpu.dot_dimension_numbers<[1], [0], [0], [1], [0, 0, 1, 1], [], []>} : vector<4x64xbf16>, vector<64x128xbf16>, vector<4x128xf32> -> vector<4x128xf32>
    %39 = arith.addf %34, %38 : vector<4x128xf32>
    %c2_i32 = arith.constant 2 : i32
    %40 = arith.addi %1, %c2_i32 : i32
    %c0_25 = arith.constant 0 : index
    %41 = arith.index_cast %40 : i32 to index
    %c0_26 = arith.constant 0 : index
    %c0_27 = arith.constant 0 : index
    %42 = vector.load %arg2[%c0_25, %41, %c0_26, %c0_27] : memref<1x6x6x128xbf16, #tpu.memory_space<vmem>>, vector<1x1x6x128xbf16>
    %43 = vector.shape_cast %42 : vector<1x1x6x128xbf16> to vector<6x128xbf16>
    %44 = vector.extract_strided_slice %43 {offsets = [0, 0], sizes = [4, 64], strides = [1, 1]} : vector<6x128xbf16> to vector<4x64xbf16>
    %c6 = arith.constant 6 : index
    %c0_28 = arith.constant 0 : index
    %c0_29 = arith.constant 0 : index
    %45 = vector.load %arg3[%c6, %c0_28, %c0_29] : memref<9x64x128xbf16, #tpu.memory_space<vmem>>, vector<1x64x128xbf16>
    %46 = vector.shape_cast %45 : vector<1x64x128xbf16> to vector<64x128xbf16>
    %cst_30 = arith.constant dense<0.000000e+00> : vector<4x128xf32>
    %47 = tpu.matmul %44, %46, %cst_30 {dimension_numbers = #tpu.dot_dimension_numbers<[1], [0], [0], [1], [0, 0, 1, 1], [], []>} : vector<4x64xbf16>, vector<64x128xbf16>, vector<4x128xf32> -> vector<4x128xf32>
    %48 = arith.addf %39, %47 : vector<4x128xf32>
    %49 = vector.extract_strided_slice %43 {offsets = [1, 0], sizes = [4, 64], strides = [1, 1]} : vector<6x128xbf16> to vector<4x64xbf16>
    %c7 = arith.constant 7 : index
    %c0_31 = arith.constant 0 : index
    %c0_32 = arith.constant 0 : index
    %50 = vector.load %arg3[%c7, %c0_31, %c0_32] : memref<9x64x128xbf16, #tpu.memory_space<vmem>>, vector<1x64x128xbf16>
    %51 = vector.shape_cast %50 : vector<1x64x128xbf16> to vector<64x128xbf16>
    %cst_33 = arith.constant dense<0.000000e+00> : vector<4x128xf32>
    %52 = tpu.matmul %49, %51, %cst_33 {dimension_numbers = #tpu.dot_dimension_numbers<[1], [0], [0], [1], [0, 0, 1, 1], [], []>} : vector<4x64xbf16>, vector<64x128xbf16>, vector<4x128xf32> -> vector<4x128xf32>
    %53 = arith.addf %48, %52 : vector<4x128xf32>
    %54 = vector.extract_strided_slice %43 {offsets = [2, 0], sizes = [4, 64], strides = [1, 1]} : vector<6x128xbf16> to vector<4x64xbf16>
    %c8 = arith.constant 8 : index
    %c0_34 = arith.constant 0 : index
    %c0_35 = arith.constant 0 : index
    %55 = vector.load %arg3[%c8, %c0_34, %c0_35] : memref<9x64x128xbf16, #tpu.memory_space<vmem>>, vector<1x64x128xbf16>
    %56 = vector.shape_cast %55 : vector<1x64x128xbf16> to vector<64x128xbf16>
    %cst_36 = arith.constant dense<0.000000e+00> : vector<4x128xf32>
    %57 = tpu.matmul %54, %56, %cst_36 {dimension_numbers = #tpu.dot_dimension_numbers<[1], [0], [0], [1], [0, 0, 1, 1], [], []>} : vector<4x64xbf16>, vector<64x128xbf16>, vector<4x128xf32> -> vector<4x128xf32>
    %58 = arith.addf %53, %57 : vector<4x128xf32>
    %c0_37 = arith.constant 0 : index
    %c0_38 = arith.constant 0 : index
    %59 = vector.load %arg4[%c0_37, %c0_38] : memref<1x128xf32, #tpu.memory_space<vmem>>, vector<1x128xf32>
    %60 = vector.broadcast %59 : vector<1x128xf32> to vector<4x128xf32>
    %61 = arith.addf %58, %60 : vector<4x128xf32>
    %cst_39 = arith.constant 0.000000e+00 : f32
    %62 = vector.broadcast %cst_39 : f32 to vector<4x128xf32>
    %63 = arith.maximumf %61, %62 : vector<4x128xf32>
    %64 = arith.truncf %63 : vector<4x128xf32> to vector<4x128xbf16>
    %c0_40 = arith.constant 0 : index
    %c0_41 = arith.constant 0 : index
    %c0_42 = arith.constant 0 : index
    %c0_43 = arith.constant 0 : index
    %65 = vector.load %arg5[%c0_40, %c0_41, %c0_42, %c0_43] : memref<1x1x4x128xbf16, #tpu.memory_space<vmem>>, vector<1x1x4x128xbf16>
    %66 = vector.shape_cast %65 : vector<1x1x4x128xbf16> to vector<4x128xbf16>
    %67 = vector.shape_cast %64 : vector<4x128xbf16> to vector<1x1x4x128xbf16>
    tpu.vector_store %arg5[%c0_40, %c0_41, %c0_42, %c0_43], %67 {strides = array<i32>} : memref<1x1x4x128xbf16, #tpu.memory_space<vmem>>, vector<1x1x4x128xbf16>,
    return
  }
  func.func @transform_0(%arg0: i32, %arg1: i32) -> (i32, i32, i32, i32) {
    %c0_i32 = arith.constant 0 : i32
    %c0_i32_0 = arith.constant 0 : i32
    %c0_i32_1 = arith.constant 0 : i32
    %c0_i32_2 = arith.constant 0 : i32
    return %arg0, %c0_i32, %c0_i32_0, %c0_i32_1 : i32, i32, i32, i32
  }
  func.func @transform_1(%arg0: i32, %arg1: i32) -> (i32, i32, i32) {
    %c0_i32 = arith.constant 0 : i32
    %c0_i32_0 = arith.constant 0 : i32
    %c0_i32_1 = arith.constant 0 : i32
    %c0_i32_2 = arith.constant 0 : i32
    return %c0_i32, %c0_i32_0, %c0_i32_1 : i32, i32, i32
  }
  func.func @transform_2(%arg0: i32, %arg1: i32) -> (i32, i32) {
    %c0_i32 = arith.constant 0 : i32
    %c0_i32_0 = arith.constant 0 : i32
    %c0_i32_1 = arith.constant 0 : i32
    return %c0_i32, %c0_i32_0 : i32, i32
  }
  func.func @transform_3(%arg0: i32, %arg1: i32) -> (i32, i32, i32, i32) {
    %c0_i32 = arith.constant 0 : i32
    %c0_i32_0 = arith.constant 0 : i32
    %c0_i32_1 = arith.constant 0 : i32
    return %arg0, %arg1, %c0_i32, %c0_i32_0 : i32, i32, i32, i32
  }
}

module attributes {stable_mosaic.version = 11 : i64} {
  func.func @kernel(%arg0: i32, %arg1: i32, %arg2: memref<1x6x6x128xbf16, #tpu.memory_space<vmem>>, %arg3: memref<9x16x128xbf16, #tpu.memory_space<vmem>>, %arg4: memref<1x4x4x128xbf16, #tpu.memory_space<vmem>>, %arg5: memref<1x64x128xbf16, #tpu.memory_space<vmem>>, %arg6: memref<1x128xf32, #tpu.memory_space<vmem>>, %arg7: memref<1x1x4x128xbf16, #tpu.memory_space<vmem>>) attributes {dimension_semantics = [#tpu.dimension_semantics<parallel>, #tpu.dimension_semantics<arbitrary>], iteration_bounds = array<i64: 2, 4>, scalar_prefetch = 0 : i64, scratch_operands = 0 : i64, tpu.core_type = #tpu.core_type<tc>, window_params = [{transform_indices = @transform_0, window_bounds = array<i64: 1, 6, 6, 128>}, {pipeline_mode = #tpu.pipeline_mode<synchronous>, transform_indices = @transform_1, window_bounds = array<i64: 9, 16, 128>}, {transform_indices = @transform_2, window_bounds = array<i64: 1, 4, 4, 128>}, {pipeline_mode = #tpu.pipeline_mode<synchronous>, transform_indices = @transform_3, window_bounds = array<i64: 1, 64, 128>}, {pipeline_mode = #tpu.pipeline_mode<synchronous>, transform_indices = @transform_4, window_bounds = array<i64: 1, 128>}, {transform_indices = @transform_5, window_bounds = array<i64: 1, 1, 4, 128>}]} {
    %cst = arith.constant 0.000000e+00 : f32
    %0 = vector.broadcast %cst : f32 to vector<4x128xf32>
    %c1_i32 = arith.constant 1 : i32
    %1 = arith.muli %arg1, %c1_i32 : i32
    %c0_i32 = arith.constant 0 : i32
    %2 = arith.addi %1, %c0_i32 : i32
    %c0 = arith.constant 0 : index
    %3 = arith.index_cast %2 : i32 to index
    %c0_0 = arith.constant 0 : index
    %c0_1 = arith.constant 0 : index
    %4 = vector.load %arg2[%c0, %3, %c0_0, %c0_1] : memref<1x6x6x128xbf16, #tpu.memory_space<vmem>>, vector<1x1x6x128xbf16>
    %5 = vector.shape_cast %4 : vector<1x1x6x128xbf16> to vector<6x128xbf16>
    %6 = vector.extract_strided_slice %5 {offsets = [0, 0], sizes = [4, 16], strides = [1, 1]} : vector<6x128xbf16> to vector<4x16xbf16>
    %c0_2 = arith.constant 0 : index
    %c0_3 = arith.constant 0 : index
    %c0_4 = arith.constant 0 : index
    %7 = vector.load %arg3[%c0_2, %c0_3, %c0_4] : memref<9x16x128xbf16, #tpu.memory_space<vmem>>, vector<1x16x128xbf16>
    %8 = vector.shape_cast %7 : vector<1x16x128xbf16> to vector<16x128xbf16>
    %cst_5 = arith.constant dense<0.000000e+00> : vector<4x128xf32>
    %9 = tpu.matmul %6, %8, %cst_5 {dimension_numbers = #tpu.dot_dimension_numbers<[1], [0], [0], [1], [0, 0, 1, 1], [], []>} : vector<4x16xbf16>, vector<16x128xbf16>, vector<4x128xf32> -> vector<4x128xf32>
    %10 = arith.addf %0, %9 : vector<4x128xf32>
    %11 = vector.extract_strided_slice %5 {offsets = [1, 0], sizes = [4, 16], strides = [1, 1]} : vector<6x128xbf16> to vector<4x16xbf16>
    %c1 = arith.constant 1 : index
    %c0_6 = arith.constant 0 : index
    %c0_7 = arith.constant 0 : index
    %12 = vector.load %arg3[%c1, %c0_6, %c0_7] : memref<9x16x128xbf16, #tpu.memory_space<vmem>>, vector<1x16x128xbf16>
    %13 = vector.shape_cast %12 : vector<1x16x128xbf16> to vector<16x128xbf16>
    %cst_8 = arith.constant dense<0.000000e+00> : vector<4x128xf32>
    %14 = tpu.matmul %11, %13, %cst_8 {dimension_numbers = #tpu.dot_dimension_numbers<[1], [0], [0], [1], [0, 0, 1, 1], [], []>} : vector<4x16xbf16>, vector<16x128xbf16>, vector<4x128xf32> -> vector<4x128xf32>
    %15 = arith.addf %10, %14 : vector<4x128xf32>
    %16 = vector.extract_strided_slice %5 {offsets = [2, 0], sizes = [4, 16], strides = [1, 1]} : vector<6x128xbf16> to vector<4x16xbf16>
    %c2 = arith.constant 2 : index
    %c0_9 = arith.constant 0 : index
    %c0_10 = arith.constant 0 : index
    %17 = vector.load %arg3[%c2, %c0_9, %c0_10] : memref<9x16x128xbf16, #tpu.memory_space<vmem>>, vector<1x16x128xbf16>
    %18 = vector.shape_cast %17 : vector<1x16x128xbf16> to vector<16x128xbf16>
    %cst_11 = arith.constant dense<0.000000e+00> : vector<4x128xf32>
    %19 = tpu.matmul %16, %18, %cst_11 {dimension_numbers = #tpu.dot_dimension_numbers<[1], [0], [0], [1], [0, 0, 1, 1], [], []>} : vector<4x16xbf16>, vector<16x128xbf16>, vector<4x128xf32> -> vector<4x128xf32>
    %20 = arith.addf %15, %19 : vector<4x128xf32>
    %c1_i32_12 = arith.constant 1 : i32
    %21 = arith.addi %1, %c1_i32_12 : i32
    %c0_13 = arith.constant 0 : index
    %22 = arith.index_cast %21 : i32 to index
    %c0_14 = arith.constant 0 : index
    %c0_15 = arith.constant 0 : index
    %23 = vector.load %arg2[%c0_13, %22, %c0_14, %c0_15] : memref<1x6x6x128xbf16, #tpu.memory_space<vmem>>, vector<1x1x6x128xbf16>
    %24 = vector.shape_cast %23 : vector<1x1x6x128xbf16> to vector<6x128xbf16>
    %25 = vector.extract_strided_slice %24 {offsets = [0, 0], sizes = [4, 16], strides = [1, 1]} : vector<6x128xbf16> to vector<4x16xbf16>
    %c3 = arith.constant 3 : index
    %c0_16 = arith.constant 0 : index
    %c0_17 = arith.constant 0 : index
    %26 = vector.load %arg3[%c3, %c0_16, %c0_17] : memref<9x16x128xbf16, #tpu.memory_space<vmem>>, vector<1x16x128xbf16>
    %27 = vector.shape_cast %26 : vector<1x16x128xbf16> to vector<16x128xbf16>
    %cst_18 = arith.constant dense<0.000000e+00> : vector<4x128xf32>
    %28 = tpu.matmul %25, %27, %cst_18 {dimension_numbers = #tpu.dot_dimension_numbers<[1], [0], [0], [1], [0, 0, 1, 1], [], []>} : vector<4x16xbf16>, vector<16x128xbf16>, vector<4x128xf32> -> vector<4x128xf32>
    %29 = arith.addf %20, %28 : vector<4x128xf32>
    %30 = vector.extract_strided_slice %24 {offsets = [1, 0], sizes = [4, 16], strides = [1, 1]} : vector<6x128xbf16> to vector<4x16xbf16>
    %c4 = arith.constant 4 : index
    %c0_19 = arith.constant 0 : index
    %c0_20 = arith.constant 0 : index
    %31 = vector.load %arg3[%c4, %c0_19, %c0_20] : memref<9x16x128xbf16, #tpu.memory_space<vmem>>, vector<1x16x128xbf16>
    %32 = vector.shape_cast %31 : vector<1x16x128xbf16> to vector<16x128xbf16>
    %cst_21 = arith.constant dense<0.000000e+00> : vector<4x128xf32>
    %33 = tpu.matmul %30, %32, %cst_21 {dimension_numbers = #tpu.dot_dimension_numbers<[1], [0], [0], [1], [0, 0, 1, 1], [], []>} : vector<4x16xbf16>, vector<16x128xbf16>, vector<4x128xf32> -> vector<4x128xf32>
    %34 = arith.addf %29, %33 : vector<4x128xf32>
    %35 = vector.extract_strided_slice %24 {offsets = [2, 0], sizes = [4, 16], strides = [1, 1]} : vector<6x128xbf16> to vector<4x16xbf16>
    %c5 = arith.constant 5 : index
    %c0_22 = arith.constant 0 : index
    %c0_23 = arith.constant 0 : index
    %36 = vector.load %arg3[%c5, %c0_22, %c0_23] : memref<9x16x128xbf16, #tpu.memory_space<vmem>>, vector<1x16x128xbf16>
    %37 = vector.shape_cast %36 : vector<1x16x128xbf16> to vector<16x128xbf16>
    %cst_24 = arith.constant dense<0.000000e+00> : vector<4x128xf32>
    %38 = tpu.matmul %35, %37, %cst_24 {dimension_numbers = #tpu.dot_dimension_numbers<[1], [0], [0], [1], [0, 0, 1, 1], [], []>} : vector<4x16xbf16>, vector<16x128xbf16>, vector<4x128xf32> -> vector<4x128xf32>
    %39 = arith.addf %34, %38 : vector<4x128xf32>
    %c2_i32 = arith.constant 2 : i32
    %40 = arith.addi %1, %c2_i32 : i32
    %c0_25 = arith.constant 0 : index
    %41 = arith.index_cast %40 : i32 to index
    %c0_26 = arith.constant 0 : index
    %c0_27 = arith.constant 0 : index
    %42 = vector.load %arg2[%c0_25, %41, %c0_26, %c0_27] : memref<1x6x6x128xbf16, #tpu.memory_space<vmem>>, vector<1x1x6x128xbf16>
    %43 = vector.shape_cast %42 : vector<1x1x6x128xbf16> to vector<6x128xbf16>
    %44 = vector.extract_strided_slice %43 {offsets = [0, 0], sizes = [4, 16], strides = [1, 1]} : vector<6x128xbf16> to vector<4x16xbf16>
    %c6 = arith.constant 6 : index
    %c0_28 = arith.constant 0 : index
    %c0_29 = arith.constant 0 : index
    %45 = vector.load %arg3[%c6, %c0_28, %c0_29] : memref<9x16x128xbf16, #tpu.memory_space<vmem>>, vector<1x16x128xbf16>
    %46 = vector.shape_cast %45 : vector<1x16x128xbf16> to vector<16x128xbf16>
    %cst_30 = arith.constant dense<0.000000e+00> : vector<4x128xf32>
    %47 = tpu.matmul %44, %46, %cst_30 {dimension_numbers = #tpu.dot_dimension_numbers<[1], [0], [0], [1], [0, 0, 1, 1], [], []>} : vector<4x16xbf16>, vector<16x128xbf16>, vector<4x128xf32> -> vector<4x128xf32>
    %48 = arith.addf %39, %47 : vector<4x128xf32>
    %49 = vector.extract_strided_slice %43 {offsets = [1, 0], sizes = [4, 16], strides = [1, 1]} : vector<6x128xbf16> to vector<4x16xbf16>
    %c7 = arith.constant 7 : index
    %c0_31 = arith.constant 0 : index
    %c0_32 = arith.constant 0 : index
    %50 = vector.load %arg3[%c7, %c0_31, %c0_32] : memref<9x16x128xbf16, #tpu.memory_space<vmem>>, vector<1x16x128xbf16>
    %51 = vector.shape_cast %50 : vector<1x16x128xbf16> to vector<16x128xbf16>
    %cst_33 = arith.constant dense<0.000000e+00> : vector<4x128xf32>
    %52 = tpu.matmul %49, %51, %cst_33 {dimension_numbers = #tpu.dot_dimension_numbers<[1], [0], [0], [1], [0, 0, 1, 1], [], []>} : vector<4x16xbf16>, vector<16x128xbf16>, vector<4x128xf32> -> vector<4x128xf32>
    %53 = arith.addf %48, %52 : vector<4x128xf32>
    %54 = vector.extract_strided_slice %43 {offsets = [2, 0], sizes = [4, 16], strides = [1, 1]} : vector<6x128xbf16> to vector<4x16xbf16>
    %c8 = arith.constant 8 : index
    %c0_34 = arith.constant 0 : index
    %c0_35 = arith.constant 0 : index
    %55 = vector.load %arg3[%c8, %c0_34, %c0_35] : memref<9x16x128xbf16, #tpu.memory_space<vmem>>, vector<1x16x128xbf16>
    %56 = vector.shape_cast %55 : vector<1x16x128xbf16> to vector<16x128xbf16>
    %cst_36 = arith.constant dense<0.000000e+00> : vector<4x128xf32>
    %57 = tpu.matmul %54, %56, %cst_36 {dimension_numbers = #tpu.dot_dimension_numbers<[1], [0], [0], [1], [0, 0, 1, 1], [], []>} : vector<4x16xbf16>, vector<16x128xbf16>, vector<4x128xf32> -> vector<4x128xf32>
    %58 = arith.addf %53, %57 : vector<4x128xf32>
    %c1_i32_37 = arith.constant 1 : i32
    %59 = arith.muli %arg1, %c1_i32_37 : i32
    %c0_i32_38 = arith.constant 0 : i32
    %60 = arith.addi %59, %c0_i32_38 : i32
    %c0_39 = arith.constant 0 : index
    %61 = arith.index_cast %60 : i32 to index
    %c0_40 = arith.constant 0 : index
    %c0_41 = arith.constant 0 : index
    %62 = vector.load %arg4[%c0_39, %61, %c0_40, %c0_41] : memref<1x4x4x128xbf16, #tpu.memory_space<vmem>>, vector<1x1x4x128xbf16>
    %63 = vector.shape_cast %62 : vector<1x1x4x128xbf16> to vector<4x128xbf16>
    %64 = vector.extract_strided_slice %63 {offsets = [0, 0], sizes = [4, 64], strides = [1, 1]} : vector<4x128xbf16> to vector<4x64xbf16>
    %c0_42 = arith.constant 0 : index
    %c0_43 = arith.constant 0 : index
    %c0_44 = arith.constant 0 : index
    %65 = vector.load %arg5[%c0_42, %c0_43, %c0_44] : memref<1x64x128xbf16, #tpu.memory_space<vmem>>, vector<1x64x128xbf16>
    %66 = vector.shape_cast %65 : vector<1x64x128xbf16> to vector<64x128xbf16>
    %cst_45 = arith.constant dense<0.000000e+00> : vector<4x128xf32>
    %67 = tpu.matmul %64, %66, %cst_45 {dimension_numbers = #tpu.dot_dimension_numbers<[1], [0], [0], [1], [0, 0, 1, 1], [], []>} : vector<4x64xbf16>, vector<64x128xbf16>, vector<4x128xf32> -> vector<4x128xf32>
    %68 = arith.addf %58, %67 : vector<4x128xf32>
    %c0_46 = arith.constant 0 : index
    %c0_47 = arith.constant 0 : index
    %69 = vector.load %arg6[%c0_46, %c0_47] : memref<1x128xf32, #tpu.memory_space<vmem>>, vector<1x128xf32>
    %70 = vector.broadcast %69 : vector<1x128xf32> to vector<4x128xf32>
    %71 = arith.addf %68, %70 : vector<4x128xf32>
    %cst_48 = arith.constant 0.000000e+00 : f32
    %72 = vector.broadcast %cst_48 : f32 to vector<4x128xf32>
    %73 = arith.maximumf %71, %72 : vector<4x128xf32>
    %74 = arith.truncf %73 : vector<4x128xf32> to vector<4x128xbf16>
    %c0_49 = arith.constant 0 : index
    %c0_50 = arith.constant 0 : index
    %c0_51 = arith.constant 0 : index
    %c0_52 = arith.constant 0 : index
    %75 = vector.load %arg7[%c0_49, %c0_50, %c0_51, %c0_52] : memref<1x1x4x128xbf16, #tpu.memory_space<vmem>>, vector<1x1x4x128xbf16>
    %76 = vector.shape_cast %75 : vector<1x1x4x128xbf16> to vector<4x128xbf16>
    %77 = vector.shape_cast %74 : vector<4x128xbf16> to vector<1x1x4x128xbf16>
    tpu.vector_store %arg7[%c0_49, %c0_50, %c0_51, %c0_52], %77 {strides = array<i32>} : memref<1x1x4x128xbf16, #tpu.memory_space<vmem>>, vector<1x1x4x128xbf16>,
    return
  }
  func.func @transform_0(%arg0: i32, %arg1: i32) -> (i32, i32, i32, i32) {
    %c0_i32 = arith.constant 0 : i32
    %c0_i32_0 = arith.constant 0 : i32
    %c0_i32_1 = arith.constant 0 : i32
    %c0_i32_2 = arith.constant 0 : i32
    return %arg0, %c0_i32, %c0_i32_0, %c0_i32_1 : i32, i32, i32, i32
  }
  func.func @transform_1(%arg0: i32, %arg1: i32) -> (i32, i32, i32) {
    %c0_i32 = arith.constant 0 : i32
    %c0_i32_0 = arith.constant 0 : i32
    %c0_i32_1 = arith.constant 0 : i32
    %c0_i32_2 = arith.constant 0 : i32
    return %c0_i32, %c0_i32_0, %c0_i32_1 : i32, i32, i32
  }
  func.func @transform_2(%arg0: i32, %arg1: i32) -> (i32, i32, i32, i32) {
    %c0_i32 = arith.constant 0 : i32
    %c0_i32_0 = arith.constant 0 : i32
    %c0_i32_1 = arith.constant 0 : i32
    %c0_i32_2 = arith.constant 0 : i32
    return %arg0, %c0_i32, %c0_i32_0, %c0_i32_1 : i32, i32, i32, i32
  }
  func.func @transform_3(%arg0: i32, %arg1: i32) -> (i32, i32, i32) {
    %c0_i32 = arith.constant 0 : i32
    %c0_i32_0 = arith.constant 0 : i32
    %c0_i32_1 = arith.constant 0 : i32
    %c0_i32_2 = arith.constant 0 : i32
    return %c0_i32, %c0_i32_0, %c0_i32_1 : i32, i32, i32
  }
  func.func @transform_4(%arg0: i32, %arg1: i32) -> (i32, i32) {
    %c0_i32 = arith.constant 0 : i32
    %c0_i32_0 = arith.constant 0 : i32
    %c0_i32_1 = arith.constant 0 : i32
    return %c0_i32, %c0_i32_0 : i32, i32
  }
  func.func @transform_5(%arg0: i32, %arg1: i32) -> (i32, i32, i32, i32) {
    %c0_i32 = arith.constant 0 : i32
    %c0_i32_0 = arith.constant 0 : i32
    %c0_i32_1 = arith.constant 0 : i32
    return %arg0, %arg1, %c0_i32, %c0_i32_0 : i32, i32, i32, i32
  }
}

module attributes {stable_mosaic.version = 11 : i64} {
  func.func @kernel(%arg0: i32, %arg1: i32, %arg2: memref<1x6x3x256xbf16, #tpu.memory_space<vmem>>, %arg3: memref<9x16x128xbf16, #tpu.memory_space<vmem>>, %arg4: memref<1x128xf32, #tpu.memory_space<vmem>>, %arg5: memref<1x1x2x128xbf16, #tpu.memory_space<vmem>>) attributes {dimension_semantics = [#tpu.dimension_semantics<parallel>, #tpu.dimension_semantics<arbitrary>], iteration_bounds = array<i64: 2, 2>, scalar_prefetch = 0 : i64, scratch_operands = 0 : i64, tpu.core_type = #tpu.core_type<tc>, window_params = [{transform_indices = @transform_0, window_bounds = array<i64: 1, 6, 3, 256>}, {pipeline_mode = #tpu.pipeline_mode<synchronous>, transform_indices = @transform_1, window_bounds = array<i64: 9, 16, 128>}, {pipeline_mode = #tpu.pipeline_mode<synchronous>, transform_indices = @transform_2, window_bounds = array<i64: 1, 128>}, {transform_indices = @transform_3, window_bounds = array<i64: 1, 1, 2, 128>}]} {
    %cst = arith.constant 0.000000e+00 : f32
    %0 = vector.broadcast %cst : f32 to vector<2x128xf32>
    %c2_i32 = arith.constant 2 : i32
    %1 = arith.muli %arg1, %c2_i32 : i32
    %c0_i32 = arith.constant 0 : i32
    %2 = arith.addi %1, %c0_i32 : i32
    %c0 = arith.constant 0 : index
    %3 = arith.index_cast %2 : i32 to index
    %c0_0 = arith.constant 0 : index
    %c0_1 = arith.constant 0 : index
    %4 = vector.load %arg2[%c0, %3, %c0_0, %c0_1] : memref<1x6x3x256xbf16, #tpu.memory_space<vmem>>, vector<1x1x3x256xbf16>
    %5 = vector.shape_cast %4 : vector<1x1x3x256xbf16> to vector<3x256xbf16>
    %6 = vector.extract_strided_slice %5 {offsets = [0, 0], sizes = [2, 16], strides = [1, 1]} : vector<3x256xbf16> to vector<2x16xbf16>
    %c0_2 = arith.constant 0 : index
    %c0_3 = arith.constant 0 : index
    %c0_4 = arith.constant 0 : index
    %7 = vector.load %arg3[%c0_2, %c0_3, %c0_4] : memref<9x16x128xbf16, #tpu.memory_space<vmem>>, vector<1x16x128xbf16>
    %8 = vector.shape_cast %7 : vector<1x16x128xbf16> to vector<16x128xbf16>
    %cst_5 = arith.constant dense<0.000000e+00> : vector<2x128xf32>
    %9 = tpu.matmul %6, %8, %cst_5 {dimension_numbers = #tpu.dot_dimension_numbers<[1], [0], [0], [1], [0, 0, 1, 1], [], []>} : vector<2x16xbf16>, vector<16x128xbf16>, vector<2x128xf32> -> vector<2x128xf32>
    %10 = arith.addf %0, %9 : vector<2x128xf32>
    %11 = vector.extract_strided_slice %5 {offsets = [0, 128], sizes = [2, 16], strides = [1, 1]} : vector<3x256xbf16> to vector<2x16xbf16>
    %c1 = arith.constant 1 : index
    %c0_6 = arith.constant 0 : index
    %c0_7 = arith.constant 0 : index
    %12 = vector.load %arg3[%c1, %c0_6, %c0_7] : memref<9x16x128xbf16, #tpu.memory_space<vmem>>, vector<1x16x128xbf16>
    %13 = vector.shape_cast %12 : vector<1x16x128xbf16> to vector<16x128xbf16>
    %cst_8 = arith.constant dense<0.000000e+00> : vector<2x128xf32>
    %14 = tpu.matmul %11, %13, %cst_8 {dimension_numbers = #tpu.dot_dimension_numbers<[1], [0], [0], [1], [0, 0, 1, 1], [], []>} : vector<2x16xbf16>, vector<16x128xbf16>, vector<2x128xf32> -> vector<2x128xf32>
    %15 = arith.addf %10, %14 : vector<2x128xf32>
    %16 = vector.extract_strided_slice %5 {offsets = [1, 0], sizes = [2, 16], strides = [1, 1]} : vector<3x256xbf16> to vector<2x16xbf16>
    %c2 = arith.constant 2 : index
    %c0_9 = arith.constant 0 : index
    %c0_10 = arith.constant 0 : index
    %17 = vector.load %arg3[%c2, %c0_9, %c0_10] : memref<9x16x128xbf16, #tpu.memory_space<vmem>>, vector<1x16x128xbf16>
    %18 = vector.shape_cast %17 : vector<1x16x128xbf16> to vector<16x128xbf16>
    %cst_11 = arith.constant dense<0.000000e+00> : vector<2x128xf32>
    %19 = tpu.matmul %16, %18, %cst_11 {dimension_numbers = #tpu.dot_dimension_numbers<[1], [0], [0], [1], [0, 0, 1, 1], [], []>} : vector<2x16xbf16>, vector<16x128xbf16>, vector<2x128xf32> -> vector<2x128xf32>
    %20 = arith.addf %15, %19 : vector<2x128xf32>
    %c1_i32 = arith.constant 1 : i32
    %21 = arith.addi %1, %c1_i32 : i32
    %c0_12 = arith.constant 0 : index
    %22 = arith.index_cast %21 : i32 to index
    %c0_13 = arith.constant 0 : index
    %c0_14 = arith.constant 0 : index
    %23 = vector.load %arg2[%c0_12, %22, %c0_13, %c0_14] : memref<1x6x3x256xbf16, #tpu.memory_space<vmem>>, vector<1x1x3x256xbf16>
    %24 = vector.shape_cast %23 : vector<1x1x3x256xbf16> to vector<3x256xbf16>
    %25 = vector.extract_strided_slice %24 {offsets = [0, 0], sizes = [2, 16], strides = [1, 1]} : vector<3x256xbf16> to vector<2x16xbf16>
    %c3 = arith.constant 3 : index
    %c0_15 = arith.constant 0 : index
    %c0_16 = arith.constant 0 : index
    %26 = vector.load %arg3[%c3, %c0_15, %c0_16] : memref<9x16x128xbf16, #tpu.memory_space<vmem>>, vector<1x16x128xbf16>
    %27 = vector.shape_cast %26 : vector<1x16x128xbf16> to vector<16x128xbf16>
    %cst_17 = arith.constant dense<0.000000e+00> : vector<2x128xf32>
    %28 = tpu.matmul %25, %27, %cst_17 {dimension_numbers = #tpu.dot_dimension_numbers<[1], [0], [0], [1], [0, 0, 1, 1], [], []>} : vector<2x16xbf16>, vector<16x128xbf16>, vector<2x128xf32> -> vector<2x128xf32>
    %29 = arith.addf %20, %28 : vector<2x128xf32>
    %30 = vector.extract_strided_slice %24 {offsets = [0, 128], sizes = [2, 16], strides = [1, 1]} : vector<3x256xbf16> to vector<2x16xbf16>
    %c4 = arith.constant 4 : index
    %c0_18 = arith.constant 0 : index
    %c0_19 = arith.constant 0 : index
    %31 = vector.load %arg3[%c4, %c0_18, %c0_19] : memref<9x16x128xbf16, #tpu.memory_space<vmem>>, vector<1x16x128xbf16>
    %32 = vector.shape_cast %31 : vector<1x16x128xbf16> to vector<16x128xbf16>
    %cst_20 = arith.constant dense<0.000000e+00> : vector<2x128xf32>
    %33 = tpu.matmul %30, %32, %cst_20 {dimension_numbers = #tpu.dot_dimension_numbers<[1], [0], [0], [1], [0, 0, 1, 1], [], []>} : vector<2x16xbf16>, vector<16x128xbf16>, vector<2x128xf32> -> vector<2x128xf32>
    %34 = arith.addf %29, %33 : vector<2x128xf32>
    %35 = vector.extract_strided_slice %24 {offsets = [1, 0], sizes = [2, 16], strides = [1, 1]} : vector<3x256xbf16> to vector<2x16xbf16>
    %c5 = arith.constant 5 : index
    %c0_21 = arith.constant 0 : index
    %c0_22 = arith.constant 0 : index
    %36 = vector.load %arg3[%c5, %c0_21, %c0_22] : memref<9x16x128xbf16, #tpu.memory_space<vmem>>, vector<1x16x128xbf16>
    %37 = vector.shape_cast %36 : vector<1x16x128xbf16> to vector<16x128xbf16>
    %cst_23 = arith.constant dense<0.000000e+00> : vector<2x128xf32>
    %38 = tpu.matmul %35, %37, %cst_23 {dimension_numbers = #tpu.dot_dimension_numbers<[1], [0], [0], [1], [0, 0, 1, 1], [], []>} : vector<2x16xbf16>, vector<16x128xbf16>, vector<2x128xf32> -> vector<2x128xf32>
    %39 = arith.addf %34, %38 : vector<2x128xf32>
    %c2_i32_24 = arith.constant 2 : i32
    %40 = arith.addi %1, %c2_i32_24 : i32
    %c0_25 = arith.constant 0 : index
    %41 = arith.index_cast %40 : i32 to index
    %c0_26 = arith.constant 0 : index
    %c0_27 = arith.constant 0 : index
    %42 = vector.load %arg2[%c0_25, %41, %c0_26, %c0_27] : memref<1x6x3x256xbf16, #tpu.memory_space<vmem>>, vector<1x1x3x256xbf16>
    %43 = vector.shape_cast %42 : vector<1x1x3x256xbf16> to vector<3x256xbf16>
    %44 = vector.extract_strided_slice %43 {offsets = [0, 0], sizes = [2, 16], strides = [1, 1]} : vector<3x256xbf16> to vector<2x16xbf16>
    %c6 = arith.constant 6 : index
    %c0_28 = arith.constant 0 : index
    %c0_29 = arith.constant 0 : index
    %45 = vector.load %arg3[%c6, %c0_28, %c0_29] : memref<9x16x128xbf16, #tpu.memory_space<vmem>>, vector<1x16x128xbf16>
    %46 = vector.shape_cast %45 : vector<1x16x128xbf16> to vector<16x128xbf16>
    %cst_30 = arith.constant dense<0.000000e+00> : vector<2x128xf32>
    %47 = tpu.matmul %44, %46, %cst_30 {dimension_numbers = #tpu.dot_dimension_numbers<[1], [0], [0], [1], [0, 0, 1, 1], [], []>} : vector<2x16xbf16>, vector<16x128xbf16>, vector<2x128xf32> -> vector<2x128xf32>
    %48 = arith.addf %39, %47 : vector<2x128xf32>
    %49 = vector.extract_strided_slice %43 {offsets = [0, 128], sizes = [2, 16], strides = [1, 1]} : vector<3x256xbf16> to vector<2x16xbf16>
    %c7 = arith.constant 7 : index
    %c0_31 = arith.constant 0 : index
    %c0_32 = arith.constant 0 : index
    %50 = vector.load %arg3[%c7, %c0_31, %c0_32] : memref<9x16x128xbf16, #tpu.memory_space<vmem>>, vector<1x16x128xbf16>
    %51 = vector.shape_cast %50 : vector<1x16x128xbf16> to vector<16x128xbf16>
    %cst_33 = arith.constant dense<0.000000e+00> : vector<2x128xf32>
    %52 = tpu.matmul %49, %51, %cst_33 {dimension_numbers = #tpu.dot_dimension_numbers<[1], [0], [0], [1], [0, 0, 1, 1], [], []>} : vector<2x16xbf16>, vector<16x128xbf16>, vector<2x128xf32> -> vector<2x128xf32>
    %53 = arith.addf %48, %52 : vector<2x128xf32>
    %54 = vector.extract_strided_slice %43 {offsets = [1, 0], sizes = [2, 16], strides = [1, 1]} : vector<3x256xbf16> to vector<2x16xbf16>
    %c8 = arith.constant 8 : index
    %c0_34 = arith.constant 0 : index
    %c0_35 = arith.constant 0 : index
    %55 = vector.load %arg3[%c8, %c0_34, %c0_35] : memref<9x16x128xbf16, #tpu.memory_space<vmem>>, vector<1x16x128xbf16>
    %56 = vector.shape_cast %55 : vector<1x16x128xbf16> to vector<16x128xbf16>
    %cst_36 = arith.constant dense<0.000000e+00> : vector<2x128xf32>
    %57 = tpu.matmul %54, %56, %cst_36 {dimension_numbers = #tpu.dot_dimension_numbers<[1], [0], [0], [1], [0, 0, 1, 1], [], []>} : vector<2x16xbf16>, vector<16x128xbf16>, vector<2x128xf32> -> vector<2x128xf32>
    %58 = arith.addf %53, %57 : vector<2x128xf32>
    %c0_37 = arith.constant 0 : index
    %c0_38 = arith.constant 0 : index
    %59 = vector.load %arg4[%c0_37, %c0_38] : memref<1x128xf32, #tpu.memory_space<vmem>>, vector<1x128xf32>
    %60 = vector.broadcast %59 : vector<1x128xf32> to vector<2x128xf32>
    %61 = arith.addf %58, %60 : vector<2x128xf32>
    %cst_39 = arith.constant 0.000000e+00 : f32
    %62 = vector.broadcast %cst_39 : f32 to vector<2x128xf32>
    %63 = arith.maximumf %61, %62 : vector<2x128xf32>
    %64 = arith.truncf %63 : vector<2x128xf32> to vector<2x128xbf16>
    %c0_40 = arith.constant 0 : index
    %c0_41 = arith.constant 0 : index
    %c0_42 = arith.constant 0 : index
    %c0_43 = arith.constant 0 : index
    %65 = vector.load %arg5[%c0_40, %c0_41, %c0_42, %c0_43] : memref<1x1x2x128xbf16, #tpu.memory_space<vmem>>, vector<1x1x2x128xbf16>
    %66 = vector.shape_cast %65 : vector<1x1x2x128xbf16> to vector<2x128xbf16>
    %67 = vector.shape_cast %64 : vector<2x128xbf16> to vector<1x1x2x128xbf16>
    tpu.vector_store %arg5[%c0_40, %c0_41, %c0_42, %c0_43], %67 {strides = array<i32>} : memref<1x1x2x128xbf16, #tpu.memory_space<vmem>>, vector<1x1x2x128xbf16>,
    return
  }
  func.func @transform_0(%arg0: i32, %arg1: i32) -> (i32, i32, i32, i32) {
    %c0_i32 = arith.constant 0 : i32
    %c0_i32_0 = arith.constant 0 : i32
    %c0_i32_1 = arith.constant 0 : i32
    %c0_i32_2 = arith.constant 0 : i32
    return %arg0, %c0_i32, %c0_i32_0, %c0_i32_1 : i32, i32, i32, i32
  }
  func.func @transform_1(%arg0: i32, %arg1: i32) -> (i32, i32, i32) {
    %c0_i32 = arith.constant 0 : i32
    %c0_i32_0 = arith.constant 0 : i32
    %c0_i32_1 = arith.constant 0 : i32
    %c0_i32_2 = arith.constant 0 : i32
    return %c0_i32, %c0_i32_0, %c0_i32_1 : i32, i32, i32
  }
  func.func @transform_2(%arg0: i32, %arg1: i32) -> (i32, i32) {
    %c0_i32 = arith.constant 0 : i32
    %c0_i32_0 = arith.constant 0 : i32
    %c0_i32_1 = arith.constant 0 : i32
    return %c0_i32, %c0_i32_0 : i32, i32
  }
  func.func @transform_3(%arg0: i32, %arg1: i32) -> (i32, i32, i32, i32) {
    %c0_i32 = arith.constant 0 : i32
    %c0_i32_0 = arith.constant 0 : i32
    %c0_i32_1 = arith.constant 0 : i32
    return %arg0, %arg1, %c0_i32, %c0_i32_0 : i32, i32, i32, i32
  }
}

module attributes {stable_mosaic.version = 11 : i64} {
  func.func @kernel(%arg0: i32, %arg1: i32, %arg2: memref<1x4x4x128xbf16, #tpu.memory_space<vmem>>, %arg3: memref<9x32x128xbf16, #tpu.memory_space<vmem>>, %arg4: memref<1x4x2x256xbf16, #tpu.memory_space<vmem>>, %arg5: memref<1x16x128xbf16, #tpu.memory_space<vmem>>, %arg6: memref<1x128xf32, #tpu.memory_space<vmem>>, %arg7: memref<1x1x2x128xbf16, #tpu.memory_space<vmem>>) attributes {dimension_semantics = [#tpu.dimension_semantics<parallel>, #tpu.dimension_semantics<arbitrary>], iteration_bounds = array<i64: 2, 2>, scalar_prefetch = 0 : i64, scratch_operands = 0 : i64, tpu.core_type = #tpu.core_type<tc>, window_params = [{transform_indices = @transform_0, window_bounds = array<i64: 1, 4, 4, 128>}, {pipeline_mode = #tpu.pipeline_mode<synchronous>, transform_indices = @transform_1, window_bounds = array<i64: 9, 32, 128>}, {transform_indices = @transform_2, window_bounds = array<i64: 1, 4, 2, 256>}, {pipeline_mode = #tpu.pipeline_mode<synchronous>, transform_indices = @transform_3, window_bounds = array<i64: 1, 16, 128>}, {pipeline_mode = #tpu.pipeline_mode<synchronous>, transform_indices = @transform_4, window_bounds = array<i64: 1, 128>}, {transform_indices = @transform_5, window_bounds = array<i64: 1, 1, 2, 128>}]} {
    %cst = arith.constant 0.000000e+00 : f32
    %0 = vector.broadcast %cst : f32 to vector<2x128xf32>
    %c1_i32 = arith.constant 1 : i32
    %1 = arith.muli %arg1, %c1_i32 : i32
    %c0_i32 = arith.constant 0 : i32
    %2 = arith.addi %1, %c0_i32 : i32
    %c0 = arith.constant 0 : index
    %3 = arith.index_cast %2 : i32 to index
    %c0_0 = arith.constant 0 : index
    %c0_1 = arith.constant 0 : index
    %4 = vector.load %arg2[%c0, %3, %c0_0, %c0_1] : memref<1x4x4x128xbf16, #tpu.memory_space<vmem>>, vector<1x1x4x128xbf16>
    %5 = vector.shape_cast %4 : vector<1x1x4x128xbf16> to vector<4x128xbf16>
    %6 = vector.extract_strided_slice %5 {offsets = [0, 0], sizes = [2, 32], strides = [1, 1]} : vector<4x128xbf16> to vector<2x32xbf16>
    %c0_2 = arith.constant 0 : index
    %c0_3 = arith.constant 0 : index
    %c0_4 = arith.constant 0 : index
    %7 = vector.load %arg3[%c0_2, %c0_3, %c0_4] : memref<9x32x128xbf16, #tpu.memory_space<vmem>>, vector<1x32x128xbf16>
    %8 = vector.shape_cast %7 : vector<1x32x128xbf16> to vector<32x128xbf16>
    %cst_5 = arith.constant dense<0.000000e+00> : vector<2x128xf32>
    %9 = tpu.matmul %6, %8, %cst_5 {dimension_numbers = #tpu.dot_dimension_numbers<[1], [0], [0], [1], [0, 0, 1, 1], [], []>} : vector<2x32xbf16>, vector<32x128xbf16>, vector<2x128xf32> -> vector<2x128xf32>
    %10 = arith.addf %0, %9 : vector<2x128xf32>
    %11 = vector.extract_strided_slice %5 {offsets = [1, 0], sizes = [2, 32], strides = [1, 1]} : vector<4x128xbf16> to vector<2x32xbf16>
    %c1 = arith.constant 1 : index
    %c0_6 = arith.constant 0 : index
    %c0_7 = arith.constant 0 : index
    %12 = vector.load %arg3[%c1, %c0_6, %c0_7] : memref<9x32x128xbf16, #tpu.memory_space<vmem>>, vector<1x32x128xbf16>
    %13 = vector.shape_cast %12 : vector<1x32x128xbf16> to vector<32x128xbf16>
    %cst_8 = arith.constant dense<0.000000e+00> : vector<2x128xf32>
    %14 = tpu.matmul %11, %13, %cst_8 {dimension_numbers = #tpu.dot_dimension_numbers<[1], [0], [0], [1], [0, 0, 1, 1], [], []>} : vector<2x32xbf16>, vector<32x128xbf16>, vector<2x128xf32> -> vector<2x128xf32>
    %15 = arith.addf %10, %14 : vector<2x128xf32>
    %16 = vector.extract_strided_slice %5 {offsets = [2, 0], sizes = [2, 32], strides = [1, 1]} : vector<4x128xbf16> to vector<2x32xbf16>
    %c2 = arith.constant 2 : index
    %c0_9 = arith.constant 0 : index
    %c0_10 = arith.constant 0 : index
    %17 = vector.load %arg3[%c2, %c0_9, %c0_10] : memref<9x32x128xbf16, #tpu.memory_space<vmem>>, vector<1x32x128xbf16>
    %18 = vector.shape_cast %17 : vector<1x32x128xbf16> to vector<32x128xbf16>
    %cst_11 = arith.constant dense<0.000000e+00> : vector<2x128xf32>
    %19 = tpu.matmul %16, %18, %cst_11 {dimension_numbers = #tpu.dot_dimension_numbers<[1], [0], [0], [1], [0, 0, 1, 1], [], []>} : vector<2x32xbf16>, vector<32x128xbf16>, vector<2x128xf32> -> vector<2x128xf32>
    %20 = arith.addf %15, %19 : vector<2x128xf32>
    %c1_i32_12 = arith.constant 1 : i32
    %21 = arith.addi %1, %c1_i32_12 : i32
    %c0_13 = arith.constant 0 : index
    %22 = arith.index_cast %21 : i32 to index
    %c0_14 = arith.constant 0 : index
    %c0_15 = arith.constant 0 : index
    %23 = vector.load %arg2[%c0_13, %22, %c0_14, %c0_15] : memref<1x4x4x128xbf16, #tpu.memory_space<vmem>>, vector<1x1x4x128xbf16>
    %24 = vector.shape_cast %23 : vector<1x1x4x128xbf16> to vector<4x128xbf16>
    %25 = vector.extract_strided_slice %24 {offsets = [0, 0], sizes = [2, 32], strides = [1, 1]} : vector<4x128xbf16> to vector<2x32xbf16>
    %c3 = arith.constant 3 : index
    %c0_16 = arith.constant 0 : index
    %c0_17 = arith.constant 0 : index
    %26 = vector.load %arg3[%c3, %c0_16, %c0_17] : memref<9x32x128xbf16, #tpu.memory_space<vmem>>, vector<1x32x128xbf16>
    %27 = vector.shape_cast %26 : vector<1x32x128xbf16> to vector<32x128xbf16>
    %cst_18 = arith.constant dense<0.000000e+00> : vector<2x128xf32>
    %28 = tpu.matmul %25, %27, %cst_18 {dimension_numbers = #tpu.dot_dimension_numbers<[1], [0], [0], [1], [0, 0, 1, 1], [], []>} : vector<2x32xbf16>, vector<32x128xbf16>, vector<2x128xf32> -> vector<2x128xf32>
    %29 = arith.addf %20, %28 : vector<2x128xf32>
    %30 = vector.extract_strided_slice %24 {offsets = [1, 0], sizes = [2, 32], strides = [1, 1]} : vector<4x128xbf16> to vector<2x32xbf16>
    %c4 = arith.constant 4 : index
    %c0_19 = arith.constant 0 : index
    %c0_20 = arith.constant 0 : index
    %31 = vector.load %arg3[%c4, %c0_19, %c0_20] : memref<9x32x128xbf16, #tpu.memory_space<vmem>>, vector<1x32x128xbf16>
    %32 = vector.shape_cast %31 : vector<1x32x128xbf16> to vector<32x128xbf16>
    %cst_21 = arith.constant dense<0.000000e+00> : vector<2x128xf32>
    %33 = tpu.matmul %30, %32, %cst_21 {dimension_numbers = #tpu.dot_dimension_numbers<[1], [0], [0], [1], [0, 0, 1, 1], [], []>} : vector<2x32xbf16>, vector<32x128xbf16>, vector<2x128xf32> -> vector<2x128xf32>
    %34 = arith.addf %29, %33 : vector<2x128xf32>
    %35 = vector.extract_strided_slice %24 {offsets = [2, 0], sizes = [2, 32], strides = [1, 1]} : vector<4x128xbf16> to vector<2x32xbf16>
    %c5 = arith.constant 5 : index
    %c0_22 = arith.constant 0 : index
    %c0_23 = arith.constant 0 : index
    %36 = vector.load %arg3[%c5, %c0_22, %c0_23] : memref<9x32x128xbf16, #tpu.memory_space<vmem>>, vector<1x32x128xbf16>
    %37 = vector.shape_cast %36 : vector<1x32x128xbf16> to vector<32x128xbf16>
    %cst_24 = arith.constant dense<0.000000e+00> : vector<2x128xf32>
    %38 = tpu.matmul %35, %37, %cst_24 {dimension_numbers = #tpu.dot_dimension_numbers<[1], [0], [0], [1], [0, 0, 1, 1], [], []>} : vector<2x32xbf16>, vector<32x128xbf16>, vector<2x128xf32> -> vector<2x128xf32>
    %39 = arith.addf %34, %38 : vector<2x128xf32>
    %c2_i32 = arith.constant 2 : i32
    %40 = arith.addi %1, %c2_i32 : i32
    %c0_25 = arith.constant 0 : index
    %41 = arith.index_cast %40 : i32 to index
    %c0_26 = arith.constant 0 : index
    %c0_27 = arith.constant 0 : index
    %42 = vector.load %arg2[%c0_25, %41, %c0_26, %c0_27] : memref<1x4x4x128xbf16, #tpu.memory_space<vmem>>, vector<1x1x4x128xbf16>
    %43 = vector.shape_cast %42 : vector<1x1x4x128xbf16> to vector<4x128xbf16>
    %44 = vector.extract_strided_slice %43 {offsets = [0, 0], sizes = [2, 32], strides = [1, 1]} : vector<4x128xbf16> to vector<2x32xbf16>
    %c6 = arith.constant 6 : index
    %c0_28 = arith.constant 0 : index
    %c0_29 = arith.constant 0 : index
    %45 = vector.load %arg3[%c6, %c0_28, %c0_29] : memref<9x32x128xbf16, #tpu.memory_space<vmem>>, vector<1x32x128xbf16>
    %46 = vector.shape_cast %45 : vector<1x32x128xbf16> to vector<32x128xbf16>
    %cst_30 = arith.constant dense<0.000000e+00> : vector<2x128xf32>
    %47 = tpu.matmul %44, %46, %cst_30 {dimension_numbers = #tpu.dot_dimension_numbers<[1], [0], [0], [1], [0, 0, 1, 1], [], []>} : vector<2x32xbf16>, vector<32x128xbf16>, vector<2x128xf32> -> vector<2x128xf32>
    %48 = arith.addf %39, %47 : vector<2x128xf32>
    %49 = vector.extract_strided_slice %43 {offsets = [1, 0], sizes = [2, 32], strides = [1, 1]} : vector<4x128xbf16> to vector<2x32xbf16>
    %c7 = arith.constant 7 : index
    %c0_31 = arith.constant 0 : index
    %c0_32 = arith.constant 0 : index
    %50 = vector.load %arg3[%c7, %c0_31, %c0_32] : memref<9x32x128xbf16, #tpu.memory_space<vmem>>, vector<1x32x128xbf16>
    %51 = vector.shape_cast %50 : vector<1x32x128xbf16> to vector<32x128xbf16>
    %cst_33 = arith.constant dense<0.000000e+00> : vector<2x128xf32>
    %52 = tpu.matmul %49, %51, %cst_33 {dimension_numbers = #tpu.dot_dimension_numbers<[1], [0], [0], [1], [0, 0, 1, 1], [], []>} : vector<2x32xbf16>, vector<32x128xbf16>, vector<2x128xf32> -> vector<2x128xf32>
    %53 = arith.addf %48, %52 : vector<2x128xf32>
    %54 = vector.extract_strided_slice %43 {offsets = [2, 0], sizes = [2, 32], strides = [1, 1]} : vector<4x128xbf16> to vector<2x32xbf16>
    %c8 = arith.constant 8 : index
    %c0_34 = arith.constant 0 : index
    %c0_35 = arith.constant 0 : index
    %55 = vector.load %arg3[%c8, %c0_34, %c0_35] : memref<9x32x128xbf16, #tpu.memory_space<vmem>>, vector<1x32x128xbf16>
    %56 = vector.shape_cast %55 : vector<1x32x128xbf16> to vector<32x128xbf16>
    %cst_36 = arith.constant dense<0.000000e+00> : vector<2x128xf32>
    %57 = tpu.matmul %54, %56, %cst_36 {dimension_numbers = #tpu.dot_dimension_numbers<[1], [0], [0], [1], [0, 0, 1, 1], [], []>} : vector<2x32xbf16>, vector<32x128xbf16>, vector<2x128xf32> -> vector<2x128xf32>
    %58 = arith.addf %53, %57 : vector<2x128xf32>
    %c2_i32_37 = arith.constant 2 : i32
    %59 = arith.muli %arg1, %c2_i32_37 : i32
    %c0_i32_38 = arith.constant 0 : i32
    %60 = arith.addi %59, %c0_i32_38 : i32
    %c0_39 = arith.constant 0 : index
    %61 = arith.index_cast %60 : i32 to index
    %c0_40 = arith.constant 0 : index
    %c0_41 = arith.constant 0 : index
    %62 = vector.load %arg4[%c0_39, %61, %c0_40, %c0_41] : memref<1x4x2x256xbf16, #tpu.memory_space<vmem>>, vector<1x1x2x256xbf16>
    %63 = vector.shape_cast %62 : vector<1x1x2x256xbf16> to vector<2x256xbf16>
    %64 = vector.extract_strided_slice %63 {offsets = [0, 0], sizes = [2, 16], strides = [1, 1]} : vector<2x256xbf16> to vector<2x16xbf16>
    %c0_42 = arith.constant 0 : index
    %c0_43 = arith.constant 0 : index
    %c0_44 = arith.constant 0 : index
    %65 = vector.load %arg5[%c0_42, %c0_43, %c0_44] : memref<1x16x128xbf16, #tpu.memory_space<vmem>>, vector<1x16x128xbf16>
    %66 = vector.shape_cast %65 : vector<1x16x128xbf16> to vector<16x128xbf16>
    %cst_45 = arith.constant dense<0.000000e+00> : vector<2x128xf32>
    %67 = tpu.matmul %64, %66, %cst_45 {dimension_numbers = #tpu.dot_dimension_numbers<[1], [0], [0], [1], [0, 0, 1, 1], [], []>} : vector<2x16xbf16>, vector<16x128xbf16>, vector<2x128xf32> -> vector<2x128xf32>
    %68 = arith.addf %58, %67 : vector<2x128xf32>
    %c0_46 = arith.constant 0 : index
    %c0_47 = arith.constant 0 : index
    %69 = vector.load %arg6[%c0_46, %c0_47] : memref<1x128xf32, #tpu.memory_space<vmem>>, vector<1x128xf32>
    %70 = vector.broadcast %69 : vector<1x128xf32> to vector<2x128xf32>
    %71 = arith.addf %68, %70 : vector<2x128xf32>
    %cst_48 = arith.constant 0.000000e+00 : f32
    %72 = vector.broadcast %cst_48 : f32 to vector<2x128xf32>
    %73 = arith.maximumf %71, %72 : vector<2x128xf32>
    %74 = arith.truncf %73 : vector<2x128xf32> to vector<2x128xbf16>
    %c0_49 = arith.constant 0 : index
    %c0_50 = arith.constant 0 : index
    %c0_51 = arith.constant 0 : index
    %c0_52 = arith.constant 0 : index
    %75 = vector.load %arg7[%c0_49, %c0_50, %c0_51, %c0_52] : memref<1x1x2x128xbf16, #tpu.memory_space<vmem>>, vector<1x1x2x128xbf16>
    %76 = vector.shape_cast %75 : vector<1x1x2x128xbf16> to vector<2x128xbf16>
    %77 = vector.shape_cast %74 : vector<2x128xbf16> to vector<1x1x2x128xbf16>
    tpu.vector_store %arg7[%c0_49, %c0_50, %c0_51, %c0_52], %77 {strides = array<i32>} : memref<1x1x2x128xbf16, #tpu.memory_space<vmem>>, vector<1x1x2x128xbf16>,
    return
  }
  func.func @transform_0(%arg0: i32, %arg1: i32) -> (i32, i32, i32, i32) {
    %c0_i32 = arith.constant 0 : i32
    %c0_i32_0 = arith.constant 0 : i32
    %c0_i32_1 = arith.constant 0 : i32
    %c0_i32_2 = arith.constant 0 : i32
    return %arg0, %c0_i32, %c0_i32_0, %c0_i32_1 : i32, i32, i32, i32
  }
  func.func @transform_1(%arg0: i32, %arg1: i32) -> (i32, i32, i32) {
    %c0_i32 = arith.constant 0 : i32
    %c0_i32_0 = arith.constant 0 : i32
    %c0_i32_1 = arith.constant 0 : i32
    %c0_i32_2 = arith.constant 0 : i32
    return %c0_i32, %c0_i32_0, %c0_i32_1 : i32, i32, i32
  }
  func.func @transform_2(%arg0: i32, %arg1: i32) -> (i32, i32, i32, i32) {
    %c0_i32 = arith.constant 0 : i32
    %c0_i32_0 = arith.constant 0 : i32
    %c0_i32_1 = arith.constant 0 : i32
    %c0_i32_2 = arith.constant 0 : i32
    return %arg0, %c0_i32, %c0_i32_0, %c0_i32_1 : i32, i32, i32, i32
  }
  func.func @transform_3(%arg0: i32, %arg1: i32) -> (i32, i32, i32) {
    %c0_i32 = arith.constant 0 : i32
    %c0_i32_0 = arith.constant 0 : i32
    %c0_i32_1 = arith.constant 0 : i32
    %c0_i32_2 = arith.constant 0 : i32
    return %c0_i32, %c0_i32_0, %c0_i32_1 : i32, i32, i32
  }
  func.func @transform_4(%arg0: i32, %arg1: i32) -> (i32, i32) {
    %c0_i32 = arith.constant 0 : i32
    %c0_i32_0 = arith.constant 0 : i32
    %c0_i32_1 = arith.constant 0 : i32
    return %c0_i32, %c0_i32_0 : i32, i32
  }
  func.func @transform_5(%arg0: i32, %arg1: i32) -> (i32, i32, i32, i32) {
    %c0_i32 = arith.constant 0 : i32
    %c0_i32_0 = arith.constant 0 : i32
    %c0_i32_1 = arith.constant 0 : i32
    return %arg0, %arg1, %c0_i32, %c0_i32_0 : i32, i32, i32, i32
  }
}

module attributes {stable_mosaic.version = 11 : i64} {
  func.func @kernel(%arg0: i32, %arg1: i32, %arg2: memref<1x4x2x256xbf16, #tpu.memory_space<vmem>>, %arg3: memref<9x32x128xbf16, #tpu.memory_space<vmem>>, %arg4: memref<1x128xf32, #tpu.memory_space<vmem>>, %arg5: memref<1x1x1x128xbf16, #tpu.memory_space<vmem>>) attributes {dimension_semantics = [#tpu.dimension_semantics<parallel>, #tpu.dimension_semantics<arbitrary>], iteration_bounds = array<i64: 2, 1>, scalar_prefetch = 0 : i64, scratch_operands = 0 : i64, tpu.core_type = #tpu.core_type<tc>, window_params = [{transform_indices = @transform_0, window_bounds = array<i64: 1, 4, 2, 256>}, {pipeline_mode = #tpu.pipeline_mode<synchronous>, transform_indices = @transform_1, window_bounds = array<i64: 9, 32, 128>}, {pipeline_mode = #tpu.pipeline_mode<synchronous>, transform_indices = @transform_2, window_bounds = array<i64: 1, 128>}, {transform_indices = @transform_3, window_bounds = array<i64: 1, 1, 1, 128>}]} {
    %cst = arith.constant 0.000000e+00 : f32
    %0 = vector.broadcast %cst : f32 to vector<1x128xf32>
    %c2_i32 = arith.constant 2 : i32
    %1 = arith.muli %arg1, %c2_i32 : i32
    %c0_i32 = arith.constant 0 : i32
    %2 = arith.addi %1, %c0_i32 : i32
    %c0 = arith.constant 0 : index
    %3 = arith.index_cast %2 : i32 to index
    %c0_0 = arith.constant 0 : index
    %c0_1 = arith.constant 0 : index
    %4 = vector.load %arg2[%c0, %3, %c0_0, %c0_1] : memref<1x4x2x256xbf16, #tpu.memory_space<vmem>>, vector<1x1x2x256xbf16>
    %5 = vector.shape_cast %4 : vector<1x1x2x256xbf16> to vector<2x256xbf16>
    %6 = vector.extract_strided_slice %5 {offsets = [0, 0], sizes = [1, 32], strides = [1, 1]} : vector<2x256xbf16> to vector<1x32xbf16>
    %c0_2 = arith.constant 0 : index
    %c0_3 = arith.constant 0 : index
    %c0_4 = arith.constant 0 : index
    %7 = vector.load %arg3[%c0_2, %c0_3, %c0_4] : memref<9x32x128xbf16, #tpu.memory_space<vmem>>, vector<1x32x128xbf16>
    %8 = vector.shape_cast %7 : vector<1x32x128xbf16> to vector<32x128xbf16>
    %cst_5 = arith.constant dense<0.000000e+00> : vector<1x128xf32>
    %9 = tpu.matmul %6, %8, %cst_5 {dimension_numbers = #tpu.dot_dimension_numbers<[1], [0], [0], [1], [0, 0, 1, 1], [], []>} : vector<1x32xbf16>, vector<32x128xbf16>, vector<1x128xf32> -> vector<1x128xf32>
    %10 = arith.addf %0, %9 : vector<1x128xf32>
    %11 = vector.extract_strided_slice %5 {offsets = [0, 128], sizes = [1, 32], strides = [1, 1]} : vector<2x256xbf16> to vector<1x32xbf16>
    %c1 = arith.constant 1 : index
    %c0_6 = arith.constant 0 : index
    %c0_7 = arith.constant 0 : index
    %12 = vector.load %arg3[%c1, %c0_6, %c0_7] : memref<9x32x128xbf16, #tpu.memory_space<vmem>>, vector<1x32x128xbf16>
    %13 = vector.shape_cast %12 : vector<1x32x128xbf16> to vector<32x128xbf16>
    %cst_8 = arith.constant dense<0.000000e+00> : vector<1x128xf32>
    %14 = tpu.matmul %11, %13, %cst_8 {dimension_numbers = #tpu.dot_dimension_numbers<[1], [0], [0], [1], [0, 0, 1, 1], [], []>} : vector<1x32xbf16>, vector<32x128xbf16>, vector<1x128xf32> -> vector<1x128xf32>
    %15 = arith.addf %10, %14 : vector<1x128xf32>
    %16 = vector.extract_strided_slice %5 {offsets = [1, 0], sizes = [1, 32], strides = [1, 1]} : vector<2x256xbf16> to vector<1x32xbf16>
    %c2 = arith.constant 2 : index
    %c0_9 = arith.constant 0 : index
    %c0_10 = arith.constant 0 : index
    %17 = vector.load %arg3[%c2, %c0_9, %c0_10] : memref<9x32x128xbf16, #tpu.memory_space<vmem>>, vector<1x32x128xbf16>
    %18 = vector.shape_cast %17 : vector<1x32x128xbf16> to vector<32x128xbf16>
    %cst_11 = arith.constant dense<0.000000e+00> : vector<1x128xf32>
    %19 = tpu.matmul %16, %18, %cst_11 {dimension_numbers = #tpu.dot_dimension_numbers<[1], [0], [0], [1], [0, 0, 1, 1], [], []>} : vector<1x32xbf16>, vector<32x128xbf16>, vector<1x128xf32> -> vector<1x128xf32>
    %20 = arith.addf %15, %19 : vector<1x128xf32>
    %c1_i32 = arith.constant 1 : i32
    %21 = arith.addi %1, %c1_i32 : i32
    %c0_12 = arith.constant 0 : index
    %22 = arith.index_cast %21 : i32 to index
    %c0_13 = arith.constant 0 : index
    %c0_14 = arith.constant 0 : index
    %23 = vector.load %arg2[%c0_12, %22, %c0_13, %c0_14] : memref<1x4x2x256xbf16, #tpu.memory_space<vmem>>, vector<1x1x2x256xbf16>
    %24 = vector.shape_cast %23 : vector<1x1x2x256xbf16> to vector<2x256xbf16>
    %25 = vector.extract_strided_slice %24 {offsets = [0, 0], sizes = [1, 32], strides = [1, 1]} : vector<2x256xbf16> to vector<1x32xbf16>
    %c3 = arith.constant 3 : index
    %c0_15 = arith.constant 0 : index
    %c0_16 = arith.constant 0 : index
    %26 = vector.load %arg3[%c3, %c0_15, %c0_16] : memref<9x32x128xbf16, #tpu.memory_space<vmem>>, vector<1x32x128xbf16>
    %27 = vector.shape_cast %26 : vector<1x32x128xbf16> to vector<32x128xbf16>
    %cst_17 = arith.constant dense<0.000000e+00> : vector<1x128xf32>
    %28 = tpu.matmul %25, %27, %cst_17 {dimension_numbers = #tpu.dot_dimension_numbers<[1], [0], [0], [1], [0, 0, 1, 1], [], []>} : vector<1x32xbf16>, vector<32x128xbf16>, vector<1x128xf32> -> vector<1x128xf32>
    %29 = arith.addf %20, %28 : vector<1x128xf32>
    %30 = vector.extract_strided_slice %24 {offsets = [0, 128], sizes = [1, 32], strides = [1, 1]} : vector<2x256xbf16> to vector<1x32xbf16>
    %c4 = arith.constant 4 : index
    %c0_18 = arith.constant 0 : index
    %c0_19 = arith.constant 0 : index
    %31 = vector.load %arg3[%c4, %c0_18, %c0_19] : memref<9x32x128xbf16, #tpu.memory_space<vmem>>, vector<1x32x128xbf16>
    %32 = vector.shape_cast %31 : vector<1x32x128xbf16> to vector<32x128xbf16>
    %cst_20 = arith.constant dense<0.000000e+00> : vector<1x128xf32>
    %33 = tpu.matmul %30, %32, %cst_20 {dimension_numbers = #tpu.dot_dimension_numbers<[1], [0], [0], [1], [0, 0, 1, 1], [], []>} : vector<1x32xbf16>, vector<32x128xbf16>, vector<1x128xf32> -> vector<1x128xf32>
    %34 = arith.addf %29, %33 : vector<1x128xf32>
    %35 = vector.extract_strided_slice %24 {offsets = [1, 0], sizes = [1, 32], strides = [1, 1]} : vector<2x256xbf16> to vector<1x32xbf16>
    %c5 = arith.constant 5 : index
    %c0_21 = arith.constant 0 : index
    %c0_22 = arith.constant 0 : index
    %36 = vector.load %arg3[%c5, %c0_21, %c0_22] : memref<9x32x128xbf16, #tpu.memory_space<vmem>>, vector<1x32x128xbf16>
    %37 = vector.shape_cast %36 : vector<1x32x128xbf16> to vector<32x128xbf16>
    %cst_23 = arith.constant dense<0.000000e+00> : vector<1x128xf32>
    %38 = tpu.matmul %35, %37, %cst_23 {dimension_numbers = #tpu.dot_dimension_numbers<[1], [0], [0], [1], [0, 0, 1, 1], [], []>} : vector<1x32xbf16>, vector<32x128xbf16>, vector<1x128xf32> -> vector<1x128xf32>
    %39 = arith.addf %34, %38 : vector<1x128xf32>
    %c2_i32_24 = arith.constant 2 : i32
    %40 = arith.addi %1, %c2_i32_24 : i32
    %c0_25 = arith.constant 0 : index
    %41 = arith.index_cast %40 : i32 to index
    %c0_26 = arith.constant 0 : index
    %c0_27 = arith.constant 0 : index
    %42 = vector.load %arg2[%c0_25, %41, %c0_26, %c0_27] : memref<1x4x2x256xbf16, #tpu.memory_space<vmem>>, vector<1x1x2x256xbf16>
    %43 = vector.shape_cast %42 : vector<1x1x2x256xbf16> to vector<2x256xbf16>
    %44 = vector.extract_strided_slice %43 {offsets = [0, 0], sizes = [1, 32], strides = [1, 1]} : vector<2x256xbf16> to vector<1x32xbf16>
    %c6 = arith.constant 6 : index
    %c0_28 = arith.constant 0 : index
    %c0_29 = arith.constant 0 : index
    %45 = vector.load %arg3[%c6, %c0_28, %c0_29] : memref<9x32x128xbf16, #tpu.memory_space<vmem>>, vector<1x32x128xbf16>
    %46 = vector.shape_cast %45 : vector<1x32x128xbf16> to vector<32x128xbf16>
    %cst_30 = arith.constant dense<0.000000e+00> : vector<1x128xf32>
    %47 = tpu.matmul %44, %46, %cst_30 {dimension_numbers = #tpu.dot_dimension_numbers<[1], [0], [0], [1], [0, 0, 1, 1], [], []>} : vector<1x32xbf16>, vector<32x128xbf16>, vector<1x128xf32> -> vector<1x128xf32>
    %48 = arith.addf %39, %47 : vector<1x128xf32>
    %49 = vector.extract_strided_slice %43 {offsets = [0, 128], sizes = [1, 32], strides = [1, 1]} : vector<2x256xbf16> to vector<1x32xbf16>
    %c7 = arith.constant 7 : index
    %c0_31 = arith.constant 0 : index
    %c0_32 = arith.constant 0 : index
    %50 = vector.load %arg3[%c7, %c0_31, %c0_32] : memref<9x32x128xbf16, #tpu.memory_space<vmem>>, vector<1x32x128xbf16>
    %51 = vector.shape_cast %50 : vector<1x32x128xbf16> to vector<32x128xbf16>
    %cst_33 = arith.constant dense<0.000000e+00> : vector<1x128xf32>
    %52 = tpu.matmul %49, %51, %cst_33 {dimension_numbers = #tpu.dot_dimension_numbers<[1], [0], [0], [1], [0, 0, 1, 1], [], []>} : vector<1x32xbf16>, vector<32x128xbf16>, vector<1x128xf32> -> vector<1x128xf32>
    %53 = arith.addf %48, %52 : vector<1x128xf32>
    %54 = vector.extract_strided_slice %43 {offsets = [1, 0], sizes = [1, 32], strides = [1, 1]} : vector<2x256xbf16> to vector<1x32xbf16>
    %c8 = arith.constant 8 : index
    %c0_34 = arith.constant 0 : index
    %c0_35 = arith.constant 0 : index
    %55 = vector.load %arg3[%c8, %c0_34, %c0_35] : memref<9x32x128xbf16, #tpu.memory_space<vmem>>, vector<1x32x128xbf16>
    %56 = vector.shape_cast %55 : vector<1x32x128xbf16> to vector<32x128xbf16>
    %cst_36 = arith.constant dense<0.000000e+00> : vector<1x128xf32>
    %57 = tpu.matmul %54, %56, %cst_36 {dimension_numbers = #tpu.dot_dimension_numbers<[1], [0], [0], [1], [0, 0, 1, 1], [], []>} : vector<1x32xbf16>, vector<32x128xbf16>, vector<1x128xf32> -> vector<1x128xf32>
    %58 = arith.addf %53, %57 : vector<1x128xf32>
    %c0_37 = arith.constant 0 : index
    %c0_38 = arith.constant 0 : index
    %59 = vector.load %arg4[%c0_37, %c0_38] : memref<1x128xf32, #tpu.memory_space<vmem>>, vector<1x128xf32>
    %60 = arith.addf %58, %59 : vector<1x128xf32>
    %cst_39 = arith.constant 0.000000e+00 : f32
    %61 = vector.broadcast %cst_39 : f32 to vector<1x128xf32>
    %62 = arith.maximumf %60, %61 : vector<1x128xf32>
    %63 = arith.truncf %62 : vector<1x128xf32> to vector<1x128xbf16>
    %c0_40 = arith.constant 0 : index
    %c0_41 = arith.constant 0 : index
    %c0_42 = arith.constant 0 : index
    %c0_43 = arith.constant 0 : index
    %64 = vector.load %arg5[%c0_40, %c0_41, %c0_42, %c0_43] : memref<1x1x1x128xbf16, #tpu.memory_space<vmem>>, vector<1x1x1x128xbf16>
    %65 = vector.shape_cast %64 : vector<1x1x1x128xbf16> to vector<1x128xbf16>
    %66 = vector.shape_cast %63 : vector<1x128xbf16> to vector<1x1x1x128xbf16>
    tpu.vector_store %arg5[%c0_40, %c0_41, %c0_42, %c0_43], %66 {strides = array<i32>} : memref<1x1x1x128xbf16, #tpu.memory_space<vmem>>, vector<1x1x1x128xbf16>,
    return
  }
  func.func @transform_0(%arg0: i32, %arg1: i32) -> (i32, i32, i32, i32) {
    %c0_i32 = arith.constant 0 : i32
    %c0_i32_0 = arith.constant 0 : i32
    %c0_i32_1 = arith.constant 0 : i32
    %c0_i32_2 = arith.constant 0 : i32
    return %arg0, %c0_i32, %c0_i32_0, %c0_i32_1 : i32, i32, i32, i32
  }
  func.func @transform_1(%arg0: i32, %arg1: i32) -> (i32, i32, i32) {
    %c0_i32 = arith.constant 0 : i32
    %c0_i32_0 = arith.constant 0 : i32
    %c0_i32_1 = arith.constant 0 : i32
    %c0_i32_2 = arith.constant 0 : i32
    return %c0_i32, %c0_i32_0, %c0_i32_1 : i32, i32, i32
  }
  func.func @transform_2(%arg0: i32, %arg1: i32) -> (i32, i32) {
    %c0_i32 = arith.constant 0 : i32
    %c0_i32_0 = arith.constant 0 : i32
    %c0_i32_1 = arith.constant 0 : i32
    return %c0_i32, %c0_i32_0 : i32, i32
  }
  func.func @transform_3(%arg0: i32, %arg1: i32) -> (i32, i32, i32, i32) {
    %c0_i32 = arith.constant 0 : i32
    %c0_i32_0 = arith.constant 0 : i32
    %c0_i32_1 = arith.constant 0 : i32
    return %arg0, %arg1, %c0_i32, %c0_i32_0 : i32, i32, i32, i32
  }
}

module attributes {stable_mosaic.version = 11 : i64} {
  func.func @kernel(%arg0: i32, %arg1: i32, %arg2: memref<1x3x3x128xbf16, #tpu.memory_space<vmem>>, %arg3: memref<9x64x128xbf16, #tpu.memory_space<vmem>>, %arg4: memref<1x2x1x256xbf16, #tpu.memory_space<vmem>>, %arg5: memref<1x32x128xbf16, #tpu.memory_space<vmem>>, %arg6: memref<1x128xf32, #tpu.memory_space<vmem>>, %arg7: memref<1x1x1x128xbf16, #tpu.memory_space<vmem>>) attributes {dimension_semantics = [#tpu.dimension_semantics<parallel>, #tpu.dimension_semantics<arbitrary>], iteration_bounds = array<i64: 2, 1>, scalar_prefetch = 0 : i64, scratch_operands = 0 : i64, tpu.core_type = #tpu.core_type<tc>, window_params = [{transform_indices = @transform_0, window_bounds = array<i64: 1, 3, 3, 128>}, {pipeline_mode = #tpu.pipeline_mode<synchronous>, transform_indices = @transform_1, window_bounds = array<i64: 9, 64, 128>}, {transform_indices = @transform_2, window_bounds = array<i64: 1, 2, 1, 256>}, {pipeline_mode = #tpu.pipeline_mode<synchronous>, transform_indices = @transform_3, window_bounds = array<i64: 1, 32, 128>}, {pipeline_mode = #tpu.pipeline_mode<synchronous>, transform_indices = @transform_4, window_bounds = array<i64: 1, 128>}, {transform_indices = @transform_5, window_bounds = array<i64: 1, 1, 1, 128>}]} {
    %cst = arith.constant 0.000000e+00 : f32
    %0 = vector.broadcast %cst : f32 to vector<1x128xf32>
    %c1_i32 = arith.constant 1 : i32
    %1 = arith.muli %arg1, %c1_i32 : i32
    %c0_i32 = arith.constant 0 : i32
    %2 = arith.addi %1, %c0_i32 : i32
    %c0 = arith.constant 0 : index
    %3 = arith.index_cast %2 : i32 to index
    %c0_0 = arith.constant 0 : index
    %c0_1 = arith.constant 0 : index
    %4 = vector.load %arg2[%c0, %3, %c0_0, %c0_1] : memref<1x3x3x128xbf16, #tpu.memory_space<vmem>>, vector<1x1x3x128xbf16>
    %5 = vector.shape_cast %4 : vector<1x1x3x128xbf16> to vector<3x128xbf16>
    %6 = vector.extract_strided_slice %5 {offsets = [0, 0], sizes = [1, 64], strides = [1, 1]} : vector<3x128xbf16> to vector<1x64xbf16>
    %c0_2 = arith.constant 0 : index
    %c0_3 = arith.constant 0 : index
    %c0_4 = arith.constant 0 : index
    %7 = vector.load %arg3[%c0_2, %c0_3, %c0_4] : memref<9x64x128xbf16, #tpu.memory_space<vmem>>, vector<1x64x128xbf16>
    %8 = vector.shape_cast %7 : vector<1x64x128xbf16> to vector<64x128xbf16>
    %cst_5 = arith.constant dense<0.000000e+00> : vector<1x128xf32>
    %9 = tpu.matmul %6, %8, %cst_5 {dimension_numbers = #tpu.dot_dimension_numbers<[1], [0], [0], [1], [0, 0, 1, 1], [], []>} : vector<1x64xbf16>, vector<64x128xbf16>, vector<1x128xf32> -> vector<1x128xf32>
    %10 = arith.addf %0, %9 : vector<1x128xf32>
    %11 = vector.extract_strided_slice %5 {offsets = [1, 0], sizes = [1, 64], strides = [1, 1]} : vector<3x128xbf16> to vector<1x64xbf16>
    %c1 = arith.constant 1 : index
    %c0_6 = arith.constant 0 : index
    %c0_7 = arith.constant 0 : index
    %12 = vector.load %arg3[%c1, %c0_6, %c0_7] : memref<9x64x128xbf16, #tpu.memory_space<vmem>>, vector<1x64x128xbf16>
    %13 = vector.shape_cast %12 : vector<1x64x128xbf16> to vector<64x128xbf16>
    %cst_8 = arith.constant dense<0.000000e+00> : vector<1x128xf32>
    %14 = tpu.matmul %11, %13, %cst_8 {dimension_numbers = #tpu.dot_dimension_numbers<[1], [0], [0], [1], [0, 0, 1, 1], [], []>} : vector<1x64xbf16>, vector<64x128xbf16>, vector<1x128xf32> -> vector<1x128xf32>
    %15 = arith.addf %10, %14 : vector<1x128xf32>
    %16 = vector.extract_strided_slice %5 {offsets = [2, 0], sizes = [1, 64], strides = [1, 1]} : vector<3x128xbf16> to vector<1x64xbf16>
    %c2 = arith.constant 2 : index
    %c0_9 = arith.constant 0 : index
    %c0_10 = arith.constant 0 : index
    %17 = vector.load %arg3[%c2, %c0_9, %c0_10] : memref<9x64x128xbf16, #tpu.memory_space<vmem>>, vector<1x64x128xbf16>
    %18 = vector.shape_cast %17 : vector<1x64x128xbf16> to vector<64x128xbf16>
    %cst_11 = arith.constant dense<0.000000e+00> : vector<1x128xf32>
    %19 = tpu.matmul %16, %18, %cst_11 {dimension_numbers = #tpu.dot_dimension_numbers<[1], [0], [0], [1], [0, 0, 1, 1], [], []>} : vector<1x64xbf16>, vector<64x128xbf16>, vector<1x128xf32> -> vector<1x128xf32>
    %20 = arith.addf %15, %19 : vector<1x128xf32>
    %c1_i32_12 = arith.constant 1 : i32
    %21 = arith.addi %1, %c1_i32_12 : i32
    %c0_13 = arith.constant 0 : index
    %22 = arith.index_cast %21 : i32 to index
    %c0_14 = arith.constant 0 : index
    %c0_15 = arith.constant 0 : index
    %23 = vector.load %arg2[%c0_13, %22, %c0_14, %c0_15] : memref<1x3x3x128xbf16, #tpu.memory_space<vmem>>, vector<1x1x3x128xbf16>
    %24 = vector.shape_cast %23 : vector<1x1x3x128xbf16> to vector<3x128xbf16>
    %25 = vector.extract_strided_slice %24 {offsets = [0, 0], sizes = [1, 64], strides = [1, 1]} : vector<3x128xbf16> to vector<1x64xbf16>
    %c3 = arith.constant 3 : index
    %c0_16 = arith.constant 0 : index
    %c0_17 = arith.constant 0 : index
    %26 = vector.load %arg3[%c3, %c0_16, %c0_17] : memref<9x64x128xbf16, #tpu.memory_space<vmem>>, vector<1x64x128xbf16>
    %27 = vector.shape_cast %26 : vector<1x64x128xbf16> to vector<64x128xbf16>
    %cst_18 = arith.constant dense<0.000000e+00> : vector<1x128xf32>
    %28 = tpu.matmul %25, %27, %cst_18 {dimension_numbers = #tpu.dot_dimension_numbers<[1], [0], [0], [1], [0, 0, 1, 1], [], []>} : vector<1x64xbf16>, vector<64x128xbf16>, vector<1x128xf32> -> vector<1x128xf32>
    %29 = arith.addf %20, %28 : vector<1x128xf32>
    %30 = vector.extract_strided_slice %24 {offsets = [1, 0], sizes = [1, 64], strides = [1, 1]} : vector<3x128xbf16> to vector<1x64xbf16>
    %c4 = arith.constant 4 : index
    %c0_19 = arith.constant 0 : index
    %c0_20 = arith.constant 0 : index
    %31 = vector.load %arg3[%c4, %c0_19, %c0_20] : memref<9x64x128xbf16, #tpu.memory_space<vmem>>, vector<1x64x128xbf16>
    %32 = vector.shape_cast %31 : vector<1x64x128xbf16> to vector<64x128xbf16>
    %cst_21 = arith.constant dense<0.000000e+00> : vector<1x128xf32>
    %33 = tpu.matmul %30, %32, %cst_21 {dimension_numbers = #tpu.dot_dimension_numbers<[1], [0], [0], [1], [0, 0, 1, 1], [], []>} : vector<1x64xbf16>, vector<64x128xbf16>, vector<1x128xf32> -> vector<1x128xf32>
    %34 = arith.addf %29, %33 : vector<1x128xf32>
    %35 = vector.extract_strided_slice %24 {offsets = [2, 0], sizes = [1, 64], strides = [1, 1]} : vector<3x128xbf16> to vector<1x64xbf16>
    %c5 = arith.constant 5 : index
    %c0_22 = arith.constant 0 : index
    %c0_23 = arith.constant 0 : index
    %36 = vector.load %arg3[%c5, %c0_22, %c0_23] : memref<9x64x128xbf16, #tpu.memory_space<vmem>>, vector<1x64x128xbf16>
    %37 = vector.shape_cast %36 : vector<1x64x128xbf16> to vector<64x128xbf16>
    %cst_24 = arith.constant dense<0.000000e+00> : vector<1x128xf32>
    %38 = tpu.matmul %35, %37, %cst_24 {dimension_numbers = #tpu.dot_dimension_numbers<[1], [0], [0], [1], [0, 0, 1, 1], [], []>} : vector<1x64xbf16>, vector<64x128xbf16>, vector<1x128xf32> -> vector<1x128xf32>
    %39 = arith.addf %34, %38 : vector<1x128xf32>
    %c2_i32 = arith.constant 2 : i32
    %40 = arith.addi %1, %c2_i32 : i32
    %c0_25 = arith.constant 0 : index
    %41 = arith.index_cast %40 : i32 to index
    %c0_26 = arith.constant 0 : index
    %c0_27 = arith.constant 0 : index
    %42 = vector.load %arg2[%c0_25, %41, %c0_26, %c0_27] : memref<1x3x3x128xbf16, #tpu.memory_space<vmem>>, vector<1x1x3x128xbf16>
    %43 = vector.shape_cast %42 : vector<1x1x3x128xbf16> to vector<3x128xbf16>
    %44 = vector.extract_strided_slice %43 {offsets = [0, 0], sizes = [1, 64], strides = [1, 1]} : vector<3x128xbf16> to vector<1x64xbf16>
    %c6 = arith.constant 6 : index
    %c0_28 = arith.constant 0 : index
    %c0_29 = arith.constant 0 : index
    %45 = vector.load %arg3[%c6, %c0_28, %c0_29] : memref<9x64x128xbf16, #tpu.memory_space<vmem>>, vector<1x64x128xbf16>
    %46 = vector.shape_cast %45 : vector<1x64x128xbf16> to vector<64x128xbf16>
    %cst_30 = arith.constant dense<0.000000e+00> : vector<1x128xf32>
    %47 = tpu.matmul %44, %46, %cst_30 {dimension_numbers = #tpu.dot_dimension_numbers<[1], [0], [0], [1], [0, 0, 1, 1], [], []>} : vector<1x64xbf16>, vector<64x128xbf16>, vector<1x128xf32> -> vector<1x128xf32>
    %48 = arith.addf %39, %47 : vector<1x128xf32>
    %49 = vector.extract_strided_slice %43 {offsets = [1, 0], sizes = [1, 64], strides = [1, 1]} : vector<3x128xbf16> to vector<1x64xbf16>
    %c7 = arith.constant 7 : index
    %c0_31 = arith.constant 0 : index
    %c0_32 = arith.constant 0 : index
    %50 = vector.load %arg3[%c7, %c0_31, %c0_32] : memref<9x64x128xbf16, #tpu.memory_space<vmem>>, vector<1x64x128xbf16>
    %51 = vector.shape_cast %50 : vector<1x64x128xbf16> to vector<64x128xbf16>
    %cst_33 = arith.constant dense<0.000000e+00> : vector<1x128xf32>
    %52 = tpu.matmul %49, %51, %cst_33 {dimension_numbers = #tpu.dot_dimension_numbers<[1], [0], [0], [1], [0, 0, 1, 1], [], []>} : vector<1x64xbf16>, vector<64x128xbf16>, vector<1x128xf32> -> vector<1x128xf32>
    %53 = arith.addf %48, %52 : vector<1x128xf32>
    %54 = vector.extract_strided_slice %43 {offsets = [2, 0], sizes = [1, 64], strides = [1, 1]} : vector<3x128xbf16> to vector<1x64xbf16>
    %c8 = arith.constant 8 : index
    %c0_34 = arith.constant 0 : index
    %c0_35 = arith.constant 0 : index
    %55 = vector.load %arg3[%c8, %c0_34, %c0_35] : memref<9x64x128xbf16, #tpu.memory_space<vmem>>, vector<1x64x128xbf16>
    %56 = vector.shape_cast %55 : vector<1x64x128xbf16> to vector<64x128xbf16>
    %cst_36 = arith.constant dense<0.000000e+00> : vector<1x128xf32>
    %57 = tpu.matmul %54, %56, %cst_36 {dimension_numbers = #tpu.dot_dimension_numbers<[1], [0], [0], [1], [0, 0, 1, 1], [], []>} : vector<1x64xbf16>, vector<64x128xbf16>, vector<1x128xf32> -> vector<1x128xf32>
    %58 = arith.addf %53, %57 : vector<1x128xf32>
    %c2_i32_37 = arith.constant 2 : i32
    %59 = arith.muli %arg1, %c2_i32_37 : i32
    %c0_i32_38 = arith.constant 0 : i32
    %60 = arith.addi %59, %c0_i32_38 : i32
    %c0_39 = arith.constant 0 : index
    %61 = arith.index_cast %60 : i32 to index
    %c0_40 = arith.constant 0 : index
    %c0_41 = arith.constant 0 : index
    %62 = vector.load %arg4[%c0_39, %61, %c0_40, %c0_41] : memref<1x2x1x256xbf16, #tpu.memory_space<vmem>>, vector<1x1x1x256xbf16>
    %63 = vector.shape_cast %62 : vector<1x1x1x256xbf16> to vector<1x256xbf16>
    %64 = vector.extract_strided_slice %63 {offsets = [0, 0], sizes = [1, 32], strides = [1, 1]} : vector<1x256xbf16> to vector<1x32xbf16>
    %c0_42 = arith.constant 0 : index
    %c0_43 = arith.constant 0 : index
    %c0_44 = arith.constant 0 : index
    %65 = vector.load %arg5[%c0_42, %c0_43, %c0_44] : memref<1x32x128xbf16, #tpu.memory_space<vmem>>, vector<1x32x128xbf16>
    %66 = vector.shape_cast %65 : vector<1x32x128xbf16> to vector<32x128xbf16>
    %cst_45 = arith.constant dense<0.000000e+00> : vector<1x128xf32>
    %67 = tpu.matmul %64, %66, %cst_45 {dimension_numbers = #tpu.dot_dimension_numbers<[1], [0], [0], [1], [0, 0, 1, 1], [], []>} : vector<1x32xbf16>, vector<32x128xbf16>, vector<1x128xf32> -> vector<1x128xf32>
    %68 = arith.addf %58, %67 : vector<1x128xf32>
    %c0_46 = arith.constant 0 : index
    %c0_47 = arith.constant 0 : index
    %69 = vector.load %arg6[%c0_46, %c0_47] : memref<1x128xf32, #tpu.memory_space<vmem>>, vector<1x128xf32>
    %70 = arith.addf %68, %69 : vector<1x128xf32>
    %cst_48 = arith.constant 0.000000e+00 : f32
    %71 = vector.broadcast %cst_48 : f32 to vector<1x128xf32>
    %72 = arith.maximumf %70, %71 : vector<1x128xf32>
    %73 = arith.truncf %72 : vector<1x128xf32> to vector<1x128xbf16>
    %c0_49 = arith.constant 0 : index
    %c0_50 = arith.constant 0 : index
    %c0_51 = arith.constant 0 : index
    %c0_52 = arith.constant 0 : index
    %74 = vector.load %arg7[%c0_49, %c0_50, %c0_51, %c0_52] : memref<1x1x1x128xbf16, #tpu.memory_space<vmem>>, vector<1x1x1x128xbf16>
    %75 = vector.shape_cast %74 : vector<1x1x1x128xbf16> to vector<1x128xbf16>
    %76 = vector.shape_cast %73 : vector<1x128xbf16> to vector<1x1x1x128xbf16>
    tpu.vector_store %arg7[%c0_49, %c0_50, %c0_51, %c0_52], %76 {strides = array<i32>} : memref<1x1x1x128xbf16, #tpu.memory_space<vmem>>, vector<1x1x1x128xbf16>,
    return
  }
  func.func @transform_0(%arg0: i32, %arg1: i32) -> (i32, i32, i32, i32) {
    %c0_i32 = arith.constant 0 : i32
    %c0_i32_0 = arith.constant 0 : i32
    %c0_i32_1 = arith.constant 0 : i32
    %c0_i32_2 = arith.constant 0 : i32
    return %arg0, %c0_i32, %c0_i32_0, %c0_i32_1 : i32, i32, i32, i32
  }
  func.func @transform_1(%arg0: i32, %arg1: i32) -> (i32, i32, i32) {
    %c0_i32 = arith.constant 0 : i32
    %c0_i32_0 = arith.constant 0 : i32
    %c0_i32_1 = arith.constant 0 : i32
    %c0_i32_2 = arith.constant 0 : i32
    return %c0_i32, %c0_i32_0, %c0_i32_1 : i32, i32, i32
  }
  func.func @transform_2(%arg0: i32, %arg1: i32) -> (i32, i32, i32, i32) {
    %c0_i32 = arith.constant 0 : i32
    %c0_i32_0 = arith.constant 0 : i32
    %c0_i32_1 = arith.constant 0 : i32
    %c0_i32_2 = arith.constant 0 : i32
    return %arg0, %c0_i32, %c0_i32_0, %c0_i32_1 : i32, i32, i32, i32
  }
  func.func @transform_3(%arg0: i32, %arg1: i32) -> (i32, i32, i32) {
    %c0_i32 = arith.constant 0 : i32
    %c0_i32_0 = arith.constant 0 : i32
    %c0_i32_1 = arith.constant 0 : i32
    %c0_i32_2 = arith.constant 0 : i32
    return %c0_i32, %c0_i32_0, %c0_i32_1 : i32, i32, i32
  }
  func.func @transform_4(%arg0: i32, %arg1: i32) -> (i32, i32) {
    %c0_i32 = arith.constant 0 : i32
    %c0_i32_0 = arith.constant 0 : i32
    %c0_i32_1 = arith.constant 0 : i32
    return %c0_i32, %c0_i32_0 : i32, i32
  }
  func.func @transform_5(%arg0: i32, %arg1: i32) -> (i32, i32, i32, i32) {
    %c0_i32 = arith.constant 0 : i32
    %c0_i32_0 = arith.constant 0 : i32
    %c0_i32_1 = arith.constant 0 : i32
    return %arg0, %arg1, %c0_i32, %c0_i32_0 : i32, i32, i32, i32
  }
}

module attributes {stable_mosaic.version = 11 : i64} {
  func.func @kernel(%arg0: i32, %arg1: i32, %arg2: memref<1x3x2x256xbf16, #tpu.memory_space<vmem>>, %arg3: memref<9x64x128xbf16, #tpu.memory_space<vmem>>, %arg4: memref<1x128xf32, #tpu.memory_space<vmem>>, %arg5: memref<1x1x1x128xbf16, #tpu.memory_space<vmem>>) attributes {dimension_semantics = [#tpu.dimension_semantics<parallel>, #tpu.dimension_semantics<arbitrary>], iteration_bounds = array<i64: 2, 1>, scalar_prefetch = 0 : i64, scratch_operands = 0 : i64, tpu.core_type = #tpu.core_type<tc>, window_params = [{transform_indices = @transform_0, window_bounds = array<i64: 1, 3, 2, 256>}, {pipeline_mode = #tpu.pipeline_mode<synchronous>, transform_indices = @transform_1, window_bounds = array<i64: 9, 64, 128>}, {pipeline_mode = #tpu.pipeline_mode<synchronous>, transform_indices = @transform_2, window_bounds = array<i64: 1, 128>}, {transform_indices = @transform_3, window_bounds = array<i64: 1, 1, 1, 128>}]} {
    %cst = arith.constant 0.000000e+00 : f32
    %0 = vector.broadcast %cst : f32 to vector<1x128xf32>
    %c2_i32 = arith.constant 2 : i32
    %1 = arith.muli %arg1, %c2_i32 : i32
    %c0_i32 = arith.constant 0 : i32
    %2 = arith.addi %1, %c0_i32 : i32
    %c0 = arith.constant 0 : index
    %3 = arith.index_cast %2 : i32 to index
    %c0_0 = arith.constant 0 : index
    %c0_1 = arith.constant 0 : index
    %4 = vector.load %arg2[%c0, %3, %c0_0, %c0_1] : memref<1x3x2x256xbf16, #tpu.memory_space<vmem>>, vector<1x1x2x256xbf16>
    %5 = vector.shape_cast %4 : vector<1x1x2x256xbf16> to vector<2x256xbf16>
    %6 = vector.extract_strided_slice %5 {offsets = [0, 0], sizes = [1, 64], strides = [1, 1]} : vector<2x256xbf16> to vector<1x64xbf16>
    %c0_2 = arith.constant 0 : index
    %c0_3 = arith.constant 0 : index
    %c0_4 = arith.constant 0 : index
    %7 = vector.load %arg3[%c0_2, %c0_3, %c0_4] : memref<9x64x128xbf16, #tpu.memory_space<vmem>>, vector<1x64x128xbf16>
    %8 = vector.shape_cast %7 : vector<1x64x128xbf16> to vector<64x128xbf16>
    %cst_5 = arith.constant dense<0.000000e+00> : vector<1x128xf32>
    %9 = tpu.matmul %6, %8, %cst_5 {dimension_numbers = #tpu.dot_dimension_numbers<[1], [0], [0], [1], [0, 0, 1, 1], [], []>} : vector<1x64xbf16>, vector<64x128xbf16>, vector<1x128xf32> -> vector<1x128xf32>
    %10 = arith.addf %0, %9 : vector<1x128xf32>
    %11 = vector.extract_strided_slice %5 {offsets = [0, 128], sizes = [1, 64], strides = [1, 1]} : vector<2x256xbf16> to vector<1x64xbf16>
    %c1 = arith.constant 1 : index
    %c0_6 = arith.constant 0 : index
    %c0_7 = arith.constant 0 : index
    %12 = vector.load %arg3[%c1, %c0_6, %c0_7] : memref<9x64x128xbf16, #tpu.memory_space<vmem>>, vector<1x64x128xbf16>
    %13 = vector.shape_cast %12 : vector<1x64x128xbf16> to vector<64x128xbf16>
    %cst_8 = arith.constant dense<0.000000e+00> : vector<1x128xf32>
    %14 = tpu.matmul %11, %13, %cst_8 {dimension_numbers = #tpu.dot_dimension_numbers<[1], [0], [0], [1], [0, 0, 1, 1], [], []>} : vector<1x64xbf16>, vector<64x128xbf16>, vector<1x128xf32> -> vector<1x128xf32>
    %15 = arith.addf %10, %14 : vector<1x128xf32>
    %16 = vector.extract_strided_slice %5 {offsets = [1, 0], sizes = [1, 64], strides = [1, 1]} : vector<2x256xbf16> to vector<1x64xbf16>
    %c2 = arith.constant 2 : index
    %c0_9 = arith.constant 0 : index
    %c0_10 = arith.constant 0 : index
    %17 = vector.load %arg3[%c2, %c0_9, %c0_10] : memref<9x64x128xbf16, #tpu.memory_space<vmem>>, vector<1x64x128xbf16>
    %18 = vector.shape_cast %17 : vector<1x64x128xbf16> to vector<64x128xbf16>
    %cst_11 = arith.constant dense<0.000000e+00> : vector<1x128xf32>
    %19 = tpu.matmul %16, %18, %cst_11 {dimension_numbers = #tpu.dot_dimension_numbers<[1], [0], [0], [1], [0, 0, 1, 1], [], []>} : vector<1x64xbf16>, vector<64x128xbf16>, vector<1x128xf32> -> vector<1x128xf32>
    %20 = arith.addf %15, %19 : vector<1x128xf32>
    %c1_i32 = arith.constant 1 : i32
    %21 = arith.addi %1, %c1_i32 : i32
    %c0_12 = arith.constant 0 : index
    %22 = arith.index_cast %21 : i32 to index
    %c0_13 = arith.constant 0 : index
    %c0_14 = arith.constant 0 : index
    %23 = vector.load %arg2[%c0_12, %22, %c0_13, %c0_14] : memref<1x3x2x256xbf16, #tpu.memory_space<vmem>>, vector<1x1x2x256xbf16>
    %24 = vector.shape_cast %23 : vector<1x1x2x256xbf16> to vector<2x256xbf16>
    %25 = vector.extract_strided_slice %24 {offsets = [0, 0], sizes = [1, 64], strides = [1, 1]} : vector<2x256xbf16> to vector<1x64xbf16>
    %c3 = arith.constant 3 : index
    %c0_15 = arith.constant 0 : index
    %c0_16 = arith.constant 0 : index
    %26 = vector.load %arg3[%c3, %c0_15, %c0_16] : memref<9x64x128xbf16, #tpu.memory_space<vmem>>, vector<1x64x128xbf16>
    %27 = vector.shape_cast %26 : vector<1x64x128xbf16> to vector<64x128xbf16>
    %cst_17 = arith.constant dense<0.000000e+00> : vector<1x128xf32>
    %28 = tpu.matmul %25, %27, %cst_17 {dimension_numbers = #tpu.dot_dimension_numbers<[1], [0], [0], [1], [0, 0, 1, 1], [], []>} : vector<1x64xbf16>, vector<64x128xbf16>, vector<1x128xf32> -> vector<1x128xf32>
    %29 = arith.addf %20, %28 : vector<1x128xf32>
    %30 = vector.extract_strided_slice %24 {offsets = [0, 128], sizes = [1, 64], strides = [1, 1]} : vector<2x256xbf16> to vector<1x64xbf16>
    %c4 = arith.constant 4 : index
    %c0_18 = arith.constant 0 : index
    %c0_19 = arith.constant 0 : index
    %31 = vector.load %arg3[%c4, %c0_18, %c0_19] : memref<9x64x128xbf16, #tpu.memory_space<vmem>>, vector<1x64x128xbf16>
    %32 = vector.shape_cast %31 : vector<1x64x128xbf16> to vector<64x128xbf16>
    %cst_20 = arith.constant dense<0.000000e+00> : vector<1x128xf32>
    %33 = tpu.matmul %30, %32, %cst_20 {dimension_numbers = #tpu.dot_dimension_numbers<[1], [0], [0], [1], [0, 0, 1, 1], [], []>} : vector<1x64xbf16>, vector<64x128xbf16>, vector<1x128xf32> -> vector<1x128xf32>
    %34 = arith.addf %29, %33 : vector<1x128xf32>
    %35 = vector.extract_strided_slice %24 {offsets = [1, 0], sizes = [1, 64], strides = [1, 1]} : vector<2x256xbf16> to vector<1x64xbf16>
    %c5 = arith.constant 5 : index
    %c0_21 = arith.constant 0 : index
    %c0_22 = arith.constant 0 : index
    %36 = vector.load %arg3[%c5, %c0_21, %c0_22] : memref<9x64x128xbf16, #tpu.memory_space<vmem>>, vector<1x64x128xbf16>
    %37 = vector.shape_cast %36 : vector<1x64x128xbf16> to vector<64x128xbf16>
    %cst_23 = arith.constant dense<0.000000e+00> : vector<1x128xf32>
    %38 = tpu.matmul %35, %37, %cst_23 {dimension_numbers = #tpu.dot_dimension_numbers<[1], [0], [0], [1], [0, 0, 1, 1], [], []>} : vector<1x64xbf16>, vector<64x128xbf16>, vector<1x128xf32> -> vector<1x128xf32>
    %39 = arith.addf %34, %38 : vector<1x128xf32>
    %c2_i32_24 = arith.constant 2 : i32
    %40 = arith.addi %1, %c2_i32_24 : i32
    %c0_25 = arith.constant 0 : index
    %41 = arith.index_cast %40 : i32 to index
    %c0_26 = arith.constant 0 : index
    %c0_27 = arith.constant 0 : index
    %42 = vector.load %arg2[%c0_25, %41, %c0_26, %c0_27] : memref<1x3x2x256xbf16, #tpu.memory_space<vmem>>, vector<1x1x2x256xbf16>
    %43 = vector.shape_cast %42 : vector<1x1x2x256xbf16> to vector<2x256xbf16>
    %44 = vector.extract_strided_slice %43 {offsets = [0, 0], sizes = [1, 64], strides = [1, 1]} : vector<2x256xbf16> to vector<1x64xbf16>
    %c6 = arith.constant 6 : index
    %c0_28 = arith.constant 0 : index
    %c0_29 = arith.constant 0 : index
    %45 = vector.load %arg3[%c6, %c0_28, %c0_29] : memref<9x64x128xbf16, #tpu.memory_space<vmem>>, vector<1x64x128xbf16>
    %46 = vector.shape_cast %45 : vector<1x64x128xbf16> to vector<64x128xbf16>
    %cst_30 = arith.constant dense<0.000000e+00> : vector<1x128xf32>
    %47 = tpu.matmul %44, %46, %cst_30 {dimension_numbers = #tpu.dot_dimension_numbers<[1], [0], [0], [1], [0, 0, 1, 1], [], []>} : vector<1x64xbf16>, vector<64x128xbf16>, vector<1x128xf32> -> vector<1x128xf32>
    %48 = arith.addf %39, %47 : vector<1x128xf32>
    %49 = vector.extract_strided_slice %43 {offsets = [0, 128], sizes = [1, 64], strides = [1, 1]} : vector<2x256xbf16> to vector<1x64xbf16>
    %c7 = arith.constant 7 : index
    %c0_31 = arith.constant 0 : index
    %c0_32 = arith.constant 0 : index
    %50 = vector.load %arg3[%c7, %c0_31, %c0_32] : memref<9x64x128xbf16, #tpu.memory_space<vmem>>, vector<1x64x128xbf16>
    %51 = vector.shape_cast %50 : vector<1x64x128xbf16> to vector<64x128xbf16>
    %cst_33 = arith.constant dense<0.000000e+00> : vector<1x128xf32>
    %52 = tpu.matmul %49, %51, %cst_33 {dimension_numbers = #tpu.dot_dimension_numbers<[1], [0], [0], [1], [0, 0, 1, 1], [], []>} : vector<1x64xbf16>, vector<64x128xbf16>, vector<1x128xf32> -> vector<1x128xf32>
    %53 = arith.addf %48, %52 : vector<1x128xf32>
    %54 = vector.extract_strided_slice %43 {offsets = [1, 0], sizes = [1, 64], strides = [1, 1]} : vector<2x256xbf16> to vector<1x64xbf16>
    %c8 = arith.constant 8 : index
    %c0_34 = arith.constant 0 : index
    %c0_35 = arith.constant 0 : index
    %55 = vector.load %arg3[%c8, %c0_34, %c0_35] : memref<9x64x128xbf16, #tpu.memory_space<vmem>>, vector<1x64x128xbf16>
    %56 = vector.shape_cast %55 : vector<1x64x128xbf16> to vector<64x128xbf16>
    %cst_36 = arith.constant dense<0.000000e+00> : vector<1x128xf32>
    %57 = tpu.matmul %54, %56, %cst_36 {dimension_numbers = #tpu.dot_dimension_numbers<[1], [0], [0], [1], [0, 0, 1, 1], [], []>} : vector<1x64xbf16>, vector<64x128xbf16>, vector<1x128xf32> -> vector<1x128xf32>
    %58 = arith.addf %53, %57 : vector<1x128xf32>
    %c0_37 = arith.constant 0 : index
    %c0_38 = arith.constant 0 : index
    %59 = vector.load %arg4[%c0_37, %c0_38] : memref<1x128xf32, #tpu.memory_space<vmem>>, vector<1x128xf32>
    %60 = arith.addf %58, %59 : vector<1x128xf32>
    %cst_39 = arith.constant 0.000000e+00 : f32
    %61 = vector.broadcast %cst_39 : f32 to vector<1x128xf32>
    %62 = arith.maximumf %60, %61 : vector<1x128xf32>
    %63 = arith.truncf %62 : vector<1x128xf32> to vector<1x128xbf16>
    %c0_40 = arith.constant 0 : index
    %c0_41 = arith.constant 0 : index
    %c0_42 = arith.constant 0 : index
    %c0_43 = arith.constant 0 : index
    %64 = vector.load %arg5[%c0_40, %c0_41, %c0_42, %c0_43] : memref<1x1x1x128xbf16, #tpu.memory_space<vmem>>, vector<1x1x1x128xbf16>
    %65 = vector.shape_cast %64 : vector<1x1x1x128xbf16> to vector<1x128xbf16>
    %66 = vector.shape_cast %63 : vector<1x128xbf16> to vector<1x1x1x128xbf16>
    tpu.vector_store %arg5[%c0_40, %c0_41, %c0_42, %c0_43], %66 {strides = array<i32>} : memref<1x1x1x128xbf16, #tpu.memory_space<vmem>>, vector<1x1x1x128xbf16>,
    return
  }
  func.func @transform_0(%arg0: i32, %arg1: i32) -> (i32, i32, i32, i32) {
    %c0_i32 = arith.constant 0 : i32
    %c0_i32_0 = arith.constant 0 : i32
    %c0_i32_1 = arith.constant 0 : i32
    %c0_i32_2 = arith.constant 0 : i32
    return %arg0, %c0_i32, %c0_i32_0, %c0_i32_1 : i32, i32, i32, i32
  }
  func.func @transform_1(%arg0: i32, %arg1: i32) -> (i32, i32, i32) {
    %c0_i32 = arith.constant 0 : i32
    %c0_i32_0 = arith.constant 0 : i32
    %c0_i32_1 = arith.constant 0 : i32
    %c0_i32_2 = arith.constant 0 : i32
    return %c0_i32, %c0_i32_0, %c0_i32_1 : i32, i32, i32
  }
  func.func @transform_2(%arg0: i32, %arg1: i32) -> (i32, i32) {
    %c0_i32 = arith.constant 0 : i32
    %c0_i32_0 = arith.constant 0 : i32
    %c0_i32_1 = arith.constant 0 : i32
    return %c0_i32, %c0_i32_0 : i32, i32
  }
  func.func @transform_3(%arg0: i32, %arg1: i32) -> (i32, i32, i32, i32) {
    %c0_i32 = arith.constant 0 : i32
    %c0_i32_0 = arith.constant 0 : i32
    %c0_i32_1 = arith.constant 0 : i32
    return %arg0, %arg1, %c0_i32, %c0_i32_0 : i32, i32, i32, i32
  }
}

module attributes {stable_mosaic.version = 11 : i64} {
  func.func @kernel(%arg0: i32, %arg1: i32, %arg2: memref<1x3x3x128xbf16, #tpu.memory_space<vmem>>, %arg3: memref<9x128x128xbf16, #tpu.memory_space<vmem>>, %arg4: memref<1x1x1x256xbf16, #tpu.memory_space<vmem>>, %arg5: memref<1x64x128xbf16, #tpu.memory_space<vmem>>, %arg6: memref<1x128xf32, #tpu.memory_space<vmem>>, %arg7: memref<1x1x1x128xbf16, #tpu.memory_space<vmem>>) attributes {dimension_semantics = [#tpu.dimension_semantics<parallel>, #tpu.dimension_semantics<arbitrary>], iteration_bounds = array<i64: 2, 1>, scalar_prefetch = 0 : i64, scratch_operands = 0 : i64, tpu.core_type = #tpu.core_type<tc>, window_params = [{transform_indices = @transform_0, window_bounds = array<i64: 1, 3, 3, 128>}, {pipeline_mode = #tpu.pipeline_mode<synchronous>, transform_indices = @transform_1, window_bounds = array<i64: 9, 128, 128>}, {transform_indices = @transform_2, window_bounds = array<i64: 1, 1, 1, 256>}, {pipeline_mode = #tpu.pipeline_mode<synchronous>, transform_indices = @transform_3, window_bounds = array<i64: 1, 64, 128>}, {pipeline_mode = #tpu.pipeline_mode<synchronous>, transform_indices = @transform_4, window_bounds = array<i64: 1, 128>}, {transform_indices = @transform_5, window_bounds = array<i64: 1, 1, 1, 128>}]} {
    %cst = arith.constant 0.000000e+00 : f32
    %0 = vector.broadcast %cst : f32 to vector<1x128xf32>
    %c1_i32 = arith.constant 1 : i32
    %1 = arith.muli %arg1, %c1_i32 : i32
    %c0_i32 = arith.constant 0 : i32
    %2 = arith.addi %1, %c0_i32 : i32
    %c0 = arith.constant 0 : index
    %3 = arith.index_cast %2 : i32 to index
    %c0_0 = arith.constant 0 : index
    %c0_1 = arith.constant 0 : index
    %4 = vector.load %arg2[%c0, %3, %c0_0, %c0_1] : memref<1x3x3x128xbf16, #tpu.memory_space<vmem>>, vector<1x1x3x128xbf16>
    %5 = vector.shape_cast %4 : vector<1x1x3x128xbf16> to vector<3x128xbf16>
    %6 = vector.extract_strided_slice %5 {offsets = [0, 0], sizes = [1, 128], strides = [1, 1]} : vector<3x128xbf16> to vector<1x128xbf16>
    %c0_2 = arith.constant 0 : index
    %c0_3 = arith.constant 0 : index
    %c0_4 = arith.constant 0 : index
    %7 = vector.load %arg3[%c0_2, %c0_3, %c0_4] : memref<9x128x128xbf16, #tpu.memory_space<vmem>>, vector<1x128x128xbf16>
    %8 = vector.shape_cast %7 : vector<1x128x128xbf16> to vector<128x128xbf16>
    %cst_5 = arith.constant dense<0.000000e+00> : vector<1x128xf32>
    %9 = tpu.matmul %6, %8, %cst_5 {dimension_numbers = #tpu.dot_dimension_numbers<[1], [0], [0], [1], [0, 0, 1, 1], [], []>} : vector<1x128xbf16>, vector<128x128xbf16>, vector<1x128xf32> -> vector<1x128xf32>
    %10 = arith.addf %0, %9 : vector<1x128xf32>
    %11 = vector.extract_strided_slice %5 {offsets = [1, 0], sizes = [1, 128], strides = [1, 1]} : vector<3x128xbf16> to vector<1x128xbf16>
    %c1 = arith.constant 1 : index
    %c0_6 = arith.constant 0 : index
    %c0_7 = arith.constant 0 : index
    %12 = vector.load %arg3[%c1, %c0_6, %c0_7] : memref<9x128x128xbf16, #tpu.memory_space<vmem>>, vector<1x128x128xbf16>
    %13 = vector.shape_cast %12 : vector<1x128x128xbf16> to vector<128x128xbf16>
    %cst_8 = arith.constant dense<0.000000e+00> : vector<1x128xf32>
    %14 = tpu.matmul %11, %13, %cst_8 {dimension_numbers = #tpu.dot_dimension_numbers<[1], [0], [0], [1], [0, 0, 1, 1], [], []>} : vector<1x128xbf16>, vector<128x128xbf16>, vector<1x128xf32> -> vector<1x128xf32>
    %15 = arith.addf %10, %14 : vector<1x128xf32>
    %16 = vector.extract_strided_slice %5 {offsets = [2, 0], sizes = [1, 128], strides = [1, 1]} : vector<3x128xbf16> to vector<1x128xbf16>
    %c2 = arith.constant 2 : index
    %c0_9 = arith.constant 0 : index
    %c0_10 = arith.constant 0 : index
    %17 = vector.load %arg3[%c2, %c0_9, %c0_10] : memref<9x128x128xbf16, #tpu.memory_space<vmem>>, vector<1x128x128xbf16>
    %18 = vector.shape_cast %17 : vector<1x128x128xbf16> to vector<128x128xbf16>
    %cst_11 = arith.constant dense<0.000000e+00> : vector<1x128xf32>
    %19 = tpu.matmul %16, %18, %cst_11 {dimension_numbers = #tpu.dot_dimension_numbers<[1], [0], [0], [1], [0, 0, 1, 1], [], []>} : vector<1x128xbf16>, vector<128x128xbf16>, vector<1x128xf32> -> vector<1x128xf32>
    %20 = arith.addf %15, %19 : vector<1x128xf32>
    %c1_i32_12 = arith.constant 1 : i32
    %21 = arith.addi %1, %c1_i32_12 : i32
    %c0_13 = arith.constant 0 : index
    %22 = arith.index_cast %21 : i32 to index
    %c0_14 = arith.constant 0 : index
    %c0_15 = arith.constant 0 : index
    %23 = vector.load %arg2[%c0_13, %22, %c0_14, %c0_15] : memref<1x3x3x128xbf16, #tpu.memory_space<vmem>>, vector<1x1x3x128xbf16>
    %24 = vector.shape_cast %23 : vector<1x1x3x128xbf16> to vector<3x128xbf16>
    %25 = vector.extract_strided_slice %24 {offsets = [0, 0], sizes = [1, 128], strides = [1, 1]} : vector<3x128xbf16> to vector<1x128xbf16>
    %c3 = arith.constant 3 : index
    %c0_16 = arith.constant 0 : index
    %c0_17 = arith.constant 0 : index
    %26 = vector.load %arg3[%c3, %c0_16, %c0_17] : memref<9x128x128xbf16, #tpu.memory_space<vmem>>, vector<1x128x128xbf16>
    %27 = vector.shape_cast %26 : vector<1x128x128xbf16> to vector<128x128xbf16>
    %cst_18 = arith.constant dense<0.000000e+00> : vector<1x128xf32>
    %28 = tpu.matmul %25, %27, %cst_18 {dimension_numbers = #tpu.dot_dimension_numbers<[1], [0], [0], [1], [0, 0, 1, 1], [], []>} : vector<1x128xbf16>, vector<128x128xbf16>, vector<1x128xf32> -> vector<1x128xf32>
    %29 = arith.addf %20, %28 : vector<1x128xf32>
    %30 = vector.extract_strided_slice %24 {offsets = [1, 0], sizes = [1, 128], strides = [1, 1]} : vector<3x128xbf16> to vector<1x128xbf16>
    %c4 = arith.constant 4 : index
    %c0_19 = arith.constant 0 : index
    %c0_20 = arith.constant 0 : index
    %31 = vector.load %arg3[%c4, %c0_19, %c0_20] : memref<9x128x128xbf16, #tpu.memory_space<vmem>>, vector<1x128x128xbf16>
    %32 = vector.shape_cast %31 : vector<1x128x128xbf16> to vector<128x128xbf16>
    %cst_21 = arith.constant dense<0.000000e+00> : vector<1x128xf32>
    %33 = tpu.matmul %30, %32, %cst_21 {dimension_numbers = #tpu.dot_dimension_numbers<[1], [0], [0], [1], [0, 0, 1, 1], [], []>} : vector<1x128xbf16>, vector<128x128xbf16>, vector<1x128xf32> -> vector<1x128xf32>
    %34 = arith.addf %29, %33 : vector<1x128xf32>
    %35 = vector.extract_strided_slice %24 {offsets = [2, 0], sizes = [1, 128], strides = [1, 1]} : vector<3x128xbf16> to vector<1x128xbf16>
    %c5 = arith.constant 5 : index
    %c0_22 = arith.constant 0 : index
    %c0_23 = arith.constant 0 : index
    %36 = vector.load %arg3[%c5, %c0_22, %c0_23] : memref<9x128x128xbf16, #tpu.memory_space<vmem>>, vector<1x128x128xbf16>
    %37 = vector.shape_cast %36 : vector<1x128x128xbf16> to vector<128x128xbf16>
    %cst_24 = arith.constant dense<0.000000e+00> : vector<1x128xf32>
    %38 = tpu.matmul %35, %37, %cst_24 {dimension_numbers = #tpu.dot_dimension_numbers<[1], [0], [0], [1], [0, 0, 1, 1], [], []>} : vector<1x128xbf16>, vector<128x128xbf16>, vector<1x128xf32> -> vector<1x128xf32>
    %39 = arith.addf %34, %38 : vector<1x128xf32>
    %c2_i32 = arith.constant 2 : i32
    %40 = arith.addi %1, %c2_i32 : i32
    %c0_25 = arith.constant 0 : index
    %41 = arith.index_cast %40 : i32 to index
    %c0_26 = arith.constant 0 : index
    %c0_27 = arith.constant 0 : index
    %42 = vector.load %arg2[%c0_25, %41, %c0_26, %c0_27] : memref<1x3x3x128xbf16, #tpu.memory_space<vmem>>, vector<1x1x3x128xbf16>
    %43 = vector.shape_cast %42 : vector<1x1x3x128xbf16> to vector<3x128xbf16>
    %44 = vector.extract_strided_slice %43 {offsets = [0, 0], sizes = [1, 128], strides = [1, 1]} : vector<3x128xbf16> to vector<1x128xbf16>
    %c6 = arith.constant 6 : index
    %c0_28 = arith.constant 0 : index
    %c0_29 = arith.constant 0 : index
    %45 = vector.load %arg3[%c6, %c0_28, %c0_29] : memref<9x128x128xbf16, #tpu.memory_space<vmem>>, vector<1x128x128xbf16>
    %46 = vector.shape_cast %45 : vector<1x128x128xbf16> to vector<128x128xbf16>
    %cst_30 = arith.constant dense<0.000000e+00> : vector<1x128xf32>
    %47 = tpu.matmul %44, %46, %cst_30 {dimension_numbers = #tpu.dot_dimension_numbers<[1], [0], [0], [1], [0, 0, 1, 1], [], []>} : vector<1x128xbf16>, vector<128x128xbf16>, vector<1x128xf32> -> vector<1x128xf32>
    %48 = arith.addf %39, %47 : vector<1x128xf32>
    %49 = vector.extract_strided_slice %43 {offsets = [1, 0], sizes = [1, 128], strides = [1, 1]} : vector<3x128xbf16> to vector<1x128xbf16>
    %c7 = arith.constant 7 : index
    %c0_31 = arith.constant 0 : index
    %c0_32 = arith.constant 0 : index
    %50 = vector.load %arg3[%c7, %c0_31, %c0_32] : memref<9x128x128xbf16, #tpu.memory_space<vmem>>, vector<1x128x128xbf16>
    %51 = vector.shape_cast %50 : vector<1x128x128xbf16> to vector<128x128xbf16>
    %cst_33 = arith.constant dense<0.000000e+00> : vector<1x128xf32>
    %52 = tpu.matmul %49, %51, %cst_33 {dimension_numbers = #tpu.dot_dimension_numbers<[1], [0], [0], [1], [0, 0, 1, 1], [], []>} : vector<1x128xbf16>, vector<128x128xbf16>, vector<1x128xf32> -> vector<1x128xf32>
    %53 = arith.addf %48, %52 : vector<1x128xf32>
    %54 = vector.extract_strided_slice %43 {offsets = [2, 0], sizes = [1, 128], strides = [1, 1]} : vector<3x128xbf16> to vector<1x128xbf16>
    %c8 = arith.constant 8 : index
    %c0_34 = arith.constant 0 : index
    %c0_35 = arith.constant 0 : index
    %55 = vector.load %arg3[%c8, %c0_34, %c0_35] : memref<9x128x128xbf16, #tpu.memory_space<vmem>>, vector<1x128x128xbf16>
    %56 = vector.shape_cast %55 : vector<1x128x128xbf16> to vector<128x128xbf16>
    %cst_36 = arith.constant dense<0.000000e+00> : vector<1x128xf32>
    %57 = tpu.matmul %54, %56, %cst_36 {dimension_numbers = #tpu.dot_dimension_numbers<[1], [0], [0], [1], [0, 0, 1, 1], [], []>} : vector<1x128xbf16>, vector<128x128xbf16>, vector<1x128xf32> -> vector<1x128xf32>
    %58 = arith.addf %53, %57 : vector<1x128xf32>
    %c2_i32_37 = arith.constant 2 : i32
    %59 = arith.muli %arg1, %c2_i32_37 : i32
    %c0_i32_38 = arith.constant 0 : i32
    %60 = arith.addi %59, %c0_i32_38 : i32
    %c0_39 = arith.constant 0 : index
    %61 = arith.index_cast %60 : i32 to index
    %c0_40 = arith.constant 0 : index
    %c0_41 = arith.constant 0 : index
    %62 = vector.load %arg4[%c0_39, %61, %c0_40, %c0_41] : memref<1x1x1x256xbf16, #tpu.memory_space<vmem>>, vector<1x1x1x256xbf16>
    %63 = vector.shape_cast %62 : vector<1x1x1x256xbf16> to vector<1x256xbf16>
    %64 = vector.extract_strided_slice %63 {offsets = [0, 0], sizes = [1, 64], strides = [1, 1]} : vector<1x256xbf16> to vector<1x64xbf16>
    %c0_42 = arith.constant 0 : index
    %c0_43 = arith.constant 0 : index
    %c0_44 = arith.constant 0 : index
    %65 = vector.load %arg5[%c0_42, %c0_43, %c0_44] : memref<1x64x128xbf16, #tpu.memory_space<vmem>>, vector<1x64x128xbf16>
    %66 = vector.shape_cast %65 : vector<1x64x128xbf16> to vector<64x128xbf16>
    %cst_45 = arith.constant dense<0.000000e+00> : vector<1x128xf32>
    %67 = tpu.matmul %64, %66, %cst_45 {dimension_numbers = #tpu.dot_dimension_numbers<[1], [0], [0], [1], [0, 0, 1, 1], [], []>} : vector<1x64xbf16>, vector<64x128xbf16>, vector<1x128xf32> -> vector<1x128xf32>
    %68 = arith.addf %58, %67 : vector<1x128xf32>
    %c0_46 = arith.constant 0 : index
    %c0_47 = arith.constant 0 : index
    %69 = vector.load %arg6[%c0_46, %c0_47] : memref<1x128xf32, #tpu.memory_space<vmem>>, vector<1x128xf32>
    %70 = arith.addf %68, %69 : vector<1x128xf32>
    %cst_48 = arith.constant 0.000000e+00 : f32
    %71 = vector.broadcast %cst_48 : f32 to vector<1x128xf32>
    %72 = arith.maximumf %70, %71 : vector<1x128xf32>
    %73 = arith.truncf %72 : vector<1x128xf32> to vector<1x128xbf16>
    %c0_49 = arith.constant 0 : index
    %c0_50 = arith.constant 0 : index
    %c0_51 = arith.constant 0 : index
    %c0_52 = arith.constant 0 : index
    %74 = vector.load %arg7[%c0_49, %c0_50, %c0_51, %c0_52] : memref<1x1x1x128xbf16, #tpu.memory_space<vmem>>, vector<1x1x1x128xbf16>
    %75 = vector.shape_cast %74 : vector<1x1x1x128xbf16> to vector<1x128xbf16>
    %76 = vector.shape_cast %73 : vector<1x128xbf16> to vector<1x1x1x128xbf16>
    tpu.vector_store %arg7[%c0_49, %c0_50, %c0_51, %c0_52], %76 {strides = array<i32>} : memref<1x1x1x128xbf16, #tpu.memory_space<vmem>>, vector<1x1x1x128xbf16>,
    return
  }
  func.func @transform_0(%arg0: i32, %arg1: i32) -> (i32, i32, i32, i32) {
    %c0_i32 = arith.constant 0 : i32
    %c0_i32_0 = arith.constant 0 : i32
    %c0_i32_1 = arith.constant 0 : i32
    %c0_i32_2 = arith.constant 0 : i32
    return %arg0, %c0_i32, %c0_i32_0, %c0_i32_1 : i32, i32, i32, i32
  }
  func.func @transform_1(%arg0: i32, %arg1: i32) -> (i32, i32, i32) {
    %c0_i32 = arith.constant 0 : i32
    %c0_i32_0 = arith.constant 0 : i32
    %c0_i32_1 = arith.constant 0 : i32
    %c0_i32_2 = arith.constant 0 : i32
    return %c0_i32, %c0_i32_0, %c0_i32_1 : i32, i32, i32
  }
  func.func @transform_2(%arg0: i32, %arg1: i32) -> (i32, i32, i32, i32) {
    %c0_i32 = arith.constant 0 : i32
    %c0_i32_0 = arith.constant 0 : i32
    %c0_i32_1 = arith.constant 0 : i32
    %c0_i32_2 = arith.constant 0 : i32
    return %arg0, %c0_i32, %c0_i32_0, %c0_i32_1 : i32, i32, i32, i32
  }
  func.func @transform_3(%arg0: i32, %arg1: i32) -> (i32, i32, i32) {
    %c0_i32 = arith.constant 0 : i32
    %c0_i32_0 = arith.constant 0 : i32
    %c0_i32_1 = arith.constant 0 : i32
    %c0_i32_2 = arith.constant 0 : i32
    return %c0_i32, %c0_i32_0, %c0_i32_1 : i32, i32, i32
  }
  func.func @transform_4(%arg0: i32, %arg1: i32) -> (i32, i32) {
    %c0_i32 = arith.constant 0 : i32
    %c0_i32_0 = arith.constant 0 : i32
    %c0_i32_1 = arith.constant 0 : i32
    return %c0_i32, %c0_i32_0 : i32, i32
  }
  func.func @transform_5(%arg0: i32, %arg1: i32) -> (i32, i32, i32, i32) {
    %c0_i32 = arith.constant 0 : i32
    %c0_i32_0 = arith.constant 0 : i32
    %c0_i32_1 = arith.constant 0 : i32
    return %arg0, %arg1, %c0_i32, %c0_i32_0 : i32, i32, i32, i32
  }
}

</mosaic_0001>

<bundles_post_ra>
// kernel: resnet_forward.11
= control target key start
LH: loop header
LB: loop body
LE: loop exit
PB: predicated region body
PF: predicated region fallthrough
CT: control target
= control target key end

     0   :  { %s404_s6 = smov 0   ;;  %s406_s7 = smov 0   ;;  %s464_s0 = inlined_call_operand.vmem [shape: bf16[2,10,5,256], index: 0, kind: input, shape index: {}]   ;;  %s465_s1 = inlined_call_operand.vmem [shape: bf16[2,4,4,128], index: 1, kind: output, shape index: {}]  }
   0x1   :  { %s408_s8 = smov 0   ;;  %s410_s9 = smov 0  }
   0x2   :  { %s412_s10 = smov 0  }
   0x3 LB: > { %s20_s11 = sadd.s32 1, %s384_s8  ;;  %s23_s12 = sadd.s32 1, %s388_s9  ;;  %s392_s10 = sphi %s412_s10, %s11_s10   ;;  %s388_s9 = sphi %s410_s9, %s469_s9   ;;  %s384_s8 = sphi %s408_s8, %s468_s8   ;;  %s380_s7 = sphi %s406_s7, %s467_s7   ;;  %s376_s6 = sphi %s404_s6, %s466_s6  }
   0x4   : > { %p21_p0 = scmp.ge.s32.totalorder %s20_s11, 4  ;;  %p294_p1 = scmp.ge.s32.totalorder %s392_s10, 1 }
   0x5   : > { %p101_p2 = scmp.lt.s32.totalorder %s392_s10, 9 }
   0x6   : > { %s471_s11 = smov (%p21_p0, %s20_s11), 0  ;;  %s473_s12 = smov (!%p21_p0, %s23_s12), %s388_s9 }
   0x7   : > { %p102_p3 = pnand %p294_p1, %p101_p2  ;;  %p25_p4 = scmp.ge.s32.totalorder %s473_s12, 2 }
   0x8   : > { %p124_p5 = scmp.lt.s32.totalorder (!%p102_p3), %s380_s7, 1  ;;  %s310_s14 = sshll.u32 (!%p102_p3), %s376_s6, 4 }
   0x9   : > { %s475_s12 = smov (%p25_p4, %s473_s12), 0  ;;  %105 = sbr.rel (%p102_p3) target bundleno = 45 (0x2d), region = 24 }
   0xa   : > { %p131_p6 = scmp.lt.s32.totalorder (!%p102_p3), %s376_s6, 3 }
  0x10   : > { %s477_s7 = smov (!%p124_p5, %s380_s7), 1  ;;  %s479_s6 = smov (!%p131_p6, %s376_s6), 3 }
  0x11   : > { %s313_s13 = smul.u32 80, %s477_s7  ;;  %s296_s19 = sshll.u32 %s477_s7, 2 }
  0x12   : > { %s134_s20 = sadd.s32 %s296_s19, %s479_s6 }
  0x13   : > { %s128_s17 = scalar_lea.vmem %s464_s0, %s313_s13  ;;  %s297_s21 = sshll.u32 %s134_s20, 1 }
  0x14   : > { %s140_s18 = scalar_lea.vmem %s128_s17, %s310_s14  ;;  %s136_s24 = scalar_lea.vmem %s465_s1, %s297_s21 }
  0x15   : > { %v141_v0 = vld [vmem:[%s140_s18] sm:$0x77]  ;;  %v303_v1 = vld [vmem:[%s140_s18 + $0x8] sm:$0x77]  ;;  %v306_v7 = vld [vmem:[%s140_s18 + $0x10] sm:$0x77] }
  0x16   : > { %v143_v2 = vrot.slane %v141_v0, 4  ;;  %v147_v3 = vshrl.u32 %v141_v0, 16  ;;  %v150_v4 = vshll.u32 %v141_v0, 16  ;;  %v168_v5 = vshrl.u32 %v303_v1, 16 }
  0x17   : > { %v171_v6 = vshll.u32 %v303_v1, 16  ;;  %v189_v14 = vshrl.u32 %v306_v7, 16  ;;  %v192_v15 = vshll.u32 %v306_v7, 16  ;;  %v164_v19 = vrot.slane %v303_v1, 4 }
  0x18   : > { %v149_v8 = vrot.slane %v147_v3, 4  ;;  %v152_v9 = vrot.slane %v150_v4, 5  ;;  %v170_v10 = vrot.slane %v168_v5, 4  ;;  %v145_v12 = vmax.bf16 %v143_v2, %v141_v0 }
  0x19   : > { %v173_v11 = vrot.slane %v171_v6, 5  ;;  %v191_v20 = vrot.slane %v189_v14, 4  ;;  %v194_v21 = vrot.slane %v192_v15, 5  ;;  %v185_v27 = vrot.slane %v306_v7, 4 }
  0x1a   : > { %v153_v13 = vor.u32 %v152_v9, %v149_v8 }
  0x1b   : > { %v174_v17 = vor.u32 %v173_v11, %v170_v10  ;;  %v195_v25 = vor.u32 %v194_v21, %v191_v20 }
  0x1c   : > { %v154_v16 = vrot.slane %v153_v13, 4 }
  0x1d   : > { %v175_v23 = vrot.slane %v174_v17, 4  ;;  %v196_v29 = vrot.slane %v195_v25, 4 }
  0x1e   : > { %v156_v18 = vmax.bf16 %v154_v16, %v145_v12 }
  0x20   : > { %v162_v22 = vmax.bf16 %v303_v1, %v156_v18 }
  0x22   : > { %v166_v24 = vmax.bf16 %v164_v19, %v162_v22 }
  0x24   : > { %v177_v26 = vmax.bf16 %v175_v23, %v166_v24 }
  0x26   : > { %v183_v28 = vmax.bf16 %v306_v7, %v177_v26 }
  0x28   : > { %v187_v30 = vmax.bf16 %v185_v27, %v183_v28 }
  0x2a   : > { %v198_v31 = vmax.bf16 %v196_v29, %v187_v30 }
  0x2c   : > { %199 = vst [vmem:[%s136_s24] sm:$0x3] %v198_v31 }
  0x2d PF: > { %s11_s10 = sadd.s32 1, %s392_s10   ;;  %s466_s6 = smov %s384_s8 }
  0x2e   : > { %p8_p7 = scmp.ge.s32.totalorder %s11_s10, 10   ;;  %s467_s7 = smov %s388_s9 }
  0x2f   : > { %s468_s8 = smov %s471_s11  ;;  %s469_s9 = smov %s475_s12 }
  0x30   :  { %10 = sbr.rel (!%p8_p7) target bundleno = 3 (0x3), region = 57 }

// kernel: resnet_forward.12
= control target key start
LH: loop header
LB: loop body
LE: loop exit
PB: predicated region body
PF: predicated region fallthrough
CT: control target
= control target key end

     0   :  { %s1451_s12 = smov 0   ;;  %s1453_s13 = smov 0   ;;  %s1690_s0 = inlined_call_operand.vmem [shape: bf16[2,6,6,128], index: 0, kind: input, shape index: {}]   ;;  %s1691_s1 = inlined_call_operand.vmem [shape: bf16[9,64,128], index: 1, kind: input, shape index: {}]   ;;  %s1692_s2 = inlined_call_operand.vmem [shape: f32[1,128], index: 2, kind: input, shape index: {}]   ;;  %s1693_s3 = inlined_call_operand.vmem [shape: bf16[2,4,4,128], index: 3, kind: output, shape index: {}]  }
   0x1   :  { %s1455_s14 = smov 0   ;;  %s1457_s15 = smov 0  }
   0x2   :  { %s1459_s16 = smov 0  }
   0x3 LB: > { %s22_s17 = sadd.s32 1, %s1419_s14  ;;  %s25_s18 = sadd.s32 1, %s1423_s15  ;;  %s1427_s16 = sphi %s1459_s16, %s13_s16   ;;  %s1423_s15 = sphi %s1457_s15, %s1697_s15   ;;  %s1419_s14 = sphi %s1455_s14, %s1696_s14   ;;  %s1415_s13 = sphi %s1453_s13, %s1695_s13   ;;  %s1411_s12 = sphi %s1451_s12, %s1694_s12  }
   0x4   : > { %p23_p0 = scmp.ge.s32.totalorder %s22_s17, 4  ;;  %p1030_p1 = scmp.ge.s32.totalorder %s1427_s16, 1 }
   0x5   : > { %p151_p2 = scmp.lt.s32.totalorder %s1427_s16, 9 }
   0x6   : > { %s1699_s17 = smov (%p23_p0, %s22_s17), 0  ;;  %s1701_s18 = smov (!%p23_p0, %s25_s18), %s1423_s15 }
   0x7   : > { %p152_p3 = pnand %p1030_p1, %p151_p2  ;;  %p27_p4 = scmp.ge.s32.totalorder %s1701_s18, 2 }
   0x8   : > { %v1350_v0 = vld [vmem:[%s1691_s1 + $0x20] sm:$0xff] (!%p152_p3)   ;;  %v1429_v1 = vmov (!%p152_p3), 0.0   ;;  %v1352_v3 = vld [vmem:[%s1691_s1 + $0x28] sm:$0xff] (!%p152_p3)   ;;  %vm1430_vm0 = vmmov (!%p152_p3), 0   ;;  %p178_p5 = scmp.lt.s32.totalorder (!%p152_p3), %s1415_s13, 1  ;;  %s1034_s27 = sshll.u32 (!%p152_p3), %s1411_s12, 2 }
   0x9   : > { %s1703_s18 = smov (%p27_p4, %s1701_s18), 0  ;;  %155 = sbr.rel (%p152_p3) target bundleno = 315 (0x13b), region = 32 }
   0xa   : > { %1199 = vmatprep.subr.bf16.mxu0 (!%p152_p3), %v1429_v1  ;;  %1211 = vmatprep.subr.bf16.mxu1 (!%p152_p3), %v1429_v1  ;;  %v1351_v2 = vld [vmem:[%s1691_s1] sm:$0xff] (!%p152_p3)   ;;  %v1353_v4 = vld [vmem:[%s1691_s1 + $0x8] sm:$0xff] (!%p152_p3)   ;;  %v1354_v5 = vld [vmem:[%s1691_s1 + $0x30] sm:$0xff] (!%p152_p3)   ;;  %vm246_vm1 = vcmask (!%p152_p3), 523264   ;;  %p185_p6 = scmp.lt.s32.totalorder (!%p152_p3), %s1411_s12, 3 }
   0xb   : > { %1200 = vmatpush3.bf16.msra.mxu0 (!%p152_p3), %v1350_v0  ;;  %1207 = vmatprep.mubr.msk.bf16.mxu0 (!%p152_p3), %vm1430_vm0, %v1429_v1  ;;  %v1355_v6 = vld [vmem:[%s1691_s1 + $0x10] sm:$0xff] (!%p152_p3)   ;;  %v1356_v7 = vld [vmem:[%s1691_s1 + $0x38] sm:$0xff] (!%p152_p3)   ;;  %v1360_v14 = vld [vmem:[%s1691_s1 + $0x60] sm:$0xff] (!%p152_p3)  }
   0xc   : > { %1212 = vmatpush3.bf16.msra.mxu1 (!%p152_p3), %v1351_v2  ;;  %1201 = vmatprep.subr.bf16.mxu0 (!%p152_p3), %v1429_v1  ;;  %v1357_v9 = vld [vmem:[%s1691_s1 + $0x18] sm:$0xff] (!%p152_p3)   ;;  %v1359_v15 = vld [vmem:[%s1691_s1 + $0x40] sm:$0xff] (!%p152_p3)   ;;  %v1362_v17 = vld [vmem:[%s1691_s1 + $0x68] sm:$0xff] (!%p152_p3)  }
   0xd   : > { %1213 = vmatprep.subr.bf16.mxu1 (!%p152_p3), %v1429_v1  ;;  %1219 = vmatprep.mubr.msk.bf16.mxu1 (!%p152_p3), %vm1430_vm0, %v1429_v1  ;;  %v1361_v18 = vld [vmem:[%s1691_s1 + $0x48] sm:$0xff] (!%p152_p3)   ;;  %v1364_v19 = vld [vmem:[%s1691_s1 + $0x70] sm:$0xff] (!%p152_p3)   ;;  %v1366_v21 = vld [vmem:[%s1691_s1 + $0x78] sm:$0xff] (!%p152_p3)  }
   0xe   : > { %v1363_v20 = vld [vmem:[%s1691_s1 + $0x50] sm:$0xff] (!%p152_p3)   ;;  %v1365_v22 = vld [vmem:[%s1691_s1 + $0x58] sm:$0xff] (!%p152_p3)   ;;  %v1369_v25 = vld [vmem:[%s1691_s1 + $0xa0] sm:$0xff] (!%p152_p3)  }
   0xf   : > { %1202 = vmatpush3.bf16.msra.mxu0 (!%p152_p3), %v1352_v3  ;;  %v1367_v26 = vld [vmem:[%s1691_s1 + $0x80] sm:$0xff] (!%p152_p3)   ;;  %v1371_v28 = vld [vmem:[%s1691_s1 + $0xa8] sm:$0xff] (!%p152_p3)   ;;  %v1373_v31 = vld [vmem:[%s1691_s1 + $0xb0] sm:$0xff] (!%p152_p3)  }
  0x10   : > { %s1705_s13 = smov (!%p178_p5, %s1415_s13), 1  ;;  %1214 = vmatpush3.bf16.msra.mxu1 %v1353_v4  ;;  %1203 = vmatprep.subr.bf16.mxu0 %v1429_v1  ;;  %v1370_v29 = vld [vmem:[%s1691_s1 + $0x88] sm:$0xff]   ;;  %v1372_v32 = vld [vmem:[%s1691_s1 + $0x90] sm:$0xff]   ;;  %v1375_v35 = vld [vmem:[%s1691_s1 + $0xb8] sm:$0xff]   ;;  %s1707_s12 = smov (!%p185_p6, %s1411_s12), 3 }
  0x11   : > { %s1307_s30 = smul.u32 24, %s1705_s13  ;;  %1215 = vmatprep.subr.bf16.mxu1 %v1429_v1  ;;  %v1374_v36 = vld [vmem:[%s1691_s1 + $0x98] sm:$0xff]   ;;  %v1377_v39 = vld [vmem:[%s1691_s1 + $0xe0] sm:$0xff]   ;;  %v1379_v43 = vld [vmem:[%s1691_s1 + $0xe8] sm:$0xff]   ;;  %s1032_s19 = sshll.u32 %s1705_s13, 2 }
  0x12   : > { %v1376_v41 = vld [vmem:[%s1691_s1 + $0xc0] sm:$0xff]   ;;  %v1378_v44 = vld [vmem:[%s1691_s1 + $0xc8] sm:$0xff]   ;;  %v1381_v46 = vld [vmem:[%s1691_s1 + $0xf0] sm:$0xff]   ;;  %s188_s20 = sadd.s32 %s1032_s19, %s1707_s12 }
  0x13   : > { %s182_s8 = scalar_lea.vmem %s1690_s0, %s1307_s30  ;;  %1204 = vmatpush3.bf16.msra.mxu0 %v1354_v5  ;;  %v1380_v47 = vld [vmem:[%s1691_s1 + $0xd0] sm:$0xff]   ;;  %v1383_v50 = vld [vmem:[%s1691_s1 + $0xf8] sm:$0xff]   ;;  %v1385_v53 = vld [vmem:[%s1691_s1 + $0x100] sm:$0xff]   ;;  %s1033_s22 = sshll.u32 %s188_s20, 1 }
  0x14   : > { %s1521_s11 = scalar_lea.vmem %s182_s8, %s1034_s27  ;;  %1216 = vmatpush3.bf16.msra.mxu1 %v1355_v6  ;;  %1205 = vmatprep.subr.bf16.mxu0 %v1429_v1  ;;  %v1382_v51 = vld [vmem:[%s1691_s1 + $0xd8] sm:$0xff]   ;;  %v1386_v54 = vld [vmem:[%s1691_s1 + $0x108] sm:$0xff]   ;;  %v1387_v55 = vld [vmem:[%s1691_s1 + $0x110] sm:$0xff]   ;;  %s190_s25 = scalar_lea.vmem %s1693_s3, %s1033_s22 }
  0x15   : > { %v194_v8 = vld [vmem:[%s1521_s11] sm:$0x7]  ;;  %1217 = vmatprep.subr.bf16.mxu1 %v1429_v1  ;;  %v1068_v23 = vld [vmem:[%s1521_s11 + $0x4] sm:$0x7]  ;;  %v1110_v40 = vld [vmem:[%s1521_s11 + $0x8] sm:$0x7] }
  0x16   : > { %v1043_v10 = vcombine.low %v194_v8, %v194_v8  ;;  %v1090_v27 = vcombine.low %v1068_v23, %v1068_v23  ;;  %v1132_v42 = vcombine.low %v1110_v40, %v1110_v40  ;;  %v1388_v56 = vld [vmem:[%s1691_s1 + $0x118] sm:$0xff]  }
  0x17   : > { %1206 = vmatpush3.bf16.msra.mxu0 %v1356_v7 }
  0x18   : > { %v216_v11 = vshrl.u32 %v1043_v10, 16  ;;  %v218_v12 = vshll.u32 %v1043_v10, 16  ;;  %1218 = vmatpush3.bf16.msra.mxu1 %v1357_v9  ;;  %1223 = vmatprep.subr.bf16.mxu0 %v1429_v1  ;;  %v366_v24 = vrot.slane %v1043_v10, 1  ;;  %v531_v30 = vshll.u32 %v1090_v27, 16 }
  0x19   : > { %1235 = vmatprep.subr.bf16.mxu1 %v1429_v1  ;;  %v529_v33 = vshrl.u32 %v1090_v27, 16  ;;  %v612_v37 = vrot.slane %v1090_v27, 1  ;;  %v777_v45 = vshll.u32 %v1132_v42, 16  ;;  %v775_v48 = vshrl.u32 %v1132_v42, 16 }
  0x1a   : > { %v220_v13 = vrot.slane %v218_v12, 1  ;;  %v533_v34 = vrot.slane %v531_v30, 1  ;;  %v858_v57 = vrot.slane %v1132_v42, 1 }
  0x1b   : > { %1220 = vmatmul.mubr.msk.bf16.vlgmr.msra.gmra.mrb[0].mxu1 %vm246_vm1, %v194_v8  ;;  %v779_v49 = vrot.slane %v777_v45, 1 }
  0x1c   : > { %v221_v16 = vor.u32 %v220_v13, %v216_v11  ;;  %1236 = vmatpush3.bf16.msra.mxu1 %v1360_v14  ;;  %1243 = vmatprep.mubr.msk.bf16.mxu1 %vm1430_vm0, %v1429_v1  ;;  %v534_v38 = vor.u32 %v533_v34, %v529_v33  ;;  %v1151_v34 = vld [vmem:[%s1692_s2] ss:$0 sm:$0xff] }
  0x1d   : > { %1237 = vmatprep.subr.bf16.mxu1 %v1429_v1  ;;  %v780_v52 = vor.u32 %v779_v49, %v775_v48 }
  0x1e   : > { %1208 = vmatmul.mubr.msk.bf16.vlgmr.msra.gmra.mrb[0].mxu0 %vm246_vm1, %v221_v16 }
  0x1f   : > { %1224 = vmatpush3.bf16.msra.mxu0 %v1359_v15  ;;  %1231 = vmatprep.mubr.msk.bf16.mxu0 %vm1430_vm0, %v1429_v1 }
  0x20   : > { %1225 = vmatprep.subr.bf16.mxu0 %v1429_v1  ;;  %1238 = vmatpush3.bf16.msra.mxu1 %v1362_v17 }
  0x21   : > { %1239 = vmatprep.subr.bf16.mxu1 %v1429_v1 }
  0x23   : > { %1226 = vmatpush3.bf16.msra.mxu0 %v1361_v18 }
  0x24   : > { %1227 = vmatprep.subr.bf16.mxu0 %v1429_v1  ;;  %1240 = vmatpush3.bf16.msra.mxu1 %v1364_v19 }
  0x25   : > { %1241 = vmatprep.subr.bf16.mxu1 %v1429_v1 }
  0x27   : > { %1228 = vmatpush3.bf16.msra.mxu0 %v1363_v20 }
  0x28   : > { %1229 = vmatprep.subr.bf16.mxu0 %v1429_v1  ;;  %1242 = vmatpush3.bf16.msra.mxu1 %v1366_v21 }
  0x29   : > { %1259 = vmatprep.subr.bf16.mxu1 %v1429_v1 }
  0x2b   : > { %1230 = vmatpush3.bf16.msra.mxu0 %v1365_v22  ;;  %1244 = vmatmul.mubr.msk.bf16.vlgmr.msra.gmra.mrb[4].mxu1 %vm246_vm1, %v1068_v23 }
  0x2c   : > { %1247 = vmatprep.subr.bf16.mxu0 %v1429_v1  ;;  %1260 = vmatpush3.bf16.msra.mxu1 %v1369_v25 }
  0x2d   : > { %1261 = vmatprep.subr.bf16.mxu1 %v1429_v1  ;;  %1267 = vmatprep.mubr.msk.bf16.mxu1 %vm1430_vm0, %v1429_v1 }
  0x2e   : > { %1232 = vmatmul.mubr.msk.bf16.vlgmr.msra.gmra.mrb[4].mxu0 %vm246_vm1, %v366_v24 }
  0x2f   : > { %1248 = vmatpush3.bf16.msra.mxu0 %v1367_v26  ;;  %1255 = vmatprep.mubr.msk.bf16.mxu0 %vm1430_vm0, %v1429_v1 }
  0x30   : > { %1249 = vmatprep.subr.bf16.mxu0 %v1429_v1  ;;  %1262 = vmatpush3.bf16.msra.mxu1 %v1371_v28 }
  0x31   : > { %1263 = vmatprep.subr.bf16.mxu1 %v1429_v1 }
  0x33   : > { %1250 = vmatpush3.bf16.msra.mxu0 %v1370_v29 }
  0x34   : > { %1251 = vmatprep.subr.bf16.mxu0 %v1429_v1  ;;  %1264 = vmatpush3.bf16.msra.mxu1 %v1373_v31 }
  0x35   : > { %1265 = vmatprep.subr.bf16.mxu1 %v1429_v1 }
  0x37   : > { %1252 = vmatpush3.bf16.msra.mxu0 %v1372_v32 }
  0x38   : > { %1253 = vmatprep.subr.bf16.mxu0 %v1429_v1  ;;  %1266 = vmatpush3.bf16.msra.mxu1 %v1375_v35 }
  0x39   : > { %1283 = vmatprep.subr.bf16.mxu1 %v1429_v1 }
  0x3b   : > { %1254 = vmatpush3.bf16.msra.mxu0 %v1374_v36  ;;  %1268 = vmatmul.mubr.msk.bf16.vlgmr.msra.gmra.mrb[8].mxu1 %vm246_vm1, %v612_v37 }
  0x3c   : > { %1271 = vmatprep.subr.bf16.mxu0 %v1429_v1  ;;  %1284 = vmatpush3.bf16.msra.mxu1 %v1377_v39 }
  0x3d   : > { %1285 = vmatprep.subr.bf16.mxu1 %v1429_v1  ;;  %1291 = vmatprep.mubr.msk.bf16.mxu1 %vm1430_vm0, %v1429_v1 }
  0x3e   : > { %1256 = vmatmul.mubr.msk.bf16.vlgmr.msra.gmra.mrb[8].mxu0 %vm246_vm1, %v534_v38 }
  0x3f   : > { %1272 = vmatpush3.bf16.msra.mxu0 %v1376_v41  ;;  %1279 = vmatprep.mubr.msk.bf16.mxu0 %vm1430_vm0, %v1429_v1 }
  0x40   : > { %1273 = vmatprep.subr.bf16.mxu0 %v1429_v1  ;;  %1286 = vmatpush3.bf16.msra.mxu1 %v1379_v43 }
  0x41   : > { %1287 = vmatprep.subr.bf16.mxu1 %v1429_v1 }
  0x43   : > { %1274 = vmatpush3.bf16.msra.mxu0 %v1378_v44 }
  0x44   : > { %1275 = vmatprep.subr.bf16.mxu0 %v1429_v1  ;;  %1288 = vmatpush3.bf16.msra.mxu1 %v1381_v46 }
  0x45   : > { %1289 = vmatprep.subr.bf16.mxu1 %v1429_v1 }
  0x47   : > { %1276 = vmatpush3.bf16.msra.mxu0 %v1380_v47 }
  0x48   : > { %1277 = vmatprep.subr.bf16.mxu0 %v1429_v1  ;;  %1290 = vmatpush3.bf16.msra.mxu1 %v1383_v50 }
  0x4b   : > { %1278 = vmatpush3.bf16.msra.mxu0 %v1382_v51  ;;  %1292 = vmatmul.mubr.msk.bf16.vlgmr.msra.gmra.mrb[12].mxu1 %vm246_vm1, %v780_v52 }
  0x4c   : > { %1295 = vmatprep.subr.bf16.mxu0 %v1429_v1 }
  0x4e   : > { %1280 = vmatmul.mubr.msk.bf16.vlgmr.msra.gmra.mrb[12].mxu0 %vm246_vm1, %v1110_v40 }
  0x4f   : > { %1296 = vmatpush3.bf16.msra.mxu0 %v1385_v53  ;;  %1303 = vmatprep.mubr.msk.bf16.mxu0 %vm1430_vm0, %v1429_v1 }
  0x50   : > { %1297 = vmatprep.subr.bf16.mxu0 %v1429_v1 }
  0x53   : > { %1298 = vmatpush3.bf16.msra.mxu0 %v1386_v54 }
  0x54   : > { %1299 = vmatprep.subr.bf16.mxu0 %v1429_v1 }
  0x57   : > { %1300 = vmatpush3.bf16.msra.mxu0 %v1387_v55 }
  0x58   : > { %1301 = vmatprep.subr.bf16.mxu0 %v1429_v1 }
  0x5b   : > { %1302 = vmatpush3.bf16.msra.mxu0 %v1388_v56 }
  0x5e   : > { %1304 = vmatmul.mubr.msk.bf16.vlgmr.msra.gmra.mrb[16].mxu0 %vm246_vm1, %v858_v57 }
  0xee   : > { %v351_v58 = vpop.f32.mrb[0].mxu1 }
  0xef   : > { %v1221_v60 = vpop.f32.mrb[1].mxu1 }
  0xf0   : > { %v354_v63 = vpop.f32.mrb[2].mxu1 }
  0xf1   : > { %v284_v59 = vpop.f32.mrb[0].mxu0  ;;  %v1222_v2 = vpop.f32.mrb[3].mxu1 }
  0xf2   : > { %v1209_v61 = vpop.f32.mrb[1].mxu0  ;;  %v352_v62 = vadd.f32 %v351_v58, %v284_v59 }
  0xf3   : > { %v287_v0 = vpop.f32.mrb[2].mxu0 }
  0xf4   : > { %v1210_v3 = vpop.f32.mrb[3].mxu0 }
  0xfe   : > { %v509_v4 = vpop.f32.mrb[4].mxu1 }
  0xff   : > { %v1245_v6 = vpop.f32.mrb[5].mxu1 }
 0x100   : > { %v512_v9 = vpop.f32.mrb[6].mxu1 }
 0x101   : > { %v428_v5 = vpop.f32.mrb[4].mxu0  ;;  %v1246_v10 = vpop.f32.mrb[7].mxu1 }
 0x102   : > { %v434_v7 = vadd.f32 %v428_v5, %v352_v62  ;;  %v1233_v8 = vpop.f32.mrb[5].mxu0 }
 0x103   : > { %v431_v1 = vpop.f32.mrb[6].mxu0 }
 0x104   : > { %v515_v11 = vadd.f32 %v509_v4, %v434_v7  ;;  %v1234_v12 = vpop.f32.mrb[7].mxu0 }
 0x10e   : > { %v674_v13 = vpop.f32.mrb[8].mxu1 }
 0x10f   : > { %v1269_v15 = vpop.f32.mrb[9].mxu1 }
 0x110   : > { %v677_v18 = vpop.f32.mrb[10].mxu1 }
 0x111   : > { %v596_v14 = vpop.f32.mrb[8].mxu0  ;;  %v1270_v20 = vpop.f32.mrb[11].mxu1 }
 0x112   : > { %v602_v16 = vadd.f32 %v596_v14, %v515_v11  ;;  %v1257_v17 = vpop.f32.mrb[9].mxu0 }
 0x113   : > { %v599_v19 = vpop.f32.mrb[10].mxu0 }
 0x114   : > { %v680_v21 = vadd.f32 %v674_v13, %v602_v16  ;;  %v1258_v22 = vpop.f32.mrb[11].mxu0 }
 0x11e   : > { %v842_v23 = vpop.f32.mrb[12].mxu1 }
 0x11f   : > { %v1293_v25 = vpop.f32.mrb[13].mxu1 }
 0x120   : > { %v845_v28 = vpop.f32.mrb[14].mxu1 }
 0x121   : > { %v755_v24 = vpop.f32.mrb[12].mxu0  ;;  %v1294_v30 = vpop.f32.mrb[15].mxu1 }
 0x122   : > { %v761_v26 = vadd.f32 %v755_v24, %v680_v21  ;;  %v1281_v27 = vpop.f32.mrb[13].mxu0 }
 0x123   : > { %v758_v29 = vpop.f32.mrb[14].mxu0 }
 0x124   : > { %v848_v31 = vadd.f32 %v842_v23, %v761_v26  ;;  %v1282_v32 = vpop.f32.mrb[15].mxu0 }
 0x131   : > { %v920_v33 = vpop.f32.mrb[16].mxu0 }
 0x132   : > { %v926_v35 = vadd.f32 %v920_v33, %v848_v31  ;;  %v1305_v36 = vpop.f32.mrb[17].mxu0 }
 0x133   : > { %v923_v37 = vpop.f32.mrb[18].mxu0 }
 0x134   : > { %v934_v38 = vadd.f32 %v1151_v34, %v926_v35  ;;  %v1306_v39 = vpop.f32.mrb[19].mxu0 }
 0x136   : > { %v935_v40 = vmax.f32 %v934_v38, 0.0 }
 0x138   : > { %v936_v41 = vpack.c.bf16 %v935_v40, %v935_v40 }
 0x13a   : > { %937 = vst [vmem:[%s190_s25] sm:$0x3] %v936_v41 }
 0x13b PF: > { %s13_s16 = sadd.s32 1, %s1427_s16   ;;  %s1694_s12 = smov %s1419_s14 }
 0x13c   : > { %p10_p7 = scmp.ge.s32.totalorder %s13_s16, 10   ;;  %s1695_s13 = smov %s1423_s15 }
 0x13d   : > { %s1696_s14 = smov %s1699_s17  ;;  %s1697_s15 = smov %s1703_s18 }
 0x13e   :  { %12 = sbr.rel (!%p10_p7) target bundleno = 3 (0x3), region = 73 }

// kernel: resnet_forward.10
= control target key start
LH: loop header
LB: loop body
LE: loop exit
PB: predicated region body
PF: predicated region fallthrough
CT: control target
= control target key end

     0   :  { %s3587_s12 = smov 0   ;;  %s3589_s13 = smov 0   ;;  %s4274_s0 = inlined_call_operand.vmem [shape: bf16[2,22,11,6], index: 0, kind: input, shape index: {}]   ;;  %s4275_s1 = inlined_call_operand.vmem [shape: bf16[49,3,128], index: 1, kind: input, shape index: {}]   ;;  %s4276_s2 = inlined_call_operand.vmem [shape: f32[1,128], index: 2, kind: input, shape index: {}]   ;;  %s4277_s3 = inlined_call_operand.vmem [shape: bf16[2,8,8,128], index: 3, kind: output, shape index: {}]  }
   0x1   :  { %s3591_s14 = smov 0   ;;  %s3593_s15 = smov 0  }
   0x2   :  { %s3595_s16 = smov 0  }
   0x3 LB: > { %s22_s17 = sadd.s32 1, %s3553_s14  ;;  %s25_s18 = sadd.s32 1, %s3557_s15  ;;  %s3561_s16 = sphi %s3595_s16, %s13_s16   ;;  %s3557_s15 = sphi %s3593_s15, %s4281_s15   ;;  %s3553_s14 = sphi %s3591_s14, %s4280_s14   ;;  %s3549_s13 = sphi %s3589_s13, %s4279_s13   ;;  %s3545_s12 = sphi %s3587_s12, %s4278_s12  }
   0x4   : > { %p23_p0 = scmp.ge.s32.totalorder %s22_s17, 8  ;;  %p2919_p1 = scmp.ge.s32.totalorder %s3561_s16, 1 }
   0x5   : > { %p151_p2 = scmp.lt.s32.totalorder %s3561_s16, 17 }
   0x6   : > { %s4283_s17 = smov (%p23_p0, %s22_s17), 0  ;;  %s4285_s18 = smov (!%p23_p0, %s25_s18), %s3557_s15 }
   0x7   : > { %p152_p3 = pnand %p2919_p1, %p151_p2  ;;  %p27_p4 = scmp.ge.s32.totalorder %s4285_s18, 2 }
   0x8   : > { %p178_p5 = scmp.lt.s32.totalorder (!%p152_p3), %s3549_s13, 1  ;;  %v2926_v0 = vld [vmem:[%s4275_s1 + $0x2] sm:$0x3] (!%p152_p3)  ;;  %vm210_vm0 = vcmask (!%p152_p3), 1040384   ;;  %v3563_v1 = vmov (!%p152_p3), 0.0   ;;  %vm211_vm1 = vcmask (!%p152_p3), 1041408  }
   0x9   : > { %s4287_s18 = smov (%p27_p4, %s4285_s18), 0  ;;  %155 = sbr.rel (%p152_p3) target bundleno = 552 (0x228), region = 32 }
   0xa   : > { %3170 = vmatprep.subr.bf16.mxu0 (!%p152_p3), %v3563_v1  ;;  %3176 = vmatprep.subr.bf16.mxu1 (!%p152_p3), %v3563_v1  ;;  %v198_v2 = vld [vmem:[%s4275_s1] sm:$0x3] (!%p152_p3)  ;;  %v3564_v3 = vmov (!%p152_p3), 65535   ;;  %vm3565_vm2 = vmmov (!%p152_p3), 0   ;;  %v2933_v6 = vld [vmem:[%s4275_s1 + $0x6] sm:$0x3] (!%p152_p3) }
   0xb   : > { %v212_v4 = vsel (!%p152_p3), %vm210_vm0, 4294967295, %v3564_v3  ;;  %3172 = vmatprep.mubr.msk.bf16.mxu0 (!%p152_p3), %vm3565_vm2, %v3563_v1  ;;  %3178 = vmatprep.mubr.msk.bf16.mxu1 (!%p152_p3), %vm3565_vm2, %v3563_v1  ;;  %s3065_s26 = sshll.u32 (!%p152_p3), %s3545_s12, 4  ;;  %vm206_vm3 = vcmask (!%p152_p3), 23552   ;;  %s3566_s4 = smov (!%p152_p3), 125  }
   0xc   : > { %v3633_v5 = vsel (!%p152_p3), %vm211_vm1, %v212_v4, 0  ;;  %p185_p6 = scmp.lt.s32.totalorder (!%p152_p3), %s3545_s12, 7 }
   0xd   : > { %v215_v7 = vand.u32 (!%p152_p3), %v2926_v0, %v3633_v5  ;;  %v261_v8 = vand.u32 (!%p152_p3), %v3633_v5, %v198_v2  ;;  %v370_v9 = vand.u32 (!%p152_p3), %v2933_v6, %v3633_v5 }
   0xf   : > { %3171 = vmatpush3.bf16.msra.mxu0 (!%p152_p3), %v215_v7  ;;  %3177 = vmatpush3.bf16.msra.mxu1 (!%p152_p3), %v261_v8 }
  0x10   : > { %s4289_s13 = smov (!%p178_p5, %s3549_s13), 1  ;;  %3182 = vmatprep.subr.bf16.mxu0 %v3563_v1  ;;  %3188 = vmatprep.subr.bf16.mxu1 %v3563_v1  ;;  %s4291_s12 = smov (!%p185_p6, %s3545_s12), 7 }
  0x11   : > { %s3464_s25 = smul.u32 176, %s4289_s13  ;;  %s2921_s24 = sshll.u32 %s4289_s13, 3 }
  0x13   : > { %s182_s29 = scalar_lea.vmem %s4274_s0, %s3464_s25  ;;  %s188_s25 = sadd.s32 %s2921_s24, %s4291_s12 }
  0x14   : > { %s3646_s30 = scalar_lea.vmem %s182_s29, %s3065_s26  ;;  %s2922_s28 = sshll.u32 %s188_s25, 2 }
  0x15   : > { %v196_v10 = vld [vmem:[%s3646_s30] sm:$0xf]  ;;  %v197_v11 = vld [vmem:[%s3646_s30 + $0x4] sm:$0x3]  ;;  %v3653_v12 = vld [vmem:[%s3646_s30 + $0x8] sm:$0xf] }
  0x16   : > { %v2927_v13 = vcombine.low %v196_v10, %v196_v10  ;;  %v3655_v14 = vcombine.low %v196_v10, %v197_v11  ;;  %v2944_v15 = vld [vmem:[%s3646_s30 + $0xc] sm:$0x3]  ;;  %v3659_v16 = vld [vmem:[%s3646_s30 + $0x10] sm:$0xf]  ;;  %v2964_v17 = vld [vmem:[%s3646_s30 + $0x14] sm:$0x3]  ;;  %3179 = vmatmul.mubr.msk.bf16.vlgmr.msra.gmra.mrb[0].mxu1 %vm206_vm3, %v196_v10  ;;  %v2948_v23 = vcombine.low %v3653_v12, %v3653_v12 }
  0x17   : > { %v3664_v18 = vcombine.low %v3653_v12, %v2944_v15  ;;  %v3667_v19 = vcombine.low %v3659_v16, %v2964_v17  ;;  %3189 = vmatpush3.bf16.msra.mxu1 %v370_v9  ;;  %3190 = vmatprep.mubr.msk.bf16.mxu1 %vm3565_vm2, %v3563_v1  ;;  %v2984_v31 = vld [vmem:[%s3646_s30 + $0x1c] sm:$0x3]  ;;  %v3703_v39 = vld [vmem:[%s3646_s30 + $0x18] sm:$0xf]  ;;  %v3004_v40 = vld [vmem:[%s3646_s30 + $0x24] sm:$0x3]  ;;  %v2968_v54 = vcombine.low %v3659_v16, %v3659_v16 }
  0x18   : > { %204 = vrot.lane.b32.xlu0 %v2927_v13, %s3566_s4  ;;  %v309_v20 = vshrl.u32 %v3655_v14, 16  ;;  %v311_v21 = vshll.u32 %v3655_v14, 16  ;;  %v415_v22 = vrot.slane %v3655_v14, 1  ;;  %3200 = vmatprep.subr.bf16.mxu1 %v3563_v1  ;;  %v3709_v42 = vcombine.low %v3703_v39, %v2984_v31  ;;  %v3720_v47 = vld [vmem:[%s3646_s30 + $0x20] sm:$0xf] }
  0x19   : > { %v681_v24 = vshrl.u32 %v3664_v18, 16  ;;  %v683_v25 = vshll.u32 %v3664_v18, 16  ;;  %v1053_v26 = vshrl.u32 %v3667_v19, 16  ;;  %v1055_v30 = vshll.u32 %v3667_v19, 16  ;;  %v3024_v60 = vld [vmem:[%s3646_s30 + $0x2c] sm:$0x3] }
  0x1a   : > { %v313_v27 = vrot.slane %v311_v21, 1  ;;  %v3681_v28 = vrot.slane %v309_v20, 1  ;;  %v3683_v29 = vrot.slane %v311_v21, 2  ;;  %465 = vrot.lane.b32.xlu1 %v415_v22, %s3566_s4  ;;  %v787_v44 = vrot.slane %v3664_v18, 1  ;;  %v3752_v62 = vld [vmem:[%s3646_s30 + $0x28] sm:$0xf] }
  0x1b   : > { %v685_v32 = vrot.slane %v683_v25, 1  ;;  %v3690_v33 = vrot.slane %v681_v24, 1  ;;  %v3692_v34 = vrot.slane %v683_v25, 2  ;;  %v3694_v35 = vrot.slane %v1053_v26, 1  ;;  %v2965_v18 = vld [vmem:[%s4275_s1 + $0x1c] sm:$0x3] }
  0x1c   : > { %v3696_v36 = vor.u32 %v313_v27, %v309_v20  ;;  %v518_v37 = vor.u32 %v3683_v29, %v3681_v28  ;;  %v3700_v38 = vrot.slane %v1055_v30, 2  ;;  %v1057_v45 = vrot.slane %v1055_v30, 1  ;;  %v3044_v27 = vld [vmem:[%s3646_s30 + $0x34] sm:$0x3] }
  0x1d   : > { %v890_v41 = vor.u32 %v3692_v34, %v3690_v33  ;;  %v3714_v43 = vor.u32 %v685_v32, %v681_v24  ;;  %v1425_v48 = vshrl.u32 %v3709_v42, 16  ;;  %v1427_v49 = vshll.u32 %v3709_v42, 16  ;;  %v2970_v33 = vld [vmem:[%s4275_s1 + $0x20] sm:$0x3] }
  0x1e   : > { %364 = vrot.lane.b32.xlu0 %v3696_v36, %s3566_s4  ;;  %626 = vrot.lane.b32.xlu1 %v2948_v23, %s3566_s4  ;;  %v1262_v46 = vor.u32 %v3700_v38, %v3694_v35  ;;  %v3725_v50 = vcombine.low %v3720_v47, %v3004_v40  ;;  %v3739_v55 = vor.u32 %v1057_v45, %v1053_v26  ;;  %v1159_v63 = vrot.slane %v3667_v19, 1  ;;  %v3806_v26 = vld [vmem:[%s3646_s30 + $0x30] sm:$0xf] }
  0x1f   : > { %v3727_v51 = vrot.slane %v1425_v48, 1  ;;  %v3729_v52 = vrot.slane %v1427_v49, 2  ;;  %v2988_v61 = vcombine.low %v3703_v39, %v3703_v39  ;;  %v1429_v0 = vrot.slane %v1427_v49, 1 }
  0x20   : > { %v1797_v53 = vshrl.u32 %v3725_v50, 16  ;;  %v1799_v56 = vshll.u32 %v3725_v50, 16  ;;  %v3761_v3 = vcombine.low %v3752_v62, %v3024_v60  ;;  %v1531_v6 = vrot.slane %v3709_v42, 1  ;;  %v2930_v60 = vld [vmem:[%s4275_s1 + $0x4] sm:$0x3] }
  0x21   : > { %v1634_v57 = vor.u32 %v3729_v52, %v3727_v51  ;;  %v3767_v4 = vor.u32 %v1429_v0, %v1425_v48  ;;  %v3008_v11 = vcombine.low %v3720_v47, %v3720_v47  ;;  %v1903_v20 = vrot.slane %v3725_v50, 1  ;;  %v3010_v51 = vld [vmem:[%s4275_s1 + $0x3c] sm:$0x3] }
  0x22   : > { %736 = vrot.lane.b32.xlu0 %v3714_v43, %s3566_s4  ;;  %837 = vrot.lane.b32.xlu1 %v787_v44, %s3566_s4  ;;  %v3744_v58 = vrot.slane %v1797_v53, 1  ;;  %v3746_v59 = vrot.slane %v1799_v56, 2  ;;  %v1801_v7 = vrot.slane %v1799_v56, 1  ;;  %v2171_v8 = vshll.u32 %v3761_v3, 16 }
  0x23   : > { %v2169_v9 = vshrl.u32 %v3761_v3, 16  ;;  %v3028_v21 = vcombine.low %v3752_v62, %v3752_v62  ;;  %v2275_v25 = vrot.slane %v3761_v3, 1  ;;  %v3048_v30 = vcombine.low %v3806_v26, %v3806_v26  ;;  %v3045_v3 = vld [vmem:[%s4275_s1 + $0x54] sm:$0x3] }
  0x24   : > { %v2006_v2 = vor.u32 %v3746_v59, %v3744_v58  ;;  %v3772_v10 = vrot.slane %v2171_v8, 2  ;;  %v3781_v13 = vor.u32 %v1801_v7, %v1797_v53  ;;  %v2173_v23 = vrot.slane %v2171_v8, 1  ;;  %v2937_v7 = vld [vmem:[%s4275_s1 + $0xa] sm:$0x3]  ;;  %v2935_v8 = vld [vmem:[%s4275_s1 + $0x8] sm:$0x3] }
  0x25   : > { %v3783_v15 = vrot.slane %v2169_v9, 1  ;;  %v3813_v31 = vcombine.low %v3806_v26, %v3044_v27  ;;  %v2939_v27 = vld [vmem:[%s4275_s1 + $0xc] sm:$0x3] }
  0x26   : > { %998 = vrot.lane.b32.xlu0 %v2968_v54, %s3566_s4  ;;  %1108 = vrot.lane.b32.xlu1 %v3739_v55, %s3566_s4  ;;  %v3797_v24 = vor.u32 %v2173_v23, %v2169_v9  ;;  %v471_v9 = vand.u32 %v2937_v7, %v3633_v5  ;;  %v2945_v23 = vld [vmem:[%s4275_s1 + $0xe] sm:$0x3] }
  0x27   : > { %v2378_v17 = vor.u32 %v3772_v10, %v3783_v15  ;;  %v2541_v32 = vshrl.u32 %v3813_v31, 16  ;;  %v2543_v40 = vshll.u32 %v3813_v31, 16  ;;  %v2647_v56 = vrot.slane %v3813_v31, 1  ;;  %v3050_v10 = vld [vmem:[%s4275_s1 + $0x58] sm:$0x3] }
  0x29   : > { %v2545_v45 = vrot.slane %v2543_v40, 1  ;;  %v3817_v48 = vrot.slane %v2541_v32, 1  ;;  %v3819_v49 = vrot.slane %v2543_v40, 2  ;;  %v2950_v40 = vld [vmem:[%s4275_s1 + $0x12] sm:$0x3] }
  0x2a   : > { %1209 = vrot.lane.b32.xlu0 %v1159_v63, %s3566_s4  ;;  %1370 = vrot.lane.b32.xlu1 %v2988_v61, %s3566_s4  ;;  %v319_v61 = vand.u32 %v2930_v60, %v3633_v5  ;;  %v691_v14 = vand.u32 %v2950_v40, %v3633_v5  ;;  %v2955_v60 = vld [vmem:[%s4275_s1 + $0x16] sm:$0x3] }
  0x2b   : > { %v3821_v53 = vor.u32 %v2545_v45, %v2541_v32  ;;  %v2750_v54 = vor.u32 %v3819_v49, %v3817_v48  ;;  %v578_v32 = vand.u32 %v2945_v23, %v3633_v5  ;;  %v2947_v45 = vld [vmem:[%s4275_s1 + $0x10] sm:$0x3]  ;;  %v792_v28 = vand.u32 %v2955_v60, %v3633_v5  ;;  %v2973_v23 = vld [vmem:[%s4275_s1 + $0x22] sm:$0x3] }
  0x2e   : > { %1480 = vrot.lane.b32.xlu0 %v3767_v4, %s3566_s4  ;;  %1581 = vrot.lane.b32.xlu1 %v1531_v6, %s3566_s4 }
  0x32   : > { %1742 = vrot.lane.b32.xlu0 %v3008_v11, %s3566_s4  ;;  %1852 = vrot.lane.b32.xlu1 %v3781_v13, %s3566_s4  ;;  %v420_v11 = vand.u32 %v2935_v8, %v3633_v5 }
  0x36   : > { %1953 = vrot.lane.b32.xlu0 %v1903_v20, %s3566_s4  ;;  %2114 = vrot.lane.b32.xlu1 %v3028_v21, %s3566_s4 }
  0x3a   : > { %2224 = vrot.lane.b32.xlu0 %v3797_v24, %s3566_s4  ;;  %2325 = vrot.lane.b32.xlu1 %v2275_v25, %s3566_s4 }
  0x3e   : > { %2486 = vrot.lane.b32.xlu0 %v3048_v30, %s3566_s4  ;;  %2596 = vrot.lane.b32.xlu1 %v3821_v53, %s3566_s4 }
  0x42   : > { %2697 = vrot.lane.b32.xlu0 %v2647_v56, %s3566_s4  ;;  %s190_s4 = scalar_lea.vmem %s4277_s3, %s2922_s28 }
  0x8a   : > { %v205_v0 = vpop.permute.xlu0 %204 }
  0x8b   : > { %3173 = vmatmul.mubr.msk.bf16.vlgmr.msra.gmra.mrb[0].mxu0 %vm206_vm3, %v205_v0 }
  0x8c   : > { %3183 = vmatpush3.bf16.msra.mxu0 %v319_v61  ;;  %3184 = vmatprep.mubr.msk.bf16.mxu0 %vm3565_vm2, %v3563_v1  ;;  %v466_v30 = vpop.permute.xlu1 %465  ;;  %v2959_v61 = vld [vmem:[%s4275_s1 + $0x1a] sm:$0x3] }
  0x8d   : > { %3194 = vmatprep.subr.bf16.mxu0 %v3563_v1  ;;  %v895_v0 = vand.u32 %v2959_v61, %v3633_v5 }
  0x90   : > { %v365_v21 = vpop.permute.xlu0 %364  ;;  %v627_v29 = vpop.permute.xlu1 %626 }
  0x91   : > { %3191 = vmatmul.mubr.msk.bf16.vlgmr.msra.gmra.mrb[4].mxu1 %vm206_vm3, %v365_v21  ;;  %v950_v21 = vand.u32 %v2965_v18, %v3633_v5 }
  0x92   : > { %3201 = vmatpush3.bf16.msra.mxu1 %v471_v9  ;;  %3202 = vmatprep.mubr.msk.bf16.mxu1 %vm3565_vm2, %v3563_v1  ;;  %v2967_v9 = vld [vmem:[%s4275_s1 + $0x1e] sm:$0x3] }
  0x93   : > { %3185 = vmatmul.mubr.msk.bf16.vlgmr.msra.gmra.mrb[4].mxu0 %vm206_vm3, %v3696_v36  ;;  %3212 = vmatprep.subr.bf16.mxu1 %v3563_v1  ;;  %v523_v36 = vand.u32 %v2939_v27, %v3633_v5  ;;  %v1063_v27 = vand.u32 %v2970_v33, %v3633_v5  ;;  %v1807_v33 = vand.u32 %v3010_v51, %v3633_v5 }
  0x94   : > { %3195 = vmatpush3.bf16.msra.mxu0 %v420_v11  ;;  %3196 = vmatprep.mubr.msk.bf16.mxu0 %vm3565_vm2, %v3563_v1  ;;  %v737_v7 = vpop.permute.xlu0 %736  ;;  %v838_v11 = vpop.permute.xlu1 %837 }
  0x95   : > { %3206 = vmatprep.subr.bf16.mxu0 %v3563_v1 }
  0x98   : > { %v999_v34 = vpop.permute.xlu0 %998 }
  0x99   : > { %3203 = vmatmul.mubr.msk.bf16.vlgmr.msra.gmra.mrb[8].mxu1 %vm206_vm3, %v466_v30  ;;  %v2977_v30 = vld [vmem:[%s4275_s1 + $0x26] sm:$0x3] }
  0x9a   : > { %3213 = vmatpush3.bf16.msra.mxu1 %v578_v32  ;;  %3214 = vmatprep.mubr.msk.bf16.mxu1 %vm3565_vm2, %v3563_v1  ;;  %v2975_v32 = vld [vmem:[%s4275_s1 + $0x24] sm:$0x3]  ;;  %v1215_v40 = vand.u32 %v2977_v30, %v3633_v5 }
  0x9b   : > { %3197 = vmatmul.mubr.msk.bf16.vlgmr.msra.gmra.mrb[8].mxu0 %vm206_vm3, %v415_v22  ;;  %3224 = vmatprep.subr.bf16.mxu1 %v3563_v1  ;;  %v632_v22 = vand.u32 %v2947_v45, %v3633_v5  ;;  %v2985_v45 = vld [vmem:[%s4275_s1 + $0x2a] sm:$0x3] }
  0x9c   : > { %3207 = vmatpush3.bf16.msra.mxu0 %v523_v36  ;;  %3208 = vmatprep.mubr.msk.bf16.mxu0 %vm3565_vm2, %v3563_v1  ;;  %v1109_v36 = vpop.permute.xlu1 %1108  ;;  %v1322_v60 = vand.u32 %v2985_v45, %v3633_v5  ;;  %v3030_v45 = vld [vmem:[%s4275_s1 + $0x4a] sm:$0x3] }
  0x9d   : > { %3218 = vmatprep.subr.bf16.mxu0 %v3563_v1  ;;  %v2179_v50 = vand.u32 %v3030_v45, %v3633_v5 }
  0xa0   : > { %v1371_v38 = vpop.permute.xlu1 %1370 }
  0xa1   : > { %3215 = vmatmul.mubr.msk.bf16.vlgmr.msra.gmra.mrb[12].mxu1 %vm206_vm3, %v3653_v12  ;;  %v2953_v12 = vld [vmem:[%s4275_s1 + $0x14] sm:$0x3] }
  0xa2   : > { %3225 = vmatpush3.bf16.msra.mxu1 %v691_v14  ;;  %3226 = vmatprep.mubr.msk.bf16.mxu1 %vm3565_vm2, %v3563_v1  ;;  %v2979_v14 = vld [vmem:[%s4275_s1 + $0x28] sm:$0x3] }
  0xa3   : > { %3209 = vmatmul.mubr.msk.bf16.vlgmr.msra.gmra.mrb[12].mxu0 %vm206_vm3, %v518_v37  ;;  %3236 = vmatprep.subr.bf16.mxu1 %v3563_v1  ;;  %v742_v37 = vand.u32 %v2953_v12, %v3633_v5  ;;  %v2990_v12 = vld [vmem:[%s4275_s1 + $0x2e] sm:$0x3] }
  0xa4   : > { %3219 = vmatpush3.bf16.msra.mxu0 %v632_v22  ;;  %3220 = vmatprep.mubr.msk.bf16.mxu0 %vm3565_vm2, %v3563_v1  ;;  %v1210_v22 = vpop.permute.xlu0 %1209  ;;  %v1435_v19 = vand.u32 %v2990_v12, %v3633_v5 }
  0xa5   : > { %3230 = vmatprep.subr.bf16.mxu0 %v3563_v1 }
  0xa9   : > { %3227 = vmatmul.mubr.msk.bf16.vlgmr.msra.gmra.mrb[16].mxu1 %vm206_vm3, %v3714_v43  ;;  %v2957_v43 = vld [vmem:[%s4275_s1 + $0x18] sm:$0x3] }
  0xaa   : > { %3237 = vmatpush3.bf16.msra.mxu1 %v792_v28  ;;  %3238 = vmatprep.mubr.msk.bf16.mxu1 %vm3565_vm2, %v3563_v1  ;;  %v843_v8 = vand.u32 %v2957_v43, %v3633_v5  ;;  %v2987_v28 = vld [vmem:[%s4275_s1 + $0x2c] sm:$0x3]  ;;  %v1481_v43 = vpop.permute.xlu0 %1480 }
  0xab   : > { %3221 = vmatmul.mubr.msk.bf16.vlgmr.msra.gmra.mrb[16].mxu0 %vm206_vm3, %v627_v29  ;;  %3248 = vmatprep.subr.bf16.mxu1 %v3563_v1  ;;  %v2995_v29 = vld [vmem:[%s4275_s1 + $0x32] sm:$0x3] }
  0xac   : > { %3231 = vmatpush3.bf16.msra.mxu0 %v742_v37  ;;  %3232 = vmatprep.mubr.msk.bf16.mxu0 %vm3565_vm2, %v3563_v1  ;;  %v1536_v35 = vand.u32 %v2995_v29, %v3633_v5  ;;  %v2999_v37 = vld [vmem:[%s4275_s1 + $0x36] sm:$0x3]  ;;  %v2438_v29 = vand.u32 %v3045_v3, %v3633_v5 }
  0xad   : > { %3242 = vmatprep.subr.bf16.mxu0 %v3563_v1  ;;  %v1639_v61 = vand.u32 %v2999_v37, %v3633_v5 }
  0xae   : > { %v1743_v52 = vpop.permute.xlu0 %1742 }
  0xb1   : > { %3239 = vmatmul.mubr.msk.bf16.vlgmr.msra.gmra.mrb[20].mxu1 %vm206_vm3, %v787_v44  ;;  %v1004_v44 = vand.u32 %v2967_v9, %v3633_v5  ;;  %v3007_v9 = vld [vmem:[%s4275_s1 + $0x3a] sm:$0x3] }
  0xb2   : > { %3249 = vmatpush3.bf16.msra.mxu1 %v895_v0  ;;  %3250 = vmatprep.mubr.msk.bf16.mxu1 %vm3565_vm2, %v3563_v1 }
  0xb3   : > { %3233 = vmatmul.mubr.msk.bf16.vlgmr.msra.gmra.mrb[20].mxu0 %vm206_vm3, %v737_v7  ;;  %3260 = vmatprep.subr.bf16.mxu1 %v3563_v1 }
  0xb4   : > { %3243 = vmatpush3.bf16.msra.mxu0 %v843_v8  ;;  %3244 = vmatprep.mubr.msk.bf16.mxu0 %vm3565_vm2, %v3563_v1 }
  0xb5   : > { %3254 = vmatprep.subr.bf16.mxu0 %v3563_v1 }
  0xb9   : > { %3251 = vmatmul.mubr.msk.bf16.vlgmr.msra.gmra.mrb[24].mxu1 %vm206_vm3, %v890_v41  ;;  %v1114_v41 = vand.u32 %v2973_v23, %v3633_v5  ;;  %v3013_v23 = vld [vmem:[%s4275_s1 + $0x3e] sm:$0x3] }
  0xba   : > { %3261 = vmatpush3.bf16.msra.mxu1 %v1004_v44  ;;  %3262 = vmatprep.mubr.msk.bf16.mxu1 %vm3565_vm2, %v3563_v1  ;;  %v1748_v44 = vand.u32 %v3007_v9, %v3633_v5 }
  0xbb   : > { %3245 = vmatmul.mubr.msk.bf16.vlgmr.msra.gmra.mrb[24].mxu0 %vm206_vm3, %v838_v11  ;;  %3272 = vmatprep.subr.bf16.mxu1 %v3563_v1  ;;  %v1582_v11 = vpop.permute.xlu1 %1581 }
  0xbc   : > { %3255 = vmatpush3.bf16.msra.mxu0 %v950_v21  ;;  %3256 = vmatprep.mubr.msk.bf16.mxu0 %vm3565_vm2, %v3563_v1 }
  0xbd   : > { %3266 = vmatprep.subr.bf16.mxu0 %v3563_v1 }
  0xc1   : > { %3263 = vmatmul.mubr.msk.bf16.vlgmr.msra.gmra.mrb[28].mxu1 %vm206_vm3, %v999_v34  ;;  %v3017_v34 = vld [vmem:[%s4275_s1 + $0x42] sm:$0x3] }
  0xc2   : > { %3273 = vmatpush3.bf16.msra.mxu1 %v1114_v41  ;;  %3274 = vmatprep.mubr.msk.bf16.mxu1 %vm3565_vm2, %v3563_v1  ;;  %v3015_v41 = vld [vmem:[%s4275_s1 + $0x40] sm:$0x3]  ;;  %v1959_v30 = vand.u32 %v3017_v34, %v3633_v5 }
  0xc3   : > { %3257 = vmatmul.mubr.msk.bf16.vlgmr.msra.gmra.mrb[28].mxu0 %vm206_vm3, %v3659_v16  ;;  %3284 = vmatprep.subr.bf16.mxu1 %v3563_v1  ;;  %v1164_v16 = vand.u32 %v2975_v32, %v3633_v5  ;;  %v3025_v32 = vld [vmem:[%s4275_s1 + $0x46] sm:$0x3] }
  0xc4   : > { %3267 = vmatpush3.bf16.msra.mxu0 %v1063_v27  ;;  %3268 = vmatprep.mubr.msk.bf16.mxu0 %vm3565_vm2, %v3563_v1  ;;  %v1853_v27 = vpop.permute.xlu1 %1852 }
  0xc5   : > { %3278 = vmatprep.subr.bf16.mxu0 %v3563_v1 }
  0xc8   : > { %v2115_v59 = vpop.permute.xlu1 %2114 }
  0xc9   : > { %3275 = vmatmul.mubr.msk.bf16.vlgmr.msra.gmra.mrb[32].mxu1 %vm206_vm3, %v1109_v36  ;;  %v3019_v36 = vld [vmem:[%s4275_s1 + $0x44] sm:$0x3] }
  0xca   : > { %3285 = vmatpush3.bf16.msra.mxu1 %v1215_v40  ;;  %3286 = vmatprep.mubr.msk.bf16.mxu1 %vm3565_vm2, %v3563_v1  ;;  %v1954_v40 = vpop.permute.xlu0 %1953 }
  0xcb   : > { %3269 = vmatmul.mubr.msk.bf16.vlgmr.msra.gmra.mrb[32].mxu0 %vm206_vm3, %v3739_v55  ;;  %3296 = vmatprep.subr.bf16.mxu1 %v3563_v1  ;;  %v1267_v55 = vand.u32 %v2979_v14, %v3633_v5  ;;  %v3027_v14 = vld [vmem:[%s4275_s1 + $0x48] sm:$0x3] }
  0xcc   : > { %3279 = vmatpush3.bf16.msra.mxu0 %v1164_v16  ;;  %3280 = vmatprep.mubr.msk.bf16.mxu0 %vm3565_vm2, %v3563_v1  ;;  %v2066_v16 = vand.u32 %v3025_v32, %v3633_v5 }
  0xcd   : > { %3290 = vmatprep.subr.bf16.mxu0 %v3563_v1 }
  0xce   : > { %v2225_v12 = vpop.permute.xlu0 %2224 }
  0xd1   : > { %3287 = vmatmul.mubr.msk.bf16.vlgmr.msra.gmra.mrb[36].mxu1 %vm206_vm3, %v1210_v22  ;;  %v3035_v22 = vld [vmem:[%s4275_s1 + $0x4e] sm:$0x3] }
  0xd2   : > { %3297 = vmatpush3.bf16.msra.mxu1 %v1322_v60  ;;  %3298 = vmatprep.mubr.msk.bf16.mxu1 %vm3565_vm2, %v3563_v1  ;;  %v2280_v58 = vand.u32 %v3035_v22, %v3633_v5  ;;  %v3039_v60 = vld [vmem:[%s4275_s1 + $0x52] sm:$0x3]  ;;  %v2487_v15 = vpop.permute.xlu0 %2486 }
  0xd3   : > { %3281 = vmatmul.mubr.msk.bf16.vlgmr.msra.gmra.mrb[36].mxu0 %vm206_vm3, %v1159_v63  ;;  %3308 = vmatprep.subr.bf16.mxu1 %v3563_v1  ;;  %v1376_v63 = vand.u32 %v2987_v28, %v3633_v5 }
  0xd4   : > { %3291 = vmatpush3.bf16.msra.mxu0 %v1267_v55  ;;  %3292 = vmatprep.mubr.msk.bf16.mxu0 %vm3565_vm2, %v3563_v1  ;;  %v2383_v55 = vand.u32 %v3039_v60, %v3633_v5 }
  0xd5   : > { %3302 = vmatprep.subr.bf16.mxu0 %v3563_v1 }
  0xd9   : > { %3299 = vmatmul.mubr.msk.bf16.vlgmr.msra.gmra.mrb[40].mxu1 %vm206_vm3, %v3703_v39  ;;  %v2993_v39 = vld [vmem:[%s4275_s1 + $0x30] sm:$0x3] }
  0xda   : > { %3309 = vmatpush3.bf16.msra.mxu1 %v1435_v19  ;;  %3310 = vmatprep.mubr.msk.bf16.mxu1 %vm3565_vm2, %v3563_v1  ;;  %v3047_v19 = vld [vmem:[%s4275_s1 + $0x56] sm:$0x3] }
  0xdb   : > { %3293 = vmatmul.mubr.msk.bf16.vlgmr.msra.gmra.mrb[40].mxu0 %vm206_vm3, %v1262_v46  ;;  %3320 = vmatprep.subr.bf16.mxu1 %v3563_v1  ;;  %v1486_v46 = vand.u32 %v2993_v39, %v3633_v5  ;;  %v3053_v39 = vld [vmem:[%s4275_s1 + $0x5a] sm:$0x3] }
  0xdc   : > { %3303 = vmatpush3.bf16.msra.mxu0 %v1376_v63  ;;  %3304 = vmatprep.mubr.msk.bf16.mxu0 %vm3565_vm2, %v3563_v1  ;;  %v2326_v63 = vpop.permute.xlu1 %2325 }
  0xdd   : > { %3314 = vmatprep.subr.bf16.mxu0 %v3563_v1 }
  0xe0   : > { %v2597_v37 = vpop.permute.xlu1 %2596 }
  0xe1   : > { %3311 = vmatmul.mubr.msk.bf16.vlgmr.msra.gmra.mrb[44].mxu1 %vm206_vm3, %v3767_v4  ;;  %v2997_v4 = vld [vmem:[%s4275_s1 + $0x34] sm:$0x3] }
  0xe2   : > { %3321 = vmatpush3.bf16.msra.mxu1 %v1536_v35  ;;  %3322 = vmatprep.mubr.msk.bf16.mxu1 %vm3565_vm2, %v3563_v1  ;;  %v1587_v0 = vand.u32 %v2997_v4, %v3633_v5  ;;  %v2551_v35 = vand.u32 %v3050_v10, %v3633_v5 }
  0xe3   : > { %3305 = vmatmul.mubr.msk.bf16.vlgmr.msra.gmra.mrb[44].mxu0 %vm206_vm3, %v1371_v38  ;;  %3332 = vmatprep.subr.bf16.mxu1 %v3563_v1  ;;  %v3057_v38 = vld [vmem:[%s4275_s1 + $0x5e] sm:$0x3] }
  0xe4   : > { %3315 = vmatpush3.bf16.msra.mxu0 %v1486_v46  ;;  %3316 = vmatprep.mubr.msk.bf16.mxu0 %vm3565_vm2, %v3563_v1  ;;  %v3055_v46 = vld [vmem:[%s4275_s1 + $0x5c] sm:$0x3]  ;;  %v2703_v4 = vand.u32 %v3057_v38, %v3633_v5 }
  0xe5   : > { %3326 = vmatprep.subr.bf16.mxu0 %v3563_v1 }
  0xe9   : > { %3323 = vmatmul.mubr.msk.bf16.vlgmr.msra.gmra.mrb[48].mxu1 %vm206_vm3, %v1531_v6  ;;  %v4048_v7 = vpop.f32.mrb[0].mxu1  ;;  %v3005_v6 = vld [vmem:[%s4275_s1 + $0x38] sm:$0x3] }
  0xea   : > { %3333 = vmatpush3.bf16.msra.mxu1 %v1639_v61  ;;  %3334 = vmatprep.mubr.msk.bf16.mxu1 %vm3565_vm2, %v3563_v1  ;;  %v3180_v8 = vpop.f32.mrb[1].mxu1  ;;  %v1694_v21 = vand.u32 %v3005_v6, %v3633_v5  ;;  %v3059_v61 = vld [vmem:[%s4275_s1 + $0x60] sm:$0x3] }
  0xeb   : > { %3317 = vmatmul.mubr.msk.bf16.vlgmr.msra.gmra.mrb[48].mxu0 %vm206_vm3, %v1481_v43  ;;  %3344 = vmatprep.subr.bf16.mxu1 %v3563_v1  ;;  %v300_v18 = vpop.f32.mrb[2].mxu1  ;;  %v2698_v43 = vpop.permute.xlu0 %2697 }
  0xec   : > { %3327 = vmatpush3.bf16.msra.mxu0 %v1587_v0  ;;  %3328 = vmatprep.mubr.msk.bf16.mxu0 %vm3565_vm2, %v3563_v1  ;;  %v3181_v42 = vpop.f32.mrb[3].mxu1  ;;  %v2755_v0 = vand.u32 %v3059_v61, %v3633_v5 }
  0xed   : > { %3338 = vmatprep.subr.bf16.mxu0 %v3563_v1 }
  0xf1   : > { %3335 = vmatmul.mubr.msk.bf16.vlgmr.msra.gmra.mrb[52].mxu1 %vm206_vm3, %v1634_v57  ;;  %v1858_v57 = vand.u32 %v3013_v23, %v3633_v5 }
  0xf2   : > { %3345 = vmatpush3.bf16.msra.mxu1 %v1748_v44  ;;  %3346 = vmatprep.mubr.msk.bf16.mxu1 %vm3565_vm2, %v3563_v1 }
  0xf3   : > { %3329 = vmatmul.mubr.msk.bf16.vlgmr.msra.gmra.mrb[52].mxu0 %vm206_vm3, %v1582_v11  ;;  %3356 = vmatprep.subr.bf16.mxu1 %v3563_v1 }
  0xf4   : > { %3339 = vmatpush3.bf16.msra.mxu0 %v1694_v21  ;;  %3340 = vmatprep.mubr.msk.bf16.mxu0 %vm3565_vm2, %v3563_v1 }
  0xf5   : > { %3350 = vmatprep.subr.bf16.mxu0 %v3563_v1 }
  0xf9   : > { %3347 = vmatmul.mubr.msk.bf16.vlgmr.msra.gmra.mrb[56].mxu1 %vm206_vm3, %v1743_v52 }
  0xfa   : > { %3357 = vmatpush3.bf16.msra.mxu1 %v1858_v57  ;;  %3358 = vmatprep.mubr.msk.bf16.mxu1 %vm3565_vm2, %v3563_v1 }
  0xfb   : > { %3341 = vmatmul.mubr.msk.bf16.vlgmr.msra.gmra.mrb[56].mxu0 %vm206_vm3, %v3720_v47  ;;  %3368 = vmatprep.subr.bf16.mxu1 %v3563_v1  ;;  %v1908_v47 = vand.u32 %v3015_v41, %v3633_v5 }
  0xfc   : > { %3351 = vmatpush3.bf16.msra.mxu0 %v1807_v33  ;;  %3352 = vmatprep.mubr.msk.bf16.mxu0 %vm3565_vm2, %v3563_v1 }
  0xfd   : > { %3362 = vmatprep.subr.bf16.mxu0 %v3563_v1 }
 0x101   : > { %3359 = vmatmul.mubr.msk.bf16.vlgmr.msra.gmra.mrb[60].mxu1 %vm206_vm3, %v1853_v27 }
 0x102   : > { %3369 = vmatpush3.bf16.msra.mxu1 %v1959_v30  ;;  %3370 = vmatprep.mubr.msk.bf16.mxu1 %vm3565_vm2, %v3563_v1 }
 0x103   : > { %3353 = vmatmul.mubr.msk.bf16.vlgmr.msra.gmra.mrb[60].mxu0 %vm206_vm3, %v3781_v13  ;;  %3380 = vmatprep.subr.bf16.mxu1 %v3563_v1  ;;  %v2011_v13 = vand.u32 %v3019_v36, %v3633_v5 }
 0x104   : > { %3363 = vmatpush3.bf16.msra.mxu0 %v1908_v47  ;;  %3364 = vmatprep.mubr.msk.bf16.mxu0 %vm3565_vm2, %v3563_v1 }
 0x105   : > { %3374 = vmatprep.subr.bf16.mxu0 %v3563_v1 }
 0x109   : > { %3371 = vmatmul.mubr.msk.bf16.vlgmr.msra.gmra.mrb[64].mxu1 %vm206_vm3, %v1954_v40 }
 0x10a   : > { %3381 = vmatpush3.bf16.msra.mxu1 %v2066_v16  ;;  %3382 = vmatprep.mubr.msk.bf16.mxu1 %vm3565_vm2, %v3563_v1 }
 0x10b   : > { %3365 = vmatmul.mubr.msk.bf16.vlgmr.msra.gmra.mrb[64].mxu0 %vm206_vm3, %v1903_v20  ;;  %3392 = vmatprep.subr.bf16.mxu1 %v3563_v1  ;;  %v2120_v20 = vand.u32 %v3027_v14, %v3633_v5 }
 0x10c   : > { %3375 = vmatpush3.bf16.msra.mxu0 %v2011_v13  ;;  %3376 = vmatprep.mubr.msk.bf16.mxu0 %vm3565_vm2, %v3563_v1 }
 0x10d   : > { %3386 = vmatprep.subr.bf16.mxu0 %v3563_v1 }
 0x111   : > { %3383 = vmatmul.mubr.msk.bf16.vlgmr.msra.gmra.mrb[68].mxu1 %vm206_vm3, %v3752_v62  ;;  %v3033_v62 = vld [vmem:[%s4275_s1 + $0x4c] sm:$0x3] }
 0x112   : > { %3393 = vmatpush3.bf16.msra.mxu1 %v2179_v50  ;;  %3394 = vmatprep.mubr.msk.bf16.mxu1 %vm3565_vm2, %v3563_v1 }
 0x113   : > { %3377 = vmatmul.mubr.msk.bf16.vlgmr.msra.gmra.mrb[68].mxu0 %vm206_vm3, %v2006_v2  ;;  %3404 = vmatprep.subr.bf16.mxu1 %v3563_v1  ;;  %v2230_v2 = vand.u32 %v3033_v62, %v3633_v5 }
 0x114   : > { %3387 = vmatpush3.bf16.msra.mxu0 %v2120_v20  ;;  %3388 = vmatprep.mubr.msk.bf16.mxu0 %vm3565_vm2, %v3563_v1 }
 0x115   : > { %3398 = vmatprep.subr.bf16.mxu0 %v3563_v1 }
 0x119   : > { %3395 = vmatmul.mubr.msk.bf16.vlgmr.msra.gmra.mrb[72].mxu1 %vm206_vm3, %v3797_v24  ;;  %v3037_v24 = vld [vmem:[%s4275_s1 + $0x50] sm:$0x3] }
 0x11a   : > { %3405 = vmatpush3.bf16.msra.mxu1 %v2280_v58  ;;  %3406 = vmatprep.mubr.msk.bf16.mxu1 %vm3565_vm2, %v3563_v1  ;;  %v2331_v28 = vand.u32 %v3037_v24, %v3633_v5 }
 0x11b   : > { %3389 = vmatmul.mubr.msk.bf16.vlgmr.msra.gmra.mrb[72].mxu0 %vm206_vm3, %v2115_v59  ;;  %3416 = vmatprep.subr.bf16.mxu1 %v3563_v1 }
 0x11c   : > { %3399 = vmatpush3.bf16.msra.mxu0 %v2230_v2  ;;  %3400 = vmatprep.mubr.msk.bf16.mxu0 %vm3565_vm2, %v3563_v1 }
 0x11d   : > { %3410 = vmatprep.subr.bf16.mxu0 %v3563_v1 }
 0x121   : > { %3407 = vmatmul.mubr.msk.bf16.vlgmr.msra.gmra.mrb[76].mxu1 %vm206_vm3, %v2275_v25  ;;  %v2492_v25 = vand.u32 %v3047_v19, %v3633_v5 }
 0x122   : > { %3417 = vmatpush3.bf16.msra.mxu1 %v2383_v55  ;;  %3418 = vmatprep.mubr.msk.bf16.mxu1 %vm3565_vm2, %v3563_v1 }
 0x123   : > { %3401 = vmatmul.mubr.msk.bf16.vlgmr.msra.gmra.mrb[76].mxu0 %vm206_vm3, %v2225_v12  ;;  %3428 = vmatprep.subr.bf16.mxu1 %v3563_v1 }
 0x124   : > { %3411 = vmatpush3.bf16.msra.mxu0 %v2331_v28  ;;  %3412 = vmatprep.mubr.msk.bf16.mxu0 %vm3565_vm2, %v3563_v1 }
 0x125   : > { %3422 = vmatprep.subr.bf16.mxu0 %v3563_v1 }
 0x129   : > { %3419 = vmatmul.mubr.msk.bf16.vlgmr.msra.gmra.mrb[80].mxu1 %vm206_vm3, %v2378_v17  ;;  %v2602_v17 = vand.u32 %v3053_v39, %v3633_v5 }
 0x12a   : > { %3429 = vmatpush3.bf16.msra.mxu1 %v2492_v25  ;;  %3430 = vmatprep.mubr.msk.bf16.mxu1 %vm3565_vm2, %v3563_v1 }
 0x12b   : > { %3413 = vmatmul.mubr.msk.bf16.vlgmr.msra.gmra.mrb[80].mxu0 %vm206_vm3, %v2326_v63  ;;  %3440 = vmatprep.subr.bf16.mxu1 %v3563_v1 }
 0x12c   : > { %3423 = vmatpush3.bf16.msra.mxu0 %v2438_v29  ;;  %3424 = vmatprep.mubr.msk.bf16.mxu0 %vm3565_vm2, %v3563_v1 }
 0x12d   : > { %3434 = vmatprep.subr.bf16.mxu0 %v3563_v1 }
 0x131   : > { %3431 = vmatmul.mubr.msk.bf16.vlgmr.msra.gmra.mrb[84].mxu1 %vm206_vm3, %v2487_v15 }
 0x132   : > { %3441 = vmatpush3.bf16.msra.mxu1 %v2602_v17  ;;  %3442 = vmatprep.mubr.msk.bf16.mxu1 %vm3565_vm2, %v3563_v1 }
 0x133   : > { %3425 = vmatmul.mubr.msk.bf16.vlgmr.msra.gmra.mrb[84].mxu0 %vm206_vm3, %v3806_v26  ;;  %3452 = vmatprep.subr.bf16.mxu1 %v3563_v1  ;;  %v2652_v26 = vand.u32 %v3055_v46, %v3633_v5 }
 0x134   : > { %3435 = vmatpush3.bf16.msra.mxu0 %v2551_v35  ;;  %3436 = vmatprep.mubr.msk.bf16.mxu0 %vm3565_vm2, %v3563_v1 }
 0x135   : > { %3446 = vmatprep.subr.bf16.mxu0 %v3563_v1 }
 0x139   : > { %3443 = vmatmul.mubr.msk.bf16.vlgmr.msra.gmra.mrb[88].mxu1 %vm206_vm3, %v2597_v37 }
 0x13a   : > { %3453 = vmatpush3.bf16.msra.mxu1 %v2703_v4  ;;  %3454 = vmatprep.mubr.msk.bf16.mxu1 %vm3565_vm2, %v3563_v1 }
 0x13b   : > { %3437 = vmatmul.mubr.msk.bf16.vlgmr.msra.gmra.mrb[88].mxu0 %vm206_vm3, %v3821_v53 }
 0x13c   : > { %3447 = vmatpush3.bf16.msra.mxu0 %v2652_v26  ;;  %3448 = vmatprep.mubr.msk.bf16.mxu0 %vm3565_vm2, %v3563_v1 }
 0x13d   : > { %3458 = vmatprep.subr.bf16.mxu0 %v3563_v1 }
 0x141   : > { %3455 = vmatmul.mubr.msk.bf16.vlgmr.msra.gmra.mrb[92].mxu1 %vm206_vm3, %v2698_v43 }
 0x143   : > { %3449 = vmatmul.mubr.msk.bf16.vlgmr.msra.gmra.mrb[92].mxu0 %vm206_vm3, %v2647_v56 }
 0x144   : > { %3459 = vmatpush3.bf16.msra.mxu0 %v2755_v0  ;;  %3460 = vmatprep.mubr.msk.bf16.mxu0 %vm3565_vm2, %v3563_v1 }
 0x14b   : > { %3461 = vmatmul.mubr.msk.bf16.vlgmr.msra.gmra.mrb[96].mxu0 %vm206_vm3, %v2750_v54 }
 0x15e   : > { %v251_v53 = vpop.f32.mrb[0].mxu0 }
 0x15f   : > { %v298_v8 = vadd.f32 %v4048_v7, %v251_v53  ;;  %v3174_v9 = vpop.f32.mrb[1].mxu0 }
 0x160   : > { %v254_v5 = vpop.f32.mrb[2].mxu0 }
 0x161   : > { %v3175_v18 = vpop.f32.mrb[3].mxu0 }
 0x164   : > { %v406_v42 = vpop.f32.mrb[4].mxu1 }
 0x165   : > { %v3192_v6 = vpop.f32.mrb[5].mxu1 }
 0x166   : > { %v355_v31 = vpop.f32.mrb[4].mxu0  ;;  %v409_v44 = vpop.f32.mrb[6].mxu1 }
 0x167   : > { %v361_v56 = vadd.f32 %v355_v31, %v298_v8  ;;  %v3186_v11 = vpop.f32.mrb[5].mxu0  ;;  %v3193_v21 = vpop.f32.mrb[7].mxu1 }
 0x168   : > { %v358_v23 = vpop.f32.mrb[6].mxu0 }
 0x169   : > { %v412_v1 = vadd.f32 %v406_v42, %v361_v56  ;;  %v3187_v51 = vpop.f32.mrb[7].mxu0 }
 0x16c   : > { %v507_v52 = vpop.f32.mrb[8].mxu1 }
 0x16d   : > { %v3204_v48 = vpop.f32.mrb[9].mxu1 }
 0x16e   : > { %v456_v49 = vpop.f32.mrb[8].mxu0  ;;  %v510_v54 = vpop.f32.mrb[10].mxu1 }
 0x16f   : > { %v462_v57 = vadd.f32 %v456_v49, %v412_v1  ;;  %v3198_v33 = vpop.f32.mrb[9].mxu0  ;;  %v3205_v7 = vpop.f32.mrb[11].mxu1 }
 0x170   : > { %v459_v34 = vpop.f32.mrb[10].mxu0 }
 0x171   : > { %v513_v41 = vadd.f32 %v507_v52, %v462_v57  ;;  %v3199_v27 = vpop.f32.mrb[11].mxu0 }
 0x174   : > { %v614_v30 = vpop.f32.mrb[12].mxu1 }
 0x175   : > { %v3216_v47 = vpop.f32.mrb[13].mxu1 }
 0x176   : > { %v559_v32 = vpop.f32.mrb[12].mxu0  ;;  %v617_v36 = vpop.f32.mrb[14].mxu1 }
 0x177   : > { %v565_v40 = vadd.f32 %v559_v32, %v513_v41  ;;  %v3210_v16 = vpop.f32.mrb[13].mxu0  ;;  %v3217_v13 = vpop.f32.mrb[15].mxu1 }
 0x178   : > { %v562_v45 = vpop.f32.mrb[14].mxu0 }
 0x179   : > { %v620_v14 = vadd.f32 %v614_v30, %v565_v40  ;;  %v3211_v50 = vpop.f32.mrb[15].mxu0 }
 0x17c   : > { %v727_v20 = vpop.f32.mrb[16].mxu1 }
 0x17d   : > { %v3228_v22 = vpop.f32.mrb[17].mxu1 }
 0x17e   : > { %v668_v62 = vpop.f32.mrb[16].mxu0  ;;  %v730_v58 = vpop.f32.mrb[18].mxu1 }
 0x17f   : > { %v674_v59 = vadd.f32 %v668_v62, %v620_v14  ;;  %v3222_v2 = vpop.f32.mrb[17].mxu0  ;;  %v3229_v60 = vpop.f32.mrb[19].mxu1 }
 0x180   : > { %v671_v24 = vpop.f32.mrb[18].mxu0 }
 0x181   : > { %v733_v55 = vadd.f32 %v727_v20, %v674_v59  ;;  %v3223_v12 = vpop.f32.mrb[19].mxu0 }
 0x184   : > { %v828_v28 = vpop.f32.mrb[20].mxu1 }
 0x185   : > { %v3240_v19 = vpop.f32.mrb[21].mxu1 }
 0x186   : > { %v778_v3 = vpop.f32.mrb[20].mxu0  ;;  %v831_v25 = vpop.f32.mrb[22].mxu1 }
 0x187   : > { %v784_v63 = vadd.f32 %v778_v3, %v733_v55  ;;  %v3234_v29 = vpop.f32.mrb[21].mxu0  ;;  %v3241_v39 = vpop.f32.mrb[23].mxu1 }
 0x188   : > { %v781_v10 = vpop.f32.mrb[22].mxu0 }
 0x189   : > { %v834_v15 = vadd.f32 %v828_v28, %v784_v63  ;;  %v3235_v17 = vpop.f32.mrb[23].mxu0 }
 0x18c   : > { %v931_v35 = vpop.f32.mrb[24].mxu1 }
 0x18d   : > { %v3252_v38 = vpop.f32.mrb[25].mxu1 }
 0x18e   : > { %v879_v46 = vpop.f32.mrb[24].mxu0  ;;  %v934_v37 = vpop.f32.mrb[26].mxu1 }
 0x18f   : > { %v885_v4 = vadd.f32 %v879_v46, %v834_v15  ;;  %v3246_v26 = vpop.f32.mrb[25].mxu0  ;;  %v3253_v61 = vpop.f32.mrb[27].mxu1 }
 0x190   : > { %v882_v43 = vpop.f32.mrb[26].mxu0 }
 0x191   : > { %v937_v0 = vadd.f32 %v931_v35, %v885_v4  ;;  %v3247_v53 = vpop.f32.mrb[27].mxu0 }
 0x194   : > { %v1040_v8 = vpop.f32.mrb[28].mxu1 }
 0x195   : > { %v3264_v9 = vpop.f32.mrb[29].mxu1 }
 0x196   : > { %v986_v5 = vpop.f32.mrb[28].mxu0  ;;  %v1043_v18 = vpop.f32.mrb[30].mxu1 }
 0x197   : > { %v992_v42 = vadd.f32 %v986_v5, %v937_v0  ;;  %v3258_v6 = vpop.f32.mrb[29].mxu0  ;;  %v3265_v31 = vpop.f32.mrb[31].mxu1 }
 0x198   : > { %v989_v44 = vpop.f32.mrb[30].mxu0 }
 0x199   : > { %v1046_v56 = vadd.f32 %v1040_v8, %v992_v42  ;;  %v3259_v11 = vpop.f32.mrb[31].mxu0 }
 0x19c   : > { %v1150_v21 = vpop.f32.mrb[32].mxu1 }
 0x19d   : > { %v3276_v23 = vpop.f32.mrb[33].mxu1 }
 0x19e   : > { %v1099_v1 = vpop.f32.mrb[32].mxu0  ;;  %v1153_v51 = vpop.f32.mrb[34].mxu1 }
 0x19f   : > { %v1105_v52 = vadd.f32 %v1099_v1, %v1046_v56  ;;  %v3270_v48 = vpop.f32.mrb[33].mxu0  ;;  %v3277_v49 = vpop.f32.mrb[35].mxu1 }
 0x1a0   : > { %v1102_v54 = vpop.f32.mrb[34].mxu0 }
 0x1a1   : > { %v1156_v57 = vadd.f32 %v1150_v21, %v1105_v52  ;;  %v3271_v33 = vpop.f32.mrb[35].mxu0 }
 0x1a4   : > { %v1251_v7 = vpop.f32.mrb[36].mxu1 }
 0x1a5   : > { %v3288_v34 = vpop.f32.mrb[37].mxu1 }
 0x1a6   : > { %v1200_v41 = vpop.f32.mrb[36].mxu0  ;;  %v1254_v27 = vpop.f32.mrb[38].mxu1 }
 0x1a7   : > { %v1206_v30 = vadd.f32 %v1200_v41, %v1156_v57  ;;  %v3282_v47 = vpop.f32.mrb[37].mxu0  ;;  %v3289_v32 = vpop.f32.mrb[39].mxu1 }
 0x1a8   : > { %v1203_v36 = vpop.f32.mrb[38].mxu0 }
 0x1a9   : > { %v1257_v40 = vadd.f32 %v1251_v7, %v1206_v30  ;;  %v3283_v16 = vpop.f32.mrb[39].mxu0 }
 0x1ac   : > { %v1358_v13 = vpop.f32.mrb[40].mxu1 }
 0x1ad   : > { %v3300_v45 = vpop.f32.mrb[41].mxu1 }
 0x1ae   : > { %v1303_v14 = vpop.f32.mrb[40].mxu0  ;;  %v1361_v50 = vpop.f32.mrb[42].mxu1 }
 0x1af   : > { %v1309_v20 = vadd.f32 %v1303_v14, %v1257_v40  ;;  %v3294_v22 = vpop.f32.mrb[41].mxu0  ;;  %v3301_v62 = vpop.f32.mrb[43].mxu1 }
 0x1b0   : > { %v1306_v58 = vpop.f32.mrb[42].mxu0 }
 0x1b1   : > { %v1364_v59 = vadd.f32 %v1358_v13, %v1309_v20  ;;  %v3295_v2 = vpop.f32.mrb[43].mxu0 }
 0x1b4   : > { %v1471_v60 = vpop.f32.mrb[44].mxu1 }
 0x1b5   : > { %v3312_v24 = vpop.f32.mrb[45].mxu1 }
 0x1b6   : > { %v1412_v55 = vpop.f32.mrb[44].mxu0  ;;  %v1474_v12 = vpop.f32.mrb[46].mxu1 }
 0x1b7   : > { %v1418_v28 = vadd.f32 %v1412_v55, %v1364_v59  ;;  %v3306_v19 = vpop.f32.mrb[45].mxu0  ;;  %v3313_v3 = vpop.f32.mrb[47].mxu1 }
 0x1b8   : > { %v1415_v25 = vpop.f32.mrb[46].mxu0 }
 0x1b9   : > { %v1477_v63 = vadd.f32 %v1471_v60, %v1418_v28  ;;  %v3307_v29 = vpop.f32.mrb[47].mxu0 }
 0x1bc   : > { %v1572_v39 = vpop.f32.mrb[48].mxu1 }
 0x1bd   : > { %v3324_v10 = vpop.f32.mrb[49].mxu1 }
 0x1be   : > { %v1522_v15 = vpop.f32.mrb[48].mxu0  ;;  %v1575_v17 = vpop.f32.mrb[50].mxu1 }
 0x1bf   : > { %v1528_v35 = vadd.f32 %v1522_v15, %v1477_v63  ;;  %v3318_v38 = vpop.f32.mrb[49].mxu0  ;;  %v3325_v46 = vpop.f32.mrb[51].mxu1 }
 0x1c0   : > { %v1525_v37 = vpop.f32.mrb[50].mxu0 }
 0x1c1   : > { %v1578_v4 = vadd.f32 %v1572_v39, %v1528_v35  ;;  %v3319_v26 = vpop.f32.mrb[51].mxu0 }
 0x1c4   : > { %v1675_v61 = vpop.f32.mrb[52].mxu1 }
 0x1c5   : > { %v3336_v43 = vpop.f32.mrb[53].mxu1 }
 0x1c6   : > { %v1623_v0 = vpop.f32.mrb[52].mxu0  ;;  %v1678_v53 = vpop.f32.mrb[54].mxu1 }
 0x1c7   : > { %v1629_v8 = vadd.f32 %v1623_v0, %v1578_v4  ;;  %v3330_v9 = vpop.f32.mrb[53].mxu0  ;;  %v3337_v5 = vpop.f32.mrb[55].mxu1 }
 0x1c8   : > { %v1626_v18 = vpop.f32.mrb[54].mxu0 }
 0x1c9   : > { %v1681_v42 = vadd.f32 %v1675_v61, %v1629_v8  ;;  %v3331_v6 = vpop.f32.mrb[55].mxu0 }
 0x1cc   : > { %v1784_v31 = vpop.f32.mrb[56].mxu1 }
 0x1cd   : > { %v3348_v44 = vpop.f32.mrb[57].mxu1 }
 0x1ce   : > { %v1730_v56 = vpop.f32.mrb[56].mxu0  ;;  %v1787_v11 = vpop.f32.mrb[58].mxu1 }
 0x1cf   : > { %v1736_v21 = vadd.f32 %v1730_v56, %v1681_v42  ;;  %v3342_v23 = vpop.f32.mrb[57].mxu0  ;;  %v3349_v1 = vpop.f32.mrb[59].mxu1 }
 0x1d0   : > { %v1733_v51 = vpop.f32.mrb[58].mxu0 }
 0x1d1   : > { %v1790_v52 = vadd.f32 %v1784_v31, %v1736_v21  ;;  %v3343_v48 = vpop.f32.mrb[59].mxu0 }
 0x1d4   : > { %v1894_v49 = vpop.f32.mrb[60].mxu1 }
 0x1d5   : > { %v3360_v54 = vpop.f32.mrb[61].mxu1 }
 0x1d6   : > { %v1843_v57 = vpop.f32.mrb[60].mxu0  ;;  %v1897_v33 = vpop.f32.mrb[62].mxu1 }
 0x1d7   : > { %v1849_v7 = vadd.f32 %v1843_v57, %v1790_v52  ;;  %v3354_v34 = vpop.f32.mrb[61].mxu0  ;;  %v3361_v41 = vpop.f32.mrb[63].mxu1 }
 0x1d8   : > { %v1846_v27 = vpop.f32.mrb[62].mxu0 }
 0x1d9   : > { %v1900_v30 = vadd.f32 %v1894_v49, %v1849_v7  ;;  %v3355_v47 = vpop.f32.mrb[63].mxu0 }
 0x1dc   : > { %v1995_v32 = vpop.f32.mrb[64].mxu1 }
 0x1dd   : > { %v3372_v36 = vpop.f32.mrb[65].mxu1 }
 0x1de   : > { %v1944_v40 = vpop.f32.mrb[64].mxu0  ;;  %v1998_v16 = vpop.f32.mrb[66].mxu1 }
 0x1df   : > { %v1950_v13 = vadd.f32 %v1944_v40, %v1900_v30  ;;  %v3366_v45 = vpop.f32.mrb[65].mxu0  ;;  %v3373_v14 = vpop.f32.mrb[67].mxu1 }
 0x1e0   : > { %v1947_v50 = vpop.f32.mrb[66].mxu0 }
 0x1e1   : > { %v2001_v20 = vadd.f32 %v1995_v32, %v1950_v13  ;;  %v3367_v22 = vpop.f32.mrb[67].mxu0 }
 0x1e4   : > { %v2102_v62 = vpop.f32.mrb[68].mxu1 }
 0x1e5   : > { %v3384_v58 = vpop.f32.mrb[69].mxu1 }
 0x1e6   : > { %v2047_v59 = vpop.f32.mrb[68].mxu0  ;;  %v2105_v2 = vpop.f32.mrb[70].mxu1 }
 0x1e7   : > { %v2053_v60 = vadd.f32 %v2047_v59, %v2001_v20  ;;  %v3378_v24 = vpop.f32.mrb[69].mxu0  ;;  %v3385_v55 = vpop.f32.mrb[71].mxu1 }
 0x1e8   : > { %v2050_v12 = vpop.f32.mrb[70].mxu0 }
 0x1e9   : > { %v2108_v28 = vadd.f32 %v2102_v62, %v2053_v60  ;;  %v3379_v19 = vpop.f32.mrb[71].mxu0  ;;  %v3061_v12 = vld [vmem:[%s4276_s2] ss:$0 sm:$0xff] }
 0x1ec   : > { %v2215_v3 = vpop.f32.mrb[72].mxu1 }
 0x1ed   : > { %v3396_v25 = vpop.f32.mrb[73].mxu1 }
 0x1ee   : > { %v2156_v63 = vpop.f32.mrb[72].mxu0  ;;  %v2218_v29 = vpop.f32.mrb[74].mxu1 }
 0x1ef   : > { %v2162_v39 = vadd.f32 %v2156_v63, %v2108_v28  ;;  %v3390_v10 = vpop.f32.mrb[73].mxu0  ;;  %v3397_v15 = vpop.f32.mrb[75].mxu1 }
 0x1f0   : > { %v2159_v17 = vpop.f32.mrb[74].mxu0 }
 0x1f1   : > { %v2221_v35 = vadd.f32 %v2215_v3, %v2162_v39  ;;  %v3391_v38 = vpop.f32.mrb[75].mxu0 }
 0x1f4   : > { %v2316_v46 = vpop.f32.mrb[76].mxu1 }
 0x1f5   : > { %v3408_v37 = vpop.f32.mrb[77].mxu1 }
 0x1f6   : > { %v2266_v4 = vpop.f32.mrb[76].mxu0  ;;  %v2319_v26 = vpop.f32.mrb[78].mxu1 }
 0x1f7   : > { %v2272_v61 = vadd.f32 %v2266_v4, %v2221_v35  ;;  %v3402_v43 = vpop.f32.mrb[77].mxu0  ;;  %v3409_v0 = vpop.f32.mrb[79].mxu1 }
 0x1f8   : > { %v2269_v53 = vpop.f32.mrb[78].mxu0 }
 0x1f9   : > { %v2322_v8 = vadd.f32 %v2316_v46, %v2272_v61  ;;  %v3403_v9 = vpop.f32.mrb[79].mxu0 }
 0x1fc   : > { %v2419_v5 = vpop.f32.mrb[80].mxu1 }
 0x1fd   : > { %v3420_v18 = vpop.f32.mrb[81].mxu1 }
 0x1fe   : > { %v2367_v42 = vpop.f32.mrb[80].mxu0  ;;  %v2422_v6 = vpop.f32.mrb[82].mxu1 }
 0x1ff   : > { %v2373_v31 = vadd.f32 %v2367_v42, %v2322_v8  ;;  %v3414_v44 = vpop.f32.mrb[81].mxu0  ;;  %v3421_v56 = vpop.f32.mrb[83].mxu1 }
 0x200   : > { %v2370_v11 = vpop.f32.mrb[82].mxu0 }
 0x201   : > { %v2425_v21 = vadd.f32 %v2419_v5, %v2373_v31  ;;  %v3415_v23 = vpop.f32.mrb[83].mxu0 }
 0x204   : > { %v2528_v1 = vpop.f32.mrb[84].mxu1 }
 0x205   : > { %v3432_v51 = vpop.f32.mrb[85].mxu1 }
 0x206   : > { %v2474_v52 = vpop.f32.mrb[84].mxu0  ;;  %v2531_v48 = vpop.f32.mrb[86].mxu1 }
 0x207   : > { %v2480_v49 = vadd.f32 %v2474_v52, %v2425_v21  ;;  %v3426_v54 = vpop.f32.mrb[85].mxu0  ;;  %v3433_v57 = vpop.f32.mrb[87].mxu1 }
 0x208   : > { %v2477_v33 = vpop.f32.mrb[86].mxu0 }
 0x209   : > { %v2534_v7 = vadd.f32 %v2528_v1, %v2480_v49  ;;  %v3427_v34 = vpop.f32.mrb[87].mxu0 }
 0x20c   : > { %v2638_v41 = vpop.f32.mrb[88].mxu1 }
 0x20d   : > { %v3444_v27 = vpop.f32.mrb[89].mxu1 }
 0x20e   : > { %v2587_v30 = vpop.f32.mrb[88].mxu0  ;;  %v2641_v47 = vpop.f32.mrb[90].mxu1 }
 0x20f   : > { %v2593_v32 = vadd.f32 %v2587_v30, %v2534_v7  ;;  %v3438_v36 = vpop.f32.mrb[89].mxu0  ;;  %v3445_v40 = vpop.f32.mrb[91].mxu1 }
 0x210   : > { %v2590_v16 = vpop.f32.mrb[90].mxu0 }
 0x211   : > { %v2644_v13 = vadd.f32 %v2638_v41, %v2593_v32  ;;  %v3439_v45 = vpop.f32.mrb[91].mxu0 }
 0x214   : > { %v2739_v14 = vpop.f32.mrb[92].mxu1 }
 0x215   : > { %v3456_v50 = vpop.f32.mrb[93].mxu1 }
 0x216   : > { %v2688_v20 = vpop.f32.mrb[92].mxu0  ;;  %v2742_v22 = vpop.f32.mrb[94].mxu1 }
 0x217   : > { %v2694_v62 = vadd.f32 %v2688_v20, %v2644_v13  ;;  %v3450_v58 = vpop.f32.mrb[93].mxu0  ;;  %v3457_v59 = vpop.f32.mrb[95].mxu1 }
 0x218   : > { %v2691_v2 = vpop.f32.mrb[94].mxu0 }
 0x219   : > { %v2745_v60 = vadd.f32 %v2739_v14, %v2694_v62  ;;  %v3451_v24 = vpop.f32.mrb[95].mxu0 }
 0x21e   : > { %v2791_v55 = vpop.f32.mrb[96].mxu0 }
 0x21f   : > { %v2797_v28 = vadd.f32 %v2791_v55, %v2745_v60  ;;  %v3462_v19 = vpop.f32.mrb[97].mxu0 }
 0x220   : > { %v2794_v3 = vpop.f32.mrb[98].mxu0 }
 0x221   : > { %v2805_v25 = vadd.f32 %v3061_v12, %v2797_v28  ;;  %v3463_v63 = vpop.f32.mrb[99].mxu0 }
 0x223   : > { %v2806_v29 = vmax.f32 %v2805_v25, 0.0 }
 0x225   : > { %v2807_v39 = vpack.c.bf16 %v2806_v29, %v2806_v29 }
 0x227   : > { %2808 = vst [vmem:[%s190_s4] sm:$0xf] %v2807_v39 }
 0x228 PF: > { %s13_s16 = sadd.s32 1, %s3561_s16   ;;  %s4278_s12 = smov %s3553_s14 }
 0x229   : > { %p10_p7 = scmp.ge.s32.totalorder %s13_s16, 18   ;;  %s4279_s13 = smov %s3557_s15 }
 0x22a   : > { %s4280_s14 = smov %s4283_s17  ;;  %s4281_s15 = smov %s4287_s18 }
 0x22b   :  { %12 = sbr.rel (!%p10_p7) target bundleno = 3 (0x3), region = 117 }

// kernel: resnet_forward.13
= control target key start
LH: loop header
LB: loop body
LE: loop exit
PB: predicated region body
PF: predicated region fallthrough
CT: control target
= control target key end

     0   :  { %s1260_s18 = smov 0   ;;  %s1262_s19 = smov 0   ;;  %s1409_s0 = inlined_call_operand.vmem [shape: bf16[2,6,6,128], index: 0, kind: input, shape index: {}]   ;;  %s1410_s1 = inlined_call_operand.vmem [shape: bf16[9,16,128], index: 1, kind: input, shape index: {}]   ;;  %s1411_s2 = inlined_call_operand.vmem [shape: bf16[2,4,4,128], index: 2, kind: input, shape index: {}]   ;;  %s1412_s3 = inlined_call_operand.vmem [shape: bf16[1,64,128], index: 3, kind: input, shape index: {}]   ;;  %s1413_s4 = inlined_call_operand.vmem [shape: f32[1,128], index: 4, kind: input, shape index: {}]   ;;  %s1414_s5 = inlined_call_operand.vmem [shape: bf16[2,4,4,128], index: 5, kind: output, shape index: {}]  }
   0x1   :  { %s1264_s20 = smov 0   ;;  %s1266_s21 = smov 0  }
   0x2   :  { %s1268_s22 = smov 0  }
   0x3 LB: > { %s24_s23 = sadd.s32 1, %s1218_s20  ;;  %s27_s24 = sadd.s32 1, %s1222_s21  ;;  %s1226_s22 = sphi %s1268_s22, %s15_s22   ;;  %s1222_s21 = sphi %s1266_s21, %s1418_s21   ;;  %s1218_s20 = sphi %s1264_s20, %s1417_s20   ;;  %s1214_s19 = sphi %s1262_s19, %s1416_s19   ;;  %s1210_s18 = sphi %s1260_s18, %s1415_s18  }
   0x4   : > { %p25_p0 = scmp.ge.s32.totalorder %s24_s23, 4  ;;  %p982_p1 = scmp.ge.s32.totalorder %s1226_s22, 1 }
   0x5   : > { %p211_p2 = scmp.lt.s32.totalorder %s1226_s22, 9 }
   0x6   : > { %s1420_s23 = smov (%p25_p0, %s24_s23), 0  ;;  %s1422_s24 = smov (!%p25_p0, %s27_s24), %s1222_s21 }
   0x7   : > { %p212_p3 = pnand %p982_p1, %p211_p2  ;;  %p29_p4 = scmp.ge.s32.totalorder %s1422_s24, 2 }
   0x8   : > { %v1172_v0 = vld [vmem:[%s1410_s1] sm:$0xff] (!%p212_p3)   ;;  %v1228_v1 = vmov (!%p212_p3), 0.0   ;;  %p247_p5 = scmp.lt.s32.totalorder (!%p212_p3), %s1214_s19, 1  ;;  %vm1229_vm0 = vmmov (!%p212_p3), 0   ;;  %v1176_v2 = vld [vmem:[%s1410_s1 + $0x8] sm:$0xff] (!%p212_p3)   ;;  %s988_s30 = sshll.u32 (!%p212_p3), %s1210_s18, 2 }
   0x9   : > { %s1424_s24 = smov (%p29_p4, %s1422_s24), 0  ;;  %215 = sbr.rel (%p212_p3) target bundleno = 285 (0x11d), region = 40 }
   0xa   : > { %1069 = vmatprep.subr.bf16.mxu1 (!%p212_p3), %v1228_v1  ;;  %1063 = vmatprep.subr.bf16.mxu0 (!%p212_p3), %v1228_v1  ;;  %vm290_vm1 = vcmask (!%p212_p3), 130048   ;;  %v1175_v3 = vld [vmem:[%s1410_s1 + $0x18] sm:$0xff] (!%p212_p3)   ;;  %v1177_v9 = vld [vmem:[%s1410_s1 + $0x10] sm:$0xff] (!%p212_p3)   ;;  %v1179_v11 = vld [vmem:[%s1410_s1 + $0x28] sm:$0xff] (!%p212_p3)   ;;  %s1030_s16 = sshll.u32 (!%p212_p3), %s1210_s18, 1  ;;  %vm820_vm2 = vcmask (!%p212_p3), 523264  }
   0xb   : > { %1070 = vmatpush3.bf16.msra.mxu1 (!%p212_p3), %v1172_v0  ;;  %1071 = vmatprep.mubr.msk.bf16.mxu1 (!%p212_p3), %vm1229_vm0, %v1228_v1  ;;  %v1180_v20 = vld [vmem:[%s1410_s1 + $0x20] sm:$0xff] (!%p212_p3)   ;;  %v1181_v21 = vld [vmem:[%s1410_s1 + $0x38] sm:$0xff] (!%p212_p3)   ;;  %v1182_v28 = vld [vmem:[%s1410_s1 + $0x30] sm:$0xff] (!%p212_p3)   ;;  %p259_p6 = scmp.lt.s32.totalorder (!%p212_p3), %s1210_s18, 3 }
   0xc   : > { %1081 = vmatprep.subr.bf16.mxu1 (!%p212_p3), %v1228_v1  ;;  %1065 = vmatprep.mubr.msk.bf16.mxu0 (!%p212_p3), %vm1229_vm0, %v1228_v1  ;;  %v1183_v29 = vld [vmem:[%s1412_s3] sm:$0xff] (!%p212_p3)   ;;  %v1184_v30 = vld [vmem:[%s1412_s3 + $0x8] sm:$0xff] (!%p212_p3)   ;;  %v1186_v32 = vld [vmem:[%s1412_s3 + $0x10] sm:$0xff] (!%p212_p3)  }
   0xd   : > { %1064 = vmatpush3.bf16.msra.mxu0 (!%p212_p3), %v1176_v2  ;;  %v1185_v31 = vld [vmem:[%s1410_s1 + $0x40] sm:$0xff] (!%p212_p3)   ;;  %v1187_v33 = vld [vmem:[%s1412_s3 + $0x18] sm:$0xff] (!%p212_p3)  }
   0xe   : > { %1075 = vmatprep.subr.bf16.mxu0 (!%p212_p3), %v1228_v1 }
  0x10   : > { %s1426_s19 = smov (!%p247_p5, %s1214_s19), 1  ;;  %s1428_s18 = smov (!%p259_p6, %s1210_s18), 3 }
  0x11   : > { %s1129_s29 = smul.u32 24, %s1426_s19  ;;  %s986_s27 = sshll.u32 %s1426_s19, 2 }
  0x12   : > { %s262_s28 = sadd.s32 %s986_s27, %s1428_s18 }
  0x13   : > { %s251_s8 = scalar_lea.vmem %s1409_s0, %s1129_s29  ;;  %s987_s6 = sshll.u32 %s262_s28, 1 }
  0x14   : > { %s267_s11 = scalar_lea.vmem %s251_s8, %s988_s30  ;;  %s1039_s8 = sshll.u32 %s1426_s19, 3 }
  0x15   : > { %v268_v4 = vld [vmem:[%s267_s11] sm:$0x7]  ;;  %v1016_v8 = vld [vmem:[%s267_s11 + $0x8] sm:$0x7]  ;;  %v1001_v12 = vld [vmem:[%s267_s11 + $0x4] sm:$0x7]  ;;  %s256_s15 = scalar_lea.vmem %s1411_s2, %s1039_s8  ;;  %s264_s8 = scalar_lea.vmem %s1414_s5, %s987_s6 }
  0x16   : > { %v991_v5 = vcombine.low %v268_v4, %v268_v4  ;;  %1072 = vmatmul.mubr.msk.bf16.vlgmr.msra.gmra.mrb[0].mxu1 %vm290_vm1, %v268_v4  ;;  %v1023_v14 = vcombine.low %v1016_v8, %v1016_v8  ;;  %v1008_v15 = vcombine.low %v1001_v12, %v1001_v12  ;;  %s786_s26 = scalar_lea.vmem %s256_s15, %s1030_s16 }
  0x17   : > { %1082 = vmatpush3.bf16.msra.mxu1 %v1175_v3  ;;  %1083 = vmatprep.mubr.msk.bf16.mxu1 %vm1229_vm0, %v1228_v1  ;;  %v787_v35 = vld [vmem:[%s786_s26] sm:$0x3] }
  0x18   : > { %v278_v6 = vshrl.u32 %v991_v5, 16  ;;  %v280_v7 = vshll.u32 %v991_v5, 16  ;;  %1093 = vmatprep.subr.bf16.mxu1 %v1228_v1  ;;  %v386_v16 = vrot.slane %v991_v5, 1  ;;  %v677_v17 = vshll.u32 %v1023_v14, 16 }
  0x19   : > { %v503_v18 = vshll.u32 %v1008_v15, 16  ;;  %v560_v19 = vrot.slane %v1008_v15, 1  ;;  %v675_v22 = vshrl.u32 %v1023_v14, 16  ;;  %v501_v23 = vshrl.u32 %v1008_v15, 16 }
  0x1a   : > { %v282_v10 = vrot.slane %v280_v7, 1  ;;  %v679_v25 = vrot.slane %v677_v17, 1  ;;  %v734_v34 = vrot.slane %v1023_v14, 1 }
  0x1b   : > { %v505_v24 = vrot.slane %v503_v18, 1 }
  0x1c   : > { %v283_v13 = vor.u32 %v282_v10, %v278_v6  ;;  %v680_v27 = vor.u32 %v679_v25, %v675_v22 }
  0x1d   : > { %v506_v26 = vor.u32 %v505_v24, %v501_v23 }
  0x1e   : > { %1066 = vmatmul.mubr.msk.bf16.vlgmr.msra.gmra.mrb[0].mxu0 %vm290_vm1, %v283_v13  ;;  %1084 = vmatmul.mubr.msk.bf16.vlgmr.msra.gmra.mrb[4].mxu1 %vm290_vm1, %v1001_v12 }
  0x1f   : > { %1076 = vmatpush3.bf16.msra.mxu0 %v1177_v9  ;;  %1094 = vmatpush3.bf16.msra.mxu1 %v1179_v11 }
  0x20   : > { %1077 = vmatprep.mubr.msk.bf16.mxu0 %vm1229_vm0, %v1228_v1  ;;  %1087 = vmatprep.subr.bf16.mxu0 %v1228_v1 }
  0x21   : > { %1095 = vmatprep.mubr.msk.bf16.mxu1 %vm1229_vm0, %v1228_v1  ;;  %1105 = vmatprep.subr.bf16.mxu1 %v1228_v1 }
  0x26   : > { %1078 = vmatmul.mubr.msk.bf16.vlgmr.msra.gmra.mrb[4].mxu0 %vm290_vm1, %v386_v16  ;;  %1096 = vmatmul.mubr.msk.bf16.vlgmr.msra.gmra.mrb[8].mxu1 %vm290_vm1, %v560_v19  ;;  %v1036_v16 = vld [vmem:[%s1413_s4] ss:$0 sm:$0xff] }
  0x27   : > { %1088 = vmatpush3.bf16.msra.mxu0 %v1180_v20  ;;  %1106 = vmatpush3.bf16.msra.mxu1 %v1181_v21 }
  0x28   : > { %1089 = vmatprep.mubr.msk.bf16.mxu0 %vm1229_vm0, %v1228_v1  ;;  %1099 = vmatprep.subr.bf16.mxu0 %v1228_v1 }
  0x29   : > { %1107 = vmatprep.mubr.msk.bf16.mxu1 %vm1229_vm0, %v1228_v1  ;;  %1117 = vmatprep.subr.bf16.mxu1 %v1228_v1 }
  0x2e   : > { %1090 = vmatmul.mubr.msk.bf16.vlgmr.msra.gmra.mrb[8].mxu0 %vm290_vm1, %v506_v26  ;;  %1108 = vmatmul.mubr.msk.bf16.vlgmr.msra.gmra.mrb[12].mxu1 %vm290_vm1, %v680_v27 }
  0x2f   : > { %1100 = vmatpush3.bf16.msra.mxu0 %v1182_v28  ;;  %1118 = vmatpush3.bf16.msra.mxu1 %v1183_v29 }
  0x30   : > { %1119 = vmatprep.subr.bf16.mxu1 %v1228_v1  ;;  %1101 = vmatprep.mubr.msk.bf16.mxu0 %vm1229_vm0, %v1228_v1 }
  0x31   : > { %1111 = vmatprep.subr.bf16.mxu0 %v1228_v1  ;;  %1125 = vmatprep.mubr.msk.bf16.mxu1 %vm1229_vm0, %v1228_v1 }
  0x33   : > { %1120 = vmatpush3.bf16.msra.mxu1 %v1184_v30 }
  0x34   : > { %1121 = vmatprep.subr.bf16.mxu1 %v1228_v1 }
  0x36   : > { %1102 = vmatmul.mubr.msk.bf16.vlgmr.msra.gmra.mrb[12].mxu0 %vm290_vm1, %v1016_v8 }
  0x37   : > { %1112 = vmatpush3.bf16.msra.mxu0 %v1185_v31  ;;  %1122 = vmatpush3.bf16.msra.mxu1 %v1186_v32 }
  0x38   : > { %1123 = vmatprep.subr.bf16.mxu1 %v1228_v1  ;;  %1113 = vmatprep.mubr.msk.bf16.mxu0 %vm1229_vm0, %v1228_v1 }
  0x3b   : > { %1124 = vmatpush3.bf16.msra.mxu1 %v1187_v33 }
  0x3e   : > { %1126 = vmatmul.mubr.msk.bf16.vlgmr.msra.gmra.mrb[16].mxu1 %vm820_vm2, %v787_v35  ;;  %1114 = vmatmul.mubr.msk.bf16.vlgmr.msra.gmra.mrb[16].mxu0 %vm290_vm1, %v734_v34 }
  0xe9   : > { %v377_v36 = vpop.f32.mrb[0].mxu1 }
  0xea   : > { %v1073_v37 = vpop.f32.mrb[1].mxu1 }
  0xeb   : > { %v380_v38 = vpop.f32.mrb[2].mxu1 }
  0xec   : > { %v1074_v39 = vpop.f32.mrb[3].mxu1 }
  0xf1   : > { %v328_v40 = vpop.f32.mrb[0].mxu0  ;;  %v487_v41 = vpop.f32.mrb[4].mxu1 }
  0xf2   : > { %v378_v42 = vadd.f32 %v377_v36, %v328_v40  ;;  %v1067_v43 = vpop.f32.mrb[1].mxu0  ;;  %v1085_v44 = vpop.f32.mrb[5].mxu1 }
  0xf3   : > { %v331_v45 = vpop.f32.mrb[2].mxu0  ;;  %v490_v46 = vpop.f32.mrb[6].mxu1 }
  0xf4   : > { %v1068_v47 = vpop.f32.mrb[3].mxu0  ;;  %v1086_v48 = vpop.f32.mrb[7].mxu1 }
  0xf9   : > { %v430_v49 = vpop.f32.mrb[4].mxu0  ;;  %v604_v50 = vpop.f32.mrb[8].mxu1 }
  0xfa   : > { %v436_v51 = vadd.f32 %v430_v49, %v378_v42  ;;  %v1079_v52 = vpop.f32.mrb[5].mxu0  ;;  %v1097_v53 = vpop.f32.mrb[9].mxu1 }
  0xfb   : > { %v433_v54 = vpop.f32.mrb[6].mxu0  ;;  %v607_v55 = vpop.f32.mrb[10].mxu1 }
  0xfc   : > { %v1080_v56 = vpop.f32.mrb[7].mxu0  ;;  %v1098_v57 = vpop.f32.mrb[11].mxu1  ;;  %v493_v58 = vadd.f32 %v487_v41, %v436_v51 }
 0x101   : > { %v550_v59 = vpop.f32.mrb[8].mxu0  ;;  %v724_v60 = vpop.f32.mrb[12].mxu1 }
 0x102   : > { %v556_v61 = vadd.f32 %v550_v59, %v493_v58  ;;  %v1091_v62 = vpop.f32.mrb[9].mxu0  ;;  %v1109_v63 = vpop.f32.mrb[13].mxu1 }
 0x103   : > { %v553_v0 = vpop.f32.mrb[10].mxu0  ;;  %v727_v1 = vpop.f32.mrb[14].mxu1 }
 0x104   : > { %v1092_v2 = vpop.f32.mrb[11].mxu0  ;;  %v1110_v3 = vpop.f32.mrb[15].mxu1  ;;  %v610_v4 = vadd.f32 %v604_v50, %v556_v61 }
 0x109   : > { %v661_v5 = vpop.f32.mrb[12].mxu0 }
 0x10a   : > { %v667_v6 = vadd.f32 %v661_v5, %v610_v4  ;;  %v1103_v7 = vpop.f32.mrb[13].mxu0 }
 0x10b   : > { %v664_v8 = vpop.f32.mrb[14].mxu0 }
 0x10c   : > { %v1104_v9 = vpop.f32.mrb[15].mxu0  ;;  %v730_v10 = vadd.f32 %v724_v60, %v667_v6 }
 0x111   : > { %v858_v11 = vpop.f32.mrb[16].mxu1  ;;  %v778_v12 = vpop.f32.mrb[16].mxu0 }
 0x112   : > { %v784_v13 = vadd.f32 %v778_v12, %v730_v10  ;;  %v1127_v14 = vpop.f32.mrb[17].mxu1  ;;  %v1115_v15 = vpop.f32.mrb[17].mxu0 }
 0x113   : > { %v861_v17 = vpop.f32.mrb[18].mxu1  ;;  %v781_v18 = vpop.f32.mrb[18].mxu0 }
 0x114   : > { %v864_v19 = vadd.f32 %v858_v11, %v784_v13  ;;  %v1128_v20 = vpop.f32.mrb[19].mxu1  ;;  %v1116_v21 = vpop.f32.mrb[19].mxu0 }
 0x116   : > { %v872_v22 = vadd.f32 %v1036_v16, %v864_v19 }
 0x118   : > { %v873_v23 = vmax.f32 %v872_v22, 0.0 }
 0x11a   : > { %v874_v24 = vpack.c.bf16 %v873_v23, %v873_v23 }
 0x11c   : > { %875 = vst [vmem:[%s264_s8] sm:$0x3] %v874_v24 }
 0x11d PF: > { %s15_s22 = sadd.s32 1, %s1226_s22   ;;  %s1415_s18 = smov %s1218_s20 }
 0x11e   : > { %p12_p7 = scmp.ge.s32.totalorder %s15_s22, 10   ;;  %s1416_s19 = smov %s1222_s21 }
 0x11f   : > { %s1417_s20 = smov %s1420_s23  ;;  %s1418_s21 = smov %s1424_s24 }
 0x120   :  { %14 = sbr.rel (!%p12_p7) target bundleno = 3 (0x3), region = 85 }

// kernel: resnet_forward.14
= control target key start
LH: loop header
LB: loop body
LE: loop exit
PB: predicated region body
PF: predicated region fallthrough
CT: control target
= control target key end

     0   :  { %s1068_s12 = smov 0   ;;  %s1070_s13 = smov 0   ;;  %s1203_s0 = inlined_call_operand.vmem [shape: bf16[2,6,3,256], index: 0, kind: input, shape index: {}]   ;;  %s1204_s1 = inlined_call_operand.vmem [shape: bf16[9,16,128], index: 1, kind: input, shape index: {}]   ;;  %s1205_s2 = inlined_call_operand.vmem [shape: f32[1,128], index: 2, kind: input, shape index: {}]   ;;  %s1206_s3 = inlined_call_operand.vmem [shape: bf16[2,2,2,128], index: 3, kind: output, shape index: {}]  }
   0x1   :  { %s1072_s14 = smov 0   ;;  %s1074_s15 = smov 0  }
   0x2   :  { %s1076_s16 = smov 0  }
   0x3 LB: > { %s22_s17 = sadd.s32 1, %s1035_s14  ;;  %s25_s18 = sadd.s32 1, %s1039_s15  ;;  %s1043_s16 = sphi %s1076_s16, %s13_s16   ;;  %s1039_s15 = sphi %s1074_s15, %s1210_s15   ;;  %s1035_s14 = sphi %s1072_s14, %s1209_s14   ;;  %s1031_s13 = sphi %s1070_s13, %s1208_s13   ;;  %s1027_s12 = sphi %s1068_s12, %s1207_s12  }
   0x4   : > { %p23_p0 = scmp.ge.s32.totalorder %s22_s17, 2  ;;  %p827_p1 = scmp.ge.s32.totalorder %s1043_s16, 1 }
   0x5   : > { %p151_p2 = scmp.lt.s32.totalorder %s1043_s16, 5 }
   0x6   : > { %s1212_s17 = smov (%p23_p0, %s22_s17), 0  ;;  %s1214_s18 = smov (!%p23_p0, %s25_s18), %s1039_s15 }
   0x7   : > { %p152_p3 = pnand %p827_p1, %p151_p2  ;;  %p27_p4 = scmp.ge.s32.totalorder %s1214_s18, 2 }
   0x8   : > { %v996_v0 = vld [vmem:[%s1204_s1 + $0x8] sm:$0xff] (!%p152_p3)   ;;  %v204_v1 = vlaneseq (!%p152_p3)  ;;  %v1045_v2 = vmov (!%p152_p3), 0.0   ;;  %v997_v3 = vld [vmem:[%s1204_s1] sm:$0xff] (!%p152_p3)   ;;  %vm1046_vm0 = vmmov (!%p152_p3), 0   ;;  %p177_p5 = scmp.lt.s32.totalorder (!%p152_p3), %s1031_s13, 1  ;;  %s877_s24 = sshll.u32 (!%p152_p3), %s1027_s12, 3 }
   0x9   : > { %s1216_s18 = smov (%p27_p4, %s1214_s18), 0  ;;  %155 = sbr.rel (%p152_p3) target bundleno = 279 (0x117), region = 32 }
   0xa   : > { %898 = vmatprep.subr.bf16.mxu0 (!%p152_p3), %v1045_v2  ;;  %904 = vmatprep.subr.bf16.mxu1 (!%p152_p3), %v1045_v2  ;;  %v1047_v4 = vmov (!%p152_p3), 1983009808   ;;  %v205_v6 = vshrl.u32 (!%p152_p3), %v204_v1, 7  ;;  %vm215_vm1 = vcmask (!%p152_p3), 130048   ;;  %v999_v9 = vld [vmem:[%s1204_s1 + $0x18] sm:$0xff] (!%p152_p3)   ;;  %v998_v14 = vld [vmem:[%s1204_s1 + $0x10] sm:$0xff] (!%p152_p3)  }
   0xb   : > { %899 = vmatpush3.bf16.msra.mxu0 (!%p152_p3), %v996_v0  ;;  %900 = vmatprep.mubr.msk.bf16.mxu0 (!%p152_p3), %vm1046_vm0, %v1045_v2  ;;  %v202_v5 = vunpack.c.l.s4 (!%p152_p3), %v1047_v4  ;;  %v1001_v20 = vld [vmem:[%s1204_s1 + $0x28] sm:$0xff] (!%p152_p3)   ;;  %v1000_v24 = vld [vmem:[%s1204_s1 + $0x20] sm:$0xff] (!%p152_p3)   ;;  %v1003_v26 = vld [vmem:[%s1204_s1 + $0x38] sm:$0xff] (!%p152_p3)   ;;  %p184_p6 = scmp.lt.s32.totalorder (!%p152_p3), %s1027_s12, 1 }
   0xc   : > { %905 = vmatpush3.bf16.msra.mxu1 (!%p152_p3), %v997_v3  ;;  %906 = vmatprep.mubr.msk.bf16.mxu1 (!%p152_p3), %vm1046_vm0, %v1045_v2  ;;  %v1002_v30 = vld [vmem:[%s1204_s1 + $0x30] sm:$0xff] (!%p152_p3)   ;;  %v1004_v33 = vld [vmem:[%s1204_s1 + $0x40] sm:$0xff] (!%p152_p3)  }
   0xd   : > { %910 = vmatprep.subr.bf16.mxu0 (!%p152_p3), %v1045_v2  ;;  %916 = vmatprep.subr.bf16.mxu1 (!%p152_p3), %v1045_v2  ;;  %v203_v7 = vunpack.c.0.s8 (!%p152_p3), %v202_v5 }
   0xf   : > { %v206_v8 = vsub.s32 (!%p152_p3), %v203_v7, %v205_v6 }
  0x10   : > { %s1218_s13 = smov (!%p177_p5, %s1031_s13), 1  ;;  %s1220_s12 = smov (!%p184_p6, %s1027_s12), 1 }
  0x11   : > { %s952_s23 = smul.u32 24, %s1218_s13 }
  0x13   : > { %s181_s27 = scalar_lea.vmem %s1203_s0, %s952_s23  ;;  %s829_s23 = sshll.u32 %s1218_s13, 1 }
  0x14   : > { %s1128_s30 = scalar_lea.vmem %s181_s27, %s877_s24  ;;  %s187_s26 = sadd.s32 %s829_s23, %s1220_s12 }
  0x15   : > { %v194_v10 = vld [vmem:[%s1128_s30] sm:$0xf]  ;;  %v845_v11 = vld [vmem:[%s1128_s30 + $0x4] sm:$0xf]  ;;  %v860_v27 = vld [vmem:[%s1128_s30 + $0x8] sm:$0xf]  ;;  %s188_s29 = scalar_lea.vmem %s1206_s3, %s187_s26 }
  0x16   : > { %v207_v12 = vrot.slane %v194_v10, %v206_v8  ;;  %907 = vmatmul.mubr.msk.bf16.vlgmr.msra.gmra.mrb[0].mxu1 %vm215_vm1, %v194_v10  ;;  %v436_v13 = vrot.slane %v845_v11, %v206_v8  ;;  %v616_v29 = vrot.slane %v860_v27, %v206_v8 }
  0x17   : > { %917 = vmatpush3.bf16.msra.mxu1 %v999_v9  ;;  %918 = vmatprep.mubr.msk.bf16.mxu1 %vm1046_vm0, %v1045_v2 }
  0x18   : > { %v208_v15 = vcombine.high %v207_v12, %v207_v12  ;;  %v314_v16 = vshll.u32 %v207_v12, 16  ;;  %928 = vmatprep.subr.bf16.mxu1 %v1045_v2  ;;  %v312_v17 = vshrl.u32 %v207_v12, 16  ;;  %v494_v19 = vshll.u32 %v436_v13, 16 }
  0x19   : > { %v492_v22 = vshrl.u32 %v436_v13, 16  ;;  %v437_v28 = vcombine.high %v436_v13, %v436_v13  ;;  %v617_v31 = vcombine.high %v616_v29, %v616_v29  ;;  %v674_v32 = vshll.u32 %v616_v29, 16  ;;  %v873_v13 = vld [vmem:[%s1205_s2] ss:$0 sm:$0xff] }
  0x1a   : > { %901 = vmatmul.mubr.msk.bf16.vlgmr.msra.gmra.mrb[0].mxu0 %vm215_vm1, %v208_v15  ;;  %v316_v18 = vrot.slane %v314_v16, 1  ;;  %v496_v23 = vrot.slane %v494_v19, 1  ;;  %v672_v34 = vshrl.u32 %v616_v29, 16 }
  0x1b   : > { %911 = vmatpush3.bf16.msra.mxu0 %v998_v14  ;;  %912 = vmatprep.mubr.msk.bf16.mxu0 %vm1046_vm0, %v1045_v2  ;;  %v676_v35 = vrot.slane %v674_v32, 1 }
  0x1c   : > { %922 = vmatprep.subr.bf16.mxu0 %v1045_v2  ;;  %v317_v21 = vor.u32 %v316_v18, %v312_v17  ;;  %v497_v25 = vor.u32 %v496_v23, %v492_v22 }
  0x1d   : > { %v677_v36 = vor.u32 %v676_v35, %v672_v34 }
  0x1e   : > { %919 = vmatmul.mubr.msk.bf16.vlgmr.msra.gmra.mrb[4].mxu1 %vm215_vm1, %v845_v11 }
  0x1f   : > { %929 = vmatpush3.bf16.msra.mxu1 %v1001_v20  ;;  %930 = vmatprep.mubr.msk.bf16.mxu1 %vm1046_vm0, %v1045_v2 }
  0x20   : > { %940 = vmatprep.subr.bf16.mxu1 %v1045_v2 }
  0x22   : > { %913 = vmatmul.mubr.msk.bf16.vlgmr.msra.gmra.mrb[4].mxu0 %vm215_vm1, %v317_v21 }
  0x23   : > { %923 = vmatpush3.bf16.msra.mxu0 %v1000_v24  ;;  %924 = vmatprep.mubr.msk.bf16.mxu0 %vm1046_vm0, %v1045_v2 }
  0x24   : > { %934 = vmatprep.subr.bf16.mxu0 %v1045_v2 }
  0x26   : > { %931 = vmatmul.mubr.msk.bf16.vlgmr.msra.gmra.mrb[8].mxu1 %vm215_vm1, %v497_v25 }
  0x27   : > { %941 = vmatpush3.bf16.msra.mxu1 %v1003_v26  ;;  %942 = vmatprep.mubr.msk.bf16.mxu1 %vm1046_vm0, %v1045_v2 }
  0x2a   : > { %925 = vmatmul.mubr.msk.bf16.vlgmr.msra.gmra.mrb[8].mxu0 %vm215_vm1, %v437_v28 }
  0x2b   : > { %935 = vmatpush3.bf16.msra.mxu0 %v1002_v30  ;;  %936 = vmatprep.mubr.msk.bf16.mxu0 %vm1046_vm0, %v1045_v2 }
  0x2c   : > { %946 = vmatprep.subr.bf16.mxu0 %v1045_v2 }
  0x2e   : > { %943 = vmatmul.mubr.msk.bf16.vlgmr.msra.gmra.mrb[12].mxu1 %vm215_vm1, %v617_v31 }
  0x32   : > { %937 = vmatmul.mubr.msk.bf16.vlgmr.msra.gmra.mrb[12].mxu0 %vm215_vm1, %v860_v27 }
  0x33   : > { %947 = vmatpush3.bf16.msra.mxu0 %v1004_v33  ;;  %948 = vmatprep.mubr.msk.bf16.mxu0 %vm1046_vm0, %v1045_v2 }
  0x3a   : > { %949 = vmatmul.mubr.msk.bf16.vlgmr.msra.gmra.mrb[16].mxu0 %vm215_vm1, %v677_v36 }
  0xe9   : > { %v302_v37 = vpop.f32.mrb[0].mxu1 }
  0xea   : > { %v908_v38 = vpop.f32.mrb[1].mxu1 }
  0xeb   : > { %v305_v39 = vpop.f32.mrb[2].mxu1 }
  0xec   : > { %v909_v40 = vpop.f32.mrb[3].mxu1 }
  0xed   : > { %v253_v41 = vpop.f32.mrb[0].mxu0 }
  0xee   : > { %v303_v42 = vadd.f32 %v302_v37, %v253_v41  ;;  %v902_v43 = vpop.f32.mrb[1].mxu0 }
  0xef   : > { %v256_v44 = vpop.f32.mrb[2].mxu0 }
  0xf0   : > { %v903_v45 = vpop.f32.mrb[3].mxu0 }
  0xf1   : > { %v419_v46 = vpop.f32.mrb[4].mxu1 }
  0xf2   : > { %v920_v47 = vpop.f32.mrb[5].mxu1 }
  0xf3   : > { %v422_v48 = vpop.f32.mrb[6].mxu1 }
  0xf4   : > { %v921_v49 = vpop.f32.mrb[7].mxu1 }
  0xf5   : > { %v361_v50 = vpop.f32.mrb[4].mxu0 }
  0xf6   : > { %v367_v51 = vadd.f32 %v361_v50, %v303_v42  ;;  %v914_v52 = vpop.f32.mrb[5].mxu0 }
  0xf7   : > { %v364_v53 = vpop.f32.mrb[6].mxu0 }
  0xf8   : > { %v425_v54 = vadd.f32 %v419_v46, %v367_v51  ;;  %v915_v55 = vpop.f32.mrb[7].mxu0 }
  0xf9   : > { %v541_v56 = vpop.f32.mrb[8].mxu1 }
  0xfa   : > { %v932_v57 = vpop.f32.mrb[9].mxu1 }
  0xfb   : > { %v544_v58 = vpop.f32.mrb[10].mxu1 }
  0xfc   : > { %v933_v59 = vpop.f32.mrb[11].mxu1 }
  0xfd   : > { %v481_v60 = vpop.f32.mrb[8].mxu0 }
  0xfe   : > { %v487_v61 = vadd.f32 %v481_v60, %v425_v54  ;;  %v926_v62 = vpop.f32.mrb[9].mxu0 }
  0xff   : > { %v484_v63 = vpop.f32.mrb[10].mxu0 }
 0x100   : > { %v547_v0 = vadd.f32 %v541_v56, %v487_v61  ;;  %v927_v1 = vpop.f32.mrb[11].mxu0 }
 0x101   : > { %v661_v2 = vpop.f32.mrb[12].mxu1 }
 0x102   : > { %v944_v3 = vpop.f32.mrb[13].mxu1 }
 0x103   : > { %v664_v4 = vpop.f32.mrb[14].mxu1 }
 0x104   : > { %v945_v5 = vpop.f32.mrb[15].mxu1 }
 0x105   : > { %v599_v6 = vpop.f32.mrb[12].mxu0 }
 0x106   : > { %v605_v7 = vadd.f32 %v599_v6, %v547_v0  ;;  %v938_v8 = vpop.f32.mrb[13].mxu0 }
 0x107   : > { %v602_v9 = vpop.f32.mrb[14].mxu0 }
 0x108   : > { %v667_v10 = vadd.f32 %v661_v2, %v605_v7  ;;  %v939_v11 = vpop.f32.mrb[15].mxu0 }
 0x10d   : > { %v721_v12 = vpop.f32.mrb[16].mxu0 }
 0x10e   : > { %v727_v14 = vadd.f32 %v721_v12, %v667_v10  ;;  %v950_v15 = vpop.f32.mrb[17].mxu0 }
 0x10f   : > { %v724_v16 = vpop.f32.mrb[18].mxu0 }
 0x110   : > { %v735_v17 = vadd.f32 %v873_v13, %v727_v14  ;;  %v951_v18 = vpop.f32.mrb[19].mxu0 }
 0x112   : > { %v736_v19 = vmax.f32 %v735_v17, 0.0 }
 0x114   : > { %v737_v20 = vpack.c.bf16 %v736_v19, %v736_v19 }
 0x116   : > { %738 = vst [vmem:[%s188_s29] sm:$0x1] %v737_v20 }
 0x117 PF: > { %s13_s16 = sadd.s32 1, %s1043_s16   ;;  %s1207_s12 = smov %s1035_s14 }
 0x118   : > { %p10_p7 = scmp.ge.s32.totalorder %s13_s16, 6   ;;  %s1208_s13 = smov %s1039_s15 }
 0x119   : > { %s1209_s14 = smov %s1212_s17  ;;  %s1210_s15 = smov %s1216_s18 }
 0x11a   :  { %12 = sbr.rel (!%p10_p7) target bundleno = 3 (0x3), region = 73 }

// kernel: resnet_forward.15
= control target key start
LH: loop header
LB: loop body
LE: loop exit
PB: predicated region body
PF: predicated region fallthrough
CT: control target
= control target key end

     0   :  { %s1355_s18 = smov 0   ;;  %s1357_s19 = smov 0   ;;  %s1544_s0 = inlined_call_operand.vmem [shape: bf16[2,4,4,128], index: 0, kind: input, shape index: {}]   ;;  %s1545_s1 = inlined_call_operand.vmem [shape: bf16[9,32,128], index: 1, kind: input, shape index: {}]   ;;  %s1546_s2 = inlined_call_operand.vmem [shape: bf16[2,4,2,256], index: 2, kind: input, shape index: {}]   ;;  %s1547_s3 = inlined_call_operand.vmem [shape: bf16[1,16,128], index: 3, kind: input, shape index: {}]   ;;  %s1548_s4 = inlined_call_operand.vmem [shape: f32[1,128], index: 4, kind: input, shape index: {}]   ;;  %s1549_s5 = inlined_call_operand.vmem [shape: bf16[2,2,2,128], index: 5, kind: output, shape index: {}]  }
   0x1   :  { %s1359_s20 = smov 0   ;;  %s1361_s21 = smov 0  }
   0x2   :  { %s1363_s22 = smov 0  }
   0x3 LB: > { %s24_s23 = sadd.s32 1, %s1312_s20  ;;  %s27_s24 = sadd.s32 1, %s1316_s21  ;;  %s1320_s22 = sphi %s1363_s22, %s15_s22   ;;  %s1316_s21 = sphi %s1361_s21, %s1553_s21   ;;  %s1312_s20 = sphi %s1359_s20, %s1552_s20   ;;  %s1308_s19 = sphi %s1357_s19, %s1551_s19   ;;  %s1304_s18 = sphi %s1355_s18, %s1550_s18  }
   0x4   : > { %p25_p0 = scmp.ge.s32.totalorder %s24_s23, 2  ;;  %p1035_p1 = scmp.ge.s32.totalorder %s1320_s22, 1 }
   0x5   : > { %p210_p2 = scmp.lt.s32.totalorder %s1320_s22, 5 }
   0x6   : > { %s1555_s23 = smov (%p25_p0, %s24_s23), 0  ;;  %s1557_s24 = smov (!%p25_p0, %s27_s24), %s1316_s21 }
   0x7   : > { %p211_p3 = pnand %p1035_p1, %p210_p2  ;;  %p29_p4 = scmp.ge.s32.totalorder %s1557_s24, 2 }
   0x8   : > { %v1263_v0 = vld [vmem:[%s1545_s1 + $0x10] sm:$0xff] (!%p211_p3)   ;;  %v277_v1 = vlaneseq (!%p211_p3)  ;;  %v1322_v2 = vmov (!%p211_p3), 0.0   ;;  %v1264_v3 = vld [vmem:[%s1545_s1] sm:$0xff] (!%p211_p3)   ;;  %v1265_v4 = vld [vmem:[%s1545_s1 + $0x18] sm:$0xff] (!%p211_p3)   ;;  %vm1323_vm0 = vmmov (!%p211_p3), 0   ;;  %p244_p5 = scmp.lt.s32.totalorder (!%p211_p3), %s1308_s19, 1 }
   0x9   : > { %s1559_s24 = smov (%p29_p4, %s1557_s24), 0  ;;  %214 = sbr.rel (%p211_p3) target bundleno = 284 (0x11c), region = 40 }
   0xa   : > { %1142 = vmatprep.subr.bf16.mxu0 (!%p211_p3), %v1322_v2  ;;  %1150 = vmatprep.subr.bf16.mxu1 (!%p211_p3), %v1322_v2  ;;  %v1266_v5 = vld [vmem:[%s1545_s1 + $0x8] sm:$0xff] (!%p211_p3)   ;;  %s1040_s8 = sshll.u32 (!%p211_p3), %s1304_s18, 1  ;;  %v278_v6 = vshrl.u32 (!%p211_p3), %v277_v1, 7  ;;  %v1324_v7 = vmov (!%p211_p3), 1983009808   ;;  %vm300_vm1 = vcmask (!%p211_p3), 261120  }
   0xb   : > { %1143 = vmatpush3.bf16.msra.mxu0 (!%p211_p3), %v1263_v0  ;;  %1154 = vmatprep.mubr.msk.bf16.mxu1 (!%p211_p3), %vm1323_vm0, %v1322_v2  ;;  %v275_v8 = vunpack.c.l.s4 (!%p211_p3), %v1324_v7  ;;  %v1268_v10 = vld [vmem:[%s1545_s1 + $0x30] sm:$0xff] (!%p211_p3)   ;;  %v1270_v14 = vld [vmem:[%s1545_s1 + $0x38] sm:$0xff] (!%p211_p3)   ;;  %v1267_v21 = vld [vmem:[%s1545_s1 + $0x20] sm:$0xff] (!%p211_p3)   ;;  %s1112_s6 = sshll.u32 (!%p211_p3), %s1304_s18, 2  ;;  %vm879_vm2 = vcmask (!%p211_p3), 130048   ;;  %p255_p6 = scmp.lt.s32.totalorder (!%p211_p3), %s1304_s18, 1 }
   0xc   : > { %1151 = vmatpush3.bf16.msra.mxu1 (!%p211_p3), %v1264_v3  ;;  %1144 = vmatprep.subr.bf16.mxu0 (!%p211_p3), %v1322_v2  ;;  %v1272_v20 = vld [vmem:[%s1545_s1 + $0x50] sm:$0xff] (!%p211_p3)   ;;  %v1274_v25 = vld [vmem:[%s1545_s1 + $0x58] sm:$0xff] (!%p211_p3)   ;;  %v1269_v26 = vld [vmem:[%s1545_s1 + $0x28] sm:$0xff] (!%p211_p3)  }
   0xd   : > { %1152 = vmatprep.subr.bf16.mxu1 (!%p211_p3), %v1322_v2  ;;  %1146 = vmatprep.mubr.msk.bf16.mxu0 (!%p211_p3), %vm1323_vm0, %v1322_v2  ;;  %v276_v9 = vunpack.c.0.s8 (!%p211_p3), %v275_v8  ;;  %v1276_v31 = vld [vmem:[%s1545_s1 + $0x70] sm:$0xff] (!%p211_p3)   ;;  %v1271_v32 = vld [vmem:[%s1545_s1 + $0x40] sm:$0xff] (!%p211_p3)   ;;  %v1278_v37 = vld [vmem:[%s1545_s1 + $0x78] sm:$0xff] (!%p211_p3)  }
   0xe   : > { %v1273_v38 = vld [vmem:[%s1545_s1 + $0x48] sm:$0xff] (!%p211_p3)   ;;  %v1280_v41 = vld [vmem:[%s1547_s3] sm:$0xff] (!%p211_p3)  }
   0xf   : > { %1145 = vmatpush3.bf16.msra.mxu0 (!%p211_p3), %v1265_v4  ;;  %v279_v12 = vsub.s32 (!%p211_p3), %v276_v9, %v278_v6  ;;  %v1275_v42 = vld [vmem:[%s1545_s1 + $0x60] sm:$0xff] (!%p211_p3)   ;;  %v1277_v43 = vld [vmem:[%s1545_s1 + $0x68] sm:$0xff] (!%p211_p3)  }
  0x10   : > { %s1561_s19 = smov (!%p244_p5, %s1308_s19), 1  ;;  %1153 = vmatpush3.bf16.msra.mxu1 %v1266_v5  ;;  %1158 = vmatprep.subr.bf16.mxu0 %v1322_v2  ;;  %v1279_v45 = vld [vmem:[%s1545_s1 + $0x80] sm:$0xff]   ;;  %v1281_v46 = vld [vmem:[%s1545_s1 + $0x88] sm:$0xff]   ;;  %s1563_s18 = smov (!%p255_p6, %s1304_s18), 1 }
  0x11   : > { %s1111_s9 = sshll.u32 %s1561_s19, 3  ;;  %1166 = vmatprep.subr.bf16.mxu1 %v1322_v2  ;;  %s1039_s14 = sshll.u32 %s1561_s19, 1 }
  0x12   : > { %s248_s12 = scalar_lea.vmem %s1544_s0, %s1111_s9  ;;  %s252_s30 = scalar_lea.vmem %s1546_s2, %s1111_s9 }
  0x13   : > { %s262_s15 = scalar_lea.vmem %s248_s12, %s1040_s8  ;;  %s869_s10 = scalar_lea.vmem %s252_s30, %s1112_s6 }
  0x14   : > { %v263_v11 = vld [vmem:[%s262_s15] sm:$0x3]  ;;  %v1432_v17 = vld [vmem:[%s262_s15 + $0x4] sm:$0x3]  ;;  %v1059_v18 = vld [vmem:[%s262_s15 + $0x2] sm:$0x3]  ;;  %s258_s17 = sadd.s32 %s1039_s14, %s1563_s18 }
  0x15   : > { %1155 = vmatmul.mubr.msk.bf16.vlgmr.msra.gmra.mrb[0].mxu1 %vm300_vm1, %v263_v11  ;;  %v280_v13 = vrot.slane %v263_v11, %v279_v12  ;;  %v1442_v23 = vrot.slane %v1432_v17, %v279_v12  ;;  %v538_v24 = vrot.slane %v1059_v18, %v279_v12  ;;  %v870_v44 = vld [vmem:[%s869_s10] sm:$0x3]  ;;  %s259_s27 = scalar_lea.vmem %s1549_s5, %s258_s17 }
  0x16   : > { %1167 = vmatpush3.bf16.msra.mxu1 %v1268_v10  ;;  %1170 = vmatprep.mubr.msk.bf16.mxu1 %vm1323_vm0, %v1322_v2 }
  0x17   : > { %1168 = vmatprep.subr.bf16.mxu1 %v1322_v2  ;;  %v282_v15 = vshrl.u32 %v280_v13, 16  ;;  %v284_v16 = vshll.u32 %v280_v13, 16  ;;  %v745_v27 = vshll.u32 %v1442_v23, 16  ;;  %v607_v28 = vrot.slane %v538_v24, 1 }
  0x18   : > { %v404_v29 = vrot.slane %v280_v13, 1  ;;  %v542_v30 = vshll.u32 %v538_v24, 16  ;;  %v743_v33 = vshrl.u32 %v1442_v23, 16  ;;  %v540_v35 = vshrl.u32 %v538_v24, 16 }
  0x19   : > { %v286_v19 = vrot.slane %v284_v16, 1  ;;  %v747_v34 = vrot.slane %v745_v27, 1  ;;  %v810_v47 = vrot.slane %v1442_v23, 1 }
  0x1a   : > { %1169 = vmatpush3.bf16.msra.mxu1 %v1270_v14  ;;  %v544_v36 = vrot.slane %v542_v30, 1  ;;  %v1108_v30 = vld [vmem:[%s1548_s4] ss:$0 sm:$0xff] }
  0x1b   : > { %1182 = vmatprep.subr.bf16.mxu1 %v1322_v2  ;;  %v287_v22 = vor.u32 %v286_v19, %v282_v15  ;;  %v748_v39 = vor.u32 %v747_v34, %v743_v33 }
  0x1c   : > { %v545_v40 = vor.u32 %v544_v36, %v540_v35 }
  0x1d   : > { %1171 = vmatmul.mubr.msk.bf16.vlgmr.msra.gmra.mrb[4].mxu1 %vm300_vm1, %v1059_v18  ;;  %1147 = vmatmul.mubr.msk.bf16.vlgmr.msra.gmra.mrb[0].mxu0 %vm300_vm1, %v287_v22 }
  0x1e   : > { %1183 = vmatpush3.bf16.msra.mxu1 %v1272_v20  ;;  %1159 = vmatpush3.bf16.msra.mxu0 %v1267_v21 }
  0x1f   : > { %1162 = vmatprep.mubr.msk.bf16.mxu0 %vm1323_vm0, %v1322_v2  ;;  %1160 = vmatprep.subr.bf16.mxu0 %v1322_v2 }
  0x20   : > { %1184 = vmatprep.subr.bf16.mxu1 %v1322_v2  ;;  %1186 = vmatprep.mubr.msk.bf16.mxu1 %vm1323_vm0, %v1322_v2 }
  0x22   : > { %1185 = vmatpush3.bf16.msra.mxu1 %v1274_v25  ;;  %1161 = vmatpush3.bf16.msra.mxu0 %v1269_v26 }
  0x23   : > { %1198 = vmatprep.subr.bf16.mxu1 %v1322_v2  ;;  %1174 = vmatprep.subr.bf16.mxu0 %v1322_v2 }
  0x25   : > { %1187 = vmatmul.mubr.msk.bf16.vlgmr.msra.gmra.mrb[8].mxu1 %vm300_vm1, %v607_v28  ;;  %1163 = vmatmul.mubr.msk.bf16.vlgmr.msra.gmra.mrb[4].mxu0 %vm300_vm1, %v404_v29 }
  0x26   : > { %1199 = vmatpush3.bf16.msra.mxu1 %v1276_v31  ;;  %1175 = vmatpush3.bf16.msra.mxu0 %v1271_v32 }
  0x27   : > { %1178 = vmatprep.mubr.msk.bf16.mxu0 %vm1323_vm0, %v1322_v2  ;;  %1176 = vmatprep.subr.bf16.mxu0 %v1322_v2 }
  0x28   : > { %1200 = vmatprep.subr.bf16.mxu1 %v1322_v2  ;;  %1202 = vmatprep.mubr.msk.bf16.mxu1 %vm1323_vm0, %v1322_v2 }
  0x2a   : > { %1201 = vmatpush3.bf16.msra.mxu1 %v1278_v37  ;;  %1177 = vmatpush3.bf16.msra.mxu0 %v1273_v38 }
  0x2b   : > { %1214 = vmatprep.subr.bf16.mxu1 %v1322_v2  ;;  %1190 = vmatprep.subr.bf16.mxu0 %v1322_v2 }
  0x2d   : > { %1203 = vmatmul.mubr.msk.bf16.vlgmr.msra.gmra.mrb[12].mxu1 %vm300_vm1, %v748_v39  ;;  %1179 = vmatmul.mubr.msk.bf16.vlgmr.msra.gmra.mrb[8].mxu0 %vm300_vm1, %v545_v40 }
  0x2e   : > { %1215 = vmatpush3.bf16.msra.mxu1 %v1280_v41  ;;  %1191 = vmatpush3.bf16.msra.mxu0 %v1275_v42 }
  0x2f   : > { %1194 = vmatprep.mubr.msk.bf16.mxu0 %vm1323_vm0, %v1322_v2  ;;  %1192 = vmatprep.subr.bf16.mxu0 %v1322_v2 }
  0x30   : > { %1216 = vmatprep.mubr.msk.bf16.mxu1 %vm1323_vm0, %v1322_v2 }
  0x32   : > { %1193 = vmatpush3.bf16.msra.mxu0 %v1277_v43 }
  0x33   : > { %1206 = vmatprep.subr.bf16.mxu0 %v1322_v2 }
  0x35   : > { %1217 = vmatmul.mubr.msk.bf16.vlgmr.msra.gmra.mrb[16].mxu1 %vm879_vm2, %v870_v44  ;;  %1195 = vmatmul.mubr.msk.bf16.vlgmr.msra.gmra.mrb[12].mxu0 %vm300_vm1, %v1432_v17 }
  0x36   : > { %1207 = vmatpush3.bf16.msra.mxu0 %v1279_v45  ;;  %1210 = vmatprep.mubr.msk.bf16.mxu0 %vm1323_vm0, %v1322_v2 }
  0x37   : > { %1208 = vmatprep.subr.bf16.mxu0 %v1322_v2 }
  0x3a   : > { %1209 = vmatpush3.bf16.msra.mxu0 %v1281_v46 }
  0x3d   : > { %1211 = vmatmul.mubr.msk.bf16.vlgmr.msra.gmra.mrb[16].mxu0 %vm300_vm1, %v810_v47 }
  0xe8   : > { %v393_v48 = vpop.f32.mrb[0].mxu1 }
  0xe9   : > { %v1156_v49 = vpop.f32.mrb[1].mxu1 }
  0xea   : > { %v396_v50 = vpop.f32.mrb[2].mxu1 }
  0xeb   : > { %v1157_v51 = vpop.f32.mrb[3].mxu1 }
  0xf0   : > { %v519_v52 = vpop.f32.mrb[4].mxu1  ;;  %v338_v53 = vpop.f32.mrb[0].mxu0 }
  0xf1   : > { %v1172_v54 = vpop.f32.mrb[5].mxu1  ;;  %v394_v55 = vadd.f32 %v393_v48, %v338_v53  ;;  %v1148_v56 = vpop.f32.mrb[1].mxu0 }
  0xf2   : > { %v522_v57 = vpop.f32.mrb[6].mxu1  ;;  %v341_v58 = vpop.f32.mrb[2].mxu0 }
  0xf3   : > { %v1173_v59 = vpop.f32.mrb[7].mxu1  ;;  %v1149_v60 = vpop.f32.mrb[3].mxu0 }
  0xf8   : > { %v657_v61 = vpop.f32.mrb[8].mxu1  ;;  %v454_v62 = vpop.f32.mrb[4].mxu0 }
  0xf9   : > { %v1188_v63 = vpop.f32.mrb[9].mxu1  ;;  %v460_v0 = vadd.f32 %v454_v62, %v394_v55  ;;  %v1164_v1 = vpop.f32.mrb[5].mxu0 }
  0xfa   : > { %v660_v2 = vpop.f32.mrb[10].mxu1  ;;  %v457_v3 = vpop.f32.mrb[6].mxu0 }
  0xfb   : > { %v1189_v4 = vpop.f32.mrb[11].mxu1  ;;  %v1165_v5 = vpop.f32.mrb[7].mxu0  ;;  %v525_v6 = vadd.f32 %v519_v52, %v460_v0 }
 0x100   : > { %v798_v7 = vpop.f32.mrb[12].mxu1  ;;  %v595_v8 = vpop.f32.mrb[8].mxu0 }
 0x101   : > { %v1204_v9 = vpop.f32.mrb[13].mxu1  ;;  %v601_v10 = vadd.f32 %v595_v8, %v525_v6  ;;  %v1180_v11 = vpop.f32.mrb[9].mxu0 }
 0x102   : > { %v801_v12 = vpop.f32.mrb[14].mxu1  ;;  %v598_v13 = vpop.f32.mrb[10].mxu0 }
 0x103   : > { %v1205_v14 = vpop.f32.mrb[15].mxu1  ;;  %v1181_v15 = vpop.f32.mrb[11].mxu0  ;;  %v663_v16 = vadd.f32 %v657_v61, %v601_v10 }
 0x108   : > { %v917_v17 = vpop.f32.mrb[16].mxu1  ;;  %v722_v18 = vpop.f32.mrb[12].mxu0 }
 0x109   : > { %v1218_v19 = vpop.f32.mrb[17].mxu1  ;;  %v728_v20 = vadd.f32 %v722_v18, %v663_v16  ;;  %v1196_v21 = vpop.f32.mrb[13].mxu0 }
 0x10a   : > { %v920_v22 = vpop.f32.mrb[18].mxu1  ;;  %v725_v23 = vpop.f32.mrb[14].mxu0 }
 0x10b   : > { %v1219_v24 = vpop.f32.mrb[19].mxu1  ;;  %v1197_v25 = vpop.f32.mrb[15].mxu0  ;;  %v804_v26 = vadd.f32 %v798_v7, %v728_v20 }
 0x110   : > { %v860_v27 = vpop.f32.mrb[16].mxu0 }
 0x111   : > { %v866_v28 = vadd.f32 %v860_v27, %v804_v26  ;;  %v1212_v29 = vpop.f32.mrb[17].mxu0 }
 0x112   : > { %v863_v31 = vpop.f32.mrb[18].mxu0 }
 0x113   : > { %v923_v32 = vadd.f32 %v917_v17, %v866_v28  ;;  %v1213_v33 = vpop.f32.mrb[19].mxu0 }
 0x115   : > { %v931_v34 = vadd.f32 %v1108_v30, %v923_v32 }
 0x117   : > { %v932_v35 = vmax.f32 %v931_v34, 0.0 }
 0x119   : > { %v933_v36 = vpack.c.bf16 %v932_v35, %v932_v35 }
 0x11b   : > { %934 = vst [vmem:[%s259_s27] sm:$0x1] %v933_v36 }
 0x11c PF: > { %s15_s22 = sadd.s32 1, %s1320_s22   ;;  %s1550_s18 = smov %s1312_s20 }
 0x11d   : > { %p12_p7 = scmp.ge.s32.totalorder %s15_s22, 6   ;;  %s1551_s19 = smov %s1316_s21 }
 0x11e   : > { %s1552_s20 = smov %s1555_s23  ;;  %s1553_s21 = smov %s1559_s24 }
 0x11f   :  { %14 = sbr.rel (!%p12_p7) target bundleno = 3 (0x3), region = 85 }

// kernel: resnet_forward.16
= control target key start
LH: loop header
LB: loop body
LE: loop exit
PB: predicated region body
PF: predicated region fallthrough
CT: control target
= control target key end

     0   :  { %s1167_s12 = smov 0   ;;  %s1169_s13 = smov 0   ;;  %s1322_s0 = inlined_call_operand.vmem [shape: bf16[2,4,2,256], index: 0, kind: input, shape index: {}]   ;;  %s1323_s1 = inlined_call_operand.vmem [shape: bf16[9,32,128], index: 1, kind: input, shape index: {}]   ;;  %s1324_s2 = inlined_call_operand.vmem [shape: f32[1,128], index: 2, kind: input, shape index: {}]   ;;  %s1325_s3 = inlined_call_operand.vmem [shape: bf16[2,1,1,128], index: 3, kind: output, shape index: {}]  }
   0x1   :  { %s1171_s14 = smov 0  }
   0x2 LB: > { %s25_s15 = sadd.s32 1, %s1138_s13  ;;  %p911_p0 = scmp.ge.s32.totalorder %s1142_s14, 1  ;;  %s1142_s14 = sphi %s1171_s14, %s13_s14   ;;  %s1138_s13 = sphi %s1169_s13, %s1327_s13   ;;  %s1134_s12 = sphi %s1167_s12, %s1326_s12  }
   0x3   : > { %p27_p1 = scmp.ge.s32.totalorder %s25_s15, 2  ;;  %p150_p2 = scmp.lt.s32.totalorder %s1142_s14, 3 }
   0x5   : > { %s1329_s15 = smov (%p27_p1, %s25_s15), 0  ;;  %p151_p3 = pnand %p911_p0, %p150_p2 }
   0x6   : > { %v1102_v0 = vld [vmem:[%s1323_s1 + $0x10] sm:$0xff] (!%p151_p3)   ;;  %v1144_v1 = vmov (!%p151_p3), 0.0   ;;  %v1103_v2 = vld [vmem:[%s1323_s1] sm:$0xff] (!%p151_p3)   ;;  %v202_v3 = vlaneseq (!%p151_p3)  ;;  %v1104_v4 = vld [vmem:[%s1323_s1 + $0x18] sm:$0xff] (!%p151_p3)   ;;  %vm1145_vm0 = vmmov (!%p151_p3), 0   ;;  %p174_p4 = scmp.lt.s32.totalorder (!%p151_p3), %s1134_s12, 1 }
   0x7   : > { %154 = sbr.rel (%p151_p3) target bundleno = 278 (0x116), region = 32  ;;  %1003 = vmatprep.subr.bf16.mxu0 (!%p151_p3), %v1144_v1  ;;  %1011 = vmatprep.subr.bf16.mxu1 (!%p151_p3), %v1144_v1  ;;  %v1105_v5 = vld [vmem:[%s1323_s1 + $0x8] sm:$0xff] (!%p151_p3)   ;;  %v1146_v6 = vmov (!%p151_p3), 1966171168   ;;  %vm233_vm1 = vcmask (!%p151_p3), 261120   ;;  %v1107_v10 = vld [vmem:[%s1323_s1 + $0x30] sm:$0xff] (!%p151_p3)  }
   0x8   : > { %1004 = vmatpush3.bf16.msra.mxu0 (!%p151_p3), %v1102_v0  ;;  %1007 = vmatprep.mubr.msk.bf16.mxu0 (!%p151_p3), %vm1145_vm0, %v1144_v1  ;;  %v200_v7 = vunpack.c.l.s4 (!%p151_p3), %v1146_v6  ;;  %v203_v8 = vshrl.u32 (!%p151_p3), %v202_v3, 7  ;;  %v1109_v14 = vld [vmem:[%s1323_s1 + $0x38] sm:$0xff] (!%p151_p3)   ;;  %v1106_v16 = vld [vmem:[%s1323_s1 + $0x20] sm:$0xff] (!%p151_p3)   ;;  %v1111_v19 = vld [vmem:[%s1323_s1 + $0x50] sm:$0xff] (!%p151_p3)   ;;  %vm826_vm2 = vcmask (!%p151_p3), 1040384  }
   0x9   : > { %1012 = vmatpush3.bf16.msra.mxu1 (!%p151_p3), %v1103_v2  ;;  %1005 = vmatprep.subr.bf16.mxu0 (!%p151_p3), %v1144_v1  ;;  %v1108_v22 = vld [vmem:[%s1323_s1 + $0x28] sm:$0xff] (!%p151_p3)   ;;  %v1113_v24 = vld [vmem:[%s1323_s1 + $0x58] sm:$0xff] (!%p151_p3)   ;;  %v1110_v27 = vld [vmem:[%s1323_s1 + $0x40] sm:$0xff] (!%p151_p3)   ;;  %vm827_vm3 = vsmask.f32 (!%p151_p3), 256 }
   0xa   : > { %1013 = vmatprep.subr.bf16.mxu1 (!%p151_p3), %v1144_v1  ;;  %1015 = vmatprep.mubr.msk.bf16.mxu1 (!%p151_p3), %vm1145_vm0, %v1144_v1  ;;  %v201_v9 = vunpack.c.0.s8 (!%p151_p3), %v200_v7  ;;  %v1115_v30 = vld [vmem:[%s1323_s1 + $0x70] sm:$0xff] (!%p151_p3)   ;;  %v1112_v32 = vld [vmem:[%s1323_s1 + $0x48] sm:$0xff] (!%p151_p3)   ;;  %v1117_v34 = vld [vmem:[%s1323_s1 + $0x78] sm:$0xff] (!%p151_p3)  }
   0xb   : > { %v1114_v36 = vld [vmem:[%s1323_s1 + $0x60] sm:$0xff] (!%p151_p3)   ;;  %v1116_v38 = vld [vmem:[%s1323_s1 + $0x68] sm:$0xff] (!%p151_p3)   ;;  %vm828_vm4 = vmand (!%p151_p3), %vm826_vm2, %vm827_vm3 }
   0xc   : > { %1006 = vmatpush3.bf16.msra.mxu0 (!%p151_p3), %v1104_v4  ;;  %v1219_v12 = vsub.s32 (!%p151_p3), %v201_v9, %v203_v8  ;;  %v1118_v39 = vld [vmem:[%s1323_s1 + $0x80] sm:$0xff] (!%p151_p3)   ;;  %v1119_v41 = vld [vmem:[%s1323_s1 + $0x88] sm:$0xff] (!%p151_p3)  }
   0xd   : > { %1014 = vmatpush3.bf16.msra.mxu1 (!%p151_p3), %v1105_v5  ;;  %1019 = vmatprep.subr.bf16.mxu0 (!%p151_p3), %v1144_v1 }
   0xe   : > { %s1331_s12 = smov (!%p174_p4, %s1134_s12), 1  ;;  %1027 = vmatprep.subr.bf16.mxu1 %v1144_v1 }
   0xf   : > { %s912_s24 = sshll.u32 %s1331_s12, 3  ;;  %s183_s10 = scalar_lea.vmem %s1325_s3, %s1331_s12 }
  0x10   : > { %s1212_s27 = scalar_lea.vmem %s1322_s0, %s912_s24 }
  0x11   : > { %v188_v11 = vld [vmem:[%s1212_s27] sm:$0x3]  ;;  %v930_v17 = vld [vmem:[%s1212_s27 + $0x2] sm:$0x3]  ;;  %v952_v25 = vld [vmem:[%s1212_s27 + $0x4] sm:$0x3] }
  0x12   : > { %1016 = vmatmul.mubr.msk.bf16.vlgmr.msra.gmra.mrb[0].mxu1 %vm233_vm1, %v188_v11  ;;  %v205_v13 = vrot.slane %v188_v11, %v1219_v12  ;;  %v473_v21 = vrot.slane %v930_v17, %v1219_v12  ;;  %v686_v29 = vrot.slane %v952_v25, %v1219_v12 }
  0x13   : > { %1028 = vmatpush3.bf16.msra.mxu1 %v1107_v10  ;;  %1031 = vmatprep.mubr.msk.bf16.mxu1 %vm1145_vm0, %v1144_v1 }
  0x14   : > { %1029 = vmatprep.subr.bf16.mxu1 %v1144_v1  ;;  %v206_v15 = vcombine.high %v205_v13, %v205_v13  ;;  %v213_v20 = vrot.slane %v205_v13, %v1219_v12  ;;  %v481_v23 = vrot.slane %v473_v21, %v1219_v12  ;;  %v474_v31 = vcombine.high %v473_v21, %v473_v21 }
  0x15   : > { %v687_v33 = vcombine.high %v686_v29, %v686_v29  ;;  %v694_v40 = vrot.slane %v686_v29, %v1219_v12 }
  0x16   : > { %v220_v18 = vrot.slane %v206_v15, %v1219_v12  ;;  %v338_v26 = vshrl.u32 %v213_v20, 16  ;;  %v551_v28 = vshrl.u32 %v481_v23, 16  ;;  %v488_v35 = vrot.slane %v474_v31, %v1219_v12 }
  0x17   : > { %1030 = vmatpush3.bf16.msra.mxu1 %v1109_v14  ;;  %v701_v37 = vrot.slane %v687_v33, %v1219_v12  ;;  %v764_v42 = vshrl.u32 %v694_v40, 16 }
  0x18   : > { %1043 = vmatprep.subr.bf16.mxu1 %v1144_v1  ;;  %1008 = vmatmul.mubr.msk.bf16.vlgmr.msra.gmra.mrb[0].mxu0 %vm233_vm1, %v220_v18 }
  0x19   : > { %1020 = vmatpush3.bf16.msra.mxu0 %v1106_v16  ;;  %1023 = vmatprep.mubr.msk.bf16.mxu0 %vm1145_vm0, %v1144_v1 }
  0x1a   : > { %1021 = vmatprep.subr.bf16.mxu0 %v1144_v1  ;;  %1032 = vmatmul.mubr.msk.bf16.vlgmr.msra.gmra.mrb[4].mxu1 %vm233_vm1, %v930_v17 }
  0x1b   : > { %1044 = vmatpush3.bf16.msra.mxu1 %v1111_v19  ;;  %1047 = vmatprep.mubr.msk.bf16.mxu1 %vm1145_vm0, %v1144_v1  ;;  %v822_v19 = vld [vmem:[%s1324_s2] sm:$0x1] }
  0x1c   : > { %1045 = vmatprep.subr.bf16.mxu1 %v1144_v1 }
  0x1d   : > { %1022 = vmatpush3.bf16.msra.mxu0 %v1108_v22 }
  0x1e   : > { %1035 = vmatprep.subr.bf16.mxu0 %v1144_v1 }
  0x1f   : > { %1046 = vmatpush3.bf16.msra.mxu1 %v1113_v24 }
  0x20   : > { %1024 = vmatmul.mubr.msk.bf16.vlgmr.msra.gmra.mrb[4].mxu0 %vm233_vm1, %v338_v26  ;;  %1059 = vmatprep.subr.bf16.mxu1 %v1144_v1  ;;  %v829_v26 = vld [vmem:[%s183_s10] sm:$0x1] }
  0x21   : > { %1036 = vmatpush3.bf16.msra.mxu0 %v1110_v27  ;;  %1039 = vmatprep.mubr.msk.bf16.mxu0 %vm1145_vm0, %v1144_v1 }
  0x22   : > { %1037 = vmatprep.subr.bf16.mxu0 %v1144_v1  ;;  %1048 = vmatmul.mubr.msk.bf16.vlgmr.msra.gmra.mrb[8].mxu1 %vm233_vm1, %v551_v28 }
  0x23   : > { %1060 = vmatpush3.bf16.msra.mxu1 %v1115_v30  ;;  %1063 = vmatprep.mubr.msk.bf16.mxu1 %vm1145_vm0, %v1144_v1 }
  0x24   : > { %1061 = vmatprep.subr.bf16.mxu1 %v1144_v1 }
  0x25   : > { %1038 = vmatpush3.bf16.msra.mxu0 %v1112_v32 }
  0x26   : > { %1051 = vmatprep.subr.bf16.mxu0 %v1144_v1 }
  0x27   : > { %1062 = vmatpush3.bf16.msra.mxu1 %v1117_v34 }
  0x28   : > { %1040 = vmatmul.mubr.msk.bf16.vlgmr.msra.gmra.mrb[8].mxu0 %vm233_vm1, %v488_v35 }
  0x29   : > { %1052 = vmatpush3.bf16.msra.mxu0 %v1114_v36  ;;  %1055 = vmatprep.mubr.msk.bf16.mxu0 %vm1145_vm0, %v1144_v1 }
  0x2a   : > { %1053 = vmatprep.subr.bf16.mxu0 %v1144_v1  ;;  %1064 = vmatmul.mubr.msk.bf16.vlgmr.msra.gmra.mrb[12].mxu1 %vm233_vm1, %v701_v37 }
  0x2d   : > { %1054 = vmatpush3.bf16.msra.mxu0 %v1116_v38 }
  0x2e   : > { %1067 = vmatprep.subr.bf16.mxu0 %v1144_v1 }
  0x30   : > { %1056 = vmatmul.mubr.msk.bf16.vlgmr.msra.gmra.mrb[12].mxu0 %vm233_vm1, %v952_v25 }
  0x31   : > { %1068 = vmatpush3.bf16.msra.mxu0 %v1118_v39  ;;  %1071 = vmatprep.mubr.msk.bf16.mxu0 %vm1145_vm0, %v1144_v1 }
  0x32   : > { %1069 = vmatprep.subr.bf16.mxu0 %v1144_v1 }
  0x35   : > { %1070 = vmatpush3.bf16.msra.mxu0 %v1119_v41 }
  0x38   : > { %1072 = vmatmul.mubr.msk.bf16.vlgmr.msra.gmra.mrb[16].mxu0 %vm233_vm1, %v764_v42 }
  0xe5   : > { %v326_v43 = vpop.f32.mrb[0].mxu1 }
  0xe6   : > { %v1017_v44 = vpop.f32.mrb[1].mxu1 }
  0xe7   : > { %v329_v45 = vpop.f32.mrb[2].mxu1 }
  0xe8   : > { %v1018_v46 = vpop.f32.mrb[3].mxu1 }
  0xeb   : > { %v271_v47 = vpop.f32.mrb[0].mxu0 }
  0xec   : > { %v327_v48 = vadd.f32 %v326_v43, %v271_v47  ;;  %v1009_v49 = vpop.f32.mrb[1].mxu0 }
  0xed   : > { %v274_v50 = vpop.f32.mrb[2].mxu0  ;;  %v454_v51 = vpop.f32.mrb[4].mxu1 }
  0xee   : > { %v1010_v52 = vpop.f32.mrb[3].mxu0  ;;  %v1033_v53 = vpop.f32.mrb[5].mxu1 }
  0xef   : > { %v457_v54 = vpop.f32.mrb[6].mxu1 }
  0xf0   : > { %v1034_v55 = vpop.f32.mrb[7].mxu1 }
  0xf3   : > { %v389_v56 = vpop.f32.mrb[4].mxu0 }
  0xf4   : > { %v395_v57 = vadd.f32 %v389_v56, %v327_v48  ;;  %v1025_v58 = vpop.f32.mrb[5].mxu0 }
  0xf5   : > { %v392_v59 = vpop.f32.mrb[6].mxu0  ;;  %v602_v60 = vpop.f32.mrb[8].mxu1 }
  0xf6   : > { %v460_v61 = vadd.f32 %v454_v51, %v395_v57  ;;  %v1026_v62 = vpop.f32.mrb[7].mxu0  ;;  %v1049_v63 = vpop.f32.mrb[9].mxu1 }
  0xf7   : > { %v605_v0 = vpop.f32.mrb[10].mxu1 }
  0xf8   : > { %v1050_v1 = vpop.f32.mrb[11].mxu1 }
  0xfb   : > { %v538_v2 = vpop.f32.mrb[8].mxu0 }
  0xfc   : > { %v544_v3 = vadd.f32 %v538_v2, %v460_v61  ;;  %v1041_v4 = vpop.f32.mrb[9].mxu0 }
  0xfd   : > { %v541_v5 = vpop.f32.mrb[10].mxu0  ;;  %v751_v6 = vpop.f32.mrb[12].mxu1 }
  0xfe   : > { %v608_v7 = vadd.f32 %v602_v60, %v544_v3  ;;  %v1042_v8 = vpop.f32.mrb[11].mxu0  ;;  %v1065_v9 = vpop.f32.mrb[13].mxu1 }
  0xff   : > { %v754_v10 = vpop.f32.mrb[14].mxu1 }
 0x100   : > { %v1066_v11 = vpop.f32.mrb[15].mxu1 }
 0x103   : > { %v667_v12 = vpop.f32.mrb[12].mxu0 }
 0x104   : > { %v673_v13 = vadd.f32 %v667_v12, %v608_v7  ;;  %v1057_v14 = vpop.f32.mrb[13].mxu0 }
 0x105   : > { %v670_v15 = vpop.f32.mrb[14].mxu0 }
 0x106   : > { %v757_v16 = vadd.f32 %v751_v6, %v673_v13  ;;  %v1058_v17 = vpop.f32.mrb[15].mxu0 }
 0x10b   : > { %v815_v18 = vpop.f32.mrb[16].mxu0 }
 0x10c   : > { %v821_v20 = vadd.f32 %v815_v18, %v757_v16  ;;  %v1073_v21 = vpop.f32.mrb[17].mxu0 }
 0x10d   : > { %v818_v22 = vpop.f32.mrb[18].mxu0 }
 0x10e   : > { %v823_v23 = vadd.f32 %v822_v19, %v821_v20  ;;  %v1074_v24 = vpop.f32.mrb[19].mxu0 }
 0x110   : > { %v824_v25 = vmax.f32 %v823_v23, 0.0 }
 0x112   : > { %v825_v27 = vpack.c.bf16 %v824_v25, %v824_v25 }
 0x114   : > { %v830_v28 = vsel %vm828_vm4, %v825_v27, %v829_v26 }
 0x115   : > { %831 = vst [vmem:[%s183_s10] sm:$0x1] %v830_v28 }
 0x116 PF: > { %s13_s14 = sadd.s32 1, %s1142_s14   ;;  %s1326_s12 = smov %s1138_s13 }
 0x117   : > { %p10_p5 = scmp.ge.s32.totalorder %s13_s14, 4   ;;  %s1327_s13 = smov %s1329_s15 }
 0x119   :  { %12 = sbr.rel (!%p10_p5) target bundleno = 2 (0x2), region = 73 }

// kernel: resnet_forward.17
= control target key start
LH: loop header
LB: loop body
LE: loop exit
PB: predicated region body
PF: predicated region fallthrough
CT: control target
= control target key end

     0   :  { %s1569_s18 = smov 0   ;;  %s1571_s19 = smov 0   ;;  %s1804_s0 = inlined_call_operand.vmem [shape: bf16[2,3,3,128], index: 0, kind: input, shape index: {}]   ;;  %s1805_s1 = inlined_call_operand.vmem [shape: bf16[9,64,128], index: 1, kind: input, shape index: {}]   ;;  %s1806_s2 = inlined_call_operand.vmem [shape: bf16[2,2,1,256], index: 2, kind: input, shape index: {}]   ;;  %s1807_s3 = inlined_call_operand.vmem [shape: bf16[1,32,128], index: 3, kind: input, shape index: {}]   ;;  %s1808_s4 = inlined_call_operand.vmem [shape: f32[1,128], index: 4, kind: input, shape index: {}]   ;;  %s1809_s5 = inlined_call_operand.vmem [shape: bf16[2,1,1,128], index: 5, kind: output, shape index: {}]  }
   0x1   :  { %s1573_s20 = smov 0  }
   0x2 LB: > { %s27_s21 = sadd.s32 1, %s1530_s19  ;;  %p1163_p0 = scmp.ge.s32.totalorder %s1534_s20, 1  ;;  %s1534_s20 = sphi %s1573_s20, %s15_s20   ;;  %s1530_s19 = sphi %s1571_s19, %s1811_s19   ;;  %s1526_s18 = sphi %s1569_s18, %s1810_s18  }
   0x3   : > { %p29_p1 = scmp.ge.s32.totalorder %s27_s21, 2  ;;  %p210_p2 = scmp.lt.s32.totalorder %s1534_s20, 3 }
   0x5   : > { %s1813_s21 = smov (%p29_p1, %s27_s21), 0  ;;  %p211_p3 = pnand %p1163_p0, %p210_p2 }
   0x6   : > { %v1474_v0 = vld [vmem:[%s1805_s1 + $0x20] sm:$0xff] (!%p211_p3)   ;;  %v1536_v1 = vmov (!%p211_p3), 0.0   ;;  %v1476_v3 = vld [vmem:[%s1805_s1 + $0x28] sm:$0xff] (!%p211_p3)   ;;  %vm1537_vm0 = vmmov (!%p211_p3), 0   ;;  %p243_p4 = scmp.lt.s32.totalorder (!%p211_p3), %s1526_s18, 1  ;;  %v283_v5 = vlaneseq (!%p211_p3)  ;;  %v1478_v6 = vld [vmem:[%s1805_s1 + $0x30] sm:$0xff] (!%p211_p3)  }
   0x7   : > { %214 = sbr.rel (%p211_p3) target bundleno = 311 (0x137), region = 40  ;;  %1330 = vmatprep.subr.bf16.mxu0 (!%p211_p3), %v1536_v1  ;;  %1342 = vmatprep.subr.bf16.mxu1 (!%p211_p3), %v1536_v1  ;;  %v1475_v2 = vld [vmem:[%s1805_s1] sm:$0xff] (!%p211_p3)   ;;  %v1477_v4 = vld [vmem:[%s1805_s1 + $0x8] sm:$0xff] (!%p211_p3)   ;;  %v1479_v7 = vld [vmem:[%s1805_s1 + $0x10] sm:$0xff] (!%p211_p3)   ;;  %v1538_v8 = vmov (!%p211_p3), 1983009808  }
   0x8   : > { %1331 = vmatpush3.bf16.msra.mxu0 (!%p211_p3), %v1474_v0  ;;  %1338 = vmatprep.mubr.msk.bf16.mxu0 (!%p211_p3), %vm1537_vm0, %v1536_v1  ;;  %v281_v9 = vunpack.c.l.s4 (!%p211_p3), %v1538_v8  ;;  %v284_v10 = vshrl.u32 (!%p211_p3), %v283_v5, 7  ;;  %v1480_v11 = vld [vmem:[%s1805_s1 + $0x38] sm:$0xff] (!%p211_p3)   ;;  %vm314_vm1 = vcmask (!%p211_p3), 523264   ;;  %v1483_v17 = vld [vmem:[%s1805_s1 + $0x60] sm:$0xff] (!%p211_p3)   ;;  %v1485_v20 = vld [vmem:[%s1805_s1 + $0x68] sm:$0xff] (!%p211_p3)   ;;  %vm1017_vm2 = vcmask (!%p211_p3), 261120  }
   0x9   : > { %1343 = vmatpush3.bf16.msra.mxu1 (!%p211_p3), %v1475_v2  ;;  %1332 = vmatprep.subr.bf16.mxu0 (!%p211_p3), %v1536_v1  ;;  %v1481_v12 = vld [vmem:[%s1805_s1 + $0x18] sm:$0xff] (!%p211_p3)   ;;  %v1482_v18 = vld [vmem:[%s1805_s1 + $0x40] sm:$0xff] (!%p211_p3)   ;;  %v1484_v21 = vld [vmem:[%s1805_s1 + $0x48] sm:$0xff] (!%p211_p3)   ;;  %vm1066_vm3 = vcmask (!%p211_p3), 1040384   ;;  %vm1067_vm4 = vsmask.f32 (!%p211_p3), 256 }
   0xa   : > { %1344 = vmatprep.subr.bf16.mxu1 (!%p211_p3), %v1536_v1  ;;  %1350 = vmatprep.mubr.msk.bf16.mxu1 (!%p211_p3), %vm1537_vm0, %v1536_v1  ;;  %v282_v13 = vunpack.c.0.s8 (!%p211_p3), %v281_v9  ;;  %v1487_v22 = vld [vmem:[%s1805_s1 + $0x70] sm:$0xff] (!%p211_p3)   ;;  %v1489_v24 = vld [vmem:[%s1805_s1 + $0x78] sm:$0xff] (!%p211_p3)   ;;  %v1491_v27 = vld [vmem:[%s1805_s1 + $0xa0] sm:$0xff] (!%p211_p3)  }
   0xb   : > { %v1486_v23 = vld [vmem:[%s1805_s1 + $0x50] sm:$0xff] (!%p211_p3)   ;;  %v1488_v25 = vld [vmem:[%s1805_s1 + $0x58] sm:$0xff] (!%p211_p3)   ;;  %v1490_v29 = vld [vmem:[%s1805_s1 + $0x80] sm:$0xff] (!%p211_p3)  }
   0xc   : > { %1333 = vmatpush3.bf16.msra.mxu0 (!%p211_p3), %v1476_v3  ;;  %v1632_v15 = vsub.s32 (!%p211_p3), %v282_v13, %v284_v10  ;;  %v1493_v30 = vld [vmem:[%s1805_s1 + $0xa8] sm:$0xff] (!%p211_p3)   ;;  %v1495_v32 = vld [vmem:[%s1805_s1 + $0xb0] sm:$0xff] (!%p211_p3)   ;;  %v1497_v35 = vld [vmem:[%s1805_s1 + $0xb8] sm:$0xff] (!%p211_p3)  }
   0xd   : > { %1345 = vmatpush3.bf16.msra.mxu1 (!%p211_p3), %v1477_v4  ;;  %1334 = vmatprep.subr.bf16.mxu0 (!%p211_p3), %v1536_v1  ;;  %v1492_v31 = vld [vmem:[%s1805_s1 + $0x88] sm:$0xff] (!%p211_p3)   ;;  %v1494_v33 = vld [vmem:[%s1805_s1 + $0x90] sm:$0xff] (!%p211_p3)   ;;  %v1496_v36 = vld [vmem:[%s1805_s1 + $0x98] sm:$0xff] (!%p211_p3)  }
   0xe   : > { %s1815_s18 = smov (!%p243_p4, %s1526_s18), 1  ;;  %1346 = vmatprep.subr.bf16.mxu1 %v1536_v1  ;;  %v1499_v39 = vld [vmem:[%s1805_s1 + $0xe0] sm:$0xff]   ;;  %v1501_v41 = vld [vmem:[%s1805_s1 + $0xe8] sm:$0xff]   ;;  %v1503_v43 = vld [vmem:[%s1805_s1 + $0xf0] sm:$0xff]  }
   0xf   : > { %s1446_s7 = smul.u32 6, %s1815_s18  ;;  %v1498_v40 = vld [vmem:[%s1805_s1 + $0xc0] sm:$0xff]   ;;  %v1500_v42 = vld [vmem:[%s1805_s1 + $0xc8] sm:$0xff]   ;;  %v1502_v45 = vld [vmem:[%s1805_s1 + $0xd0] sm:$0xff]  }
  0x10   : > { %1335 = vmatpush3.bf16.msra.mxu0 %v1478_v6  ;;  %v1505_v47 = vld [vmem:[%s1805_s1 + $0xf8] sm:$0xff]   ;;  %v1508_v50 = vld [vmem:[%s1807_s3] sm:$0xff]   ;;  %v1510_v52 = vld [vmem:[%s1807_s3 + $0x8] sm:$0xff]  }
  0x11   : > { %s1621_s12 = scalar_lea.vmem %s1804_s0, %s1446_s7  ;;  %1347 = vmatpush3.bf16.msra.mxu1 %v1479_v7  ;;  %1336 = vmatprep.subr.bf16.mxu0 %v1536_v1  ;;  %v1504_v48 = vld [vmem:[%s1805_s1 + $0xd8] sm:$0xff]   ;;  %v1506_v51 = vld [vmem:[%s1805_s1 + $0x100] sm:$0xff]   ;;  %s1165_s7 = sshll.u32 %s1815_s18, 2  ;;  %v1507_v53 = vld [vmem:[%s1805_s1 + $0x108] sm:$0xff]  }
  0x12   : > { %1348 = vmatprep.subr.bf16.mxu1 %v1536_v1  ;;  %v261_v14 = vld [vmem:[%s1621_s12] sm:$0x3]  ;;  %v1197_v28 = vld [vmem:[%s1621_s12 + $0x2] sm:$0x3]  ;;  %v1237_v44 = vld [vmem:[%s1621_s12 + $0x4] sm:$0x3]  ;;  %s251_s15 = scalar_lea.vmem %s1806_s2, %s1165_s7  ;;  %s257_s12 = scalar_lea.vmem %s1809_s5, %s1815_s18 }
  0x13   : > { %v286_v16 = vrot.slane %v261_v14, %v1632_v15  ;;  %v600_v34 = vrot.slane %v1197_v28, %v1632_v15  ;;  %v847_v46 = vrot.slane %v1237_v44, %v1632_v15  ;;  %v1000_v54 = vld [vmem:[%s251_s15] sm:$0x3]  ;;  %v1509_v55 = vld [vmem:[%s1805_s1 + $0x110] sm:$0xff]   ;;  %v1511_v56 = vld [vmem:[%s1805_s1 + $0x118] sm:$0xff]  }
  0x14   : > { %1337 = vmatpush3.bf16.msra.mxu0 %v1480_v11  ;;  %vm1068_vm5 = vmand %vm1066_vm3, %vm1067_vm4 }
  0x15   : > { %1349 = vmatpush3.bf16.msra.mxu1 %v1481_v12  ;;  %1354 = vmatprep.subr.bf16.mxu0 %v1536_v1  ;;  %v288_v19 = vshrl.u32 %v286_v16, 16  ;;  %v434_v26 = vrot.slane %v286_v16, 1  ;;  %v681_v37 = vrot.slane %v600_v34, 1  ;;  %v602_v38 = vshrl.u32 %v600_v34, 16 }
  0x16   : > { %1366 = vmatprep.subr.bf16.mxu1 %v1536_v1  ;;  %v849_v49 = vshrl.u32 %v847_v46, 16  ;;  %v928_v57 = vrot.slane %v847_v46, 1  ;;  %v1069_v46 = vld [vmem:[%s257_s12] sm:$0x1] }
  0x17   : > { %1339 = vmatmul.mubr.msk.bf16.vlgmr.msra.gmra.mrb[0].mxu0 %vm314_vm1, %v288_v19 }
  0x18   : > { %1351 = vmatmul.mubr.msk.bf16.vlgmr.msra.gmra.mrb[0].mxu1 %vm314_vm1, %v261_v14  ;;  %1355 = vmatpush3.bf16.msra.mxu0 %v1482_v18 }
  0x19   : > { %1367 = vmatpush3.bf16.msra.mxu1 %v1483_v17  ;;  %1356 = vmatprep.subr.bf16.mxu0 %v1536_v1 }
  0x1a   : > { %1368 = vmatprep.subr.bf16.mxu1 %v1536_v1  ;;  %1362 = vmatprep.mubr.msk.bf16.mxu0 %vm1537_vm0, %v1536_v1 }
  0x1b   : > { %1374 = vmatprep.mubr.msk.bf16.mxu1 %vm1537_vm0, %v1536_v1 }
  0x1c   : > { %1357 = vmatpush3.bf16.msra.mxu0 %v1484_v21 }
  0x1d   : > { %1369 = vmatpush3.bf16.msra.mxu1 %v1485_v20  ;;  %1358 = vmatprep.subr.bf16.mxu0 %v1536_v1 }
  0x1e   : > { %1370 = vmatprep.subr.bf16.mxu1 %v1536_v1 }
  0x20   : > { %1359 = vmatpush3.bf16.msra.mxu0 %v1486_v23 }
  0x21   : > { %1371 = vmatpush3.bf16.msra.mxu1 %v1487_v22  ;;  %1360 = vmatprep.subr.bf16.mxu0 %v1536_v1 }
  0x22   : > { %1372 = vmatprep.subr.bf16.mxu1 %v1536_v1 }
  0x24   : > { %1361 = vmatpush3.bf16.msra.mxu0 %v1488_v25 }
  0x25   : > { %1373 = vmatpush3.bf16.msra.mxu1 %v1489_v24  ;;  %1378 = vmatprep.subr.bf16.mxu0 %v1536_v1 }
  0x26   : > { %1390 = vmatprep.subr.bf16.mxu1 %v1536_v1 }
  0x27   : > { %1363 = vmatmul.mubr.msk.bf16.vlgmr.msra.gmra.mrb[4].mxu0 %vm314_vm1, %v434_v26 }
  0x28   : > { %1375 = vmatmul.mubr.msk.bf16.vlgmr.msra.gmra.mrb[4].mxu1 %vm314_vm1, %v1197_v28  ;;  %1379 = vmatpush3.bf16.msra.mxu0 %v1490_v29 }
  0x29   : > { %1391 = vmatpush3.bf16.msra.mxu1 %v1491_v27  ;;  %1380 = vmatprep.subr.bf16.mxu0 %v1536_v1 }
  0x2a   : > { %1392 = vmatprep.subr.bf16.mxu1 %v1536_v1  ;;  %1386 = vmatprep.mubr.msk.bf16.mxu0 %vm1537_vm0, %v1536_v1 }
  0x2b   : > { %1398 = vmatprep.mubr.msk.bf16.mxu1 %vm1537_vm0, %v1536_v1 }
  0x2c   : > { %1381 = vmatpush3.bf16.msra.mxu0 %v1492_v31 }
  0x2d   : > { %1393 = vmatpush3.bf16.msra.mxu1 %v1493_v30  ;;  %1382 = vmatprep.subr.bf16.mxu0 %v1536_v1 }
  0x2e   : > { %1394 = vmatprep.subr.bf16.mxu1 %v1536_v1 }
  0x30   : > { %1383 = vmatpush3.bf16.msra.mxu0 %v1494_v33 }
  0x31   : > { %1395 = vmatpush3.bf16.msra.mxu1 %v1495_v32  ;;  %1384 = vmatprep.subr.bf16.mxu0 %v1536_v1 }
  0x32   : > { %1396 = vmatprep.subr.bf16.mxu1 %v1536_v1 }
  0x34   : > { %1385 = vmatpush3.bf16.msra.mxu0 %v1496_v36 }
  0x35   : > { %1397 = vmatpush3.bf16.msra.mxu1 %v1497_v35  ;;  %1402 = vmatprep.subr.bf16.mxu0 %v1536_v1 }
  0x36   : > { %1414 = vmatprep.subr.bf16.mxu1 %v1536_v1 }
  0x37   : > { %1387 = vmatmul.mubr.msk.bf16.vlgmr.msra.gmra.mrb[8].mxu0 %vm314_vm1, %v602_v38 }
  0x38   : > { %1399 = vmatmul.mubr.msk.bf16.vlgmr.msra.gmra.mrb[8].mxu1 %vm314_vm1, %v681_v37  ;;  %1403 = vmatpush3.bf16.msra.mxu0 %v1498_v40  ;;  %v1062_v40 = vld [vmem:[%s1808_s4] sm:$0x1] }
  0x39   : > { %1415 = vmatpush3.bf16.msra.mxu1 %v1499_v39  ;;  %1404 = vmatprep.subr.bf16.mxu0 %v1536_v1 }
  0x3a   : > { %1416 = vmatprep.subr.bf16.mxu1 %v1536_v1  ;;  %1410 = vmatprep.mubr.msk.bf16.mxu0 %vm1537_vm0, %v1536_v1 }
  0x3b   : > { %1422 = vmatprep.mubr.msk.bf16.mxu1 %vm1537_vm0, %v1536_v1 }
  0x3c   : > { %1405 = vmatpush3.bf16.msra.mxu0 %v1500_v42 }
  0x3d   : > { %1417 = vmatpush3.bf16.msra.mxu1 %v1501_v41  ;;  %1406 = vmatprep.subr.bf16.mxu0 %v1536_v1 }
  0x3e   : > { %1418 = vmatprep.subr.bf16.mxu1 %v1536_v1 }
  0x40   : > { %1407 = vmatpush3.bf16.msra.mxu0 %v1502_v45 }
  0x41   : > { %1419 = vmatpush3.bf16.msra.mxu1 %v1503_v43  ;;  %1408 = vmatprep.subr.bf16.mxu0 %v1536_v1 }
  0x42   : > { %1420 = vmatprep.subr.bf16.mxu1 %v1536_v1 }
  0x44   : > { %1409 = vmatpush3.bf16.msra.mxu0 %v1504_v48 }
  0x45   : > { %1421 = vmatpush3.bf16.msra.mxu1 %v1505_v47  ;;  %1426 = vmatprep.subr.bf16.mxu0 %v1536_v1 }
  0x46   : > { %1438 = vmatprep.subr.bf16.mxu1 %v1536_v1 }
  0x47   : > { %1411 = vmatmul.mubr.msk.bf16.vlgmr.msra.gmra.mrb[12].mxu0 %vm314_vm1, %v1237_v44 }
  0x48   : > { %1423 = vmatmul.mubr.msk.bf16.vlgmr.msra.gmra.mrb[12].mxu1 %vm314_vm1, %v849_v49  ;;  %1427 = vmatpush3.bf16.msra.mxu0 %v1506_v51 }
  0x49   : > { %1439 = vmatpush3.bf16.msra.mxu1 %v1508_v50  ;;  %1428 = vmatprep.subr.bf16.mxu0 %v1536_v1 }
  0x4a   : > { %1440 = vmatprep.subr.bf16.mxu1 %v1536_v1  ;;  %1442 = vmatprep.mubr.msk.bf16.mxu1 %vm1537_vm0, %v1536_v1 }
  0x4b   : > { %1434 = vmatprep.mubr.msk.bf16.mxu0 %vm1537_vm0, %v1536_v1 }
  0x4c   : > { %1429 = vmatpush3.bf16.msra.mxu0 %v1507_v53 }
  0x4d   : > { %1441 = vmatpush3.bf16.msra.mxu1 %v1510_v52  ;;  %1430 = vmatprep.subr.bf16.mxu0 %v1536_v1 }
  0x50   : > { %1443 = vmatmul.mubr.msk.bf16.vlgmr.msra.gmra.mrb[16].mxu1 %vm1017_vm2, %v1000_v54  ;;  %1431 = vmatpush3.bf16.msra.mxu0 %v1509_v55 }
  0x51   : > { %1432 = vmatprep.subr.bf16.mxu0 %v1536_v1 }
  0x54   : > { %1433 = vmatpush3.bf16.msra.mxu0 %v1511_v56 }
  0x57   : > { %1435 = vmatmul.mubr.msk.bf16.vlgmr.msra.gmra.mrb[16].mxu0 %vm314_vm1, %v928_v57 }
  0xea   : > { %v352_v59 = vpop.f32.mrb[0].mxu0 }
  0xeb   : > { %v419_v58 = vpop.f32.mrb[0].mxu1  ;;  %v1340_v61 = vpop.f32.mrb[1].mxu0 }
  0xec   : > { %v1352_v60 = vpop.f32.mrb[1].mxu1  ;;  %v420_v62 = vadd.f32 %v419_v58, %v352_v59  ;;  %v355_v0 = vpop.f32.mrb[2].mxu0 }
  0xed   : > { %v422_v63 = vpop.f32.mrb[2].mxu1  ;;  %v1341_v3 = vpop.f32.mrb[3].mxu0 }
  0xee   : > { %v1353_v2 = vpop.f32.mrb[3].mxu1 }
  0xfa   : > { %v496_v5 = vpop.f32.mrb[4].mxu0 }
  0xfb   : > { %v577_v4 = vpop.f32.mrb[4].mxu1  ;;  %v502_v7 = vadd.f32 %v496_v5, %v420_v62  ;;  %v1364_v8 = vpop.f32.mrb[5].mxu0 }
  0xfc   : > { %v1376_v6 = vpop.f32.mrb[5].mxu1  ;;  %v499_v1 = vpop.f32.mrb[6].mxu0 }
  0xfd   : > { %v580_v9 = vpop.f32.mrb[6].mxu1  ;;  %v583_v11 = vadd.f32 %v577_v4, %v502_v7  ;;  %v1365_v12 = vpop.f32.mrb[7].mxu0 }
  0xfe   : > { %v1377_v10 = vpop.f32.mrb[7].mxu1 }
 0x10a   : > { %v665_v14 = vpop.f32.mrb[8].mxu0 }
 0x10b   : > { %v743_v13 = vpop.f32.mrb[8].mxu1  ;;  %v671_v16 = vadd.f32 %v665_v14, %v583_v11  ;;  %v1388_v17 = vpop.f32.mrb[9].mxu0 }
 0x10c   : > { %v1400_v15 = vpop.f32.mrb[9].mxu1  ;;  %v668_v19 = vpop.f32.mrb[10].mxu0 }
 0x10d   : > { %v746_v18 = vpop.f32.mrb[10].mxu1  ;;  %v749_v21 = vadd.f32 %v743_v13, %v671_v16  ;;  %v1389_v22 = vpop.f32.mrb[11].mxu0 }
 0x10e   : > { %v1401_v20 = vpop.f32.mrb[11].mxu1 }
 0x11a   : > { %v824_v24 = vpop.f32.mrb[12].mxu0 }
 0x11b   : > { %v912_v23 = vpop.f32.mrb[12].mxu1  ;;  %v830_v26 = vadd.f32 %v824_v24, %v749_v21  ;;  %v1412_v27 = vpop.f32.mrb[13].mxu0 }
 0x11c   : > { %v1424_v25 = vpop.f32.mrb[13].mxu1  ;;  %v827_v29 = vpop.f32.mrb[14].mxu0 }
 0x11d   : > { %v915_v28 = vpop.f32.mrb[14].mxu1  ;;  %v918_v31 = vadd.f32 %v912_v23, %v830_v26  ;;  %v1413_v32 = vpop.f32.mrb[15].mxu0 }
 0x11e   : > { %v1425_v30 = vpop.f32.mrb[15].mxu1 }
 0x123   : > { %v1055_v33 = vpop.f32.mrb[16].mxu1 }
 0x124   : > { %v1444_v34 = vpop.f32.mrb[17].mxu1 }
 0x125   : > { %v1058_v35 = vpop.f32.mrb[18].mxu1 }
 0x126   : > { %v1445_v36 = vpop.f32.mrb[19].mxu1 }
 0x12a   : > { %v990_v37 = vpop.f32.mrb[16].mxu0 }
 0x12b   : > { %v996_v38 = vadd.f32 %v990_v37, %v918_v31  ;;  %v1436_v39 = vpop.f32.mrb[17].mxu0 }
 0x12c   : > { %v993_v41 = vpop.f32.mrb[18].mxu0 }
 0x12d   : > { %v1061_v42 = vadd.f32 %v1055_v33, %v996_v38  ;;  %v1437_v43 = vpop.f32.mrb[19].mxu0 }
 0x12f   : > { %v1063_v44 = vadd.f32 %v1062_v40, %v1061_v42 }
 0x131   : > { %v1064_v45 = vmax.f32 %v1063_v44, 0.0 }
 0x133   : > { %v1065_v47 = vpack.c.bf16 %v1064_v45, %v1064_v45 }
 0x135   : > { %v1070_v48 = vsel %vm1068_vm5, %v1065_v47, %v1069_v46 }
 0x136   : > { %1071 = vst [vmem:[%s257_s12] sm:$0x1] %v1070_v48 }
 0x137 PF: > { %s15_s20 = sadd.s32 1, %s1534_s20   ;;  %s1810_s18 = smov %s1530_s19 }
 0x138   : > { %p12_p5 = scmp.ge.s32.totalorder %s15_s20, 4   ;;  %s1811_s19 = smov %s1813_s21 }
 0x13a   :  { %14 = sbr.rel (!%p12_p5) target bundleno = 2 (0x2), region = 85 }

// kernel: resnet_forward.18
= control target key start
LH: loop header
LB: loop body
LE: loop exit
PB: predicated region body
PF: predicated region fallthrough
CT: control target
= control target key end

     0   :  { %s1433_s12 = smov 0   ;;  %s1435_s13 = smov 0   ;;  %s1660_s0 = inlined_call_operand.vmem [shape: bf16[2,3,2,256], index: 0, kind: input, shape index: {}]   ;;  %s1661_s1 = inlined_call_operand.vmem [shape: bf16[9,64,128], index: 1, kind: input, shape index: {}]   ;;  %s1662_s2 = inlined_call_operand.vmem [shape: f32[1,128], index: 2, kind: input, shape index: {}]   ;;  %s1663_s3 = inlined_call_operand.vmem [shape: bf16[2,1,1,128], index: 3, kind: output, shape index: {}]  }
   0x1   :  { %s1437_s14 = smov 0  }
   0x2 LB: > { %s25_s15 = sadd.s32 1, %s1404_s13  ;;  %p1055_p0 = scmp.ge.s32.totalorder %s1408_s14, 1  ;;  %s1408_s14 = sphi %s1437_s14, %s13_s14   ;;  %s1404_s13 = sphi %s1435_s13, %s1665_s13   ;;  %s1400_s12 = sphi %s1433_s12, %s1664_s12  }
   0x3   : > { %p27_p1 = scmp.ge.s32.totalorder %s25_s15, 2  ;;  %p150_p2 = scmp.lt.s32.totalorder %s1408_s14, 3 }
   0x5   : > { %s1667_s15 = smov (%p27_p1, %s25_s15), 0  ;;  %p151_p3 = pnand %p1055_p0, %p150_p2 }
   0x6   : > { %v1350_v0 = vld [vmem:[%s1661_s1 + $0x20] sm:$0xff] (!%p151_p3)   ;;  %v1410_v1 = vmov (!%p151_p3), 0.0   ;;  %v1352_v3 = vld [vmem:[%s1661_s1 + $0x28] sm:$0xff] (!%p151_p3)   ;;  %vm1411_vm0 = vmmov (!%p151_p3), 0   ;;  %p174_p4 = scmp.lt.s32.totalorder (!%p151_p3), %s1400_s12, 1  ;;  %v210_v5 = vlaneseq (!%p151_p3)  ;;  %v1354_v6 = vld [vmem:[%s1661_s1 + $0x30] sm:$0xff] (!%p151_p3)  }
   0x7   : > { %154 = sbr.rel (%p151_p3) target bundleno = 312 (0x138), region = 32  ;;  %1214 = vmatprep.subr.bf16.mxu0 (!%p151_p3), %v1410_v1  ;;  %1226 = vmatprep.subr.bf16.mxu1 (!%p151_p3), %v1410_v1  ;;  %v1351_v2 = vld [vmem:[%s1661_s1] sm:$0xff] (!%p151_p3)   ;;  %v1353_v4 = vld [vmem:[%s1661_s1 + $0x8] sm:$0xff] (!%p151_p3)   ;;  %v1355_v7 = vld [vmem:[%s1661_s1 + $0x10] sm:$0xff] (!%p151_p3)   ;;  %v1412_v8 = vmov (!%p151_p3), 1966171168  }
   0x8   : > { %1215 = vmatpush3.bf16.msra.mxu0 (!%p151_p3), %v1350_v0  ;;  %1222 = vmatprep.mubr.msk.bf16.mxu0 (!%p151_p3), %vm1411_vm0, %v1410_v1  ;;  %v208_v9 = vunpack.c.l.s4 (!%p151_p3), %v1412_v8  ;;  %v211_v10 = vshrl.u32 (!%p151_p3), %v210_v5, 7  ;;  %v1356_v11 = vld [vmem:[%s1661_s1 + $0x38] sm:$0xff] (!%p151_p3)   ;;  %vm253_vm1 = vcmask (!%p151_p3), 523264   ;;  %v1359_v17 = vld [vmem:[%s1661_s1 + $0x60] sm:$0xff] (!%p151_p3)   ;;  %v1361_v21 = vld [vmem:[%s1661_s1 + $0x68] sm:$0xff] (!%p151_p3)   ;;  %vm970_vm2 = vcmask (!%p151_p3), 1040384  }
   0x9   : > { %1227 = vmatpush3.bf16.msra.mxu1 (!%p151_p3), %v1351_v2  ;;  %1216 = vmatprep.subr.bf16.mxu0 (!%p151_p3), %v1410_v1  ;;  %v1357_v12 = vld [vmem:[%s1661_s1 + $0x18] sm:$0xff] (!%p151_p3)   ;;  %v1358_v19 = vld [vmem:[%s1661_s1 + $0x40] sm:$0xff] (!%p151_p3)   ;;  %v1360_v22 = vld [vmem:[%s1661_s1 + $0x48] sm:$0xff] (!%p151_p3)   ;;  %vm971_vm3 = vsmask.f32 (!%p151_p3), 256 }
   0xa   : > { %1228 = vmatprep.subr.bf16.mxu1 (!%p151_p3), %v1410_v1  ;;  %1234 = vmatprep.mubr.msk.bf16.mxu1 (!%p151_p3), %vm1411_vm0, %v1410_v1  ;;  %v209_v13 = vunpack.c.0.s8 (!%p151_p3), %v208_v9  ;;  %v1363_v23 = vld [vmem:[%s1661_s1 + $0x70] sm:$0xff] (!%p151_p3)   ;;  %v1365_v25 = vld [vmem:[%s1661_s1 + $0x78] sm:$0xff] (!%p151_p3)   ;;  %v1367_v29 = vld [vmem:[%s1661_s1 + $0xa0] sm:$0xff] (!%p151_p3)  }
   0xb   : > { %v1362_v24 = vld [vmem:[%s1661_s1 + $0x50] sm:$0xff] (!%p151_p3)   ;;  %v1364_v26 = vld [vmem:[%s1661_s1 + $0x58] sm:$0xff] (!%p151_p3)   ;;  %v1366_v31 = vld [vmem:[%s1661_s1 + $0x80] sm:$0xff] (!%p151_p3)  }
   0xc   : > { %1217 = vmatpush3.bf16.msra.mxu0 (!%p151_p3), %v1352_v3  ;;  %v1496_v15 = vsub.s32 (!%p151_p3), %v209_v13, %v211_v10  ;;  %v1369_v32 = vld [vmem:[%s1661_s1 + $0xa8] sm:$0xff] (!%p151_p3)   ;;  %v1371_v34 = vld [vmem:[%s1661_s1 + $0xb0] sm:$0xff] (!%p151_p3)   ;;  %v1373_v38 = vld [vmem:[%s1661_s1 + $0xb8] sm:$0xff] (!%p151_p3)  }
   0xd   : > { %1229 = vmatpush3.bf16.msra.mxu1 (!%p151_p3), %v1353_v4  ;;  %1218 = vmatprep.subr.bf16.mxu0 (!%p151_p3), %v1410_v1  ;;  %v1368_v33 = vld [vmem:[%s1661_s1 + $0x88] sm:$0xff] (!%p151_p3)   ;;  %v1370_v37 = vld [vmem:[%s1661_s1 + $0x90] sm:$0xff] (!%p151_p3)   ;;  %v1372_v41 = vld [vmem:[%s1661_s1 + $0x98] sm:$0xff] (!%p151_p3)  }
   0xe   : > { %s1669_s12 = smov (!%p174_p4, %s1400_s12), 1  ;;  %1230 = vmatprep.subr.bf16.mxu1 %v1410_v1  ;;  %v1375_v42 = vld [vmem:[%s1661_s1 + $0xe0] sm:$0xff]   ;;  %v1377_v45 = vld [vmem:[%s1661_s1 + $0xe8] sm:$0xff]   ;;  %v1379_v49 = vld [vmem:[%s1661_s1 + $0xf0] sm:$0xff]  }
   0xf   : > { %s1322_s26 = smul.u32 6, %s1669_s12  ;;  %v1374_v44 = vld [vmem:[%s1661_s1 + $0xc0] sm:$0xff]   ;;  %v1376_v47 = vld [vmem:[%s1661_s1 + $0xc8] sm:$0xff]   ;;  %v1378_v50 = vld [vmem:[%s1661_s1 + $0xd0] sm:$0xff]   ;;  %s183_s28 = scalar_lea.vmem %s1663_s3, %s1669_s12 }
  0x10   : > { %1219 = vmatpush3.bf16.msra.mxu0 %v1354_v6  ;;  %v1381_v52 = vld [vmem:[%s1661_s1 + $0xf8] sm:$0xff]   ;;  %v1382_v55 = vld [vmem:[%s1661_s1 + $0x100] sm:$0xff]   ;;  %v1383_v56 = vld [vmem:[%s1661_s1 + $0x108] sm:$0xff]  }
  0x11   : > { %s1485_s4 = scalar_lea.vmem %s1660_s0, %s1322_s26  ;;  %1231 = vmatpush3.bf16.msra.mxu1 %v1355_v7  ;;  %1220 = vmatprep.subr.bf16.mxu0 %v1410_v1  ;;  %v1380_v53 = vld [vmem:[%s1661_s1 + $0xd8] sm:$0xff]   ;;  %v1384_v57 = vld [vmem:[%s1661_s1 + $0x110] sm:$0xff]   ;;  %vm972_vm4 = vmand %vm970_vm2, %vm971_vm3 }
  0x12   : > { %1232 = vmatprep.subr.bf16.mxu1 %v1410_v1  ;;  %v188_v14 = vld [vmem:[%s1485_s4] sm:$0x3]  ;;  %v1087_v28 = vld [vmem:[%s1485_s4 + $0x2] sm:$0x3]  ;;  %v1127_v46 = vld [vmem:[%s1485_s4 + $0x4] sm:$0x3] }
  0x13   : > { %v213_v16 = vrot.slane %v188_v14, %v1496_v15  ;;  %v541_v35 = vrot.slane %v1087_v28, %v1496_v15  ;;  %v802_v48 = vrot.slane %v1127_v46, %v1496_v15  ;;  %v1385_v59 = vld [vmem:[%s1661_s1 + $0x118] sm:$0xff]  }
  0x14   : > { %1221 = vmatpush3.bf16.msra.mxu0 %v1356_v11 }
  0x15   : > { %1233 = vmatpush3.bf16.msra.mxu1 %v1357_v12  ;;  %1238 = vmatprep.subr.bf16.mxu0 %v1410_v1  ;;  %v214_v18 = vcombine.high %v213_v16, %v213_v16  ;;  %v221_v27 = vrot.slane %v213_v16, %v1496_v15  ;;  %v549_v36 = vrot.slane %v541_v35, %v1496_v15 }
  0x16   : > { %1250 = vmatprep.subr.bf16.mxu1 %v1410_v1  ;;  %v542_v39 = vcombine.high %v541_v35, %v541_v35  ;;  %v803_v51 = vcombine.high %v802_v48, %v802_v48  ;;  %v810_v58 = vrot.slane %v802_v48, %v1496_v15 }
  0x17   : > { %v228_v20 = vrot.slane %v214_v18, %v1496_v15  ;;  %v374_v30 = vshrl.u32 %v221_v27, 16  ;;  %v635_v40 = vshrl.u32 %v549_v36, 16 }
  0x18   : > { %1235 = vmatmul.mubr.msk.bf16.vlgmr.msra.gmra.mrb[0].mxu1 %vm253_vm1, %v188_v14  ;;  %v556_v43 = vrot.slane %v542_v39, %v1496_v15  ;;  %v817_v54 = vrot.slane %v803_v51, %v1496_v15  ;;  %v896_v60 = vshrl.u32 %v810_v58, 16 }
  0x19   : > { %1251 = vmatpush3.bf16.msra.mxu1 %v1359_v17  ;;  %1258 = vmatprep.mubr.msk.bf16.mxu1 %vm1411_vm0, %v1410_v1 }
  0x1a   : > { %1252 = vmatprep.subr.bf16.mxu1 %v1410_v1  ;;  %1223 = vmatmul.mubr.msk.bf16.vlgmr.msra.gmra.mrb[0].mxu0 %vm253_vm1, %v228_v20 }
  0x1b   : > { %1239 = vmatpush3.bf16.msra.mxu0 %v1358_v19  ;;  %1246 = vmatprep.mubr.msk.bf16.mxu0 %vm1411_vm0, %v1410_v1 }
  0x1c   : > { %1240 = vmatprep.subr.bf16.mxu0 %v1410_v1 }
  0x1d   : > { %1253 = vmatpush3.bf16.msra.mxu1 %v1361_v21 }
  0x1e   : > { %1254 = vmatprep.subr.bf16.mxu1 %v1410_v1 }
  0x1f   : > { %1241 = vmatpush3.bf16.msra.mxu0 %v1360_v22 }
  0x20   : > { %1242 = vmatprep.subr.bf16.mxu0 %v1410_v1 }
  0x21   : > { %1255 = vmatpush3.bf16.msra.mxu1 %v1363_v23 }
  0x22   : > { %1256 = vmatprep.subr.bf16.mxu1 %v1410_v1 }
  0x23   : > { %1243 = vmatpush3.bf16.msra.mxu0 %v1362_v24 }
  0x24   : > { %1244 = vmatprep.subr.bf16.mxu0 %v1410_v1 }
  0x25   : > { %1257 = vmatpush3.bf16.msra.mxu1 %v1365_v25 }
  0x26   : > { %1274 = vmatprep.subr.bf16.mxu1 %v1410_v1 }
  0x27   : > { %1245 = vmatpush3.bf16.msra.mxu0 %v1364_v26 }
  0x28   : > { %1259 = vmatmul.mubr.msk.bf16.vlgmr.msra.gmra.mrb[4].mxu1 %vm253_vm1, %v1087_v28  ;;  %1262 = vmatprep.subr.bf16.mxu0 %v1410_v1 }
  0x29   : > { %1275 = vmatpush3.bf16.msra.mxu1 %v1367_v29  ;;  %1282 = vmatprep.mubr.msk.bf16.mxu1 %vm1411_vm0, %v1410_v1 }
  0x2a   : > { %1276 = vmatprep.subr.bf16.mxu1 %v1410_v1  ;;  %1247 = vmatmul.mubr.msk.bf16.vlgmr.msra.gmra.mrb[4].mxu0 %vm253_vm1, %v374_v30 }
  0x2b   : > { %1263 = vmatpush3.bf16.msra.mxu0 %v1366_v31  ;;  %1270 = vmatprep.mubr.msk.bf16.mxu0 %vm1411_vm0, %v1410_v1 }
  0x2c   : > { %1264 = vmatprep.subr.bf16.mxu0 %v1410_v1 }
  0x2d   : > { %1277 = vmatpush3.bf16.msra.mxu1 %v1369_v32 }
  0x2e   : > { %1278 = vmatprep.subr.bf16.mxu1 %v1410_v1 }
  0x2f   : > { %1265 = vmatpush3.bf16.msra.mxu0 %v1368_v33 }
  0x30   : > { %1266 = vmatprep.subr.bf16.mxu0 %v1410_v1 }
  0x31   : > { %1279 = vmatpush3.bf16.msra.mxu1 %v1371_v34 }
  0x32   : > { %1280 = vmatprep.subr.bf16.mxu1 %v1410_v1 }
  0x33   : > { %1267 = vmatpush3.bf16.msra.mxu0 %v1370_v37  ;;  %v966_v37 = vld [vmem:[%s1662_s2] sm:$0x1] }
  0x34   : > { %1268 = vmatprep.subr.bf16.mxu0 %v1410_v1 }
  0x35   : > { %1281 = vmatpush3.bf16.msra.mxu1 %v1373_v38 }
  0x36   : > { %1298 = vmatprep.subr.bf16.mxu1 %v1410_v1 }
  0x37   : > { %1269 = vmatpush3.bf16.msra.mxu0 %v1372_v41 }
  0x38   : > { %1283 = vmatmul.mubr.msk.bf16.vlgmr.msra.gmra.mrb[8].mxu1 %vm253_vm1, %v635_v40  ;;  %1286 = vmatprep.subr.bf16.mxu0 %v1410_v1 }
  0x39   : > { %1299 = vmatpush3.bf16.msra.mxu1 %v1375_v42  ;;  %1306 = vmatprep.mubr.msk.bf16.mxu1 %vm1411_vm0, %v1410_v1 }
  0x3a   : > { %1300 = vmatprep.subr.bf16.mxu1 %v1410_v1  ;;  %1271 = vmatmul.mubr.msk.bf16.vlgmr.msra.gmra.mrb[8].mxu0 %vm253_vm1, %v556_v43 }
  0x3b   : > { %1287 = vmatpush3.bf16.msra.mxu0 %v1374_v44  ;;  %1294 = vmatprep.mubr.msk.bf16.mxu0 %vm1411_vm0, %v1410_v1  ;;  %v973_v44 = vld [vmem:[%s183_s28] sm:$0x1] }
  0x3c   : > { %1288 = vmatprep.subr.bf16.mxu0 %v1410_v1 }
  0x3d   : > { %1301 = vmatpush3.bf16.msra.mxu1 %v1377_v45 }
  0x3e   : > { %1302 = vmatprep.subr.bf16.mxu1 %v1410_v1 }
  0x3f   : > { %1289 = vmatpush3.bf16.msra.mxu0 %v1376_v47 }
  0x40   : > { %1290 = vmatprep.subr.bf16.mxu0 %v1410_v1 }
  0x41   : > { %1303 = vmatpush3.bf16.msra.mxu1 %v1379_v49 }
  0x42   : > { %1304 = vmatprep.subr.bf16.mxu1 %v1410_v1 }
  0x43   : > { %1291 = vmatpush3.bf16.msra.mxu0 %v1378_v50 }
  0x44   : > { %1292 = vmatprep.subr.bf16.mxu0 %v1410_v1 }
  0x45   : > { %1305 = vmatpush3.bf16.msra.mxu1 %v1381_v52 }
  0x47   : > { %1293 = vmatpush3.bf16.msra.mxu0 %v1380_v53 }
  0x48   : > { %1307 = vmatmul.mubr.msk.bf16.vlgmr.msra.gmra.mrb[12].mxu1 %vm253_vm1, %v817_v54  ;;  %1310 = vmatprep.subr.bf16.mxu0 %v1410_v1 }
  0x4a   : > { %1295 = vmatmul.mubr.msk.bf16.vlgmr.msra.gmra.mrb[12].mxu0 %vm253_vm1, %v1127_v46 }
  0x4b   : > { %1311 = vmatpush3.bf16.msra.mxu0 %v1382_v55  ;;  %1318 = vmatprep.mubr.msk.bf16.mxu0 %vm1411_vm0, %v1410_v1 }
  0x4c   : > { %1312 = vmatprep.subr.bf16.mxu0 %v1410_v1 }
  0x4f   : > { %1313 = vmatpush3.bf16.msra.mxu0 %v1383_v56 }
  0x50   : > { %1314 = vmatprep.subr.bf16.mxu0 %v1410_v1 }
  0x53   : > { %1315 = vmatpush3.bf16.msra.mxu0 %v1384_v57 }
  0x54   : > { %1316 = vmatprep.subr.bf16.mxu0 %v1410_v1 }
  0x57   : > { %1317 = vmatpush3.bf16.msra.mxu0 %v1385_v59 }
  0x5a   : > { %1319 = vmatmul.mubr.msk.bf16.vlgmr.msra.gmra.mrb[16].mxu0 %vm253_vm1, %v896_v60 }
  0xeb   : > { %v358_v61 = vpop.f32.mrb[0].mxu1 }
  0xec   : > { %v1236_v62 = vpop.f32.mrb[1].mxu1 }
  0xed   : > { %v361_v63 = vpop.f32.mrb[2].mxu1  ;;  %v291_v0 = vpop.f32.mrb[0].mxu0 }
  0xee   : > { %v1237_v2 = vpop.f32.mrb[3].mxu1  ;;  %v1224_v3 = vpop.f32.mrb[1].mxu0  ;;  %v359_v4 = vadd.f32 %v358_v61, %v291_v0 }
  0xef   : > { %v294_v5 = vpop.f32.mrb[2].mxu0 }
  0xf0   : > { %v1225_v6 = vpop.f32.mrb[3].mxu0 }
  0xfb   : > { %v518_v7 = vpop.f32.mrb[4].mxu1 }
  0xfc   : > { %v1260_v8 = vpop.f32.mrb[5].mxu1 }
  0xfd   : > { %v521_v9 = vpop.f32.mrb[6].mxu1  ;;  %v437_v10 = vpop.f32.mrb[4].mxu0 }
  0xfe   : > { %v1261_v11 = vpop.f32.mrb[7].mxu1  ;;  %v443_v12 = vadd.f32 %v437_v10, %v359_v4  ;;  %v1248_v1 = vpop.f32.mrb[5].mxu0 }
  0xff   : > { %v440_v13 = vpop.f32.mrb[6].mxu0 }
 0x100   : > { %v524_v14 = vadd.f32 %v518_v7, %v443_v12  ;;  %v1249_v15 = vpop.f32.mrb[7].mxu0 }
 0x10b   : > { %v698_v16 = vpop.f32.mrb[8].mxu1 }
 0x10c   : > { %v1284_v17 = vpop.f32.mrb[9].mxu1 }
 0x10d   : > { %v701_v18 = vpop.f32.mrb[10].mxu1  ;;  %v618_v19 = vpop.f32.mrb[8].mxu0 }
 0x10e   : > { %v1285_v20 = vpop.f32.mrb[11].mxu1  ;;  %v624_v21 = vadd.f32 %v618_v19, %v524_v14  ;;  %v1272_v22 = vpop.f32.mrb[9].mxu0 }
 0x10f   : > { %v621_v23 = vpop.f32.mrb[10].mxu0 }
 0x110   : > { %v704_v24 = vadd.f32 %v698_v16, %v624_v21  ;;  %v1273_v25 = vpop.f32.mrb[11].mxu0 }
 0x11b   : > { %v879_v26 = vpop.f32.mrb[12].mxu1 }
 0x11c   : > { %v1308_v27 = vpop.f32.mrb[13].mxu1 }
 0x11d   : > { %v882_v28 = vpop.f32.mrb[14].mxu1  ;;  %v779_v29 = vpop.f32.mrb[12].mxu0 }
 0x11e   : > { %v1309_v30 = vpop.f32.mrb[15].mxu1  ;;  %v785_v31 = vadd.f32 %v779_v29, %v704_v24  ;;  %v1296_v32 = vpop.f32.mrb[13].mxu0 }
 0x11f   : > { %v782_v33 = vpop.f32.mrb[14].mxu0 }
 0x120   : > { %v885_v34 = vadd.f32 %v879_v26, %v785_v31  ;;  %v1297_v35 = vpop.f32.mrb[15].mxu0 }
 0x12d   : > { %v959_v36 = vpop.f32.mrb[16].mxu0 }
 0x12e   : > { %v965_v38 = vadd.f32 %v959_v36, %v885_v34  ;;  %v1320_v39 = vpop.f32.mrb[17].mxu0 }
 0x12f   : > { %v962_v40 = vpop.f32.mrb[18].mxu0 }
 0x130   : > { %v967_v41 = vadd.f32 %v966_v37, %v965_v38  ;;  %v1321_v42 = vpop.f32.mrb[19].mxu0 }
 0x132   : > { %v968_v43 = vmax.f32 %v967_v41, 0.0 }
 0x134   : > { %v969_v45 = vpack.c.bf16 %v968_v43, %v968_v43 }
 0x136   : > { %v974_v46 = vsel %vm972_vm4, %v969_v45, %v973_v44 }
 0x137   : > { %975 = vst [vmem:[%s183_s28] sm:$0x1] %v974_v46 }
 0x138 PF: > { %s13_s14 = sadd.s32 1, %s1408_s14   ;;  %s1664_s12 = smov %s1404_s13 }
 0x139   : > { %p10_p5 = scmp.ge.s32.totalorder %s13_s14, 4   ;;  %s1665_s13 = smov %s1667_s15 }
 0x13b   :  { %12 = sbr.rel (!%p10_p5) target bundleno = 2 (0x2), region = 73 }

// kernel: resnet_forward.19
= control target key start
LH: loop header
LB: loop body
LE: loop exit
PB: predicated region body
PF: predicated region fallthrough
CT: control target
= control target key end

     0   :  { %s2096_s18 = smov 0   ;;  %s2098_s19 = smov 0   ;;  %s2490_s0 = inlined_call_operand.vmem [shape: bf16[2,3,3,128], index: 0, kind: input, shape index: {}]   ;;  %s2491_s1 = inlined_call_operand.vmem [shape: bf16[9,128,128], index: 1, kind: input, shape index: {}]   ;;  %s2492_s2 = inlined_call_operand.vmem [shape: bf16[2,1,1,256], index: 2, kind: input, shape index: {}]   ;;  %s2493_s3 = inlined_call_operand.vmem [shape: bf16[1,64,128], index: 3, kind: input, shape index: {}]   ;;  %s2494_s4 = inlined_call_operand.vmem [shape: f32[1,128], index: 4, kind: input, shape index: {}]   ;;  %s2495_s5 = inlined_call_operand.vmem [shape: bf16[2,1,1,128], index: 5, kind: output, shape index: {}]  }
   0x1   :  { %s2100_s20 = smov 0  }
   0x2 LB: > { %s27_s21 = sadd.s32 1, %s2057_s19  ;;  %p1445_p0 = scmp.ge.s32.totalorder %s2061_s20, 1  ;;  %s2061_s20 = sphi %s2100_s20, %s15_s20   ;;  %s2057_s19 = sphi %s2098_s19, %s2497_s19   ;;  %s2053_s18 = sphi %s2096_s18, %s2496_s18  }
   0x3   : > { %p29_p1 = scmp.ge.s32.totalorder %s27_s21, 2  ;;  %p210_p2 = scmp.lt.s32.totalorder %s2061_s20, 3 }
   0x5   : > { %s2499_s21 = smov (%p29_p1, %s27_s21), 0  ;;  %p211_p3 = pnand %p1445_p0, %p210_p2 }
   0x6   : > { %v1963_v0 = vld [vmem:[%s2491_s1 + $0x40] sm:$0xff] (!%p211_p3)   ;;  %v2063_v1 = vmov (!%p211_p3), 0.0   ;;  %v1965_v3 = vld [vmem:[%s2491_s1 + $0x48] sm:$0xff] (!%p211_p3)   ;;  %vm2064_vm0 = vmmov (!%p211_p3), 0   ;;  %v1967_v5 = vld [vmem:[%s2491_s1 + $0x50] sm:$0xff] (!%p211_p3)   ;;  %p243_p4 = scmp.lt.s32.totalorder (!%p211_p3), %s2053_s18, 1  ;;  %v299_v9 = vlaneseq (!%p211_p3) }
   0x7   : > { %214 = sbr.rel (%p211_p3) target bundleno = 391 (0x187), region = 40  ;;  %1743 = vmatprep.subr.bf16.mxu0 (!%p211_p3), %v2063_v1  ;;  %1763 = vmatprep.subr.bf16.mxu1 (!%p211_p3), %v2063_v1  ;;  %v1964_v2 = vld [vmem:[%s2491_s1] sm:$0xff] (!%p211_p3)   ;;  %v1966_v4 = vld [vmem:[%s2491_s1 + $0x8] sm:$0xff] (!%p211_p3)   ;;  %v1968_v6 = vld [vmem:[%s2491_s1 + $0x10] sm:$0xff] (!%p211_p3)   ;;  %v2065_v12 = vmov (!%p211_p3), 1983009808  }
   0x8   : > { %1744 = vmatpush3.bf16.msra.mxu0 (!%p211_p3), %v1963_v0  ;;  %1759 = vmatprep.mubr.msk.bf16.mxu0 (!%p211_p3), %vm2064_vm0, %v2063_v1  ;;  %v1969_v7 = vld [vmem:[%s2491_s1 + $0x58] sm:$0xff] (!%p211_p3)   ;;  %v1971_v10 = vld [vmem:[%s2491_s1 + $0x60] sm:$0xff] (!%p211_p3)   ;;  %v297_v13 = vunpack.c.l.s4 (!%p211_p3), %v2065_v12  ;;  %v300_v14 = vshrl.u32 (!%p211_p3), %v299_v9, 7  ;;  %v1973_v15 = vld [vmem:[%s2491_s1 + $0x68] sm:$0xff] (!%p211_p3)   ;;  %vm1299_vm1 = vcmask (!%p211_p3), 523264   ;;  %vm1348_vm2 = vcmask (!%p211_p3), 1040384  }
   0x9   : > { %1764 = vmatpush3.bf16.msra.mxu1 (!%p211_p3), %v1964_v2  ;;  %1745 = vmatprep.subr.bf16.mxu0 (!%p211_p3), %v2063_v1  ;;  %v1970_v8 = vld [vmem:[%s2491_s1 + $0x18] sm:$0xff] (!%p211_p3)   ;;  %v1972_v11 = vld [vmem:[%s2491_s1 + $0x20] sm:$0xff] (!%p211_p3)   ;;  %v1974_v16 = vld [vmem:[%s2491_s1 + $0x28] sm:$0xff] (!%p211_p3)   ;;  %vm1349_vm3 = vsmask.f32 (!%p211_p3), 256 }
   0xa   : > { %1765 = vmatprep.subr.bf16.mxu1 (!%p211_p3), %v2063_v1  ;;  %1779 = vmatprep.mubr.msk.bf16.mxu1 (!%p211_p3), %vm2064_vm0, %v2063_v1  ;;  %v298_v17 = vunpack.c.0.s8 (!%p211_p3), %v297_v13  ;;  %v1975_v18 = vld [vmem:[%s2491_s1 + $0x70] sm:$0xff] (!%p211_p3)   ;;  %v1977_v23 = vld [vmem:[%s2491_s1 + $0x78] sm:$0xff] (!%p211_p3)   ;;  %v1979_v26 = vld [vmem:[%s2491_s1 + $0x80] sm:$0xff] (!%p211_p3)  }
   0xb   : > { %v1976_v21 = vld [vmem:[%s2491_s1 + $0x30] sm:$0xff] (!%p211_p3)   ;;  %v1978_v24 = vld [vmem:[%s2491_s1 + $0x38] sm:$0xff] (!%p211_p3)   ;;  %v1980_v27 = vld [vmem:[%s2491_s1 + $0xc0] sm:$0xff] (!%p211_p3)  }
   0xc   : > { %1746 = vmatpush3.bf16.msra.mxu0 (!%p211_p3), %v1965_v3  ;;  %v2181_v19 = vsub.s32 (!%p211_p3), %v298_v17, %v300_v14  ;;  %v1981_v28 = vld [vmem:[%s2491_s1 + $0x88] sm:$0xff] (!%p211_p3)   ;;  %v1983_v30 = vld [vmem:[%s2491_s1 + $0x90] sm:$0xff] (!%p211_p3)   ;;  %v1985_v32 = vld [vmem:[%s2491_s1 + $0x98] sm:$0xff] (!%p211_p3)  }
   0xd   : > { %1766 = vmatpush3.bf16.msra.mxu1 (!%p211_p3), %v1966_v4  ;;  %1747 = vmatprep.subr.bf16.mxu0 (!%p211_p3), %v2063_v1  ;;  %v1982_v29 = vld [vmem:[%s2491_s1 + $0xc8] sm:$0xff] (!%p211_p3)   ;;  %v1984_v31 = vld [vmem:[%s2491_s1 + $0xd0] sm:$0xff] (!%p211_p3)   ;;  %v1986_v33 = vld [vmem:[%s2491_s1 + $0xd8] sm:$0xff] (!%p211_p3)  }
   0xe   : > { %1767 = vmatprep.subr.bf16.mxu1 %v2063_v1  ;;  %s2501_s18 = smov (!%p243_p4, %s2053_s18), 1  ;;  %v1987_v34 = vld [vmem:[%s2491_s1 + $0xa0] sm:$0xff]   ;;  %v1989_v36 = vld [vmem:[%s2491_s1 + $0xa8] sm:$0xff]   ;;  %v1991_v38 = vld [vmem:[%s2491_s1 + $0xb0] sm:$0xff]  }
   0xf   : > { %s1935_s17 = smul.u32 6, %s2501_s18  ;;  %v1988_v35 = vld [vmem:[%s2491_s1 + $0xe0] sm:$0xff]   ;;  %v1990_v37 = vld [vmem:[%s2491_s1 + $0xe8] sm:$0xff]   ;;  %v1992_v39 = vld [vmem:[%s2491_s1 + $0xf0] sm:$0xff]   ;;  %s1447_s16 = sshll.u32 %s2501_s18, 1 }
  0x10   : > { %1748 = vmatpush3.bf16.msra.mxu0 %v1967_v5  ;;  %v1993_v40 = vld [vmem:[%s2491_s1 + $0xb8] sm:$0xff]   ;;  %v1995_v43 = vld [vmem:[%s2491_s1 + $0x100] sm:$0xff]   ;;  %v1997_v47 = vld [vmem:[%s2491_s1 + $0x108] sm:$0xff]   ;;  %s251_s27 = scalar_lea.vmem %s2492_s2, %s1447_s16  ;;  %s257_s15 = scalar_lea.vmem %s2495_s5, %s2501_s18 }
  0x11   : > { %1768 = vmatpush3.bf16.msra.mxu1 %v1968_v6  ;;  %1749 = vmatprep.subr.bf16.mxu0 %v2063_v1  ;;  %s2175_s28 = scalar_lea.vmem %s2490_s0, %s1935_s17  ;;  %v1994_v41 = vld [vmem:[%s2491_s1 + $0xf8] sm:$0xff]   ;;  %v1996_v45 = vld [vmem:[%s2491_s1 + $0x140] sm:$0xff]   ;;  %v1998_v49 = vld [vmem:[%s2491_s1 + $0x148] sm:$0xff]  }
  0x12   : > { %1769 = vmatprep.subr.bf16.mxu1 %v2063_v1  ;;  %v261_v20 = vld [vmem:[%s2175_s28] sm:$0x3]  ;;  %v1504_v44 = vld [vmem:[%s2175_s28 + $0x2] sm:$0x3]  ;;  %v2280_v46 = vld [vmem:[%s2175_s28 + $0x4] sm:$0x3] }
  0x13   : > { %v2190_v22 = vrot.slane %v261_v20, %v2181_v19  ;;  %v2287_v48 = vrot.slane %v2280_v46, %v2181_v19  ;;  %v1999_v50 = vld [vmem:[%s2491_s1 + $0x110] sm:$0xff]   ;;  %v2001_v52 = vld [vmem:[%s2491_s1 + $0x118] sm:$0xff]   ;;  %v2003_v54 = vld [vmem:[%s2491_s1 + $0x120] sm:$0xff]   ;;  %v725_v60 = vrot.slane %v1504_v44, %v2181_v19 }
  0x14   : > { %1750 = vmatpush3.bf16.msra.mxu0 %v1969_v7  ;;  %v2000_v51 = vld [vmem:[%s2491_s1 + $0x150] sm:$0xff]   ;;  %v2002_v53 = vld [vmem:[%s2491_s1 + $0x158] sm:$0xff]   ;;  %v2004_v55 = vld [vmem:[%s2491_s1 + $0x160] sm:$0xff]  }
  0x15   : > { %1770 = vmatpush3.bf16.msra.mxu1 %v1970_v8  ;;  %1751 = vmatprep.subr.bf16.mxu0 %v2063_v1  ;;  %v304_v25 = vshrl.u32 %v2190_v22, 16  ;;  %v500_v42 = vrot.slane %v2190_v22, 1  ;;  %v2005_v56 = vld [vmem:[%s2491_s1 + $0x128] sm:$0xff]   ;;  %v2007_v58 = vld [vmem:[%s2491_s1 + $0x130] sm:$0xff]   ;;  %v2009_v61 = vld [vmem:[%s2491_s1 + $0x138] sm:$0xff]   ;;  %v727_v63 = vshrl.u32 %v725_v60, 16 }
  0x16   : > { %1771 = vmatprep.subr.bf16.mxu1 %v2063_v1  ;;  %v2006_v57 = vld [vmem:[%s2491_s1 + $0x168] sm:$0xff]   ;;  %v2008_v59 = vld [vmem:[%s2491_s1 + $0x170] sm:$0xff]   ;;  %v2010_v62 = vld [vmem:[%s2491_s1 + $0x178] sm:$0xff]   ;;  %v836_v0 = vrot.slane %v725_v60, 1 }
  0x17   : > { %v2011_v2 = vld [vmem:[%s2491_s1 + $0x180] sm:$0xff]   ;;  %v2013_v4 = vld [vmem:[%s2491_s1 + $0x188] sm:$0xff]   ;;  %v2015_v6 = vld [vmem:[%s2491_s1 + $0x190] sm:$0xff]  }
  0x18   : > { %1752 = vmatpush3.bf16.msra.mxu0 %v1971_v10  ;;  %v2012_v3 = vld [vmem:[%s2491_s1 + $0x1c0] sm:$0xff]   ;;  %v2014_v5 = vld [vmem:[%s2491_s1 + $0x1c8] sm:$0xff]   ;;  %v2016_v7 = vld [vmem:[%s2491_s1 + $0x1d0] sm:$0xff]  }
  0x19   : > { %1772 = vmatpush3.bf16.msra.mxu1 %v1972_v11  ;;  %1753 = vmatprep.subr.bf16.mxu0 %v2063_v1  ;;  %v2017_v8 = vld [vmem:[%s2491_s1 + $0x198] sm:$0xff]   ;;  %v2019_v10 = vld [vmem:[%s2491_s1 + $0x1a0] sm:$0xff]   ;;  %v2021_v12 = vld [vmem:[%s2491_s1 + $0x1a8] sm:$0xff]  }
  0x1a   : > { %1773 = vmatprep.subr.bf16.mxu1 %v2063_v1  ;;  %v2018_v9 = vld [vmem:[%s2491_s1 + $0x1d8] sm:$0xff]   ;;  %v2020_v11 = vld [vmem:[%s2491_s1 + $0x1e0] sm:$0xff]   ;;  %v2022_v13 = vld [vmem:[%s2491_s1 + $0x1e8] sm:$0xff]  }
  0x1b   : > { %v2023_v14 = vld [vmem:[%s2491_s1 + $0x1b0] sm:$0xff]   ;;  %v2026_v17 = vld [vmem:[%s2491_s1 + $0x1f8] sm:$0xff]   ;;  %v2027_v19 = vld [vmem:[%s2491_s1 + $0x200] sm:$0xff]  }
  0x1c   : > { %1754 = vmatpush3.bf16.msra.mxu0 %v1973_v15  ;;  %v2024_v15 = vld [vmem:[%s2491_s1 + $0x1f0] sm:$0xff]   ;;  %v2033_v22 = vld [vmem:[%s2493_s3 + $0x8] sm:$0xff]   ;;  %vm1350_vm4 = vmand %vm1348_vm2, %vm1349_vm3 }
  0x1d   : > { %1774 = vmatpush3.bf16.msra.mxu1 %v1974_v16  ;;  %1755 = vmatprep.subr.bf16.mxu0 %v2063_v1  ;;  %v2025_v16 = vld [vmem:[%s2491_s1 + $0x1b8] sm:$0xff]  }
  0x1e   : > { %1775 = vmatprep.subr.bf16.mxu1 %v2063_v1 }
  0x20   : > { %1756 = vmatpush3.bf16.msra.mxu0 %v1975_v18  ;;  %v1063_v18 = vshrl.u32 %v2287_v48, 16 }
  0x21   : > { %1776 = vmatpush3.bf16.msra.mxu1 %v1976_v21  ;;  %1757 = vmatprep.subr.bf16.mxu0 %v2063_v1  ;;  %v2028_v21 = vld [vmem:[%s2491_s1 + $0x208] sm:$0xff]  }
  0x22   : > { %1777 = vmatprep.subr.bf16.mxu1 %v2063_v1 }
  0x24   : > { %1758 = vmatpush3.bf16.msra.mxu0 %v1977_v23  ;;  %v2029_v23 = vld [vmem:[%s2491_s1 + $0x210] sm:$0xff]  }
  0x25   : > { %1778 = vmatpush3.bf16.msra.mxu1 %v1978_v24  ;;  %1783 = vmatprep.subr.bf16.mxu0 %v2063_v1  ;;  %v2035_v24 = vld [vmem:[%s2493_s3 + $0x10] sm:$0xff]  }
  0x26   : > { %1803 = vmatprep.subr.bf16.mxu1 %v2063_v1 }
  0x27   : > { %1760 = vmatmul.mubr.bf16.vlgmr.msra.gmra.mrb[0].mxu0 %v304_v25  ;;  %v2030_v25 = vld [vmem:[%s2491_s1 + $0x218] sm:$0xff]  }
  0x28   : > { %1780 = vmatmul.mubr.bf16.vlgmr.msra.gmra.mrb[0].mxu1 %v261_v20  ;;  %1784 = vmatpush3.bf16.msra.mxu0 %v1979_v26  ;;  %v2031_v20 = vld [vmem:[%s2493_s3] sm:$0xff]   ;;  %v2037_v26 = vld [vmem:[%s2493_s3 + $0x18] sm:$0xff]  }
  0x29   : > { %1804 = vmatpush3.bf16.msra.mxu1 %v1980_v27  ;;  %1785 = vmatprep.subr.bf16.mxu0 %v2063_v1  ;;  %v2032_v27 = vld [vmem:[%s2491_s1 + $0x220] sm:$0xff]  }
  0x2a   : > { %1805 = vmatprep.subr.bf16.mxu1 %v2063_v1  ;;  %1799 = vmatprep.mubr.msk.bf16.mxu0 %vm2064_vm0, %v2063_v1 }
  0x2b   : > { %1819 = vmatprep.mubr.msk.bf16.mxu1 %vm2064_vm0, %v2063_v1 }
  0x2c   : > { %1786 = vmatpush3.bf16.msra.mxu0 %v1981_v28  ;;  %v1266_v28 = vld [vmem:[%s251_s27] sm:$0x3] }
  0x2d   : > { %1806 = vmatpush3.bf16.msra.mxu1 %v1982_v29  ;;  %1787 = vmatprep.subr.bf16.mxu0 %v2063_v1  ;;  %v2034_v29 = vld [vmem:[%s2491_s1 + $0x228] sm:$0xff]  }
  0x2e   : > { %1807 = vmatprep.subr.bf16.mxu1 %v2063_v1 }
  0x30   : > { %1788 = vmatpush3.bf16.msra.mxu0 %v1983_v30  ;;  %v2036_v30 = vld [vmem:[%s2491_s1 + $0x230] sm:$0xff]  }
  0x31   : > { %1808 = vmatpush3.bf16.msra.mxu1 %v1984_v31  ;;  %1789 = vmatprep.subr.bf16.mxu0 %v2063_v1  ;;  %v2038_v31 = vld [vmem:[%s2491_s1 + $0x238] sm:$0xff]  }
  0x32   : > { %1809 = vmatprep.subr.bf16.mxu1 %v2063_v1 }
  0x34   : > { %1790 = vmatpush3.bf16.msra.mxu0 %v1985_v32  ;;  %v1172_v32 = vrot.slane %v2287_v48, 1 }
  0x35   : > { %1810 = vmatpush3.bf16.msra.mxu1 %v1986_v33  ;;  %1791 = vmatprep.subr.bf16.mxu0 %v2063_v1 }
  0x36   : > { %1811 = vmatprep.subr.bf16.mxu1 %v2063_v1 }
  0x38   : > { %1792 = vmatpush3.bf16.msra.mxu0 %v1987_v34 }
  0x39   : > { %1812 = vmatpush3.bf16.msra.mxu1 %v1988_v35  ;;  %1793 = vmatprep.subr.bf16.mxu0 %v2063_v1 }
  0x3a   : > { %1813 = vmatprep.subr.bf16.mxu1 %v2063_v1 }
  0x3c   : > { %1794 = vmatpush3.bf16.msra.mxu0 %v1989_v36 }
  0x3d   : > { %1814 = vmatpush3.bf16.msra.mxu1 %v1990_v37  ;;  %1795 = vmatprep.subr.bf16.mxu0 %v2063_v1 }
  0x3e   : > { %1815 = vmatprep.subr.bf16.mxu1 %v2063_v1 }
  0x40   : > { %1796 = vmatpush3.bf16.msra.mxu0 %v1991_v38 }
  0x41   : > { %1816 = vmatpush3.bf16.msra.mxu1 %v1992_v39  ;;  %1797 = vmatprep.subr.bf16.mxu0 %v2063_v1 }
  0x42   : > { %1817 = vmatprep.subr.bf16.mxu1 %v2063_v1 }
  0x44   : > { %1798 = vmatpush3.bf16.msra.mxu0 %v1993_v40 }
  0x45   : > { %1818 = vmatpush3.bf16.msra.mxu1 %v1994_v41  ;;  %1823 = vmatprep.subr.bf16.mxu0 %v2063_v1 }
  0x46   : > { %1843 = vmatprep.subr.bf16.mxu1 %v2063_v1 }
  0x47   : > { %1800 = vmatmul.mubr.bf16.vlgmr.msra.gmra.mrb[4].mxu0 %v500_v42 }
  0x48   : > { %1824 = vmatpush3.bf16.msra.mxu0 %v1995_v43  ;;  %1820 = vmatmul.mubr.bf16.vlgmr.msra.gmra.mrb[4].mxu1 %v1504_v44 }
  0x49   : > { %1844 = vmatpush3.bf16.msra.mxu1 %v1996_v45  ;;  %1825 = vmatprep.subr.bf16.mxu0 %v2063_v1 }
  0x4a   : > { %1845 = vmatprep.subr.bf16.mxu1 %v2063_v1  ;;  %1839 = vmatprep.mubr.msk.bf16.mxu0 %vm2064_vm0, %v2063_v1 }
  0x4b   : > { %1859 = vmatprep.mubr.msk.bf16.mxu1 %vm2064_vm0, %v2063_v1 }
  0x4c   : > { %1826 = vmatpush3.bf16.msra.mxu0 %v1997_v47 }
  0x4d   : > { %1846 = vmatpush3.bf16.msra.mxu1 %v1998_v49  ;;  %1827 = vmatprep.subr.bf16.mxu0 %v2063_v1 }
  0x4e   : > { %1847 = vmatprep.subr.bf16.mxu1 %v2063_v1 }
  0x50   : > { %1828 = vmatpush3.bf16.msra.mxu0 %v1999_v50 }
  0x51   : > { %1848 = vmatpush3.bf16.msra.mxu1 %v2000_v51  ;;  %1829 = vmatprep.subr.bf16.mxu0 %v2063_v1 }
  0x52   : > { %1849 = vmatprep.subr.bf16.mxu1 %v2063_v1 }
  0x54   : > { %1830 = vmatpush3.bf16.msra.mxu0 %v2001_v52 }
  0x55   : > { %1850 = vmatpush3.bf16.msra.mxu1 %v2002_v53  ;;  %1831 = vmatprep.subr.bf16.mxu0 %v2063_v1 }
  0x56   : > { %1851 = vmatprep.subr.bf16.mxu1 %v2063_v1 }
  0x58   : > { %1832 = vmatpush3.bf16.msra.mxu0 %v2003_v54 }
  0x59   : > { %1852 = vmatpush3.bf16.msra.mxu1 %v2004_v55  ;;  %1833 = vmatprep.subr.bf16.mxu0 %v2063_v1 }
  0x5a   : > { %1853 = vmatprep.subr.bf16.mxu1 %v2063_v1 }
  0x5c   : > { %1834 = vmatpush3.bf16.msra.mxu0 %v2005_v56 }
  0x5d   : > { %1854 = vmatpush3.bf16.msra.mxu1 %v2006_v57  ;;  %1835 = vmatprep.subr.bf16.mxu0 %v2063_v1 }
  0x5e   : > { %1855 = vmatprep.subr.bf16.mxu1 %v2063_v1 }
  0x60   : > { %1836 = vmatpush3.bf16.msra.mxu0 %v2007_v58 }
  0x61   : > { %1856 = vmatpush3.bf16.msra.mxu1 %v2008_v59  ;;  %1837 = vmatprep.subr.bf16.mxu0 %v2063_v1 }
  0x62   : > { %1857 = vmatprep.subr.bf16.mxu1 %v2063_v1 }
  0x64   : > { %1838 = vmatpush3.bf16.msra.mxu0 %v2009_v61 }
  0x65   : > { %1858 = vmatpush3.bf16.msra.mxu1 %v2010_v62  ;;  %1863 = vmatprep.subr.bf16.mxu0 %v2063_v1 }
  0x66   : > { %1883 = vmatprep.subr.bf16.mxu1 %v2063_v1 }
  0x67   : > { %1840 = vmatmul.mubr.bf16.vlgmr.msra.gmra.mrb[8].mxu0 %v727_v63 }
  0x68   : > { %1864 = vmatpush3.bf16.msra.mxu0 %v2011_v2  ;;  %1860 = vmatmul.mubr.bf16.vlgmr.msra.gmra.mrb[8].mxu1 %v836_v0 }
  0x69   : > { %1884 = vmatpush3.bf16.msra.mxu1 %v2012_v3  ;;  %1865 = vmatprep.subr.bf16.mxu0 %v2063_v1 }
  0x6a   : > { %1885 = vmatprep.subr.bf16.mxu1 %v2063_v1  ;;  %1879 = vmatprep.mubr.msk.bf16.mxu0 %vm2064_vm0, %v2063_v1 }
  0x6b   : > { %1899 = vmatprep.mubr.msk.bf16.mxu1 %vm2064_vm0, %v2063_v1 }
  0x6c   : > { %1866 = vmatpush3.bf16.msra.mxu0 %v2013_v4 }
  0x6d   : > { %1886 = vmatpush3.bf16.msra.mxu1 %v2014_v5  ;;  %1867 = vmatprep.subr.bf16.mxu0 %v2063_v1 }
  0x6e   : > { %1887 = vmatprep.subr.bf16.mxu1 %v2063_v1 }
  0x70   : > { %1868 = vmatpush3.bf16.msra.mxu0 %v2015_v6 }
  0x71   : > { %1888 = vmatpush3.bf16.msra.mxu1 %v2016_v7  ;;  %1869 = vmatprep.subr.bf16.mxu0 %v2063_v1 }
  0x72   : > { %1889 = vmatprep.subr.bf16.mxu1 %v2063_v1 }
  0x74   : > { %1870 = vmatpush3.bf16.msra.mxu0 %v2017_v8 }
  0x75   : > { %1890 = vmatpush3.bf16.msra.mxu1 %v2018_v9  ;;  %1871 = vmatprep.subr.bf16.mxu0 %v2063_v1 }
  0x76   : > { %1891 = vmatprep.subr.bf16.mxu1 %v2063_v1 }
  0x78   : > { %1872 = vmatpush3.bf16.msra.mxu0 %v2019_v10 }
  0x79   : > { %1892 = vmatpush3.bf16.msra.mxu1 %v2020_v11  ;;  %1873 = vmatprep.subr.bf16.mxu0 %v2063_v1 }
  0x7a   : > { %1893 = vmatprep.subr.bf16.mxu1 %v2063_v1 }
  0x7c   : > { %1874 = vmatpush3.bf16.msra.mxu0 %v2021_v12 }
  0x7d   : > { %1894 = vmatpush3.bf16.msra.mxu1 %v2022_v13  ;;  %1875 = vmatprep.subr.bf16.mxu0 %v2063_v1 }
  0x7e   : > { %1895 = vmatprep.subr.bf16.mxu1 %v2063_v1 }
  0x80   : > { %1876 = vmatpush3.bf16.msra.mxu0 %v2023_v14 }
  0x81   : > { %1896 = vmatpush3.bf16.msra.mxu1 %v2024_v15  ;;  %1877 = vmatprep.subr.bf16.mxu0 %v2063_v1  ;;  %v1344_v15 = vld [vmem:[%s2494_s4] sm:$0x1] }
  0x82   : > { %1897 = vmatprep.subr.bf16.mxu1 %v2063_v1 }
  0x84   : > { %1878 = vmatpush3.bf16.msra.mxu0 %v2025_v16 }
  0x85   : > { %1898 = vmatpush3.bf16.msra.mxu1 %v2026_v17  ;;  %1903 = vmatprep.subr.bf16.mxu0 %v2063_v1 }
  0x86   : > { %1923 = vmatprep.subr.bf16.mxu1 %v2063_v1 }
  0x87   : > { %1880 = vmatmul.mubr.bf16.vlgmr.msra.gmra.mrb[12].mxu0 %v2280_v46 }
  0x88   : > { %1904 = vmatpush3.bf16.msra.mxu0 %v2027_v19  ;;  %1900 = vmatmul.mubr.bf16.vlgmr.msra.gmra.mrb[12].mxu1 %v1063_v18 }
  0x89   : > { %1905 = vmatprep.subr.bf16.mxu0 %v2063_v1  ;;  %1924 = vmatpush3.bf16.msra.mxu1 %v2031_v20 }
  0x8a   : > { %1925 = vmatprep.subr.bf16.mxu1 %v2063_v1  ;;  %1931 = vmatprep.mubr.msk.bf16.mxu1 %vm2064_vm0, %v2063_v1 }
  0x8b   : > { %1919 = vmatprep.mubr.msk.bf16.mxu0 %vm2064_vm0, %v2063_v1 }
  0x8c   : > { %1906 = vmatpush3.bf16.msra.mxu0 %v2028_v21  ;;  %v1351_v21 = vld [vmem:[%s257_s15] sm:$0x1] }
  0x8d   : > { %1907 = vmatprep.subr.bf16.mxu0 %v2063_v1  ;;  %1926 = vmatpush3.bf16.msra.mxu1 %v2033_v22 }
  0x8e   : > { %1927 = vmatprep.subr.bf16.mxu1 %v2063_v1 }
  0x90   : > { %1908 = vmatpush3.bf16.msra.mxu0 %v2029_v23 }
  0x91   : > { %1909 = vmatprep.subr.bf16.mxu0 %v2063_v1  ;;  %1928 = vmatpush3.bf16.msra.mxu1 %v2035_v24 }
  0x92   : > { %1929 = vmatprep.subr.bf16.mxu1 %v2063_v1 }
  0x94   : > { %1910 = vmatpush3.bf16.msra.mxu0 %v2030_v25 }
  0x95   : > { %1911 = vmatprep.subr.bf16.mxu0 %v2063_v1  ;;  %1930 = vmatpush3.bf16.msra.mxu1 %v2037_v26 }
  0x98   : > { %1912 = vmatpush3.bf16.msra.mxu0 %v2032_v27  ;;  %1932 = vmatmul.mubr.msk.bf16.vlgmr.msra.gmra.mrb[16].mxu1 %vm1299_vm1, %v1266_v28 }
  0x99   : > { %1913 = vmatprep.subr.bf16.mxu0 %v2063_v1 }
  0x9c   : > { %1914 = vmatpush3.bf16.msra.mxu0 %v2034_v29 }
  0x9d   : > { %1915 = vmatprep.subr.bf16.mxu0 %v2063_v1 }
  0xa0   : > { %1916 = vmatpush3.bf16.msra.mxu0 %v2036_v30 }
  0xa1   : > { %1917 = vmatprep.subr.bf16.mxu0 %v2063_v1 }
  0xa4   : > { %1918 = vmatpush3.bf16.msra.mxu0 %v2038_v31 }
  0xa7   : > { %1920 = vmatmul.mubr.bf16.vlgmr.msra.gmra.mrb[16].mxu0 %v1172_v32 }
  0xfa   : > { %v389_v33 = vpop.f32.mrb[0].mxu0 }
  0xfb   : > { %v1761_v34 = vpop.f32.mrb[1].mxu0  ;;  %v477_v35 = vpop.f32.mrb[0].mxu1 }
  0xfc   : > { %v478_v36 = vadd.f32 %v477_v35, %v389_v33  ;;  %v392_v37 = vpop.f32.mrb[2].mxu0  ;;  %v1781_v38 = vpop.f32.mrb[1].mxu1 }
  0xfd   : > { %v1762_v39 = vpop.f32.mrb[3].mxu0  ;;  %v480_v40 = vpop.f32.mrb[2].mxu1 }
  0xfe   : > { %v1782_v41 = vpop.f32.mrb[3].mxu1 }
 0x11a   : > { %v584_v42 = vpop.f32.mrb[4].mxu0 }
 0x11b   : > { %v590_v43 = vadd.f32 %v584_v42, %v478_v36  ;;  %v1801_v44 = vpop.f32.mrb[5].mxu0  ;;  %v694_v45 = vpop.f32.mrb[4].mxu1 }
 0x11c   : > { %v587_v46 = vpop.f32.mrb[6].mxu0  ;;  %v1821_v47 = vpop.f32.mrb[5].mxu1 }
 0x11d   : > { %v700_v1 = vadd.f32 %v694_v45, %v590_v43  ;;  %v1802_v49 = vpop.f32.mrb[7].mxu0  ;;  %v697_v48 = vpop.f32.mrb[6].mxu1 }
 0x11e   : > { %v1822_v50 = vpop.f32.mrb[7].mxu1 }
 0x13a   : > { %v812_v51 = vpop.f32.mrb[8].mxu0 }
 0x13b   : > { %v818_v52 = vadd.f32 %v812_v51, %v700_v1  ;;  %v1841_v53 = vpop.f32.mrb[9].mxu0  ;;  %v920_v54 = vpop.f32.mrb[8].mxu1 }
 0x13c   : > { %v815_v55 = vpop.f32.mrb[10].mxu0  ;;  %v1861_v56 = vpop.f32.mrb[9].mxu1 }
 0x13d   : > { %v926_v57 = vadd.f32 %v920_v54, %v818_v52  ;;  %v1842_v58 = vpop.f32.mrb[11].mxu0  ;;  %v923_v59 = vpop.f32.mrb[10].mxu1 }
 0x13e   : > { %v1862_v60 = vpop.f32.mrb[11].mxu1 }
 0x15a   : > { %v1030_v61 = vpop.f32.mrb[12].mxu0 }
 0x15b   : > { %v1036_v62 = vadd.f32 %v1030_v61, %v926_v57  ;;  %v1881_v63 = vpop.f32.mrb[13].mxu0  ;;  %v1148_v0 = vpop.f32.mrb[12].mxu1 }
 0x15c   : > { %v1033_v2 = vpop.f32.mrb[14].mxu0  ;;  %v1901_v3 = vpop.f32.mrb[13].mxu1 }
 0x15d   : > { %v1154_v4 = vadd.f32 %v1148_v0, %v1036_v62  ;;  %v1882_v5 = vpop.f32.mrb[15].mxu0  ;;  %v1151_v6 = vpop.f32.mrb[14].mxu1 }
 0x15e   : > { %v1902_v7 = vpop.f32.mrb[15].mxu1 }
 0x16b   : > { %v1337_v8 = vpop.f32.mrb[16].mxu1 }
 0x16c   : > { %v1933_v9 = vpop.f32.mrb[17].mxu1 }
 0x16d   : > { %v1340_v10 = vpop.f32.mrb[18].mxu1 }
 0x16e   : > { %v1934_v11 = vpop.f32.mrb[19].mxu1 }
 0x17a   : > { %v1256_v12 = vpop.f32.mrb[16].mxu0 }
 0x17b   : > { %v1262_v13 = vadd.f32 %v1256_v12, %v1154_v4  ;;  %v1921_v14 = vpop.f32.mrb[17].mxu0 }
 0x17c   : > { %v1259_v16 = vpop.f32.mrb[18].mxu0 }
 0x17d   : > { %v1343_v17 = vadd.f32 %v1337_v8, %v1262_v13  ;;  %v1922_v18 = vpop.f32.mrb[19].mxu0 }
 0x17f   : > { %v1345_v19 = vadd.f32 %v1344_v15, %v1343_v17 }
 0x181   : > { %v1346_v20 = vmax.f32 %v1345_v19, 0.0 }
 0x183   : > { %v1347_v22 = vpack.c.bf16 %v1346_v20, %v1346_v20 }
 0x185   : > { %v1352_v23 = vsel %vm1350_vm4, %v1347_v22, %v1351_v21 }
 0x186   : > { %1353 = vst [vmem:[%s257_s15] sm:$0x1] %v1352_v23 }
 0x187 PF: > { %s15_s20 = sadd.s32 1, %s2061_s20   ;;  %s2496_s18 = smov %s2057_s19 }
 0x188   : > { %p12_p5 = scmp.ge.s32.totalorder %s15_s20, 4   ;;  %s2497_s19 = smov %s2499_s21 }
 0x18a   :  { %14 = sbr.rel (!%p12_p5) target bundleno = 2 (0x2), region = 85 }

</bundles_post_ra>
